<compile_context>
chip_gen: v7x
topology: tpu7x:2x2x1
jax: 0.10.0
libtpu: 0.0.40
codegen_flags: <defaults>
</compile_context>

<pallas_src>
import functools

import jax
import jax.numpy as jnp
from jax import lax
from jax.experimental import pallas as pl
from jax.experimental.pallas import tpu as pltpu

_EPS = 1e-5


def _basic_block_kernel(x_ref, w1_ref, s1_ref, t1_ref,
                        w2_ref, s2_ref, t2_ref,
                        wsc_ref, ssc_ref, tsc_ref,
                        out_ref,
                        xpad_ref, mid_ref,
                        *, Nb, H, W, c_in, planes, has_shortcut):
    """conv1 -> BN1 -> ReLU -> conv2 -> BN2 -> (+shortcut) -> ReLU.

    Processes Nb batch elements per grid step.  Each 3x3 conv is expressed as
    9 tap matmuls of shape (Nb*H*W, c) x (c, planes): bf16 operands, f32
    accumulation on the MXU, f32 epilogue on the VPU.
    """
    f32 = jnp.float32
    M = Nb * H * W
    Hp, Wp = H + 2, W + 2

    # --- zero-pad halo maintenance ------------------------------------------
    # Scratch memory is uninitialized, so the 1-pixel halo must be zero before
    # the tap loads read it.  Re-zeroing only the halo every step is cheap
    # (O(perimeter)) and keeps correctness independent of grid order and of
    # megacore sharding (no reliance on program_id == 0 running first).
    def zero_halo(ref, c):
        dt = ref.dtype
        ref[:, 0:1, :, :] = jnp.zeros((Nb, 1, Wp, c), dt)
        ref[:, Hp - 1:Hp, :, :] = jnp.zeros((Nb, 1, Wp, c), dt)
        ref[:, :, 0:1, :] = jnp.zeros((Nb, Hp, 1, c), dt)
        ref[:, :, Wp - 1:Wp, :] = jnp.zeros((Nb, Hp, 1, c), dt)

    zero_halo(xpad_ref, c_in)
    zero_halo(mid_ref, planes)

    x = x_ref[...]                                        # (Nb, H, W, c_in) bf16
    xpad_ref[:, 1:H + 1, 1:W + 1, :] = x                  # interior only

    def conv3x3(src_ref, w_ref, c):
        # 3x3 / pad=1 / stride=1 conv: 9 shifted windows, each contracted with
        # its (c, planes) tap weight in a single large-M MXU matmul.
        def tap(k):
            dy, dx = divmod(k, 3)
            patch = src_ref[:, dy:dy + H, dx:dx + W, :].reshape(M, c)
            return jnp.dot(patch, w_ref[k], preferred_element_type=f32)
        acc = tap(0)
        for k in range(1, 9):
            acc = acc + tap(k)
        return acc                                        # (M, planes) f32

    # ---- conv1 + BN1 (+ folded conv bias) + ReLU ----------------------------
    out1 = jnp.maximum(conv3x3(xpad_ref, w1_ref, c_in) * s1_ref[...]
                       + t1_ref[...], 0.0)                # (M, planes) f32
    mid_ref[:, 1:H + 1, 1:W + 1, :] = (
        out1.astype(mid_ref.dtype).reshape(Nb, H, W, planes))

    # ---- conv2 + BN2 (+ folded conv bias) -----------------------------------
    out2 = conv3x3(mid_ref, w2_ref, planes) * s2_ref[...] + t2_ref[...]

    # ---- shortcut: 1x1 conv (no bias) + BN, or identity ---------------------
    xc = x.reshape(M, c_in)
    if has_shortcut:
        sc = jnp.dot(xc, wsc_ref[...], preferred_element_type=f32)
        sc = sc * ssc_ref[...] + tsc_ref[...]
    else:
        sc = xc.astype(f32)                               # c_in == planes

    res = jnp.maximum(out2 + sc, 0.0)                     # (M, planes) f32
    out_ref[...] = res.reshape(Nb, H, W, planes).astype(out_ref.dtype)


def basic_block_forward(x_nchw, params, *, stride=1, batch_block=None,
                        mxu_dtype=jnp.bfloat16):
    """PyTorch-compatible wrapper: NCHW in, NCHW out (float32)."""
    assert stride == 1, "TODO(synk): stride > 1 not implemented in-kernel"
    N, c_in, H, W = x_nchw.shape
    planes = params['w1'].shape[3]
    has_shortcut = bool(params['has_shortcut'])
    if not has_shortcut:
        assert c_in == planes, (
            f"identity shortcut requires in_planes == planes ({c_in} vs {planes})")

    if batch_block is None:
        # Amortize the ~0.35us per-grid-step pipeline overhead by processing
        # several batch elements per step, preferring an even grid length so
        # both v7x TensorCores stay busy under "parallel" sharding.
        batch_block = 1
        for cand in (8, 4, 2):
            if N % cand == 0 and (N // cand) % 2 == 0:
                batch_block = cand
                break
        if batch_block == 1 and N > 2 and N % 2 == 0:
            batch_block = 2
    assert N % batch_block == 0
    Nb = batch_block

    # --- glue: NCHW -> NHWC, bf16 MXU operands, 2-D tap weights --------------
    x = jnp.transpose(x_nchw, (0, 2, 3, 1)).astype(mxu_dtype)     # (N,H,W,Cin)
    w1 = params['w1'].reshape(9, c_in, planes).astype(mxu_dtype)  # (tap,Cin,P)
    w2 = params['w2'].reshape(9, planes, planes).astype(mxu_dtype)
    wsc = params['wsc'].astype(mxu_dtype)                         # (Cin, P)
    s1 = params['s1'].reshape(1, planes).astype(jnp.float32)
    t1 = params['t1'].reshape(1, planes).astype(jnp.float32)
    s2 = params['s2'].reshape(1, planes).astype(jnp.float32)
    t2 = params['t2'].reshape(1, planes).astype(jnp.float32)
    ssc = params['ssc'].reshape(1, planes).astype(jnp.float32)
    tsc = params['tsc'].reshape(1, planes).astype(jnp.float32)

    kern = functools.partial(_basic_block_kernel, Nb=Nb, H=H, W=W, c_in=c_in,
                             planes=planes, has_shortcut=has_shortcut)

    def rep(shape):
        # Whole-array operand, identical for every grid step.
        zero = (0,) * len(shape)
        return pl.BlockSpec(shape, lambda n, _z=zero: _z)

    grid_spec = pltpu.PrefetchScalarGridSpec(
        num_scalar_prefetch=0,
        grid=(N // Nb,),
        in_specs=[
            pl.BlockSpec((Nb, H, W, c_in), lambda n: (n, 0, 0, 0)),  # x (unpadded)
            rep((9, c_in, planes)),                                  # w1 taps
            rep((1, planes)), rep((1, planes)),                      # bn1 scale/shift
            rep((9, planes, planes)),                                # w2 taps
            rep((1, planes)), rep((1, planes)),                      # bn2 scale/shift
            rep((c_in, planes)),                                     # shortcut 1x1 w
            rep((1, planes)), rep((1, planes)),                      # bn_sc scale/shift
        ],
        # Block's last two dims equal the full array dims (legal for any
        # planes); see the lane-density TODO at the top of the file.
        out_specs=pl.BlockSpec((Nb, H, W, planes), lambda n: (n, 0, 0, 0)),
        scratch_shapes=[
            pltpu.VMEM((Nb, H + 2, W + 2, c_in), mxu_dtype),    # zero-padded x
            pltpu.VMEM((Nb, H + 2, W + 2, planes), mxu_dtype),  # zero-padded conv2 in
        ],
    )

    out_nhwc = pl.pallas_call(
        kern,
        out_shape=jax.ShapeDtypeStruct((N, H, W, planes), jnp.float32),
        grid_spec=grid_spec,
        compiler_params=pltpu.CompilerParams(
            dimension_semantics=("parallel",)),
    )(x, w1, s1, t1, w2, s2, t2, wsc, ssc, tsc)

    return jnp.transpose(out_nhwc, (0, 3, 1, 2))                  # NHWC -> NCHW


def make_params(key, in_planes, planes, has_shortcut):
    """Deterministic synthetic parameters (conv weights in HWIO layout)."""
    ks = jax.random.split(key, 17)
    nrm = lambda k, shape, s=0.1: s * jax.random.normal(k, shape, dtype=jnp.float32)

    w1 = nrm(ks[0], (3, 3, in_planes, planes))
    b1 = nrm(ks[1], (planes,))
    w2 = nrm(ks[2], (3, 3, planes, planes))
    b2 = nrm(ks[3], (planes,))

    def bn(k0, k1, k2, k3, c):
        gamma = 1.0 + nrm(k0, (c,))
        beta = nrm(k1, (c,))
        mean = nrm(k2, (c,))
        var = jnp.abs(nrm(k3, (c,))) + 0.5
        return gamma, beta, mean, var

    bn1 = bn(ks[4], ks[5], ks[6], ks[7], planes)
    bn2 = bn(ks[8], ks[9], ks[10], ks[11], planes)

    def fold(bn_params, bias):
        gamma, beta, mean, var = bn_params
        scale = gamma / jnp.sqrt(var + _EPS)
        shift = beta - mean * scale + scale * bias
        return scale, shift

    s1, t1 = fold(bn1, b1)
    s2, t2 = fold(bn2, b2)

    if has_shortcut:
        wsc_hwio = nrm(ks[12], (1, 1, in_planes, planes))
        bnsc = bn(ks[13], ks[14], ks[15], ks[16], planes)
        ssc, tsc = fold(bnsc, jnp.zeros((planes,), jnp.float32))
    else:
        wsc_hwio = jnp.zeros((1, 1, in_planes, planes), jnp.float32)
        bnsc = (jnp.ones((planes,)), jnp.zeros((planes,)),
                jnp.zeros((planes,)), jnp.ones((planes,)))
        ssc = jnp.ones((planes,), jnp.float32)
        tsc = jnp.zeros((planes,), jnp.float32)

    return dict(w1=w1, b1=b1, w2=w2, b2=b2, bn1=bn1, bn2=bn2,
                wsc_hwio=wsc_hwio, bnsc=bnsc,
                s1=s1, t1=t1, s2=s2, t2=t2,
                wsc=wsc_hwio[0, 0], ssc=ssc, tsc=tsc,
                has_shortcut=has_shortcut)


def reference_forward(x_nchw, p, operand_dtype=jnp.float32):
    """Pure-JAX reference mirroring the PyTorch module (eval-mode BN).

    With operand_dtype=float32 this is the exact f32 forward pass; with
    bfloat16 the convolution operands are rounded the same way the kernel
    rounds its MXU operands (accumulation stays f32), giving a tight bound.
    """
    dn = ('NCHW', 'HWIO', 'NCHW')
    q = lambda a: a.astype(operand_dtype).astype(jnp.float32)

    def conv(xx, w, pad):
        return lax.conv_general_dilated(
            q(xx), q(w), (1, 1), [(pad, pad), (pad, pad)],
            dimension_numbers=dn, precision=lax.Precision.HIGHEST)

    def bn(xx, bn_params):
        gamma, beta, mean, var = bn_params
        g = gamma / jnp.sqrt(var + _EPS)
        return xx * g[None, :, None, None] + (beta - mean * g)[None, :, None, None]

    out = conv(x_nchw, p['w1'], 1) + p['b1'][None, :, None, None]
    out = jax.nn.relu(bn(out, p['bn1']))
    out = conv(out, p['w2'], 1) + p['b2'][None, :, None, None]
    out = bn(out, p['bn2'])
    if p['has_shortcut']:
        sc = bn(conv(x_nchw, p['wsc_hwio'], 0), p['bnsc'])
    else:
        sc = q(x_nchw)
    return jax.nn.relu(out + sc)


if __name__ == "__main__":
    N, in_planes, planes, H, W = 2, 4, 8, 16, 16
    has_shortcut = (in_planes != planes)          # stride=1, but channel change

    key = jax.random.PRNGKey(0)
    kx, kp = jax.random.split(key)
    x = jax.random.normal(kx, (N, in_planes, H, W), dtype=jnp.float32)
    params = make_params(kp, in_planes, planes, has_shortcut)

    out = jax.block_until_ready(basic_block_forward(x, params))

    # Tight check against a reference whose conv operands are rounded the same
    # way the kernel rounds its bf16 MXU operands, plus a looser sanity check
    # against the pure-f32 (PyTorch-semantics) reference.
    ref_q = reference_forward(x, params, operand_dtype=jnp.bfloat16)
    ref_f = reference_forward(x, params)
    assert out.shape == ref_f.shape == (N, planes, H, W)
    err_q = float(jnp.max(jnp.abs(out - ref_q)))
    err_f = float(jnp.max(jnp.abs(out - ref_f)))
    if err_q > 2e-2 or err_f > 1e-1:
        raise AssertionError(
            f"kernel mismatch: max_err={err_q} (bf16-operand ref), "
            f"{err_f} (f32 ref)")

    print("KERNEL_OK")
</pallas_src>

<mosaic_0001>
module attributes {stable_mosaic.version = 11 : i64} {
  func.func @_basic_block_kernel(%arg0: i32, %arg1: memref<1x16x16x4xbf16, #tpu.memory_space<vmem>>, %arg2: memref<9x4x8xbf16, #tpu.memory_space<vmem>>, %arg3: memref<1x8xf32, #tpu.memory_space<vmem>>, %arg4: memref<1x8xf32, #tpu.memory_space<vmem>>, %arg5: memref<9x8x8xbf16, #tpu.memory_space<vmem>>, %arg6: memref<1x8xf32, #tpu.memory_space<vmem>>, %arg7: memref<1x8xf32, #tpu.memory_space<vmem>>, %arg8: memref<4x8xbf16, #tpu.memory_space<vmem>>, %arg9: memref<1x8xf32, #tpu.memory_space<vmem>>, %arg10: memref<1x8xf32, #tpu.memory_space<vmem>>, %arg11: memref<1x16x16x8xf32, #tpu.memory_space<vmem>>, %arg12: memref<1x18x18x4xbf16, #tpu.memory_space<vmem>>, %arg13: memref<1x18x18x8xbf16, #tpu.memory_space<vmem>>) attributes {dimension_semantics = [#tpu.dimension_semantics<parallel>], iteration_bounds = array<i64: 2>, scalar_prefetch = 0 : i64, scratch_operands = 2 : i64, tpu.core_type = #tpu.core_type<tc>, window_params = [{transform_indices = @transform_0, window_bounds = array<i64: 1, 16, 16, 4>}, {pipeline_mode = #tpu.pipeline_mode<synchronous>, transform_indices = @transform_1, window_bounds = array<i64: 9, 4, 8>}, {pipeline_mode = #tpu.pipeline_mode<synchronous>, transform_indices = @transform_2, window_bounds = array<i64: 1, 8>}, {pipeline_mode = #tpu.pipeline_mode<synchronous>, transform_indices = @transform_3, window_bounds = array<i64: 1, 8>}, {pipeline_mode = #tpu.pipeline_mode<synchronous>, transform_indices = @transform_4, window_bounds = array<i64: 9, 8, 8>}, {pipeline_mode = #tpu.pipeline_mode<synchronous>, transform_indices = @transform_5, window_bounds = array<i64: 1, 8>}, {pipeline_mode = #tpu.pipeline_mode<synchronous>, transform_indices = @transform_6, window_bounds = array<i64: 1, 8>}, {pipeline_mode = #tpu.pipeline_mode<synchronous>, transform_indices = @transform_7, window_bounds = array<i64: 4, 8>}, {pipeline_mode = #tpu.pipeline_mode<synchronous>, transform_indices = @transform_8, window_bounds = array<i64: 1, 8>}, {pipeline_mode = #tpu.pipeline_mode<synchronous>, transform_indices = @transform_9, window_bounds = array<i64: 1, 8>}, {transform_indices = @transform_10, window_bounds = array<i64: 1, 16, 16, 8>}]} {
    %cst = arith.constant 0.000000e+00 : bf16
    %0 = vector.broadcast %cst : bf16 to vector<1x1x18x4xbf16>
    %c0 = arith.constant 0 : index
    %c0_0 = arith.constant 0 : index
    %c0_1 = arith.constant 0 : index
    %c0_2 = arith.constant 0 : index
    %1 = vector.load %arg12[%c0, %c0_0, %c0_1, %c0_2] : memref<1x18x18x4xbf16, #tpu.memory_space<vmem>>, vector<1x1x18x4xbf16>
    tpu.vector_store %arg12[%c0, %c0_0, %c0_1, %c0_2], %0 {strides = array<i32>} : memref<1x18x18x4xbf16, #tpu.memory_space<vmem>>, vector<1x1x18x4xbf16>,
    %cst_3 = arith.constant 0.000000e+00 : bf16
    %2 = vector.broadcast %cst_3 : bf16 to vector<1x1x18x4xbf16>
    %c0_4 = arith.constant 0 : index
    %c17 = arith.constant 17 : index
    %c0_5 = arith.constant 0 : index
    %c0_6 = arith.constant 0 : index
    %3 = vector.load %arg12[%c0_4, %c17, %c0_5, %c0_6] : memref<1x18x18x4xbf16, #tpu.memory_space<vmem>>, vector<1x1x18x4xbf16>
    tpu.vector_store %arg12[%c0_4, %c17, %c0_5, %c0_6], %2 {strides = array<i32>} : memref<1x18x18x4xbf16, #tpu.memory_space<vmem>>, vector<1x1x18x4xbf16>,
    %cst_7 = arith.constant 0.000000e+00 : bf16
    %4 = vector.broadcast %cst_7 : bf16 to vector<1x18x1x4xbf16>
    %c0_8 = arith.constant 0 : index
    %c0_9 = arith.constant 0 : index
    %c0_10 = arith.constant 0 : index
    %c0_11 = arith.constant 0 : index
    %5 = vector.load %arg12[%c0_8, %c0_9, %c0_10, %c0_11] : memref<1x18x18x4xbf16, #tpu.memory_space<vmem>>, vector<1x18x1x4xbf16>
    tpu.vector_store %arg12[%c0_8, %c0_9, %c0_10, %c0_11], %4 {strides = array<i32>} : memref<1x18x18x4xbf16, #tpu.memory_space<vmem>>, vector<1x18x1x4xbf16>,
    %cst_12 = arith.constant 0.000000e+00 : bf16
    %6 = vector.broadcast %cst_12 : bf16 to vector<1x18x1x4xbf16>
    %c0_13 = arith.constant 0 : index
    %c0_14 = arith.constant 0 : index
    %c17_15 = arith.constant 17 : index
    %c0_16 = arith.constant 0 : index
    %7 = vector.load %arg12[%c0_13, %c0_14, %c17_15, %c0_16] : memref<1x18x18x4xbf16, #tpu.memory_space<vmem>>, vector<1x18x1x4xbf16>
    tpu.vector_store %arg12[%c0_13, %c0_14, %c17_15, %c0_16], %6 {strides = array<i32>} : memref<1x18x18x4xbf16, #tpu.memory_space<vmem>>, vector<1x18x1x4xbf16>,
    %cst_17 = arith.constant 0.000000e+00 : bf16
    %8 = vector.broadcast %cst_17 : bf16 to vector<1x1x18x8xbf16>
    %c0_18 = arith.constant 0 : index
    %c0_19 = arith.constant 0 : index
    %c0_20 = arith.constant 0 : index
    %c0_21 = arith.constant 0 : index
    %9 = vector.load %arg13[%c0_18, %c0_19, %c0_20, %c0_21] : memref<1x18x18x8xbf16, #tpu.memory_space<vmem>>, vector<1x1x18x8xbf16>
    tpu.vector_store %arg13[%c0_18, %c0_19, %c0_20, %c0_21], %8 {strides = array<i32>} : memref<1x18x18x8xbf16, #tpu.memory_space<vmem>>, vector<1x1x18x8xbf16>,
    %cst_22 = arith.constant 0.000000e+00 : bf16
    %10 = vector.broadcast %cst_22 : bf16 to vector<1x1x18x8xbf16>
    %c0_23 = arith.constant 0 : index
    %c17_24 = arith.constant 17 : index
    %c0_25 = arith.constant 0 : index
    %c0_26 = arith.constant 0 : index
    %11 = vector.load %arg13[%c0_23, %c17_24, %c0_25, %c0_26] : memref<1x18x18x8xbf16, #tpu.memory_space<vmem>>, vector<1x1x18x8xbf16>
    tpu.vector_store %arg13[%c0_23, %c17_24, %c0_25, %c0_26], %10 {strides = array<i32>} : memref<1x18x18x8xbf16, #tpu.memory_space<vmem>>, vector<1x1x18x8xbf16>,
    %cst_27 = arith.constant 0.000000e+00 : bf16
    %12 = vector.broadcast %cst_27 : bf16 to vector<1x18x1x8xbf16>
    %c0_28 = arith.constant 0 : index
    %c0_29 = arith.constant 0 : index
    %c0_30 = arith.constant 0 : index
    %c0_31 = arith.constant 0 : index
    %13 = vector.load %arg13[%c0_28, %c0_29, %c0_30, %c0_31] : memref<1x18x18x8xbf16, #tpu.memory_space<vmem>>, vector<1x18x1x8xbf16>
    tpu.vector_store %arg13[%c0_28, %c0_29, %c0_30, %c0_31], %12 {strides = array<i32>} : memref<1x18x18x8xbf16, #tpu.memory_space<vmem>>, vector<1x18x1x8xbf16>,
    %cst_32 = arith.constant 0.000000e+00 : bf16
    %14 = vector.broadcast %cst_32 : bf16 to vector<1x18x1x8xbf16>
    %c0_33 = arith.constant 0 : index
    %c0_34 = arith.constant 0 : index
    %c17_35 = arith.constant 17 : index
    %c0_36 = arith.constant 0 : index
    %15 = vector.load %arg13[%c0_33, %c0_34, %c17_35, %c0_36] : memref<1x18x18x8xbf16, #tpu.memory_space<vmem>>, vector<1x18x1x8xbf16>
    tpu.vector_store %arg13[%c0_33, %c0_34, %c17_35, %c0_36], %14 {strides = array<i32>} : memref<1x18x18x8xbf16, #tpu.memory_space<vmem>>, vector<1x18x1x8xbf16>,
    %c0_37 = arith.constant 0 : index
    %c0_38 = arith.constant 0 : index
    %c0_39 = arith.constant 0 : index
    %c0_40 = arith.constant 0 : index
    %16 = vector.load %arg1[%c0_37, %c0_38, %c0_39, %c0_40] : memref<1x16x16x4xbf16, #tpu.memory_space<vmem>>, vector<1x16x16x4xbf16>
    %c0_41 = arith.constant 0 : index
    %c1 = arith.constant 1 : index
    %c1_42 = arith.constant 1 : index
    %c0_43 = arith.constant 0 : index
    %17 = vector.load %arg12[%c0_41, %c1, %c1_42, %c0_43] : memref<1x18x18x4xbf16, #tpu.memory_space<vmem>>, vector<1x16x16x4xbf16>
    tpu.vector_store %arg12[%c0_41, %c1, %c1_42, %c0_43], %16 {strides = array<i32>} : memref<1x18x18x4xbf16, #tpu.memory_space<vmem>>, vector<1x16x16x4xbf16>,
    %c0_44 = arith.constant 0 : index
    %c0_45 = arith.constant 0 : index
    %c0_46 = arith.constant 0 : index
    %c0_47 = arith.constant 0 : index
    %18 = vector.load %arg12[%c0_44, %c0_45, %c0_46, %c0_47] : memref<1x18x18x4xbf16, #tpu.memory_space<vmem>>, vector<1x16x16x4xbf16>
    %19 = vector.shape_cast %18 : vector<1x16x16x4xbf16> to vector<256x4xbf16>
    %c0_48 = arith.constant 0 : index
    %c0_49 = arith.constant 0 : index
    %c0_50 = arith.constant 0 : index
    %20 = vector.load %arg2[%c0_48, %c0_49, %c0_50] : memref<9x4x8xbf16, #tpu.memory_space<vmem>>, vector<1x4x8xbf16>
    %21 = vector.shape_cast %20 : vector<1x4x8xbf16> to vector<4x8xbf16>
    %cst_51 = arith.constant dense<0.000000e+00> : vector<256x8xf32>
    %22 = tpu.matmul %19, %21, %cst_51 {dimension_numbers = #tpu.dot_dimension_numbers<[1], [0], [0], [1], [0, 0, 1, 1], [], []>} : vector<256x4xbf16>, vector<4x8xbf16>, vector<256x8xf32> -> vector<256x8xf32>
    %c0_52 = arith.constant 0 : index
    %c0_53 = arith.constant 0 : index
    %c1_54 = arith.constant 1 : index
    %c0_55 = arith.constant 0 : index
    %23 = vector.load %arg12[%c0_52, %c0_53, %c1_54, %c0_55] : memref<1x18x18x4xbf16, #tpu.memory_space<vmem>>, vector<1x16x16x4xbf16>
    %24 = vector.shape_cast %23 : vector<1x16x16x4xbf16> to vector<256x4xbf16>
    %c1_56 = arith.constant 1 : index
    %c0_57 = arith.constant 0 : index
    %c0_58 = arith.constant 0 : index
    %25 = vector.load %arg2[%c1_56, %c0_57, %c0_58] : memref<9x4x8xbf16, #tpu.memory_space<vmem>>, vector<1x4x8xbf16>
    %26 = vector.shape_cast %25 : vector<1x4x8xbf16> to vector<4x8xbf16>
    %cst_59 = arith.constant dense<0.000000e+00> : vector<256x8xf32>
    %27 = tpu.matmul %24, %26, %cst_59 {dimension_numbers = #tpu.dot_dimension_numbers<[1], [0], [0], [1], [0, 0, 1, 1], [], []>} : vector<256x4xbf16>, vector<4x8xbf16>, vector<256x8xf32> -> vector<256x8xf32>
    %28 = arith.addf %22, %27 : vector<256x8xf32>
    %c0_60 = arith.constant 0 : index
    %c0_61 = arith.constant 0 : index
    %c2 = arith.constant 2 : index
    %c0_62 = arith.constant 0 : index
    %29 = vector.load %arg12[%c0_60, %c0_61, %c2, %c0_62] : memref<1x18x18x4xbf16, #tpu.memory_space<vmem>>, vector<1x16x16x4xbf16>
    %30 = vector.shape_cast %29 : vector<1x16x16x4xbf16> to vector<256x4xbf16>
    %c2_63 = arith.constant 2 : index
    %c0_64 = arith.constant 0 : index
    %c0_65 = arith.constant 0 : index
    %31 = vector.load %arg2[%c2_63, %c0_64, %c0_65] : memref<9x4x8xbf16, #tpu.memory_space<vmem>>, vector<1x4x8xbf16>
    %32 = vector.shape_cast %31 : vector<1x4x8xbf16> to vector<4x8xbf16>
    %cst_66 = arith.constant dense<0.000000e+00> : vector<256x8xf32>
    %33 = tpu.matmul %30, %32, %cst_66 {dimension_numbers = #tpu.dot_dimension_numbers<[1], [0], [0], [1], [0, 0, 1, 1], [], []>} : vector<256x4xbf16>, vector<4x8xbf16>, vector<256x8xf32> -> vector<256x8xf32>
    %34 = arith.addf %28, %33 : vector<256x8xf32>
    %c0_67 = arith.constant 0 : index
    %c1_68 = arith.constant 1 : index
    %c0_69 = arith.constant 0 : index
    %c0_70 = arith.constant 0 : index
    %35 = vector.load %arg12[%c0_67, %c1_68, %c0_69, %c0_70] : memref<1x18x18x4xbf16, #tpu.memory_space<vmem>>, vector<1x16x16x4xbf16>
    %36 = vector.shape_cast %35 : vector<1x16x16x4xbf16> to vector<256x4xbf16>
    %c3 = arith.constant 3 : index
    %c0_71 = arith.constant 0 : index
    %c0_72 = arith.constant 0 : index
    %37 = vector.load %arg2[%c3, %c0_71, %c0_72] : memref<9x4x8xbf16, #tpu.memory_space<vmem>>, vector<1x4x8xbf16>
    %38 = vector.shape_cast %37 : vector<1x4x8xbf16> to vector<4x8xbf16>
    %cst_73 = arith.constant dense<0.000000e+00> : vector<256x8xf32>
    %39 = tpu.matmul %36, %38, %cst_73 {dimension_numbers = #tpu.dot_dimension_numbers<[1], [0], [0], [1], [0, 0, 1, 1], [], []>} : vector<256x4xbf16>, vector<4x8xbf16>, vector<256x8xf32> -> vector<256x8xf32>
    %40 = arith.addf %34, %39 : vector<256x8xf32>
    %c0_74 = arith.constant 0 : index
    %c1_75 = arith.constant 1 : index
    %c1_76 = arith.constant 1 : index
    %c0_77 = arith.constant 0 : index
    %41 = vector.load %arg12[%c0_74, %c1_75, %c1_76, %c0_77] : memref<1x18x18x4xbf16, #tpu.memory_space<vmem>>, vector<1x16x16x4xbf16>
    %42 = vector.shape_cast %41 : vector<1x16x16x4xbf16> to vector<256x4xbf16>
    %c4 = arith.constant 4 : index
    %c0_78 = arith.constant 0 : index
    %c0_79 = arith.constant 0 : index
    %43 = vector.load %arg2[%c4, %c0_78, %c0_79] : memref<9x4x8xbf16, #tpu.memory_space<vmem>>, vector<1x4x8xbf16>
    %44 = vector.shape_cast %43 : vector<1x4x8xbf16> to vector<4x8xbf16>
    %cst_80 = arith.constant dense<0.000000e+00> : vector<256x8xf32>
    %45 = tpu.matmul %42, %44, %cst_80 {dimension_numbers = #tpu.dot_dimension_numbers<[1], [0], [0], [1], [0, 0, 1, 1], [], []>} : vector<256x4xbf16>, vector<4x8xbf16>, vector<256x8xf32> -> vector<256x8xf32>
    %46 = arith.addf %40, %45 : vector<256x8xf32>
    %c0_81 = arith.constant 0 : index
    %c1_82 = arith.constant 1 : index
    %c2_83 = arith.constant 2 : index
    %c0_84 = arith.constant 0 : index
    %47 = vector.load %arg12[%c0_81, %c1_82, %c2_83, %c0_84] : memref<1x18x18x4xbf16, #tpu.memory_space<vmem>>, vector<1x16x16x4xbf16>
    %48 = vector.shape_cast %47 : vector<1x16x16x4xbf16> to vector<256x4xbf16>
    %c5 = arith.constant 5 : index
    %c0_85 = arith.constant 0 : index
    %c0_86 = arith.constant 0 : index
    %49 = vector.load %arg2[%c5, %c0_85, %c0_86] : memref<9x4x8xbf16, #tpu.memory_space<vmem>>, vector<1x4x8xbf16>
    %50 = vector.shape_cast %49 : vector<1x4x8xbf16> to vector<4x8xbf16>
    %cst_87 = arith.constant dense<0.000000e+00> : vector<256x8xf32>
    %51 = tpu.matmul %48, %50, %cst_87 {dimension_numbers = #tpu.dot_dimension_numbers<[1], [0], [0], [1], [0, 0, 1, 1], [], []>} : vector<256x4xbf16>, vector<4x8xbf16>, vector<256x8xf32> -> vector<256x8xf32>
    %52 = arith.addf %46, %51 : vector<256x8xf32>
    %c0_88 = arith.constant 0 : index
    %c2_89 = arith.constant 2 : index
    %c0_90 = arith.constant 0 : index
    %c0_91 = arith.constant 0 : index
    %53 = vector.load %arg12[%c0_88, %c2_89, %c0_90, %c0_91] : memref<1x18x18x4xbf16, #tpu.memory_space<vmem>>, vector<1x16x16x4xbf16>
    %54 = vector.shape_cast %53 : vector<1x16x16x4xbf16> to vector<256x4xbf16>
    %c6 = arith.constant 6 : index
    %c0_92 = arith.constant 0 : index
    %c0_93 = arith.constant 0 : index
    %55 = vector.load %arg2[%c6, %c0_92, %c0_93] : memref<9x4x8xbf16, #tpu.memory_space<vmem>>, vector<1x4x8xbf16>
    %56 = vector.shape_cast %55 : vector<1x4x8xbf16> to vector<4x8xbf16>
    %cst_94 = arith.constant dense<0.000000e+00> : vector<256x8xf32>
    %57 = tpu.matmul %54, %56, %cst_94 {dimension_numbers = #tpu.dot_dimension_numbers<[1], [0], [0], [1], [0, 0, 1, 1], [], []>} : vector<256x4xbf16>, vector<4x8xbf16>, vector<256x8xf32> -> vector<256x8xf32>
    %58 = arith.addf %52, %57 : vector<256x8xf32>
    %c0_95 = arith.constant 0 : index
    %c2_96 = arith.constant 2 : index
    %c1_97 = arith.constant 1 : index
    %c0_98 = arith.constant 0 : index
    %59 = vector.load %arg12[%c0_95, %c2_96, %c1_97, %c0_98] : memref<1x18x18x4xbf16, #tpu.memory_space<vmem>>, vector<1x16x16x4xbf16>
    %60 = vector.shape_cast %59 : vector<1x16x16x4xbf16> to vector<256x4xbf16>
    %c7 = arith.constant 7 : index
    %c0_99 = arith.constant 0 : index
    %c0_100 = arith.constant 0 : index
    %61 = vector.load %arg2[%c7, %c0_99, %c0_100] : memref<9x4x8xbf16, #tpu.memory_space<vmem>>, vector<1x4x8xbf16>
    %62 = vector.shape_cast %61 : vector<1x4x8xbf16> to vector<4x8xbf16>
    %cst_101 = arith.constant dense<0.000000e+00> : vector<256x8xf32>
    %63 = tpu.matmul %60, %62, %cst_101 {dimension_numbers = #tpu.dot_dimension_numbers<[1], [0], [0], [1], [0, 0, 1, 1], [], []>} : vector<256x4xbf16>, vector<4x8xbf16>, vector<256x8xf32> -> vector<256x8xf32>
    %64 = arith.addf %58, %63 : vector<256x8xf32>
    %c0_102 = arith.constant 0 : index
    %c2_103 = arith.constant 2 : index
    %c2_104 = arith.constant 2 : index
    %c0_105 = arith.constant 0 : index
    %65 = vector.load %arg12[%c0_102, %c2_103, %c2_104, %c0_105] : memref<1x18x18x4xbf16, #tpu.memory_space<vmem>>, vector<1x16x16x4xbf16>
    %66 = vector.shape_cast %65 : vector<1x16x16x4xbf16> to vector<256x4xbf16>
    %c8 = arith.constant 8 : index
    %c0_106 = arith.constant 0 : index
    %c0_107 = arith.constant 0 : index
    %67 = vector.load %arg2[%c8, %c0_106, %c0_107] : memref<9x4x8xbf16, #tpu.memory_space<vmem>>, vector<1x4x8xbf16>
    %68 = vector.shape_cast %67 : vector<1x4x8xbf16> to vector<4x8xbf16>
    %cst_108 = arith.constant dense<0.000000e+00> : vector<256x8xf32>
    %69 = tpu.matmul %66, %68, %cst_108 {dimension_numbers = #tpu.dot_dimension_numbers<[1], [0], [0], [1], [0, 0, 1, 1], [], []>} : vector<256x4xbf16>, vector<4x8xbf16>, vector<256x8xf32> -> vector<256x8xf32>
    %70 = arith.addf %64, %69 : vector<256x8xf32>
    %c0_109 = arith.constant 0 : index
    %c0_110 = arith.constant 0 : index
    %71 = vector.load %arg3[%c0_109, %c0_110] : memref<1x8xf32, #tpu.memory_space<vmem>>, vector<1x8xf32>
    %72 = vector.broadcast %71 : vector<1x8xf32> to vector<256x8xf32>
    %73 = arith.mulf %70, %72 : vector<256x8xf32>
    %c0_111 = arith.constant 0 : index
    %c0_112 = arith.constant 0 : index
    %74 = vector.load %arg4[%c0_111, %c0_112] : memref<1x8xf32, #tpu.memory_space<vmem>>, vector<1x8xf32>
    %75 = vector.broadcast %74 : vector<1x8xf32> to vector<256x8xf32>
    %76 = arith.addf %73, %75 : vector<256x8xf32>
    %cst_113 = arith.constant 0.000000e+00 : f32
    %77 = vector.broadcast %cst_113 : f32 to vector<256x8xf32>
    %78 = arith.maximumf %76, %77 : vector<256x8xf32>
    %79 = arith.truncf %78 : vector<256x8xf32> to vector<256x8xbf16>
    %80 = vector.shape_cast %79 : vector<256x8xbf16> to vector<1x16x16x8xbf16>
    %c0_114 = arith.constant 0 : index
    %c1_115 = arith.constant 1 : index
    %c1_116 = arith.constant 1 : index
    %c0_117 = arith.constant 0 : index
    %81 = vector.load %arg13[%c0_114, %c1_115, %c1_116, %c0_117] : memref<1x18x18x8xbf16, #tpu.memory_space<vmem>>, vector<1x16x16x8xbf16>
    tpu.vector_store %arg13[%c0_114, %c1_115, %c1_116, %c0_117], %80 {strides = array<i32>} : memref<1x18x18x8xbf16, #tpu.memory_space<vmem>>, vector<1x16x16x8xbf16>,
    %c0_118 = arith.constant 0 : index
    %c0_119 = arith.constant 0 : index
    %c0_120 = arith.constant 0 : index
    %c0_121 = arith.constant 0 : index
    %82 = vector.load %arg13[%c0_118, %c0_119, %c0_120, %c0_121] : memref<1x18x18x8xbf16, #tpu.memory_space<vmem>>, vector<1x16x16x8xbf16>
    %83 = vector.shape_cast %82 : vector<1x16x16x8xbf16> to vector<256x8xbf16>
    %c0_122 = arith.constant 0 : index
    %c0_123 = arith.constant 0 : index
    %c0_124 = arith.constant 0 : index
    %84 = vector.load %arg5[%c0_122, %c0_123, %c0_124] : memref<9x8x8xbf16, #tpu.memory_space<vmem>>, vector<1x8x8xbf16>
    %85 = vector.shape_cast %84 : vector<1x8x8xbf16> to vector<8x8xbf16>
    %cst_125 = arith.constant dense<0.000000e+00> : vector<256x8xf32>
    %86 = tpu.matmul %83, %85, %cst_125 {dimension_numbers = #tpu.dot_dimension_numbers<[1], [0], [0], [1], [0, 0, 1, 1], [], []>} : vector<256x8xbf16>, vector<8x8xbf16>, vector<256x8xf32> -> vector<256x8xf32>
    %c0_126 = arith.constant 0 : index
    %c0_127 = arith.constant 0 : index
    %c1_128 = arith.constant 1 : index
    %c0_129 = arith.constant 0 : index
    %87 = vector.load %arg13[%c0_126, %c0_127, %c1_128, %c0_129] : memref<1x18x18x8xbf16, #tpu.memory_space<vmem>>, vector<1x16x16x8xbf16>
    %88 = vector.shape_cast %87 : vector<1x16x16x8xbf16> to vector<256x8xbf16>
    %c1_130 = arith.constant 1 : index
    %c0_131 = arith.constant 0 : index
    %c0_132 = arith.constant 0 : index
    %89 = vector.load %arg5[%c1_130, %c0_131, %c0_132] : memref<9x8x8xbf16, #tpu.memory_space<vmem>>, vector<1x8x8xbf16>
    %90 = vector.shape_cast %89 : vector<1x8x8xbf16> to vector<8x8xbf16>
    %cst_133 = arith.constant dense<0.000000e+00> : vector<256x8xf32>
    %91 = tpu.matmul %88, %90, %cst_133 {dimension_numbers = #tpu.dot_dimension_numbers<[1], [0], [0], [1], [0, 0, 1, 1], [], []>} : vector<256x8xbf16>, vector<8x8xbf16>, vector<256x8xf32> -> vector<256x8xf32>
    %92 = arith.addf %86, %91 : vector<256x8xf32>
    %c0_134 = arith.constant 0 : index
    %c0_135 = arith.constant 0 : index
    %c2_136 = arith.constant 2 : index
    %c0_137 = arith.constant 0 : index
    %93 = vector.load %arg13[%c0_134, %c0_135, %c2_136, %c0_137] : memref<1x18x18x8xbf16, #tpu.memory_space<vmem>>, vector<1x16x16x8xbf16>
    %94 = vector.shape_cast %93 : vector<1x16x16x8xbf16> to vector<256x8xbf16>
    %c2_138 = arith.constant 2 : index
    %c0_139 = arith.constant 0 : index
    %c0_140 = arith.constant 0 : index
    %95 = vector.load %arg5[%c2_138, %c0_139, %c0_140] : memref<9x8x8xbf16, #tpu.memory_space<vmem>>, vector<1x8x8xbf16>
    %96 = vector.shape_cast %95 : vector<1x8x8xbf16> to vector<8x8xbf16>
    %cst_141 = arith.constant dense<0.000000e+00> : vector<256x8xf32>
    %97 = tpu.matmul %94, %96, %cst_141 {dimension_numbers = #tpu.dot_dimension_numbers<[1], [0], [0], [1], [0, 0, 1, 1], [], []>} : vector<256x8xbf16>, vector<8x8xbf16>, vector<256x8xf32> -> vector<256x8xf32>
    %98 = arith.addf %92, %97 : vector<256x8xf32>
    %c0_142 = arith.constant 0 : index
    %c1_143 = arith.constant 1 : index
    %c0_144 = arith.constant 0 : index
    %c0_145 = arith.constant 0 : index
    %99 = vector.load %arg13[%c0_142, %c1_143, %c0_144, %c0_145] : memref<1x18x18x8xbf16, #tpu.memory_space<vmem>>, vector<1x16x16x8xbf16>
    %100 = vector.shape_cast %99 : vector<1x16x16x8xbf16> to vector<256x8xbf16>
    %c3_146 = arith.constant 3 : index
    %c0_147 = arith.constant 0 : index
    %c0_148 = arith.constant 0 : index
    %101 = vector.load %arg5[%c3_146, %c0_147, %c0_148] : memref<9x8x8xbf16, #tpu.memory_space<vmem>>, vector<1x8x8xbf16>
    %102 = vector.shape_cast %101 : vector<1x8x8xbf16> to vector<8x8xbf16>
    %cst_149 = arith.constant dense<0.000000e+00> : vector<256x8xf32>
    %103 = tpu.matmul %100, %102, %cst_149 {dimension_numbers = #tpu.dot_dimension_numbers<[1], [0], [0], [1], [0, 0, 1, 1], [], []>} : vector<256x8xbf16>, vector<8x8xbf16>, vector<256x8xf32> -> vector<256x8xf32>
    %104 = arith.addf %98, %103 : vector<256x8xf32>
    %c0_150 = arith.constant 0 : index
    %c1_151 = arith.constant 1 : index
    %c1_152 = arith.constant 1 : index
    %c0_153 = arith.constant 0 : index
    %105 = vector.load %arg13[%c0_150, %c1_151, %c1_152, %c0_153] : memref<1x18x18x8xbf16, #tpu.memory_space<vmem>>, vector<1x16x16x8xbf16>
    %106 = vector.shape_cast %105 : vector<1x16x16x8xbf16> to vector<256x8xbf16>
    %c4_154 = arith.constant 4 : index
    %c0_155 = arith.constant 0 : index
    %c0_156 = arith.constant 0 : index
    %107 = vector.load %arg5[%c4_154, %c0_155, %c0_156] : memref<9x8x8xbf16, #tpu.memory_space<vmem>>, vector<1x8x8xbf16>
    %108 = vector.shape_cast %107 : vector<1x8x8xbf16> to vector<8x8xbf16>
    %cst_157 = arith.constant dense<0.000000e+00> : vector<256x8xf32>
    %109 = tpu.matmul %106, %108, %cst_157 {dimension_numbers = #tpu.dot_dimension_numbers<[1], [0], [0], [1], [0, 0, 1, 1], [], []>} : vector<256x8xbf16>, vector<8x8xbf16>, vector<256x8xf32> -> vector<256x8xf32>
    %110 = arith.addf %104, %109 : vector<256x8xf32>
    %c0_158 = arith.constant 0 : index
    %c1_159 = arith.constant 1 : index
    %c2_160 = arith.constant 2 : index
    %c0_161 = arith.constant 0 : index
    %111 = vector.load %arg13[%c0_158, %c1_159, %c2_160, %c0_161] : memref<1x18x18x8xbf16, #tpu.memory_space<vmem>>, vector<1x16x16x8xbf16>
    %112 = vector.shape_cast %111 : vector<1x16x16x8xbf16> to vector<256x8xbf16>
    %c5_162 = arith.constant 5 : index
    %c0_163 = arith.constant 0 : index
    %c0_164 = arith.constant 0 : index
    %113 = vector.load %arg5[%c5_162, %c0_163, %c0_164] : memref<9x8x8xbf16, #tpu.memory_space<vmem>>, vector<1x8x8xbf16>
    %114 = vector.shape_cast %113 : vector<1x8x8xbf16> to vector<8x8xbf16>
    %cst_165 = arith.constant dense<0.000000e+00> : vector<256x8xf32>
    %115 = tpu.matmul %112, %114, %cst_165 {dimension_numbers = #tpu.dot_dimension_numbers<[1], [0], [0], [1], [0, 0, 1, 1], [], []>} : vector<256x8xbf16>, vector<8x8xbf16>, vector<256x8xf32> -> vector<256x8xf32>
    %116 = arith.addf %110, %115 : vector<256x8xf32>
    %c0_166 = arith.constant 0 : index
    %c2_167 = arith.constant 2 : index
    %c0_168 = arith.constant 0 : index
    %c0_169 = arith.constant 0 : index
    %117 = vector.load %arg13[%c0_166, %c2_167, %c0_168, %c0_169] : memref<1x18x18x8xbf16, #tpu.memory_space<vmem>>, vector<1x16x16x8xbf16>
    %118 = vector.shape_cast %117 : vector<1x16x16x8xbf16> to vector<256x8xbf16>
    %c6_170 = arith.constant 6 : index
    %c0_171 = arith.constant 0 : index
    %c0_172 = arith.constant 0 : index
    %119 = vector.load %arg5[%c6_170, %c0_171, %c0_172] : memref<9x8x8xbf16, #tpu.memory_space<vmem>>, vector<1x8x8xbf16>
    %120 = vector.shape_cast %119 : vector<1x8x8xbf16> to vector<8x8xbf16>
    %cst_173 = arith.constant dense<0.000000e+00> : vector<256x8xf32>
    %121 = tpu.matmul %118, %120, %cst_173 {dimension_numbers = #tpu.dot_dimension_numbers<[1], [0], [0], [1], [0, 0, 1, 1], [], []>} : vector<256x8xbf16>, vector<8x8xbf16>, vector<256x8xf32> -> vector<256x8xf32>
    %122 = arith.addf %116, %121 : vector<256x8xf32>
    %c0_174 = arith.constant 0 : index
    %c2_175 = arith.constant 2 : index
    %c1_176 = arith.constant 1 : index
    %c0_177 = arith.constant 0 : index
    %123 = vector.load %arg13[%c0_174, %c2_175, %c1_176, %c0_177] : memref<1x18x18x8xbf16, #tpu.memory_space<vmem>>, vector<1x16x16x8xbf16>
    %124 = vector.shape_cast %123 : vector<1x16x16x8xbf16> to vector<256x8xbf16>
    %c7_178 = arith.constant 7 : index
    %c0_179 = arith.constant 0 : index
    %c0_180 = arith.constant 0 : index
    %125 = vector.load %arg5[%c7_178, %c0_179, %c0_180] : memref<9x8x8xbf16, #tpu.memory_space<vmem>>, vector<1x8x8xbf16>
    %126 = vector.shape_cast %125 : vector<1x8x8xbf16> to vector<8x8xbf16>
    %cst_181 = arith.constant dense<0.000000e+00> : vector<256x8xf32>
    %127 = tpu.matmul %124, %126, %cst_181 {dimension_numbers = #tpu.dot_dimension_numbers<[1], [0], [0], [1], [0, 0, 1, 1], [], []>} : vector<256x8xbf16>, vector<8x8xbf16>, vector<256x8xf32> -> vector<256x8xf32>
    %128 = arith.addf %122, %127 : vector<256x8xf32>
    %c0_182 = arith.constant 0 : index
    %c2_183 = arith.constant 2 : index
    %c2_184 = arith.constant 2 : index
    %c0_185 = arith.constant 0 : index
    %129 = vector.load %arg13[%c0_182, %c2_183, %c2_184, %c0_185] : memref<1x18x18x8xbf16, #tpu.memory_space<vmem>>, vector<1x16x16x8xbf16>
    %130 = vector.shape_cast %129 : vector<1x16x16x8xbf16> to vector<256x8xbf16>
    %c8_186 = arith.constant 8 : index
    %c0_187 = arith.constant 0 : index
    %c0_188 = arith.constant 0 : index
    %131 = vector.load %arg5[%c8_186, %c0_187, %c0_188] : memref<9x8x8xbf16, #tpu.memory_space<vmem>>, vector<1x8x8xbf16>
    %132 = vector.shape_cast %131 : vector<1x8x8xbf16> to vector<8x8xbf16>
    %cst_189 = arith.constant dense<0.000000e+00> : vector<256x8xf32>
    %133 = tpu.matmul %130, %132, %cst_189 {dimension_numbers = #tpu.dot_dimension_numbers<[1], [0], [0], [1], [0, 0, 1, 1], [], []>} : vector<256x8xbf16>, vector<8x8xbf16>, vector<256x8xf32> -> vector<256x8xf32>
    %134 = arith.addf %128, %133 : vector<256x8xf32>
    %c0_190 = arith.constant 0 : index
    %c0_191 = arith.constant 0 : index
    %135 = vector.load %arg6[%c0_190, %c0_191] : memref<1x8xf32, #tpu.memory_space<vmem>>, vector<1x8xf32>
    %136 = vector.broadcast %135 : vector<1x8xf32> to vector<256x8xf32>
    %137 = arith.mulf %134, %136 : vector<256x8xf32>
    %c0_192 = arith.constant 0 : index
    %c0_193 = arith.constant 0 : index
    %138 = vector.load %arg7[%c0_192, %c0_193] : memref<1x8xf32, #tpu.memory_space<vmem>>, vector<1x8xf32>
    %139 = vector.broadcast %138 : vector<1x8xf32> to vector<256x8xf32>
    %140 = arith.addf %137, %139 : vector<256x8xf32>
    %141 = vector.shape_cast %16 : vector<1x16x16x4xbf16> to vector<256x4xbf16>
    %c0_194 = arith.constant 0 : index
    %c0_195 = arith.constant 0 : index
    %142 = vector.load %arg8[%c0_194, %c0_195] : memref<4x8xbf16, #tpu.memory_space<vmem>>, vector<4x8xbf16>
    %cst_196 = arith.constant dense<0.000000e+00> : vector<256x8xf32>
    %143 = tpu.matmul %141, %142, %cst_196 {dimension_numbers = #tpu.dot_dimension_numbers<[1], [0], [0], [1], [0, 0, 1, 1], [], []>} : vector<256x4xbf16>, vector<4x8xbf16>, vector<256x8xf32> -> vector<256x8xf32>
    %c0_197 = arith.constant 0 : index
    %c0_198 = arith.constant 0 : index
    %144 = vector.load %arg9[%c0_197, %c0_198] : memref<1x8xf32, #tpu.memory_space<vmem>>, vector<1x8xf32>
    %145 = vector.broadcast %144 : vector<1x8xf32> to vector<256x8xf32>
    %146 = arith.mulf %143, %145 : vector<256x8xf32>
    %c0_199 = arith.constant 0 : index
    %c0_200 = arith.constant 0 : index
    %147 = vector.load %arg10[%c0_199, %c0_200] : memref<1x8xf32, #tpu.memory_space<vmem>>, vector<1x8xf32>
    %148 = vector.broadcast %147 : vector<1x8xf32> to vector<256x8xf32>
    %149 = arith.addf %146, %148 : vector<256x8xf32>
    %150 = arith.addf %140, %149 : vector<256x8xf32>
    %cst_201 = arith.constant 0.000000e+00 : f32
    %151 = vector.broadcast %cst_201 : f32 to vector<256x8xf32>
    %152 = arith.maximumf %150, %151 : vector<256x8xf32>
    %153 = vector.shape_cast %152 : vector<256x8xf32> to vector<1x16x16x8xf32>
    %c0_202 = arith.constant 0 : index
    %c0_203 = arith.constant 0 : index
    %c0_204 = arith.constant 0 : index
    %c0_205 = arith.constant 0 : index
    %154 = vector.load %arg11[%c0_202, %c0_203, %c0_204, %c0_205] : memref<1x16x16x8xf32, #tpu.memory_space<vmem>>, vector<1x16x16x8xf32>
    tpu.vector_store %arg11[%c0_202, %c0_203, %c0_204, %c0_205], %153 {strides = array<i32>} : memref<1x16x16x8xf32, #tpu.memory_space<vmem>>, vector<1x16x16x8xf32>,
    return
  }
  func.func @transform_0(%arg0: i32) -> (i32, i32, i32, i32) {
    %c0_i32 = arith.constant 0 : i32
    %c0_i32_0 = arith.constant 0 : i32
    %c0_i32_1 = arith.constant 0 : i32
    %c0_i32_2 = arith.constant 0 : i32
    return %arg0, %c0_i32, %c0_i32_0, %c0_i32_1 : i32, i32, i32, i32
  }
  func.func @transform_1(%arg0: i32) -> (i32, i32, i32) {
    %c0_i32 = arith.constant 0 : i32
    %c0_i32_0 = arith.constant 0 : i32
    %c0_i32_1 = arith.constant 0 : i32
    %c0_i32_2 = arith.constant 0 : i32
    return %c0_i32, %c0_i32_0, %c0_i32_1 : i32, i32, i32
  }
  func.func @transform_2(%arg0: i32) -> (i32, i32) {
    %c0_i32 = arith.constant 0 : i32
    %c0_i32_0 = arith.constant 0 : i32
    %c0_i32_1 = arith.constant 0 : i32
    return %c0_i32, %c0_i32_0 : i32, i32
  }
  func.func @transform_3(%arg0: i32) -> (i32, i32) {
    %c0_i32 = arith.constant 0 : i32
    %c0_i32_0 = arith.constant 0 : i32
    %c0_i32_1 = arith.constant 0 : i32
    return %c0_i32, %c0_i32_0 : i32, i32
  }
  func.func @transform_4(%arg0: i32) -> (i32, i32, i32) {
    %c0_i32 = arith.constant 0 : i32
    %c0_i32_0 = arith.constant 0 : i32
    %c0_i32_1 = arith.constant 0 : i32
    %c0_i32_2 = arith.constant 0 : i32
    return %c0_i32, %c0_i32_0, %c0_i32_1 : i32, i32, i32
  }
  func.func @transform_5(%arg0: i32) -> (i32, i32) {
    %c0_i32 = arith.constant 0 : i32
    %c0_i32_0 = arith.constant 0 : i32
    %c0_i32_1 = arith.constant 0 : i32
    return %c0_i32, %c0_i32_0 : i32, i32
  }
  func.func @transform_6(%arg0: i32) -> (i32, i32) {
    %c0_i32 = arith.constant 0 : i32
    %c0_i32_0 = arith.constant 0 : i32
    %c0_i32_1 = arith.constant 0 : i32
    return %c0_i32, %c0_i32_0 : i32, i32
  }
  func.func @transform_7(%arg0: i32) -> (i32, i32) {
    %c0_i32 = arith.constant 0 : i32
    %c0_i32_0 = arith.constant 0 : i32
    %c0_i32_1 = arith.constant 0 : i32
    return %c0_i32, %c0_i32_0 : i32, i32
  }
  func.func @transform_8(%arg0: i32) -> (i32, i32) {
    %c0_i32 = arith.constant 0 : i32
    %c0_i32_0 = arith.constant 0 : i32
    %c0_i32_1 = arith.constant 0 : i32
    return %c0_i32, %c0_i32_0 : i32, i32
  }
  func.func @transform_9(%arg0: i32) -> (i32, i32) {
    %c0_i32 = arith.constant 0 : i32
    %c0_i32_0 = arith.constant 0 : i32
    %c0_i32_1 = arith.constant 0 : i32
    return %c0_i32, %c0_i32_0 : i32, i32
  }
  func.func @transform_10(%arg0: i32) -> (i32, i32, i32, i32) {
    %c0_i32 = arith.constant 0 : i32
    %c0_i32_0 = arith.constant 0 : i32
    %c0_i32_1 = arith.constant 0 : i32
    %c0_i32_2 = arith.constant 0 : i32
    return %arg0, %c0_i32, %c0_i32_0, %c0_i32_1 : i32, i32, i32, i32
  }
}

</mosaic_0001>

<bundles_post_ra>
// kernel: tpu_custom_call.1
= control target key start
LH: loop header
LB: loop body
LE: loop exit
PB: predicated region body
PF: predicated region fallthrough
CT: control target
= control target key end

     0   :  { %s13980_s13 = smov 0   ;;  %s18176_s0 = inlined_call_operand.vmem [shape: bf16[2,16,16,4], index: 0, kind: input, shape index: {}]   ;;  %s18177_s1 = inlined_call_operand.vmem [shape: bf16[9,4,8], index: 1, kind: input, shape index: {}]   ;;  %s18178_s2 = inlined_call_operand.vmem [shape: f32[1,8], index: 2, kind: input, shape index: {}]   ;;  %s18179_s3 = inlined_call_operand.vmem [shape: f32[1,8], index: 3, kind: input, shape index: {}]   ;;  %s18180_s4 = inlined_call_operand.vmem [shape: bf16[9,8,8], index: 4, kind: input, shape index: {}]   ;;  %s18181_s5 = inlined_call_operand.vmem [shape: f32[1,8], index: 5, kind: input, shape index: {}]   ;;  %s18182_s6 = inlined_call_operand.vmem [shape: f32[1,8], index: 6, kind: input, shape index: {}]   ;;  %s18183_s7 = inlined_call_operand.vmem [shape: bf16[4,8], index: 7, kind: input, shape index: {}]   ;;  %s18184_s8 = inlined_call_operand.vmem [shape: f32[1,8], index: 8, kind: input, shape index: {}]   ;;  %s18185_s9 = inlined_call_operand.vmem [shape: f32[1,8], index: 9, kind: input, shape index: {}]   ;;  %s18186_s10 = inlined_call_operand.vmem [shape: f32[2,16,16,8], index: 10, kind: output, shape index: {}]  }
   0x1 LB: > { %s11423_s14 = sadd.s32 4294967295, %s13922_s13   ;;  %p11427_p0 = scmp.ge.s32.totalorder %s13922_s13, 1  ;;  %s13922_s13 = sphi %s13980_s13, %s20_s13  }
   0x2   : > { %p312_p1 = scmp.lt.s32.totalorder %s13922_s13, 3 }
   0x4   : > { %p313_p2 = pnand %p11427_p0, %p312_p1 }
   0x6   : > { %316 = sbr.rel (%p313_p2) target bundleno = 1670 (0x686), region = 60 }
   0xd   : > { %v11432_v0 = vld [vmem:[%s18177_s1 + $0x2] sm:$0x3]  ;;  %vm1607_vm0 = vcmask 1041408   ;;  %vm361_vm1 = vcmask 27648   ;;  %vm364_vm2 = vcmask 24576   ;;  %v18187_v2 = vmov 0  }
   0xe   : > { %13709 = vmatprep.subr.msk.bf16.mxu0 %vm1607_vm0, %v11432_v0  ;;  %v1609_v1 = vsel %vm1607_vm0, %v11432_v0, 0  ;;  %362 = vst.msk [vmem:[#allocation2] sm:$0xf] %vm361_vm1, %v18187_v2  ;;  %363 = vst.msk [vmem:[#allocation2 + $0x4] sm:$0xf] %vm361_vm1, %v18187_v2  ;;  %vm483_vm5 = vcmask 60416   ;;  %13710 = vmatprep.subr.msk.bf16.mxu1 %vm1607_vm0, %v11432_v0 }
   0xf   : > { %365 = vst.msk [vmem:[#allocation2 + $0x8] sm:$0x1] %vm364_vm2, %v18187_v2  ;;  %vm371_vm3 = vsmask.f32 256  ;;  %vm427_vm4 = vsmask.f32 7938  ;;  %12550 = vmatpush3.bf16.msra.mxu0 %v1609_v1  ;;  %13196 = vmatpush3.bf16.msra.mxu1 %v1609_v1 }
  0x10   : > { %367 = vst.msk [vmem:[#allocation2 + $0xcc] sm:$0xf] %vm361_vm1, %v18187_v2  ;;  %368 = vst.msk [vmem:[#allocation2 + $0xd0] sm:$0xf] %vm361_vm1, %v18187_v2  ;;  %p350_p3 = scmp.lt.s32.totalorder %s11423_s14, 1  ;;  %v18298_v4 = vmov 0 }
  0x11   : > { %369 = vst.msk [vmem:[#allocation2 + $0xd4] sm:$0x1] %vm364_vm2, %v18187_v2  ;;  %vm14008_vm6 = vmand %vm364_vm2, %vm371_vm3  ;;  %v14031_v5 = vld [vmem:[%s18177_s1] sm:$0x3]  ;;  %v376_v6 = vld [vmem:[#allocation2 + $0xc] sm:$0x1] }
  0x12   : > { %484 = vst.msk [vmem:[#allocation3] sm:$0xf] %vm483_vm5, %v18187_v2  ;;  %485 = vst.msk [vmem:[#allocation3 + $0x4] sm:$0xf] %vm483_vm5, %v18187_v2  ;;  %13711 = vmatprep.subr.msk.bf16.mxu0 %vm1607_vm0, %v14031_v5  ;;  %s18585_s14 = smov (!%p350_p3, %s11423_s14), 1  ;;  %v377_v7 = vsel %vm14008_vm6, 0, %v376_v6 }
  0x13   : > { %489 = vst.msk [vmem:[#allocation3 + $0xcc] sm:$0xf] %vm483_vm5, %v18187_v2  ;;  %490 = vst.msk [vmem:[#allocation3 + $0xd0] sm:$0xf] %vm483_vm5, %v18187_v2  ;;  %v432_v8 = vld [vmem:[#allocation2 + $0x14] sm:$0x1] }
  0x14   : > { %vm14024_vm7 = vmand %vm364_vm2, %vm427_vm4  ;;  %378 = vst [vmem:[#allocation2 + $0xc] sm:$0x1] %v377_v7  ;;  %v379_v10 = vld [vmem:[#allocation2 + $0x18] sm:$0x1]  ;;  %v435_v11 = vld [vmem:[#allocation2 + $0x20] sm:$0x1] }
  0x15   : > { %v18299_v4 = vsel %vm14024_vm7, 4294967295, %v18298_v4  ;;  %v433_v9 = vsel %vm14024_vm7, 0, %v432_v8  ;;  %s12192_s19 = sshll.u32 %s18585_s14, 7  ;;  %v380_v12 = vsel %vm14008_vm6, 0, %v379_v10  ;;  %v436_v13 = vsel %vm14024_vm7, 0, %v435_v11  ;;  %vm14071_vm10 = vmand %vm361_vm1, %vm427_vm4  ;;  %s12193_s20 = sshll.u32 %s18585_s14, 8 }
  0x16   : > { %18300 = vst [vmem:[#allocation4_spill] sm:$0xff] %v18299_v4  ;;  %434 = vst [vmem:[#allocation2 + $0x14] sm:$0x1] %v433_v9  ;;  %v382_v14 = vld [vmem:[#allocation2 + $0x24] sm:$0x1]  ;;  %s14051_s22 = scalar_lea.vmem %s18176_s0, %s12192_s19  ;;  %v18303_v44 = vmov 0  ;;  %s17968_s14 = scalar_lea.vmem %s18186_s10, %s12193_s20 }
  0x17   : > { %vm635_vm8 = vsmask.f32 4368  ;;  %381 = vst [vmem:[#allocation2 + $0x18] sm:$0x1] %v380_v12  ;;  %437 = vst [vmem:[#allocation2 + $0x20] sm:$0x1] %v436_v13 }
  0x18   : > { %v383_v15 = vsel %vm14008_vm6, 0, %v382_v14  ;;  %v373_v16 = vld [vmem:[#allocation2] sm:$0x1]  ;;  %v429_v17 = vld [vmem:[#allocation2 + $0x8] sm:$0x1]  ;;  %vm14080_vm11 = vmor %vm371_vm3, %vm635_vm8  ;;  %vm1558_vm14 = vcmask 31744  }
  0x19   : > { %v14055_v18 = vld [vmem:[#allocation2 + $0x4] sm:$0xf]  ;;  %384 = vst [vmem:[#allocation2 + $0x24] sm:$0x1] %v383_v15  ;;  %v438_v19 = vld [vmem:[#allocation2 + $0x2c] sm:$0x1] }
  0x1a   : > { %v374_v20 = vsel %vm14008_vm6, 0, %v373_v16  ;;  %v430_v21 = vsel %vm14024_vm7, 0, %v429_v17  ;;  %vm1121_vm9 = vsmask.f32 3328  ;;  %v1134_v22 = vshll.u32 %v14055_v18, 16 }
  0x1b   : > { %v1138_v23 = vshrl.u32 %v14055_v18, 16  ;;  %v603_v24 = vld [vmem:[%s14051_s22] sm:$0xf]  ;;  %375 = vst [vmem:[#allocation2] sm:$0x1] %v374_v20  ;;  %v439_v43 = vsel %vm14024_vm7, 0, %v438_v19 }
  0x1c   : > { %431 = vst [vmem:[#allocation2 + $0x8] sm:$0x1] %v430_v21  ;;  %v604_v25 = vld [vmem:[%s14051_s22 + $0x4] sm:$0xf]  ;;  %v638_v26 = vshrl.u32 %v603_v24, 16  ;;  %v641_v27 = vshll.u32 %v603_v24, 16 }
  0x1d   : > { %v605_v28 = vld [vmem:[%s14051_s22 + $0x8] sm:$0xf]  ;;  %v14066_v29 = vrot.slane %v1134_v22, 5  ;;  %v1140_v30 = vrot.slane %v1138_v23, 4  ;;  %v646_v31 = vshrl.u32 %v604_v25, 16  ;;  %v649_v32 = vshll.u32 %v604_v25, 16 }
  0x1e   : > { %v606_v33 = vld [vmem:[%s14051_s22 + $0xc] sm:$0xf]  ;;  %v640_v34 = vrot.slane %v638_v26, 7  ;;  %v655_v35 = vshrl.u32 %v605_v28, 16  ;;  %v658_v36 = vshll.u32 %v605_v28, 16  ;;  %v18304_v44 = vsel %vm14080_vm11, 4294967295, %v18303_v44 }
  0x1f   : > { %v663_v37 = vshrl.u32 %v606_v33, 16  ;;  %v1141_v39 = vor.u32 %v1140_v30, %v14066_v29  ;;  %v648_v40 = vrot.slane %v646_v31, 7  ;;  %v960_v41 = vld [vmem:[#allocation2 + $0xc] sm:$0xf]  ;;  %v666_v42 = vshll.u32 %v606_v33, 16  ;;  %18305 = vst [vmem:[#allocation5_spill] sm:$0xff] %v18304_v44 }
  0x20   : > { %v643_v45 = vor.u32 %v641_v27, %v640_v34  ;;  %v644_v46 = vrot.slane %v640_v34, 4  ;;  %v964_v47 = vld [vmem:[#allocation2 + $0x14] sm:$0x1]  ;;  %v657_v48 = vrot.slane %v655_v35, 7  ;;  %440 = vst [vmem:[#allocation2 + $0x2c] sm:$0x1] %v439_v43 }
  0x21   : > { %v665_v49 = vrot.slane %v663_v37, 7  ;;  %vm1122_vm12 = vsmask.f32 7440  ;;  %v651_v50 = vor.u32 %v649_v32, %v648_v40  ;;  %v653_v51 = vrot.slane %v648_v40, 4  ;;  %v607_v52 = vld [vmem:[%s14051_s22 + $0x10] sm:$0xf] }
  0x22   : > { %v961_v53 = vsel %vm14071_vm10, %v643_v45, %v960_v41  ;;  %v660_v54 = vor.u32 %v658_v36, %v657_v48  ;;  %v661_v55 = vrot.slane %v657_v48, 4  ;;  %v967_v57 = vld [vmem:[#allocation2 + $0x18] sm:$0xf]  ;;  %v971_v58 = vld [vmem:[#allocation2 + $0x20] sm:$0x1]  ;;  %v672_v1 = vshrl.u32 %v607_v52, 16  ;;  %vm14107_vm13 = vmor %vm1121_vm9, %vm1122_vm12 }
  0x23   : > { %v668_v56 = vor.u32 %v666_v42, %v665_v49  ;;  %v385_v59 = vld [vmem:[#allocation2 + $0x30] sm:$0x1]  ;;  %v14087_v60 = vld [vmem:[#allocation2] sm:$0xf]  ;;  %v1105_v61 = vld [vmem:[#allocation2 + $0x8] sm:$0x1]  ;;  %v652_v62 = vsel %vm14080_vm11, %v644_v46, %v651_v50  ;;  %v965_v63 = vsel %vm14008_vm6, %v653_v51, %v964_v47 }
  0x24   : > { %962 = vst [vmem:[#allocation2 + $0xc] sm:$0xf] %v961_v53  ;;  %v670_v0 = vrot.slane %v665_v49, 4  ;;  %v1125_v6 = vshrl.u32 %v14087_v60, 16  ;;  %v1128_v7 = vshll.u32 %v14087_v60, 16  ;;  %v1142_v8 = vrot.slane %v1141_v39, 4 }
  0x25   : > { %v1144_v9 = vshll.u32 %v1105_v61, 16  ;;  %963 = vst.msk [vmem:[#allocation2 + $0x10] sm:$0xf] %vm361_vm1, %v652_v62  ;;  %966 = vst [vmem:[#allocation2 + $0x14] sm:$0x1] %v965_v63  ;;  %v669_v11 = vsel %vm14080_vm11, %v661_v55, %v668_v56  ;;  %v968_v12 = vsel %vm14071_vm10, %v660_v54, %v967_v57  ;;  %v14103_v14 = vrot.slane %v672_v1, 7 }
  0x26   : > { %v608_v10 = vld [vmem:[%s14051_s22 + $0x14] sm:$0xf]  ;;  %v972_v13 = vsel %vm14008_vm6, %v670_v0, %v971_v58  ;;  %v974_v15 = vld [vmem:[#allocation2 + $0x24] sm:$0xf]  ;;  %v441_v16 = vld [vmem:[#allocation2 + $0x38] sm:$0x1] }
  0x27   : > { %v1127_v19 = vrot.slane %v1125_v6, 4  ;;  %v1130_v20 = vrot.slane %v1128_v7, 5  ;;  %v1146_v21 = vrot.slane %v1144_v9, 5  ;;  %969 = vst [vmem:[#allocation2 + $0x18] sm:$0xf] %v968_v12  ;;  %v675_v22 = vshll.u32 %v607_v52, 16 }
  0x28   : > { %970 = vst.msk [vmem:[#allocation2 + $0x1c] sm:$0xf] %vm361_vm1, %v669_v11  ;;  %973 = vst [vmem:[#allocation2 + $0x20] sm:$0x1] %v972_v13  ;;  %v14113_v23 = vld [vmem:[%s14051_s22 + $0x18] sm:$0xf] }
  0x29   : > { %v680_v24 = vshrl.u32 %v608_v10, 16  ;;  %v683_v25 = vshll.u32 %v608_v10, 16  ;;  %v386_v26 = vsel %vm14008_vm6, 0, %v385_v59  ;;  %v388_v27 = vld [vmem:[#allocation2 + $0x3c] sm:$0x1]  ;;  %v1131_v28 = vor.u32 %v1130_v20, %v1127_v19 }
  0x2a   : > { %v14119_v30 = vsel %vm1607_vm0, %v14031_v5, 0  ;;  %v677_v31 = vor.u32 %v675_v22, %v14103_v14  ;;  %387 = vst [vmem:[#allocation2 + $0x30] sm:$0x1] %v386_v26  ;;  %v442_v32 = vsel %vm14024_vm7, 0, %v441_v16  ;;  %v1147_v33 = vsel %vm14107_vm13, %v1142_v8, %v1146_v21  ;;  %v14128_v36 = vld [vmem:[%s14051_s22 + $0x1c] sm:$0xf] }
  0x2b   : > { %v678_v34 = vrot.slane %v14103_v14, 4  ;;  %v682_v35 = vrot.slane %v680_v24, 7  ;;  %443 = vst [vmem:[#allocation2 + $0x38] sm:$0x1] %v442_v32  ;;  %v689_v37 = vshrl.u32 %v14113_v23, 16  ;;  %v1132_v39 = vrot.slane %v1131_v28, 4 }
  0x2c   : > { %v14131_v5 = vld [vmem:[#allocation2 + $0xc] sm:$0xf]  ;;  %v975_v40 = vsel %vm14071_vm10, %v677_v31, %v974_v15  ;;  %v692_v41 = vshll.u32 %v14113_v23, 16  ;;  %v389_v42 = vsel %vm14008_vm6, 0, %v388_v27  ;;  %v14138_v43 = vld [vmem:[#allocation2 + $0x10] sm:$0xf] }
  0x2d   : > { %v14140_v45 = vld [vmem:[#allocation2 + $0x14] sm:$0x1]  ;;  %v1149_v46 = vshrl.u32 %v14131_v5, 16  ;;  %v1152_v47 = vshll.u32 %v14131_v5, 16  ;;  %v685_v48 = vor.u32 %v683_v25, %v682_v35  ;;  %976 = vst [vmem:[#allocation2 + $0x24] sm:$0xf] %v975_v40  ;;  %v1137_v49 = vsel %vm14107_vm13, %v1132_v39, %v14066_v29 }
  0x2e   : > { %390 = vst [vmem:[#allocation2 + $0x3c] sm:$0x1] %v389_v42  ;;  %v1158_v50 = vshll.u32 %v14138_v43, 16  ;;  %v1162_v51 = vshrl.u32 %v14138_v43, 16  ;;  %v1168_v52 = vshll.u32 %v14140_v45, 16  ;;  %v11433_v53 = vcombine.low %v1137_v49, %v1147_v33 }
  0x2f   : > { %v1151_v54 = vrot.slane %v1149_v46, 4  ;;  %v1154_v55 = vrot.slane %v1152_v47, 5  ;;  %v14150_v56 = vld [vmem:[#allocation2 + $0x18] sm:$0xf]  ;;  %v697_v57 = vshrl.u32 %v14128_v36, 16  ;;  %v700_v29 = vshll.u32 %v14128_v36, 16 }
  0x30   : > { %v1160_v58 = vrot.slane %v1158_v50, 5  ;;  %v1164_v59 = vrot.slane %v1162_v51, 4  ;;  %v1170_v61 = vrot.slane %v1168_v52, 5  ;;  %v14153_v62 = vld [vmem:[#allocation2 + $0x1c] sm:$0xf]  ;;  %12551 = vmatprep.mubr.msk.bf16.mxu0 %vm1558_vm14, %v11433_v53  ;;  %v1173_v1 = vshrl.u32 %v14150_v56, 16 }
  0x31   : > { %v1155_v63 = vor.u32 %v1154_v55, %v1151_v54  ;;  %v1107_v0 = vld [vmem:[#allocation2 + $0x20] sm:$0x1]  ;;  %v1176_v6 = vshll.u32 %v14150_v56, 16  ;;  %v1182_v7 = vshll.u32 %v14153_v62, 16  ;;  %v1186_v9 = vshrl.u32 %v14153_v62, 16 }
  0x32   : > { %v1165_v8 = vor.u32 %v1164_v59, %v1160_v58  ;;  %v1192_v10 = vshll.u32 %v1107_v0, 16  ;;  %v686_v11 = vsel %vm14080_vm11, %v678_v34, %v685_v48  ;;  %v1175_v13 = vrot.slane %v1173_v1, 4  ;;  %v978_v16 = vld [vmem:[#allocation2 + $0x2c] sm:$0x1]  ;;  %v444_v34 = vld [vmem:[#allocation2 + $0x44] sm:$0x1] }
  0x33   : > { %v1156_v12 = vrot.slane %v1155_v63, 4  ;;  %v1178_v14 = vrot.slane %v1176_v6, 5  ;;  %v1184_v15 = vrot.slane %v1182_v7, 5  ;;  %977 = vst.msk [vmem:[#allocation2 + $0x28] sm:$0xf] %vm361_vm1, %v686_v11  ;;  %v1188_v20 = vrot.slane %v1186_v9, 4 }
  0x34   : > { %v1166_v19 = vrot.slane %v1165_v8, 4  ;;  %v1194_v21 = vrot.slane %v1192_v10, 5  ;;  %v687_v22 = vrot.slane %v682_v35, 4  ;;  %v14164_v23 = vld [vmem:[#allocation2 + $0x24] sm:$0xf]  ;;  %v691_v33 = vrot.slane %v689_v37, 7 }
  0x35   : > { %v1161_v24 = vsel %vm14107_vm13, %v1156_v12, %v1160_v58  ;;  %v1179_v25 = vor.u32 %v1178_v14, %v1175_v13  ;;  %v1197_v26 = vshrl.u32 %v14164_v23, 16  ;;  %v1200_v27 = vshll.u32 %v14164_v23, 16  ;;  %v611_v35 = vld [vmem:[%s14051_s22 + $0x20] sm:$0xf]  ;;  %v981_v46 = vld [vmem:[#allocation2 + $0x30] sm:$0xf] }
  0x36   : > { %v1171_v28 = vsel %vm14107_vm13, %v1166_v19, %v1170_v61  ;;  %v1189_v31 = vor.u32 %v1188_v20, %v1184_v15  ;;  %v979_v32 = vsel %vm14008_vm6, %v687_v22, %v978_v16  ;;  %v694_v48 = vor.u32 %v692_v41, %v691_v33  ;;  %v612_v51 = vld [vmem:[%s14051_s22 + $0x24] sm:$0xf]  ;;  %v985_v37 = vld [vmem:[#allocation2 + $0x38] sm:$0x1]  ;;  %v391_v0 = vld [vmem:[#allocation2 + $0x48] sm:$0x1] }
  0x37   : > { %v11434_v36 = vcombine.low %v1161_v24, %v1171_v28  ;;  %v1180_v39 = vrot.slane %v1179_v25, 4  ;;  %980 = vst [vmem:[#allocation2 + $0x2c] sm:$0x1] %v979_v32  ;;  %v1199_v40 = vrot.slane %v1197_v26, 4  ;;  %v1202_v42 = vrot.slane %v1200_v27, 5 }
  0x38   : > { %v1190_v47 = vrot.slane %v1189_v31, 4  ;;  %v695_v49 = vrot.slane %v691_v33, 4  ;;  %v699_v50 = vrot.slane %v697_v57, 7  ;;  %v445_v54 = vsel %vm14024_vm7, 0, %v444_v34  ;;  %v14184_v58 = vld [vmem:[%s18177_s1 + $0x4] sm:$0x3] }
  0x39   : > { %12552 = vmatmul.mubr.msk.bf16.vlgmr.msra.gmra.mrb[0].mxu0 %vm1558_vm14, %v11434_v36  ;;  %v1185_v52 = vsel %vm14107_vm13, %v1180_v39, %v1184_v15  ;;  %v1203_v53 = vor.u32 %v1202_v42, %v1199_v40  ;;  %v706_v55 = vshrl.u32 %v611_v35, 16  ;;  %v982_v63 = vsel %vm14071_vm10, %v694_v48, %v981_v46  ;;  %446 = vst [vmem:[#allocation2 + $0x44] sm:$0x1] %v445_v54  ;;  %v988_v12 = vld [vmem:[#allocation2 + $0x3c] sm:$0xf] }
  0x3a   : > { %12584 = vmatpush3.bf16.msra.mxu0 %v14119_v30  ;;  %v1195_v41 = vsel %vm14107_vm13, %v1190_v47, %v1194_v21  ;;  %v14189_v57 = vld [vmem:[#allocation2 + $0x28] sm:$0xf]  ;;  %v702_v59 = vor.u32 %v700_v29, %v699_v50  ;;  %v704_v61 = vrot.slane %v699_v50, 4  ;;  %983 = vst [vmem:[#allocation2 + $0x30] sm:$0xf] %v982_v63  ;;  %v709_v11 = vshll.u32 %v611_v35, 16 }
  0x3b   : > { %v11435_v1 = vcombine.low %v1185_v52, %v1195_v41  ;;  %v1204_v6 = vrot.slane %v1203_v53, 4  ;;  %v1206_v7 = vshll.u32 %v14189_v57, 16  ;;  %v1210_v8 = vshrl.u32 %v14189_v57, 16  ;;  %v447_v30 = vld [vmem:[#allocation2 + $0x50] sm:$0x1]  ;;  %13712 = vmatprep.subr.msk.bf16.mxu0 %vm1607_vm0, %v14184_v58 }
  0x3c   : > { %v703_v29 = vsel %vm14080_vm11, %v695_v49, %v702_v59  ;;  %v986_v9 = vsel %vm14008_vm6, %v704_v61, %v985_v37  ;;  %v708_v10 = vrot.slane %v706_v55, 7  ;;  %v613_v13 = vld [vmem:[%s14051_s22 + $0x28] sm:$0xf]  ;;  %v714_v16 = vshrl.u32 %v612_v51, 16  ;;  %v614_v20 = vld [vmem:[%s14051_s22 + $0x2c] sm:$0xf] }
  0x3d   : > { %12555 = vmatprep.mubr.msk.bf16.mxu0 %vm1558_vm14, %v11435_v1  ;;  %v1208_v14 = vrot.slane %v1206_v7, 5  ;;  %v1212_v15 = vrot.slane %v1210_v8, 4  ;;  %984 = vst.msk [vmem:[#allocation2 + $0x34] sm:$0xf] %vm361_vm1, %v703_v29  ;;  %987 = vst [vmem:[#allocation2 + $0x38] sm:$0x1] %v986_v9 }
  0x3e   : > { %v717_v19 = vshll.u32 %v612_v51, 16  ;;  %v1108_v21 = vld [vmem:[#allocation2 + $0x2c] sm:$0x1]  ;;  %v711_v22 = vor.u32 %v709_v11, %v708_v10  ;;  %v712_v24 = vrot.slane %v708_v10, 4  ;;  %v392_v25 = vsel %vm14008_vm6, 0, %v391_v0 }
  0x3f   : > { %v448_v26 = vsel %vm14024_vm7, 0, %v447_v30  ;;  %v1209_v27 = vsel %vm14107_vm13, %v1204_v6, %v1208_v14  ;;  %v1213_v28 = vor.u32 %v1212_v15, %v1208_v14  ;;  %v1216_v31 = vshll.u32 %v1108_v21, 16  ;;  %393 = vst [vmem:[#allocation2 + $0x48] sm:$0x1] %v392_v25  ;;  %v394_v33 = vld [vmem:[#allocation2 + $0x54] sm:$0x1] }
  0x40   : > { %v716_v32 = vrot.slane %v714_v16, 7  ;;  %449 = vst [vmem:[#allocation2 + $0x50] sm:$0x1] %v448_v26  ;;  %v989_v34 = vsel %vm14071_vm10, %v711_v22, %v988_v12  ;;  %v723_v35 = vshrl.u32 %v613_v13, 16  ;;  %v726_v36 = vshll.u32 %v613_v13, 16 }
  0x41   : > { %v731_v39 = vshrl.u32 %v614_v20, 16  ;;  %v1214_v40 = vrot.slane %v1213_v28, 4  ;;  %v1218_v42 = vrot.slane %v1216_v31, 5  ;;  %990 = vst [vmem:[#allocation2 + $0x3c] sm:$0xf] %v989_v34  ;;  %v734_v52 = vshll.u32 %v614_v20, 16 }
  0x42   : > { %v719_v46 = vor.u32 %v717_v19, %v716_v32  ;;  %v721_v47 = vrot.slane %v716_v32, 4  ;;  %v992_v48 = vld [vmem:[#allocation2 + $0x44] sm:$0x1]  ;;  %v14213_v49 = vld [vmem:[#allocation2 + $0x30] sm:$0xf]  ;;  %v725_v50 = vrot.slane %v723_v35, 7 }
  0x43   : > { %v733_v51 = vrot.slane %v731_v39, 7  ;;  %v395_v53 = vsel %vm14008_vm6, 0, %v394_v33  ;;  %v1219_v37 = vsel %vm14107_vm13, %v1214_v40, %v1218_v42  ;;  %v1221_v54 = vshrl.u32 %v14213_v49, 16  ;;  %v450_v9 = vld [vmem:[#allocation2 + $0x5c] sm:$0x1] }
  0x44   : > { %v1224_v55 = vshll.u32 %v14213_v49, 16  ;;  %v720_v41 = vsel %vm14080_vm11, %v712_v24, %v719_v46  ;;  %396 = vst [vmem:[#allocation2 + $0x54] sm:$0x1] %v395_v53  ;;  %v11436_v59 = vcombine.low %v1209_v27, %v1219_v37  ;;  %v14223_v61 = vld [vmem:[#allocation2 + $0x34] sm:$0xf]  ;;  %v993_v0 = vsel %vm14008_vm6, %v721_v47, %v992_v48 }
  0x45   : > { %v14225_v63 = vld [vmem:[#allocation2 + $0x38] sm:$0x1]  ;;  %991 = vst.msk [vmem:[#allocation2 + $0x40] sm:$0xf] %vm361_vm1, %v720_v41  ;;  %v728_v1 = vor.u32 %v726_v36, %v725_v50  ;;  %v729_v6 = vrot.slane %v725_v50, 4  ;;  %v1223_v7 = vrot.slane %v1221_v54, 4  ;;  %v736_v11 = vor.u32 %v734_v52, %v733_v51 }
  0x46   : > { %v1226_v8 = vrot.slane %v1224_v55, 5  ;;  %v1230_v30 = vshll.u32 %v14223_v61, 16  ;;  %v1234_v29 = vshrl.u32 %v14223_v61, 16  ;;  %994 = vst [vmem:[#allocation2 + $0x44] sm:$0x1] %v993_v0  ;;  %12556 = vmatmul.mubr.msk.bf16.gmra.mrb[4].mxu0 %vm1558_vm14, %v11436_v59  ;;  %v1240_v10 = vshll.u32 %v14225_v63, 16 }
  0x47   : > { %v738_v12 = vrot.slane %v733_v51, 4  ;;  %v995_v13 = vld [vmem:[#allocation2 + $0x48] sm:$0xf]  ;;  %v999_v14 = vld [vmem:[#allocation2 + $0x50] sm:$0x1]  ;;  %v737_v26 = vsel %vm14080_vm11, %v729_v6, %v736_v11  ;;  %v451_v28 = vsel %vm14024_vm7, 0, %v450_v9 }
  0x48   : > { %v1227_v15 = vor.u32 %v1226_v8, %v1223_v7  ;;  %v1232_v16 = vrot.slane %v1230_v30, 5  ;;  %v1236_v19 = vrot.slane %v1234_v29, 4  ;;  %v996_v20 = vsel %vm14071_vm10, %v728_v1, %v995_v13  ;;  %v615_v21 = vld [vmem:[%s14051_s22 + $0x30] sm:$0xf]  ;;  %v616_v22 = vld [vmem:[%s14051_s22 + $0x34] sm:$0xf] }
  0x49   : > { %v1242_v24 = vrot.slane %v1240_v10, 5  ;;  %v14238_v25 = vld [vmem:[#allocation2 + $0x3c] sm:$0xf]  ;;  %997 = vst [vmem:[#allocation2 + $0x48] sm:$0xf] %v996_v20  ;;  %v1000_v27 = vsel %vm14008_vm6, %v738_v12, %v999_v14  ;;  %v740_v35 = vshrl.u32 %v615_v21, 16 }
  0x4a   : > { %v1228_v31 = vrot.slane %v1227_v15, 4  ;;  %v1237_v32 = vor.u32 %v1236_v19, %v1232_v16  ;;  %v1245_v33 = vshrl.u32 %v14238_v25, 16  ;;  %v1248_v34 = vshll.u32 %v14238_v25, 16  ;;  %998 = vst.msk [vmem:[#allocation2 + $0x4c] sm:$0xf] %vm361_vm1, %v737_v26 }
  0x4b   : > { %1001 = vst [vmem:[#allocation2 + $0x50] sm:$0x1] %v1000_v27  ;;  %452 = vst [vmem:[#allocation2 + $0x5c] sm:$0x1] %v451_v28  ;;  %v743_v36 = vshll.u32 %v615_v21, 16  ;;  %v748_v39 = vshrl.u32 %v616_v22, 16 }
  0x4c   : > { %v751_v40 = vshll.u32 %v616_v22, 16  ;;  %v1233_v42 = vsel %vm14107_vm13, %v1228_v31, %v1232_v16  ;;  %v1238_v46 = vrot.slane %v1237_v32, 4  ;;  %v14251_v47 = vld [vmem:[#allocation2 + $0x40] sm:$0xf]  ;;  %v1247_v48 = vrot.slane %v1245_v33, 4 }
  0x4d   : > { %v1250_v50 = vrot.slane %v1248_v34, 5  ;;  %v14253_v51 = vld [vmem:[#allocation2 + $0x44] sm:$0x1]  ;;  %v1254_v52 = vshll.u32 %v14251_v47, 16  ;;  %v1258_v53 = vshrl.u32 %v14251_v47, 16  ;;  %v742_v37 = vrot.slane %v740_v35, 7 }
  0x4e   : > { %v750_v54 = vrot.slane %v748_v39, 7  ;;  %v1243_v55 = vsel %vm14107_vm13, %v1238_v46, %v1242_v24  ;;  %v1264_v59 = vshll.u32 %v14253_v51, 16  ;;  %v1002_v0 = vld [vmem:[#allocation2 + $0x54] sm:$0xf]  ;;  %v618_v46 = vld [vmem:[%s14051_s22 + $0x3c] sm:$0xf] }
  0x4f   : > { %v1251_v41 = vor.u32 %v1250_v50, %v1247_v48  ;;  %v11437_v1 = vcombine.low %v1233_v42, %v1243_v55  ;;  %v1256_v6 = vrot.slane %v1254_v52, 5  ;;  %v1260_v7 = vrot.slane %v1258_v53, 4  ;;  %v617_v42 = vld [vmem:[%s14051_s22 + $0x38] sm:$0xf]  ;;  %v619_v55 = vld [vmem:[%s14051_s22 + $0x40] sm:$0xf] }
  0x50   : > { %v745_v8 = vor.u32 %v743_v36, %v742_v37  ;;  %v1266_v29 = vrot.slane %v1264_v59, 5  ;;  %v14260_v9 = vld [vmem:[#allocation2 + $0x48] sm:$0xf]  ;;  %v746_v10 = vrot.slane %v742_v37, 4  ;;  %v753_v11 = vor.u32 %v751_v40, %v750_v54  ;;  %v397_v36 = vld [vmem:[#allocation2 + $0x60] sm:$0x1] }
  0x51   : > { %v1252_v30 = vrot.slane %v1251_v41, 4  ;;  %12559 = vmatprep.mubr.msk.bf16.mxu0 %vm1558_vm14, %v11437_v1  ;;  %v1261_v12 = vor.u32 %v1260_v7, %v1256_v6  ;;  %v14263_v13 = vld [vmem:[#allocation2 + $0x4c] sm:$0xf]  ;;  %v1269_v15 = vshrl.u32 %v14260_v9, 16  ;;  %v1272_v16 = vshll.u32 %v14260_v9, 16 }
  0x52   : > { %v14265_v14 = vld [vmem:[#allocation2 + $0x50] sm:$0x1]  ;;  %v1003_v19 = vsel %vm14071_vm10, %v745_v8, %v1002_v0  ;;  %v1278_v21 = vshll.u32 %v14263_v13, 16  ;;  %v1282_v22 = vshrl.u32 %v14263_v13, 16  ;;  %v754_v31 = vsel %vm14080_vm11, %v746_v10, %v753_v11  ;;  %v1006_v32 = vld [vmem:[#allocation2 + $0x5c] sm:$0x1] }
  0x53   : > { %v1257_v20 = vsel %vm14107_vm13, %v1252_v30, %v1256_v6  ;;  %v1288_v24 = vshll.u32 %v14265_v14, 16  ;;  %1004 = vst [vmem:[#allocation2 + $0x54] sm:$0xf] %v1003_v19  ;;  %v1262_v26 = vrot.slane %v1261_v12, 4  ;;  %v1271_v27 = vrot.slane %v1269_v15, 4 }
  0x54   : > { %v1274_v28 = vrot.slane %v1272_v16, 5  ;;  %v1280_v33 = vrot.slane %v1278_v21, 5  ;;  %v1284_v34 = vrot.slane %v1282_v22, 4  ;;  %v755_v35 = vrot.slane %v750_v54, 4  ;;  %1005 = vst.msk [vmem:[#allocation2 + $0x58] sm:$0xf] %vm361_vm1, %v754_v31 }
  0x55   : > { %v1267_v39 = vsel %vm14107_vm13, %v1262_v26, %v1266_v29  ;;  %v1290_v52 = vrot.slane %v1288_v24, 5  ;;  %v400_v37 = vld [vmem:[#allocation2 + $0x6c] sm:$0x1]  ;;  %v398_v54 = vsel %vm14008_vm6, 0, %v397_v36  ;;  %v757_v0 = vshrl.u32 %v617_v42, 16 }
  0x56   : > { %v1275_v40 = vor.u32 %v1274_v28, %v1271_v27  ;;  %v11438_v48 = vcombine.low %v1257_v20, %v1267_v39  ;;  %v1285_v50 = vor.u32 %v1284_v34, %v1280_v33  ;;  %v1007_v53 = vsel %vm14008_vm6, %v755_v35, %v1006_v32  ;;  %399 = vst [vmem:[#allocation2 + $0x60] sm:$0x1] %v398_v54  ;;  %v620_v35 = vld [vmem:[%s14051_s22 + $0x44] sm:$0xf]  ;;  %v403_v36 = vld [vmem:[#allocation2 + $0x78] sm:$0x1] }
  0x57   : > { %1008 = vst [vmem:[#allocation2 + $0x5c] sm:$0x1] %v1007_v53  ;;  %v760_v1 = vshll.u32 %v617_v42, 16  ;;  %v765_v6 = vshrl.u32 %v618_v46, 16  ;;  %v768_v30 = vshll.u32 %v618_v46, 16  ;;  %v401_v29 = vsel %vm14008_vm6, 0, %v400_v37 }
  0x58   : > { %v1276_v41 = vrot.slane %v1275_v40, 4  ;;  %12560 = vmatmul.mubr.msk.bf16.gmra.mrb[8].mxu0 %vm1558_vm14, %v11438_v48  ;;  %v1286_v59 = vrot.slane %v1285_v50, 4  ;;  %v774_v10 = vshrl.u32 %v619_v55, 16  ;;  %v759_v16 = vrot.slane %v757_v0, 7  ;;  %402 = vst [vmem:[#allocation2 + $0x6c] sm:$0x1] %v401_v29 }
  0x59   : > { %v14301_v21 = vrot.slane %v765_v6, 7  ;;  %v777_v24 = vshll.u32 %v619_v55, 16  ;;  %v621_v48 = vld [vmem:[%s14051_s22 + $0x48] sm:$0xf]  ;;  %v782_v0 = vshrl.u32 %v620_v35, 16  ;;  %vm2112_vm15 = vcmask 1042432  }
  0x5a   : > { %v1281_v7 = vsel %vm14107_vm13, %v1276_v41, %v1280_v33  ;;  %v14291_v8 = vld [vmem:[#allocation2 + $0x54] sm:$0xf]  ;;  %v1291_v11 = vsel %vm14107_vm13, %v1286_v59, %v1290_v52  ;;  %v776_v22 = vrot.slane %v774_v10, 7  ;;  %v762_v32 = vor.u32 %v760_v1, %v759_v16  ;;  %v622_v1 = vld [vmem:[%s14051_s22 + $0x4c] sm:$0xf] }
  0x5b   : > { %v1293_v12 = vshrl.u32 %v14291_v8, 16  ;;  %v1296_v15 = vshll.u32 %v14291_v8, 16  ;;  %v11439_v19 = vcombine.low %v1281_v7, %v1291_v11  ;;  %v14299_v20 = vld [vmem:[#allocation2 + $0x58] sm:$0xf]  ;;  %v763_v33 = vrot.slane %v759_v16, 4 }
  0x5c   : > { %v1302_v28 = vshll.u32 %v14299_v20, 16  ;;  %v1306_v31 = vshrl.u32 %v14299_v20, 16  ;;  %v770_v34 = vor.u32 %v768_v30, %v14301_v21  ;;  %v779_v37 = vor.u32 %v777_v24, %v776_v22  ;;  %v406_v6 = vld [vmem:[#allocation2 + $0x84] sm:$0x1]  ;;  %v624_v24 = vld [vmem:[%s14051_s22 + $0x54] sm:$0xf] }
  0x5d   : > { %v1295_v26 = vrot.slane %v1293_v12, 4  ;;  %v1298_v27 = vrot.slane %v1296_v15, 5  ;;  %12563 = vmatprep.mubr.msk.bf16.mxu0 %vm1558_vm14, %v11439_v19  ;;  %v1009_v53 = vld [vmem:[#allocation2 + $0x60] sm:$0xf]  ;;  %v780_v55 = vrot.slane %v776_v22, 4  ;;  %v785_v30 = vshll.u32 %v620_v35, 16 }
  0x5e   : > { %v14308_v39 = vld [vmem:[#allocation2 + $0x5c] sm:$0x1]  ;;  %v1304_v42 = vrot.slane %v1302_v28, 5  ;;  %v1308_v46 = vrot.slane %v1306_v31, 4  ;;  %v771_v52 = vsel %vm14080_vm11, %v763_v33, %v770_v34  ;;  %v1010_v59 = vsel %vm14071_vm10, %v762_v32, %v1009_v53  ;;  %v623_v12 = vld [vmem:[%s14051_s22 + $0x50] sm:$0xf] }
  0x5f   : > { %v1299_v40 = vor.u32 %v1298_v27, %v1295_v26  ;;  %v1312_v50 = vshll.u32 %v14308_v39, 16  ;;  %1012 = vst.msk [vmem:[#allocation2 + $0x64] sm:$0xf] %vm361_vm1, %v771_v52  ;;  %1011 = vst [vmem:[#allocation2 + $0x60] sm:$0xf] %v1010_v59  ;;  %v404_v10 = vsel %vm14008_vm6, 0, %v403_v36  ;;  %v11465_v35 = vcombine.low %v14087_v60, %v14055_v18 }
  0x60   : > { %v1309_v54 = vor.u32 %v1308_v46, %v1304_v42  ;;  %v1016_v29 = vld [vmem:[#allocation2 + $0x6c] sm:$0xf]  ;;  %v791_v11 = vshrl.u32 %v621_v48, 16  ;;  %v14323_v19 = vrot.slane %v782_v0, 7  ;;  %405 = vst [vmem:[#allocation2 + $0x78] sm:$0x1] %v404_v10 }
  0x61   : > { %v1300_v41 = vrot.slane %v1299_v40, 4  ;;  %v1314_v7 = vrot.slane %v1312_v50, 5  ;;  %v1017_v22 = vsel %vm14071_vm10, %v779_v37, %v1016_v29  ;;  %v409_v26 = vld [vmem:[#allocation2 + $0x90] sm:$0x1]  ;;  %v794_v28 = vshll.u32 %v621_v48, 16 }
  0x62   : > { %v1310_v16 = vrot.slane %v1309_v54, 4  ;;  %1018 = vst [vmem:[#allocation2 + $0x6c] sm:$0xf] %v1017_v22  ;;  %v793_v27 = vrot.slane %v791_v11, 7  ;;  %v799_v31 = vshrl.u32 %v622_v1, 16  ;;  %v802_v32 = vshll.u32 %v622_v1, 16 }
  0x63   : > { %v1305_v15 = vsel %vm14107_vm13, %v1300_v41, %v1304_v42  ;;  %v625_v33 = vld [vmem:[%s14051_s22 + $0x58] sm:$0xf]  ;;  %v787_v36 = vor.u32 %v785_v30, %v14323_v19  ;;  %v407_v40 = vsel %vm14008_vm6, 0, %v406_v6  ;;  %v626_v42 = vld [vmem:[%s14051_s22 + $0x5c] sm:$0xf]  ;;  %v808_v37 = vshrl.u32 %v623_v12, 16 }
  0x64   : > { %v1315_v34 = vsel %vm14107_vm13, %v1310_v16, %v1314_v7  ;;  %v796_v50 = vor.u32 %v794_v28, %v793_v27  ;;  %v797_v52 = vrot.slane %v793_v27, 4  ;;  %v14337_v53 = vrot.slane %v799_v31, 7  ;;  %408 = vst [vmem:[#allocation2 + $0x84] sm:$0x1] %v407_v40  ;;  %v412_v0 = vld [vmem:[#allocation2 + $0x9c] sm:$0x1] }
  0x65   : > { %v11440_v46 = vcombine.low %v1305_v15, %v1315_v34  ;;  %v788_v48 = vsel %vm14080_vm11, %v780_v55, %v787_v36  ;;  %v811_v41 = vshll.u32 %v623_v12, 16  ;;  %v816_v54 = vshrl.u32 %v624_v24, 16  ;;  %v627_v7 = vld [vmem:[%s14051_s22 + $0x60] sm:$0xf]  ;;  %v2888_v44 = vld [vmem:[#allocation2 + $0x30] sm:$0xf] }
  0x66   : > { %1019 = vst.msk [vmem:[#allocation2 + $0x70] sm:$0xf] %vm361_vm1, %v788_v48  ;;  %v804_v18 = vor.u32 %v802_v32, %v14337_v53  ;;  %v819_v60 = vshll.u32 %v624_v24, 16  ;;  %v410_v59 = vsel %vm14008_vm6, 0, %v409_v26  ;;  %v810_v1 = vrot.slane %v808_v37, 7 }
  0x67   : > { %12564 = vmatmul.mubr.msk.bf16.gmra.mrb[12].mxu0 %vm1558_vm14, %v11440_v46  ;;  %v14347_v6 = vrot.slane %v816_v54, 7  ;;  %411 = vst [vmem:[#allocation2 + $0x90] sm:$0x1] %v410_v59  ;;  %v825_v55 = vshrl.u32 %v625_v33, 16  ;;  %v1023_v29 = vld [vmem:[#allocation2 + $0x78] sm:$0xf]  ;;  %v11466_v26 = vcombine.low %v14131_v5, %v14138_v43  ;;  %v11467_v28 = vcombine.low %v14150_v56, %v14153_v62 }
  0x68   : > { %12585 = vmatprep.mubr.msk.bf16.mxu0 %vm1558_vm14, %v11465_v35  ;;  %v805_v30 = vsel %vm14080_vm11, %v797_v52, %v804_v18  ;;  %v828_v10 = vshll.u32 %v625_v33, 16  ;;  %v833_v11 = vshrl.u32 %v626_v42, 16  ;;  %v836_v12 = vshll.u32 %v626_v42, 16  ;;  %v628_v32 = vld [vmem:[%s14051_s22 + $0x64] sm:$0xf] }
  0x69   : > { %v1024_v15 = vsel %vm14071_vm10, %v796_v50, %v1023_v29  ;;  %1026 = vst.msk [vmem:[#allocation2 + $0x7c] sm:$0xf] %vm361_vm1, %v805_v30  ;;  %v813_v16 = vor.u32 %v811_v41, %v810_v1  ;;  %v814_v22 = vrot.slane %v810_v1, 4  ;;  %v821_v24 = vor.u32 %v819_v60, %v14347_v6  ;;  %v415_v62 = vld [vmem:[#allocation2 + $0xa8] sm:$0x1] }
  0x6a   : > { %v2326_v27 = vsel %vm1607_vm0, %v14184_v58, 0  ;;  %1025 = vst [vmem:[#allocation2 + $0x78] sm:$0xf] %v1024_v15  ;;  %v827_v31 = vrot.slane %v825_v55, 7  ;;  %v14365_v35 = vrot.slane %v833_v11, 7  ;;  %v413_v36 = vsel %vm14008_vm6, 0, %v412_v0 }
  0x6b   : > { %v822_v33 = vsel %vm14080_vm11, %v814_v22, %v821_v24  ;;  %v1030_v34 = vld [vmem:[#allocation2 + $0x84] sm:$0xf]  ;;  %v842_v5 = vshrl.u32 %v627_v7, 16  ;;  %414 = vst [vmem:[#allocation2 + $0x9c] sm:$0x1] %v413_v36  ;;  %v845_v37 = vshll.u32 %v627_v7, 16  ;;  %v11468_v29 = vcombine.low %v14164_v23, %v14189_v57 }
  0x6c   : > { %v1031_v58 = vsel %vm14071_vm10, %v813_v16, %v1030_v34  ;;  %1033 = vst.msk [vmem:[#allocation2 + $0x88] sm:$0xf] %vm361_vm1, %v822_v33  ;;  %v830_v56 = vor.u32 %v828_v10, %v827_v31  ;;  %v831_v40 = vrot.slane %v827_v31, 4  ;;  %v838_v42 = vor.u32 %v836_v12, %v14365_v35  ;;  %v629_v50 = vld [vmem:[%s14051_s22 + $0x68] sm:$0xf] }
  0x6d   : > { %1032 = vst [vmem:[#allocation2 + $0x84] sm:$0xf] %v1031_v58  ;;  %v844_v46 = vrot.slane %v842_v5, 7  ;;  %v14377_v52 = vld [vmem:[%s18177_s1 + $0x6] sm:$0x3]  ;;  %v850_v41 = vshrl.u32 %v628_v32, 16  ;;  %v11469_v15 = vcombine.low %v14213_v49, %v14223_v61 }
  0x6e   : > { %v1037_v48 = vld [vmem:[#allocation2 + $0x90] sm:$0xf]  ;;  %v839_v54 = vsel %vm14080_vm11, %v831_v40, %v838_v42  ;;  %v853_v60 = vshll.u32 %v628_v32, 16  ;;  %v630_v59 = vld [vmem:[%s14051_s22 + $0x6c] sm:$0xf]  ;;  %v416_v55 = vsel %vm14008_vm6, 0, %v415_v62  ;;  %v11471_v42 = vcombine.low %v14260_v9, %v14263_v13 }
  0x6f   : > { %12586 = vmatmul.mubr.msk.bf16.vlgmr.msra.gmra.mrb[0].mxu0 %vm1558_vm14, %v11466_v26  ;;  %v1038_v18 = vsel %vm14071_vm10, %v830_v56, %v1037_v48  ;;  %1040 = vst.msk [vmem:[#allocation2 + $0x94] sm:$0xf] %vm361_vm1, %v839_v54  ;;  %v848_v0 = vrot.slane %v844_v46, 4  ;;  %v14387_v1 = vrot.slane %v850_v41, 7  ;;  %v859_v7 = vshrl.u32 %v629_v50, 16 }
  0x70   : > { %12618 = vmatpush3.bf16.msra.mxu0 %v2326_v27  ;;  %12589 = vmatprep.mubr.msk.bf16.mxu0 %vm1558_vm14, %v11467_v28  ;;  %1039 = vst [vmem:[#allocation2 + $0x90] sm:$0xf] %v1038_v18  ;;  %v847_v30 = vor.u32 %v845_v37, %v844_v46  ;;  %417 = vst [vmem:[#allocation2 + $0xa8] sm:$0x1] %v416_v55  ;;  %v862_v11 = vshll.u32 %v629_v50, 16  ;;  %v867_v12 = vshrl.u32 %v630_v59, 16 }
  0x71   : > { %13713 = vmatprep.subr.msk.bf16.mxu0 %vm1607_vm0, %v14377_v52  ;;  %v855_v10 = vor.u32 %v853_v60, %v14387_v1  ;;  %v861_v22 = vrot.slane %v859_v7, 7  ;;  %v418_v24 = vld [vmem:[#allocation2 + $0xb4] sm:$0x1]  ;;  %v870_v23 = vshll.u32 %v630_v59, 16  ;;  %v631_v31 = vld [vmem:[%s14051_s22 + $0x70] sm:$0xf]  ;;  %v11470_v56 = vcombine.low %v14238_v25, %v14251_v47 }
  0x72   : > { %v1044_v16 = vld [vmem:[#allocation2 + $0x9c] sm:$0xf]  ;;  %v14404_v28 = vrot.slane %v867_v12, 7  ;;  %v419_v49 = vsel %vm14008_vm6, 0, %v418_v24  ;;  %v632_v33 = vld [vmem:[%s14051_s22 + $0x74] sm:$0xf] }
  0x73   : > { %v856_v26 = vsel %vm14080_vm11, %v848_v0, %v855_v10  ;;  %v1045_v27 = vsel %vm14071_vm10, %v847_v30, %v1044_v16  ;;  %v864_v57 = vor.u32 %v862_v11, %v861_v22  ;;  %v865_v32 = vrot.slane %v861_v22, 4  ;;  %420 = vst [vmem:[#allocation2 + $0xb4] sm:$0x1] %v419_v49  ;;  %v2065_v37 = vld [vmem:[#allocation2 + $0xc] sm:$0xe]  ;;  %v13756_v4 = vld [vmem:[#allocation2 + $0x78] sm:$0xff]  }
  0x74   : > { %1047 = vst.msk [vmem:[#allocation2 + $0xa0] sm:$0xf] %vm361_vm1, %v856_v26  ;;  %1046 = vst [vmem:[#allocation2 + $0x9c] sm:$0xf] %v1045_v27  ;;  %v872_v36 = vor.u32 %v870_v23, %v14404_v28  ;;  %v876_v58 = vshrl.u32 %v631_v31, 16  ;;  %v879_v62 = vshll.u32 %v631_v31, 16 }
  0x75   : > { %v884_v40 = vshrl.u32 %v632_v33, 16  ;;  %v887_v48 = vshll.u32 %v632_v33, 16  ;;  %vm2113_vm2 = vcmask 1046532   ;;  %v2124_v25 = vrot.slane %v14138_v43, 5  ;;  %v14428_v55 = vld [vmem:[#allocation2 + $0x64] sm:$0xf] }
  0x76   : > { %v873_v46 = vsel %vm14080_vm11, %v865_v32, %v872_v36  ;;  %v878_v50 = vrot.slane %v876_v58, 7  ;;  %v11498_v59 = vrot.slane %v2065_v37, 9  ;;  %v2127_v0 = vrot.slane %v14140_v45, 5  ;;  %vm14432_vm8 = vmor %vm2112_vm15, %vm2113_vm2  ;;  %v1088_v43 = vld [vmem:[#allocation2 + $0x60] sm:$0xf] }
  0x77   : > { %12590 = vmatmul.mubr.msk.bf16.gmra.mrb[4].mxu0 %vm1558_vm14, %v11468_v29  ;;  %v1051_v34 = vld [vmem:[#allocation2 + $0xa8] sm:$0xf]  ;;  %1054 = vst.msk [vmem:[#allocation2 + $0xac] sm:$0xf] %vm361_vm1, %v873_v46  ;;  %v14421_v41 = vrot.slane %v884_v40, 7  ;;  %v2126_v10 = vrot.slane %v2124_v25, 4  ;;  %v11472_v45 = vcombine.low %v14291_v8, %v14299_v20  ;;  %v11473_v12 = vcombine.low %v1088_v43, %v14428_v55 }
  0x78   : > { %12593 = vmatprep.mubr.msk.bf16.mxu0 %vm1558_vm14, %v11469_v15  ;;  %v1052_v5 = vsel %vm14071_vm10, %v864_v57, %v1051_v34  ;;  %v881_v54 = vor.u32 %v879_v62, %v878_v50  ;;  %v882_v18 = vrot.slane %v878_v50, 4  ;;  %v14443_v11 = vsel %vm14432_vm8, %v11498_v59, %v2124_v25  ;;  %v2069_v16 = vld [vmem:[#allocation2 + $0x3c] sm:$0xe]  ;;  %v1090_v24 = vld [vmem:[#allocation2 + $0x6c] sm:$0xf] }
  0x79   : > { %1053 = vst [vmem:[#allocation2 + $0xa8] sm:$0xf] %v1052_v5  ;;  %v889_v9 = vor.u32 %v887_v48, %v14421_v41  ;;  %v14448_v15 = vsel %vm14432_vm8, %v2126_v10, %v2127_v0  ;;  %v14453_v26 = vld [vmem:[#allocation2 + $0x70] sm:$0xf]  ;;  %v1092_v8 = vld [vmem:[#allocation2 + $0x78] sm:$0xf] }
  0x7a   : > { %v1058_v60 = vld [vmem:[#allocation2 + $0xb4] sm:$0xf]  ;;  %v11515_v22 = vcombine.low %v14443_v11, %v14448_v15  ;;  %v14456_v27 = vld [vmem:[#allocation2 + $0x7c] sm:$0xf]  ;;  %v11502_v23 = vrot.slane %v2069_v16, 9  ;;  %v2152_v57 = vrot.slane %v14251_v47, 5  ;;  %v11474_v32 = vcombine.low %v1090_v24, %v14453_v26 }
  0x7b   : > { %v1059_v7 = vsel %vm14071_vm10, %v881_v54, %v1058_v60  ;;  %v890_v29 = vsel %vm14080_vm11, %v882_v18, %v889_v9  ;;  %v2070_v49 = vld [vmem:[#allocation2 + $0x48] sm:$0xe]  ;;  %v2071_v31 = vld [vmem:[#allocation2 + $0x54] sm:$0xe]  ;;  %v11475_v33 = vcombine.low %v1092_v8, %v14456_v27  ;;  %v453_v36 = vld [vmem:[#allocation2 + $0x68] sm:$0x1] }
  0x7c   : > { %1060 = vst [vmem:[#allocation2 + $0xb4] sm:$0xf] %v1059_v7  ;;  %1061 = vst.msk [vmem:[#allocation2 + $0xb8] sm:$0xf] %vm361_vm1, %v890_v29  ;;  %v14463_v34 = vsel %vm14432_vm8, %v11502_v23, %v2152_v57  ;;  %v2154_v5 = vrot.slane %v2152_v57, 4  ;;  %v2155_v58 = vrot.slane %v14253_v51, 5 }
  0x7d   : > { %v2159_v62 = vrot.slane %v14263_v13, 5  ;;  %v456_v40 = vld [vmem:[#allocation2 + $0x74] sm:$0x1]  ;;  %v2162_v47 = vrot.slane %v14265_v14, 5  ;;  %v2166_v46 = vrot.slane %v14299_v20, 5  ;;  %v2169_v60 = vrot.slane %v14308_v39, 5 }
  0x7e   : > { %v1094_v50 = vld [vmem:[#allocation2 + $0x84] sm:$0xf]  ;;  %v14469_v48 = vld [vmem:[#allocation2 + $0x88] sm:$0xf]  ;;  %v14473_v37 = vsel %vm14432_vm8, %v2154_v5, %v2155_v58  ;;  %v459_v54 = vld [vmem:[#allocation2 + $0x80] sm:$0x1] }
  0x7f   : > { %12594 = vmatmul.mubr.msk.bf16.gmra.mrb[8].mxu0 %vm1558_vm14, %v11470_v56  ;;  %v11503_v56 = vrot.slane %v2070_v49, 9  ;;  %v2161_v51 = vrot.slane %v2159_v62, 4  ;;  %v462_v13 = vld [vmem:[#allocation2 + $0x8c] sm:$0x1]  ;;  %v1096_v14 = vld [vmem:[#allocation2 + $0x90] sm:$0xf]  ;;  %v11519_v20 = vcombine.low %v14463_v34, %v14473_v37  ;;  %v11476_v8 = vcombine.low %v1094_v50, %v14469_v48 }
  0x80   : > { %12597 = vmatprep.mubr.msk.bf16.mxu0 %vm1558_vm14, %v11471_v42  ;;  %v11504_v42 = vrot.slane %v2071_v31, 9  ;;  %v2168_v9 = vrot.slane %v2166_v46, 4  ;;  %v14488_v59 = vld [vmem:[#allocation2 + $0x94] sm:$0xf]  ;;  %v454_v7 = vsel %vm14024_vm7, 0, %v453_v36  ;;  %v460_v23 = vsel %vm14024_vm7, 0, %v459_v54 }
  0x81   : > { %v14477_v25 = vsel %vm14432_vm8, %v11503_v56, %v2159_v62  ;;  %v14492_v0 = vsel %vm14432_vm8, %v2161_v51, %v2162_v47  ;;  %v14496_v43 = vld [vmem:[#allocation2 + $0x8] sm:$0x1]  ;;  %v14499_v10 = vld [vmem:[#allocation2] sm:$0xe]  ;;  %455 = vst [vmem:[#allocation2 + $0x68] sm:$0x1] %v454_v7  ;;  %v11477_v36 = vcombine.low %v1096_v14, %v14488_v59 }
  0x82   : > { %v14484_v18 = vsel %vm14432_vm8, %v11504_v42, %v2166_v46  ;;  %v2120_v29 = vrot.slane %v14496_v43, 5  ;;  %v11520_v39 = vcombine.low %v14477_v25, %v14492_v0  ;;  %v465_v24 = vld [vmem:[#allocation2 + $0x98] sm:$0x1]  ;;  %v463_v57 = vsel %vm14024_vm7, 0, %v462_v13  ;;  %v468_v49 = vld [vmem:[#allocation2 + $0xa4] sm:$0x1] }
  0x83   : > { %v471_v31 = vld [vmem:[#allocation2 + $0xb0] sm:$0x1]  ;;  %461 = vst [vmem:[#allocation2 + $0x80] sm:$0x1] %v460_v23  ;;  %464 = vst [vmem:[#allocation2 + $0x8c] sm:$0x1] %v463_v57 }
  0x84   : > { %v474_v5 = vld [vmem:[#allocation2 + $0xbc] sm:$0x1]  ;;  %v806_v58 = vrot.slane %v14337_v53, 4  ;;  %v823_v56 = vrot.slane %v14347_v6, 4  ;;  %v840_v62 = vrot.slane %v14365_v35, 4  ;;  %v857_v47 = vrot.slane %v14387_v1, 4 }
  0x85   : > { %v14525_v42 = vld [vmem:[#allocation2 + $0xa0] sm:$0xf]  ;;  %v469_v46 = vsel %vm14024_vm7, 0, %v468_v49  ;;  %v1098_v53 = vld [vmem:[#allocation2 + $0x9c] sm:$0xf]  ;;  %v472_v1 = vsel %vm14024_vm7, 0, %v471_v31 }
  0x86   : > { %v1100_v6 = vld [vmem:[#allocation2 + $0xa8] sm:$0xf]  ;;  %v13821_v35 = vld [vmem:[#allocation2 + $0x4] sm:$0xf]  ;;  %470 = vst [vmem:[#allocation2 + $0xa4] sm:$0x1] %v469_v46 }
  0x87   : > { %12598 = vmatmul.mubr.msk.bf16.gmra.mrb[12].mxu0 %vm1558_vm14, %v11472_v45  ;;  %v14505_v45 = vsel %vm14432_vm8, %v2168_v9, %v2169_v60  ;;  %v2117_v50 = vrot.slane %v13821_v35, 5  ;;  %473 = vst [vmem:[#allocation2 + $0xb0] sm:$0x1] %v472_v1  ;;  %v475_v54 = vsel %vm14024_vm7, 0, %v474_v5  ;;  %v421_v13 = vld [vmem:[#allocation2 + $0xc0] sm:$0x1] }
  0x88   : > { %12601 = vmatprep.mubr.msk.bf16.mxu0 %vm1558_vm14, %v11473_v12  ;;  %v457_v12 = vsel %vm14024_vm7, 0, %v456_v40  ;;  %v11521_v16 = vcombine.low %v14484_v18, %v14505_v45  ;;  %v466_v40 = vsel %vm14024_vm7, 0, %v465_v24  ;;  %v1013_v51 = vld [vmem:[#allocation2 + $0x68] sm:$0x1]  ;;  %v14538_v14 = vld [vmem:[#allocation2 + $0xac] sm:$0xf] }
  0x89   : > { %458 = vst [vmem:[#allocation2 + $0x74] sm:$0x1] %v457_v12  ;;  %467 = vst [vmem:[#allocation2 + $0x98] sm:$0x1] %v466_v40  ;;  %v633_v7 = vld [vmem:[%s14051_s22 + $0x78] sm:$0xf]  ;;  %v11479_v49 = vcombine.low %v1100_v6, %v14538_v14 }
  0x8a   : > { %476 = vst [vmem:[#allocation2 + $0xbc] sm:$0x1] %v475_v54  ;;  %v634_v12 = vld [vmem:[%s14051_s22 + $0x7c] sm:$0xf]  ;;  %v2119_v24 = vrot.slane %v2117_v50, 4  ;;  %v422_v57 = vsel %vm14008_vm6, 0, %v421_v13 }
  0x8b   : > { %v1034_v23 = vld [vmem:[#allocation2 + $0x8c] sm:$0x1]  ;;  %v13822_v31 = vld [vmem:[#allocation2 + $0x1c] sm:$0xf]  ;;  %423 = vst [vmem:[#allocation2 + $0xc0] sm:$0x1] %v422_v57 }
  0x8c   : > { %v893_v40 = vshrl.u32 %v633_v7, 16  ;;  %v896_v46 = vshll.u32 %v633_v7, 16  ;;  %v904_v35 = vshll.u32 %v634_v12, 16  ;;  %v1102_v1 = vld [vmem:[#allocation2 + $0xb4] sm:$0xf]  ;;  %v2201_v45 = vrot.slane %v14488_v59, 5 }
  0x8d   : > { %v14557_v54 = vld [vmem:[#allocation2 + $0xb8] sm:$0xf]  ;;  %v13823_v57 = vld [vmem:[#allocation2 + $0x20] sm:$0x1]  ;;  %vm6754_vm9 = vcmask 64512  }
  0x8e   : > { %v895_v13 = vrot.slane %v893_v40, 7  ;;  %v11480_v43 = vcombine.low %v1102_v1, %v14557_v54  ;;  %v2068_v40 = vld [vmem:[#allocation2 + $0x30] sm:$0xe]  ;;  %v2074_v37 = vld [vmem:[#allocation2 + $0x78] sm:$0xe] }
  0x8f   : > { %12602 = vmatmul.mubr.msk.bf16.gmra.mrb[16].mxu0 %vm1558_vm14, %v11474_v32  ;;  %v772_v32 = vrot.slane %v14301_v21, 4  ;;  %v874_v21 = vrot.slane %v14404_v28, 4  ;;  %v891_v28 = vrot.slane %v14421_v41, 4  ;;  %v11478_v41 = vcombine.low %v1098_v53, %v14525_v42  ;;  %v3614_v2 = vld [vmem:[#allocation2 + $0x78] sm:$0xe] }
  0x90   : > { %12605 = vmatprep.mubr.msk.bf16.mxu0 %vm1558_vm14, %v11475_v33  ;;  %v789_v33 = vrot.slane %v14323_v19, 4  ;;  %v11497_v19 = vrot.slane %v14499_v10, 9  ;;  %v1020_v60 = vld [vmem:[#allocation2 + $0x74] sm:$0x1]  ;;  %v1041_v5 = vld [vmem:[#allocation2 + $0x98] sm:$0x1] }
  0x91   : > { %v1014_v9 = vsel %vm14008_vm6, %v772_v32, %v1013_v51  ;;  %v2131_v32 = vrot.slane %v13822_v31, 5  ;;  %v901_v53 = vshrl.u32 %v634_v12, 16  ;;  %v1042_v6 = vsel %vm14008_vm6, %v840_v62, %v1041_v5  ;;  %v1048_v51 = vld [vmem:[#allocation2 + $0xa4] sm:$0x1]  ;;  %v2067_v31 = vld [vmem:[#allocation2 + $0x24] sm:$0xe] }
  0x92   : > { %1015 = vst [vmem:[#allocation2 + $0x68] sm:$0x1] %v1014_v9  ;;  %v1021_v10 = vsel %vm14008_vm6, %v789_v33, %v1020_v60  ;;  %v1035_v33 = vsel %vm14008_vm6, %v823_v56, %v1034_v23  ;;  %1043 = vst [vmem:[#allocation2 + $0x98] sm:$0x1] %v1042_v6  ;;  %v1055_v56 = vld [vmem:[#allocation2 + $0xb0] sm:$0x1]  ;;  %v2118_v60 = vsel %vm14432_vm8, %v11497_v19, %v2117_v50 }
  0x93   : > { %1022 = vst [vmem:[#allocation2 + $0x74] sm:$0x1] %v1021_v10  ;;  %1036 = vst [vmem:[#allocation2 + $0x8c] sm:$0x1] %v1035_v33  ;;  %v14561_v9 = vrot.slane %v901_v53, 7  ;;  %v2121_v62 = vsel %vm14432_vm8, %v2119_v24, %v2120_v29  ;;  %v1056_v7 = vsel %vm14008_vm6, %v874_v21, %v1055_v56  ;;  %v898_v12 = vor.u32 %v896_v46, %v895_v13 }
  0x94   : > { %v1062_v10 = vld [vmem:[#allocation2 + $0xbc] sm:$0x1]  ;;  %1057 = vst [vmem:[#allocation2 + $0xb0] sm:$0x1] %v1056_v7  ;;  %v2066_v23 = vld [vmem:[#allocation2 + $0x18] sm:$0xe]  ;;  %v11514_v50 = vcombine.low %v2118_v60, %v2121_v62 }
  0x95   : > { %v1065_v19 = vld [vmem:[#allocation2 + $0xc0] sm:$0xf]  ;;  %v11499_v24 = vrot.slane %v2066_v23, 9  ;;  %v2145_v46 = vrot.slane %v14223_v61, 5  ;;  %v2684_v53 = vsel %vm1607_vm0, %v14377_v52, 0  ;;  %v11501_v56 = vrot.slane %v2068_v40, 9 }
  0x96   : > { %v1066_v21 = vsel %vm14071_vm10, %v898_v12, %v1065_v19  ;;  %v2148_v60 = vrot.slane %v14225_v63, 5  ;;  %v2180_v23 = vrot.slane %v14453_v26, 5  ;;  %v2187_v19 = vrot.slane %v14456_v27, 5  ;;  %vm16013_vm10 = vmand %vm483_vm5, %vm427_vm4 }
  0x97   : > { %12606 = vmatmul.mubr.msk.bf16.gmra.mrb[20].mxu0 %vm1558_vm14, %v11476_v8  ;;  %v1027_v8 = vld [vmem:[#allocation2 + $0x80] sm:$0x1]  ;;  %1067 = vst [vmem:[#allocation2 + $0xc0] sm:$0xf] %v1066_v21  ;;  %v2132_v5 = vsel %vm14432_vm8, %v11499_v24, %v2131_v32  ;;  %v2146_v63 = vsel %vm14432_vm8, %v11501_v56, %v2145_v46  ;;  %v11507_v0 = vrot.slane %v2074_v37, 9 }
  0x98   : > { %12609 = vmatprep.mubr.msk.bf16.mxu0 %vm1558_vm14, %v11477_v36  ;;  %v1028_v36 = vsel %vm14008_vm6, %v806_v58, %v1027_v8  ;;  %v1049_v58 = vsel %vm14008_vm6, %v857_v47, %v1048_v51  ;;  %v1063_v47 = vsel %vm14008_vm6, %v891_v28, %v1062_v10  ;;  %v906_v8 = vor.u32 %v904_v35, %v14561_v9  ;;  %v13825_v51 = vld [vmem:[#allocation2 + $0x2c] sm:$0x1]  ;;  %v2072_v10 = vld [vmem:[#allocation2 + $0x60] sm:$0xe] }
  0x99   : > { %1029 = vst [vmem:[#allocation2 + $0x80] sm:$0x1] %v1028_v36  ;;  %1050 = vst [vmem:[#allocation2 + $0xa4] sm:$0x1] %v1049_v58  ;;  %v2133_v28 = vrot.slane %v2131_v32, 4  ;;  %v11500_v35 = vrot.slane %v2067_v31, 9 }
  0x9a   : > { %1064 = vst [vmem:[#allocation2 + $0xbc] sm:$0x1] %v1063_v47  ;;  %v13824_v36 = vld [vmem:[#allocation2 + $0x28] sm:$0xf]  ;;  %v2141_v58 = vrot.slane %v13825_v51, 5  ;;  %v11505_v47 = vrot.slane %v2072_v10, 9 }
  0x9b   : > { %v2138_v33 = vrot.slane %v13824_v36, 5  ;;  %v14594_v32 = vld [vmem:[%s18177_s1 + $0x8] sm:$0x3]  ;;  %v2182_v21 = vrot.slane %v2180_v23, 4  ;;  %v1116_v18 = vld [vmem:[#allocation2 + $0x8c] sm:$0x1] }
  0x9c   : > { %v1113_v7 = vld [vmem:[#allocation2 + $0x68] sm:$0x1]  ;;  %v2076_v36 = vld [vmem:[#allocation2 + $0x90] sm:$0xe] }
  0x9d   : > { %v2140_v6 = vrot.slane %v2138_v33, 4  ;;  %v2139_v61 = vsel %vm14432_vm8, %v11500_v35, %v2138_v33  ;;  %v2203_v35 = vrot.slane %v2201_v45, 4 }
  0x9f   : > { %12610 = vmatmul.mubr.msk.bf16.gmra.mrb[24].mxu0 %vm1558_vm14, %v11478_v41  ;;  %v899_v41 = vrot.slane %v895_v13, 4  ;;  %v2147_v13 = vrot.slane %v2145_v46, 4  ;;  %v2142_v52 = vsel %vm14432_vm8, %v2140_v6, %v2141_v58  ;;  %v2197_v46 = vrot.slane %v1116_v18, 5 }
  0xa0   : > { %12613 = vmatprep.mubr.msk.bf16.mxu0 %vm1558_vm14, %v11479_v49  ;;  %v2134_v49 = vrot.slane %v13823_v57, 5  ;;  %v11517_v11 = vcombine.low %v2139_v61, %v2142_v52  ;;  %v1115_v34 = vld [vmem:[#allocation2 + $0x80] sm:$0x1]  ;;  %v2194_v57 = vrot.slane %v14469_v48, 5  ;;  %v2208_v6 = vrot.slane %v14525_v42, 5 }
  0xa1   : > { %v907_v29 = vsel %vm14080_vm11, %v899_v41, %v906_v8  ;;  %v2149_v62 = vsel %vm14432_vm8, %v2147_v13, %v2148_v60  ;;  %v2176_v41 = vrot.slane %v1113_v7, 5  ;;  %v2073_v8 = vld [vmem:[#allocation2 + $0x6c] sm:$0xe]  ;;  %v2190_v24 = vrot.slane %v1115_v34, 5  ;;  %v1118_v56 = vld [vmem:[#allocation2 + $0xa4] sm:$0x1] }
  0xa2   : > { %1068 = vst.msk [vmem:[#allocation2 + $0xc4] sm:$0xf] %vm361_vm1, %v907_v29  ;;  %v2135_v38 = vsel %vm14432_vm8, %v2133_v28, %v2134_v49  ;;  %v11518_v15 = vcombine.low %v2146_v63, %v2149_v62  ;;  %v1114_v29 = vld [vmem:[#allocation2 + $0x74] sm:$0x1]  ;;  %v2075_v28 = vld [vmem:[#allocation2 + $0x84] sm:$0xe]  ;;  %v2188_v49 = vsel %vm14432_vm8, %v11507_v0, %v2187_v19 }
  0xa3   : > { %v11516_v1 = vcombine.low %v2132_v5, %v2135_v38  ;;  %v2183_v25 = vrot.slane %v1114_v29, 5  ;;  %v11508_v38 = vrot.slane %v2075_v28, 9  ;;  %v2196_v40 = vrot.slane %v2194_v57, 4  ;;  %v2077_v13 = vld [vmem:[#allocation2 + $0x9c] sm:$0xe]  ;;  %v13749_v28 = vld [vmem:[#allocation2 + $0x24] sm:$0xff]  }
  0xa4   : > { %v2215_v60 = vrot.slane %v14538_v14, 5  ;;  %v1119_v61 = vld [vmem:[#allocation2 + $0xb0] sm:$0x1]  ;;  %v2078_v52 = vld [vmem:[#allocation2 + $0xa8] sm:$0xe]  ;;  %vm486_vm1 = vcmask 57344  }
  0xa5   : > { %v2184_v27 = vsel %vm14432_vm8, %v2182_v21, %v2183_v25  ;;  %v2195_v48 = vsel %vm14432_vm8, %v11508_v38, %v2194_v57  ;;  %v2198_v59 = vsel %vm14432_vm8, %v2196_v40, %v2197_v46  ;;  %v11511_v7 = vrot.slane %v2078_v52, 9  ;;  %v13747_v21 = vld [vmem:[#allocation2 + $0xc] sm:$0xff]   ;;  %v477_v25 = vld [vmem:[#allocation2 + $0xc8] sm:$0x1] }
  0xa6   : > { %v11525_v63 = vcombine.low %v2195_v48, %v2198_v59  ;;  %v2217_v10 = vrot.slane %v2215_v60, 4  ;;  %v2218_v42 = vrot.slane %v1119_v61, 5  ;;  %v478_v0 = vsel %vm14024_vm7, 0, %v477_v25  ;;  %v14690_v38 = vld [vmem:[#allocation2 + $0x28] sm:$0xf] }
  0xa7   : > { %12614 = vmatmul.mubr.msk.bf16.gmra.mrb[28].mxu0 %vm1558_vm14, %v11480_v43  ;;  %479 = vst [vmem:[#allocation2 + $0xc8] sm:$0x1] %v478_v0  ;;  %v908_v57 = vrot.slane %v14561_v9, 4  ;;  %v14693_v9 = vld [vmem:[#allocation2 + $0x34] sm:$0xf] }
  0xa8   : > { %12619 = vmatprep.mubr.msk.bf16.mxu0 %vm1558_vm14, %v11514_v50  ;;  %v11506_v50 = vrot.slane %v2073_v8, 9  ;;  %v2219_v8 = vsel %vm14432_vm8, %v2217_v10, %v2218_v42  ;;  %v3607_v48 = vld [vmem:[#allocation2 + $0x24] sm:$0xe]  ;;  %v3608_v59 = vld [vmem:[#allocation2 + $0x30] sm:$0xe]  ;;  %v3692_v52 = vrot.slane %v14693_v9, 5 }
  0xa9   : > { %v11615_v61 = vrot.slane %v3608_v59, 9 }
  0xaa   : > { %v2181_v26 = vsel %vm14432_vm8, %v11506_v50, %v2180_v23  ;;  %v1120_v23 = vld [vmem:[#allocation2 + $0xbc] sm:$0x1] }
  0xab   : > { %v11523_v33 = vcombine.low %v2181_v26, %v2184_v27  ;;  %v2225_v37 = vrot.slane %v1120_v23, 5  ;;  %v2879_v26 = vld [vmem:[#allocation2 + $0xc] sm:$0xf]  ;;  %v14676_v27 = vld [vmem:[#allocation2 + $0x1c] sm:$0xf]  ;;  %v14732_v42 = vsel %vm14432_vm8, %v11615_v61, %v3692_v52 }
  0xac   : > { %v3678_v18 = vrot.slane %v14676_v27, 5  ;;  %18312 = vst [vmem:[#allocation8_spill] sm:$0xff] %v14732_v42  ;;  %v14736_v23 = vld [vmem:[#allocation2 + $0x40] sm:$0xf]  ;;  %v14785_v61 = vld [vmem:[#allocation2 + $0x58] sm:$0xf] }
  0xae   : > { %v1069_v40 = vld [vmem:[#allocation2 + $0xc8] sm:$0x1] }
  0xaf   : > { %12620 = vmatmul.mubr.msk.bf16.vlgmr.msra.gmra.mrb[0].mxu0 %vm1558_vm14, %v11515_v22  ;;  %v2173_v22 = vrot.slane %v14428_v55, 5 }
  0xb0   : > { %12652 = vmatpush3.bf16.msra.mxu0 %v2684_v53  ;;  %12623 = vmatprep.mubr.msk.bf16.mxu0 %vm1558_vm14, %v11516_v1  ;;  %v11509_v53 = vrot.slane %v2076_v36, 9  ;;  %v2928_v36 = vshrl.u32 %v2879_v26, 16 }
  0xb1   : > { %13714 = vmatprep.subr.msk.bf16.mxu0 %vm1607_vm0, %v14594_v32  ;;  %v2175_v12 = vrot.slane %v2173_v22, 4  ;;  %v2174_v55 = vsel %vm14432_vm8, %v11505_v47, %v2173_v22  ;;  %v2211_v22 = vrot.slane %v1118_v56, 5 }
  0xb2   : > { %v2202_v51 = vsel %vm14432_vm8, %v11509_v53, %v2201_v45  ;;  %v3410_v45 = vsel %vm1607_vm0, %v14594_v32, 0  ;;  %v3680_v32 = vrot.slane %v3678_v18, 4  ;;  %v3685_v53 = vrot.slane %v14690_v38, 5 }
  0xb3   : > { %v2177_v43 = vsel %vm14432_vm8, %v2175_v12, %v2176_v41  ;;  %v2222_v12 = vrot.slane %v14557_v54, 5  ;;  %v2216_v41 = vsel %vm14432_vm8, %v11511_v7, %v2215_v60  ;;  %v13751_v7 = vld [vmem:[#allocation2 + $0x3c] sm:$0xff]  }
  0xb4   : > { %v11528_v29 = vcombine.low %v2216_v41, %v2219_v8  ;;  %v3687_v56 = vrot.slane %v3685_v53, 4 }
  0xb5   : > { %v2224_v34 = vrot.slane %v2222_v12, 4 }
  0xb7   : > { %12624 = vmatmul.mubr.msk.bf16.gmra.mrb[4].mxu0 %vm1558_vm14, %v11517_v11  ;;  %v11510_v11 = vrot.slane %v2077_v13, 9 }
  0xb8   : > { %12627 = vmatprep.mubr.msk.bf16.mxu0 %vm1558_vm14, %v11518_v15  ;;  %v2210_v15 = vrot.slane %v2208_v6, 4 }
  0xb9   : > { %v2209_v47 = vsel %vm14432_vm8, %v11510_v11, %v2208_v6  ;;  %v14707_v6 = vld [vmem:[#allocation2 + $0x38] sm:$0x1]  ;;  %v14718_v11 = vld [vmem:[#allocation2 + $0x10] sm:$0xf] }
  0xba   : > { %v2212_v14 = vsel %vm14432_vm8, %v2210_v15, %v2211_v22  ;;  %v2937_v41 = vshll.u32 %v14718_v11, 16  ;;  %v2941_v8 = vshrl.u32 %v14718_v11, 16 }
  0xbf   : > { %12628 = vmatmul.mubr.msk.bf16.gmra.mrb[8].mxu0 %vm1558_vm14, %v11519_v20  ;;  %v11522_v20 = vcombine.low %v2174_v55, %v2177_v43  ;;  %v2079_v55 = vld [vmem:[#allocation2 + $0xb4] sm:$0xe]  ;;  %v11527_v43 = vcombine.low %v2209_v47, %v2212_v14  ;;  %v3694_v47 = vrot.slane %v3692_v52, 4  ;;  %v2930_v14 = vrot.slane %v2928_v36, 4  ;;  %v14787_v52 = vld [vmem:[#allocation2 + $0x5c] sm:$0x1] }
  0xc0   : > { %12631 = vmatprep.mubr.msk.bf16.mxu0 %vm1558_vm14, %v11520_v39  ;;  %v2189_v39 = vrot.slane %v2187_v19, 4  ;;  %v11512_v19 = vrot.slane %v2079_v55, 9  ;;  %v14738_v55 = vld [vmem:[#allocation2 + $0x44] sm:$0x1]  ;;  %v2943_v36 = vrot.slane %v2941_v8, 4 }
  0xc2   : > { %v2191_v31 = vsel %vm14432_vm8, %v2189_v39, %v2190_v24  ;;  %v2223_v54 = vsel %vm14432_vm8, %v11512_v19, %v2222_v12  ;;  %v3606_v39 = vld [vmem:[#allocation2 + $0x18] sm:$0xe]  ;;  %v11621_v19 = vrot.slane %v3614_v2, 9 }
  0xc3   : > { %v11524_v5 = vcombine.low %v2188_v49, %v2191_v31  ;;  %v13748_v24 = vld [vmem:[#allocation2 + $0x18] sm:$0xff]   ;;  %v14679_v49 = vld [vmem:[#allocation2 + $0x20] sm:$0x1]  ;;  %v11613_v31 = vrot.slane %v3606_v39, 9 }
  0xc5   : > { %v14697_v46 = vsel %vm14432_vm8, %v11613_v31, %v3678_v18 }
  0xc7   : > { %12632 = vmatmul.mubr.msk.bf16.gmra.mrb[12].mxu0 %vm1558_vm14, %v11521_v16  ;;  %v1117_v16 = vld [vmem:[#allocation2 + $0x98] sm:$0x1] }
  0xc8   : > { %12635 = vmatprep.mubr.msk.bf16.mxu0 %vm1558_vm14, %v11522_v20  ;;  %v2204_v1 = vrot.slane %v1117_v16, 5  ;;  %v2226_v20 = vsel %vm14432_vm8, %v2224_v34, %v2225_v37  ;;  %v3681_v16 = vrot.slane %v14679_v49, 5  ;;  %v3609_v34 = vld [vmem:[#allocation2 + $0x3c] sm:$0xe]  ;;  %v3699_v37 = vrot.slane %v14736_v23, 5 }
  0xc9   : > { %v11529_v50 = vcombine.low %v2223_v54, %v2226_v20  ;;  %v3702_v54 = vrot.slane %v14738_v55, 5  ;;  %v14752_v20 = vld [vmem:[#allocation2 + $0x50] sm:$0x1] }
  0xca   : > { %v2205_v58 = vsel %vm14432_vm8, %v2203_v35, %v2204_v1  ;;  %v14701_v35 = vld [vmem:[#allocation2 + $0x2c] sm:$0x1]  ;;  %v1070_v1 = vsel %vm14008_vm6, %v908_v57, %v1069_v40  ;;  %v3701_v39 = vrot.slane %v3699_v37, 4  ;;  %v2882_v57 = vld [vmem:[#allocation2 + $0x18] sm:$0xf] }
  0xcb   : > { %v11526_v62 = vcombine.low %v2202_v51, %v2205_v58  ;;  %1071 = vst [vmem:[#allocation2 + $0xc8] sm:$0x1] %v1070_v1  ;;  %v14711_v51 = vsel %vm14432_vm8, %v3680_v32, %v3681_v16  ;;  %v11614_v58 = vrot.slane %v3607_v48, 9  ;;  %v3688_v13 = vrot.slane %v14701_v35, 5  ;;  %v13753_v32 = vld [vmem:[#allocation2 + $0x54] sm:$0xff]  }
  0xcc   : > { %v14762_v16 = vrot.slane %v2937_v41, 5  ;;  %v2955_v41 = vshll.u32 %v2882_v57, 16 }
  0xcd   : > { %v14722_v15 = vsel %vm14432_vm8, %v11614_v58, %v3685_v53  ;;  %v14726_v22 = vsel %vm14432_vm8, %v3687_v56, %v3688_v13  ;;  %v2952_v58 = vshrl.u32 %v2882_v57, 16  ;;  %v14783_v13 = vld [vmem:[#allocation2 + $0x24] sm:$0xf] }
  0xce   : > { %18310 = vst [vmem:[#allocation6_spill] sm:$0xff] %v14722_v15  ;;  %18311 = vst [vmem:[#allocation7_spill] sm:$0xff] %v14726_v22 }
  0xcf   : > { %12636 = vmatmul.mubr.msk.bf16.gmra.mrb[16].mxu0 %vm1558_vm14, %v11523_v33  ;;  %v2931_v33 = vshll.u32 %v2879_v26, 16  ;;  %v3709_v26 = vrot.slane %v14752_v20, 5 }
  0xd0   : > { %12639 = vmatprep.mubr.msk.bf16.mxu0 %vm1558_vm14, %v11524_v5  ;;  %v14688_v5 = vld [vmem:[%s18177_s1 + $0xa] sm:$0x3] }
  0xd1   : > { %v2933_v12 = vrot.slane %v2931_v33, 5  ;;  %v14766_v33 = vsel %vm14432_vm8, %v3701_v39, %v3702_v54 }
  0xd2   : > { %18315 = vst [vmem:[#allocation11_spill] sm:$0xff] %v14766_v33 }
  0xd3   : > { %v2934_v0 = vor.u32 %v2933_v12, %v2930_v14  ;;  %v3713_v14 = vrot.slane %v14785_v61, 5  ;;  %v3716_v12 = vrot.slane %v14787_v52, 5 }
  0xd5   : > { %v14778_v48 = vrot.slane %v2934_v0, 4 }
  0xd7   : > { %12640 = vmatmul.mubr.msk.bf16.gmra.mrb[20].mxu0 %vm1558_vm14, %v11525_v63  ;;  %v3695_v63 = vrot.slane %v14707_v6, 5 }
  0xd8   : > { %12643 = vmatprep.mubr.msk.bf16.mxu0 %vm1558_vm14, %v11526_v62  ;;  %v13750_v62 = vld [vmem:[#allocation2 + $0x30] sm:$0xff]  }
  0xdf   : > { %12644 = vmatmul.mubr.msk.bf16.gmra.mrb[24].mxu0 %vm1558_vm14, %v11527_v43  ;;  %v14742_v43 = vsel %vm14432_vm8, %v3694_v47, %v3695_v63  ;;  %v14789_v63 = vld [vmem:[#allocation2 + $0x64] sm:$0xf]  ;;  %v3611_v47 = vld [vmem:[#allocation2 + $0x54] sm:$0xe] }
  0xe0   : > { %12647 = vmatprep.mubr.msk.bf16.mxu0 %vm1558_vm14, %v11528_v29  ;;  %18313 = vst [vmem:[#allocation9_spill] sm:$0xff] %v14742_v43  ;;  %v14745_v29 = vld [vmem:[#allocation2 + $0x4c] sm:$0xf]  ;;  %v11618_v8 = vrot.slane %v3611_v47, 9  ;;  %v2957_v47 = vrot.slane %v2955_v41, 5 }
  0xe1   : > { %v3706_v25 = vrot.slane %v14745_v29, 5  ;;  %v14837_v41 = vld [vmem:[#allocation2 + $0x7c] sm:$0xf] }
  0xe3   : > { %v3708_v18 = vrot.slane %v3706_v25, 4 }
  0xe5   : > { %v14776_v1 = vsel %vm14432_vm8, %v3708_v18, %v3709_v26  ;;  %v14808_v26 = vsel %vm14432_vm8, %v11618_v8, %v3713_v14  ;;  %v13754_v18 = vld [vmem:[#allocation2 + $0x60] sm:$0xff]  }
  0xe6   : > { %18317 = vst [vmem:[#allocation13_spill] sm:$0xff] %v14776_v1  ;;  %18318 = vst [vmem:[#allocation14_spill] sm:$0xff] %v14808_v26  ;;  %v2891_v1 = vld [vmem:[#allocation2 + $0x3c] sm:$0xf] }
  0xe7   : > { %12648 = vmatmul.mubr.msk.bf16.gmra.mrb[28].mxu0 %vm1558_vm14, %v11529_v50  ;;  %v11616_v50 = vrot.slane %v3609_v34, 9  ;;  %v3612_v34 = vld [vmem:[#allocation2 + $0x60] sm:$0xe] }
  0xe8   : > { %12653 = vmatprep.mubr.msk.bf16.mxu0 %vm1558_vm14, %v13747_v21  ;;  %v3610_v21 = vld [vmem:[#allocation2 + $0x48] sm:$0xe]  ;;  %v11619_v0 = vrot.slane %v3612_v34, 9 }
  0xe9   : > { %v14760_v31 = vsel %vm14432_vm8, %v11616_v50, %v3699_v37  ;;  %v3720_v37 = vrot.slane %v14789_v63, 5  ;;  %v2961_v50 = vshll.u32 %v14676_v27, 16 }
  0xea   : > { %18314 = vst [vmem:[#allocation10_spill] sm:$0xff] %v14760_v31 }
  0xeb   : > { %v3722_v57 = vrot.slane %v3720_v37, 4  ;;  %v14828_v8 = vrot.slane %v2961_v50, 5 }
  0xef   : > { %12654 = vmatmul.mubr.msk.bf16.vlgmr.msra.gmra.mrb[0].mxu0 %vm1558_vm14, %v13748_v24  ;;  %v11617_v24 = vrot.slane %v3610_v21, 9  ;;  %v2965_v21 = vshrl.u32 %v14676_v27, 16  ;;  %v14818_v27 = vsel %vm14432_vm8, %v11619_v0, %v3720_v37  ;;  %v14840_v0 = vld [vmem:[#allocation2 + $0x80] sm:$0x1]  ;;  %v3734_v37 = vrot.slane %v14837_v41, 5 }
  0xf0   : > { %12686 = vmatpush3.bf16.msra.mxu0 %v3410_v45  ;;  %12657 = vmatprep.mubr.msk.bf16.mxu0 %vm1558_vm14, %v13749_v28  ;;  %v14756_v28 = vld [vmem:[#allocation2 + $0x14] sm:$0x1]  ;;  %v13752_v45 = vld [vmem:[#allocation2 + $0x48] sm:$0xff]   ;;  %18320 = vst [vmem:[#allocation16_spill] sm:$0xff] %v14818_v27 }
  0xf1   : > { %13715 = vmatprep.subr.msk.bf16.mxu0 %vm1607_vm0, %v14688_v5  ;;  %v14770_v40 = vsel %vm14432_vm8, %v11617_v24, %v3706_v25  ;;  %v2947_v59 = vshll.u32 %v14756_v28, 16  ;;  %v3715_v25 = vrot.slane %v3713_v14, 4  ;;  %v14804_v24 = vrot.slane %v2952_v58, 4 }
  0xf2   : > { %18316 = vst [vmem:[#allocation12_spill] sm:$0xff] %v14770_v40  ;;  %v2967_v34 = vrot.slane %v2965_v21, 4  ;;  %v3737_v14 = vrot.slane %v14840_v0, 5  ;;  %v14863_v2 = vsel %vm14432_vm8, %v11621_v19, %v3734_v37  ;;  %v14876_v19 = vld [vmem:[#allocation2 + $0x88] sm:$0xf] }
  0xf3   : > { %v14802_v39 = vrot.slane %v2947_v59, 5  ;;  %v13755_v59 = vld [vmem:[#allocation2 + $0x6c] sm:$0xff]   ;;  %v2958_v10 = vor.u32 %v2957_v47, %v14804_v24  ;;  %18324 = vst [vmem:[#allocation20_spill] sm:$0xff] %v14863_v2 }
  0xf5   : > { %v14890_v2 = vrot.slane %v2958_v10, 4 }
  0xf7   : > { %12658 = vmatmul.mubr.msk.bf16.gmra.mrb[4].mxu0 %vm1558_vm14, %v13750_v62  ;;  %v2944_v62 = vor.u32 %v2943_v36, %v14762_v16  ;;  %v2976_v36 = vshrl.u32 %v14783_v13, 16 }
  0xf8   : > { %12661 = vmatprep.mubr.msk.bf16.mxu0 %vm1558_vm14, %v13751_v7  ;;  %v14793_v7 = vld [vmem:[#allocation2 + $0x68] sm:$0x1] }
  0xf9   : > { %v3723_v54 = vrot.slane %v14793_v7, 5  ;;  %v14820_v58 = vrot.slane %v2944_v62, 4  ;;  %v14835_v62 = vld [vmem:[#allocation2 + $0x74] sm:$0x1]  ;;  %v2978_v60 = vrot.slane %v2976_v36, 4  ;;  %v2995_v36 = vshll.u32 %v14701_v35, 16 }
  0xfa   : > { %v3730_v21 = vrot.slane %v14835_v62, 5  ;;  %v14883_v35 = vld [vmem:[#allocation2 + $0x98] sm:$0x1] }
  0xfb   : > { %v14895_v26 = vrot.slane %v2995_v36, 5 }
  0xff   : > { %12662 = vmatmul.mubr.msk.bf16.gmra.mrb[8].mxu0 %vm1558_vm14, %v13752_v45  ;;  %v2971_v45 = vshll.u32 %v14679_v49, 16  ;;  %v14826_v49 = vsel %vm14432_vm8, %v3722_v57, %v3723_v54  ;;  %v3613_v54 = vld [vmem:[#allocation2 + $0x6c] sm:$0xe] }
 0x100   : > { %12665 = vmatprep.mubr.msk.bf16.mxu0 %vm1558_vm14, %v13753_v32  ;;  %v14814_v32 = vsel %vm14432_vm8, %v3715_v25, %v3716_v12  ;;  %18321 = vst [vmem:[#allocation17_spill] sm:$0xff] %v14826_v49  ;;  %v2979_v12 = vshll.u32 %v14783_v13, 16  ;;  %v14833_v25 = vld [vmem:[#allocation2 + $0x70] sm:$0xf]  ;;  %v2985_v13 = vshll.u32 %v14690_v38, 16  ;;  %v11620_v57 = vrot.slane %v3613_v54, 9 }
 0x101   : > { %18319 = vst [vmem:[#allocation15_spill] sm:$0xff] %v14814_v32  ;;  %v3727_v50 = vrot.slane %v14833_v25, 5  ;;  %v14848_v56 = vrot.slane %v2971_v45, 5  ;;  %v3736_v54 = vrot.slane %v3734_v37, 4  ;;  %v2968_v49 = vor.u32 %v2967_v34, %v14828_v8  ;;  %v14878_v37 = vld [vmem:[#allocation2 + $0x8c] sm:$0x1] }
 0x102   : > { %v2981_v27 = vrot.slane %v2979_v12, 5  ;;  %v14865_v24 = vrot.slane %v2985_v13, 5  ;;  %v14880_v13 = vld [vmem:[#allocation2 + $0x94] sm:$0xf] }
 0x103   : > { %v3729_v53 = vrot.slane %v3727_v50, 4  ;;  %v14872_v34 = vsel %vm14432_vm8, %v3736_v54, %v3737_v14  ;;  %v3741_v14 = vrot.slane %v14876_v19, 5  ;;  %v3748_v47 = vrot.slane %v14880_v13, 5 }
 0x104   : > { %18325 = vst [vmem:[#allocation21_spill] sm:$0xff] %v14872_v34  ;;  %v3751_v34 = vrot.slane %v14883_v35, 5 }
 0x105   : > { %v14859_v45 = vsel %vm14432_vm8, %v3729_v53, %v3730_v21  ;;  %v3003_v53 = vshll.u32 %v2888_v44, 16  ;;  %v3616_v21 = vld [vmem:[#allocation2 + $0x90] sm:$0xe] }
 0x106   : > { %18323 = vst [vmem:[#allocation19_spill] sm:$0xff] %v14859_v45  ;;  %v14892_v45 = vrot.slane %v2968_v49, 4 }
 0x107   : > { %12666 = vmatmul.mubr.msk.bf16.gmra.mrb[12].mxu0 %vm1558_vm14, %v13754_v18  ;;  %v2989_v18 = vshrl.u32 %v14690_v38, 16  ;;  %v13757_v38 = vld [vmem:[#allocation2 + $0x84] sm:$0xff]   ;;  %v3005_v40 = vrot.slane %v3003_v53, 5  ;;  %v3013_v53 = vshrl.u32 %v14693_v9, 16 }
 0x108   : > { %12669 = vmatprep.mubr.msk.bf16.mxu0 %vm1558_vm14, %v13755_v59  ;;  %v14854_v59 = vsel %vm14432_vm8, %v11620_v57, %v3727_v50  ;;  %v3000_v50 = vshrl.u32 %v2888_v44, 16  ;;  %v3615_v57 = vld [vmem:[#allocation2 + $0x84] sm:$0xe]  ;;  %v2982_v44 = vor.u32 %v2981_v27, %v2978_v60  ;;  %v3750_v27 = vrot.slane %v3748_v47, 4 }
 0x109   : > { %18322 = vst [vmem:[#allocation18_spill] sm:$0xff] %v14854_v59  ;;  %v2991_v12 = vrot.slane %v2989_v18, 4  ;;  %v3744_v18 = vrot.slane %v14878_v37, 5  ;;  %v11622_v54 = vrot.slane %v3615_v57, 9  ;;  %v11623_v59 = vrot.slane %v3616_v21, 9 }
 0x10a   : > { %v3002_v57 = vrot.slane %v3000_v50, 4  ;;  %v14909_v36 = vrot.slane %v2982_v44, 4  ;;  %v3009_v21 = vshll.u32 %v14693_v9, 16  ;;  %v14916_v50 = vsel %vm14432_vm8, %v3750_v27, %v3751_v34  ;;  %v14926_v44 = vld [vmem:[#allocation2 + $0xa0] sm:$0xf] }
 0x10b   : > { %v2992_v32 = vor.u32 %v2991_v12, %v14865_v24  ;;  %v14899_v60 = vsel %vm14432_vm8, %v11622_v54, %v3741_v14  ;;  %v14907_v49 = vsel %vm14432_vm8, %v11623_v59, %v3748_v47  ;;  %v13759_v12 = vld [vmem:[#allocation2 + $0x9c] sm:$0xff]   ;;  %18329 = vst [vmem:[#allocation25_spill] sm:$0xff] %v14916_v50  ;;  %v3024_v54 = vshrl.u32 %v2891_v1, 16  ;;  %v14937_v34 = vld [vmem:[#allocation2 + $0xb0] sm:$0x1] }
 0x10c   : > { %18326 = vst [vmem:[#allocation22_spill] sm:$0xff] %v14899_v60  ;;  %18328 = vst [vmem:[#allocation24_spill] sm:$0xff] %v14907_v49  ;;  %v2940_v47 = vsel %vm14107_vm13, %v14778_v48, %v14762_v16  ;;  %v2950_v9 = vsel %vm14107_vm13, %v14820_v58, %v14802_v39  ;;  %v3617_v27 = vld [vmem:[#allocation2 + $0x9c] sm:$0xe]  ;;  %v3755_v59 = vrot.slane %v14926_v44, 5  ;;  %v3027_v48 = vshll.u32 %v2891_v1, 16 }
 0x10d   : > { %v11624_v50 = vrot.slane %v3617_v27, 9  ;;  %v3618_v49 = vld [vmem:[#allocation2 + $0xa8] sm:$0xe]  ;;  %v14944_v60 = vrot.slane %v2992_v32, 4  ;;  %v3015_v33 = vrot.slane %v3013_v53, 4  ;;  %v14965_v53 = vrot.slane %v3024_v54, 4 }
 0x10e   : > { %v3757_v39 = vrot.slane %v3755_v59, 4  ;;  %v11625_v58 = vrot.slane %v3618_v49, 9  ;;  %v14967_v42 = vrot.slane %v3027_v48, 5  ;;  %v2964_v48 = vsel %vm14107_vm13, %v14890_v2, %v14828_v8  ;;  %v3619_v2 = vld [vmem:[#allocation2 + $0xb4] sm:$0xe] }
 0x10f   : > { %12670 = vmatmul.mubr.msk.bf16.gmra.mrb[16].mxu0 %vm1558_vm14, %v13756_v4  ;;  %v3743_v4 = vrot.slane %v3741_v14, 4  ;;  %v14930_v14 = vld [vmem:[#allocation2 + $0xac] sm:$0xf]  ;;  %v14951_v31 = vsel %vm14432_vm8, %v11624_v50, %v3755_v59  ;;  %v2998_v8 = vsel %vm14107_vm13, %v14944_v60, %v14895_v26  ;;  %v2897_v60 = vld [vmem:[#allocation2 + $0x54] sm:$0xf] }
 0x110   : > { %12673 = vmatprep.mubr.msk.bf16.mxu0 %vm1558_vm14, %v13757_v38  ;;  %v13758_v38 = vld [vmem:[#allocation2 + $0x90] sm:$0xff]   ;;  %18330 = vst [vmem:[#allocation26_spill] sm:$0xff] %v14951_v31  ;;  %v3030_v15 = vor.u32 %v14967_v42, %v14965_v53 }
 0x111   : > { %v14903_v10 = vsel %vm14432_vm8, %v3743_v4, %v3744_v18  ;;  %v3019_v18 = vshll.u32 %v14707_v6, 16  ;;  %v14928_v4 = vld [vmem:[#allocation2 + $0xa4] sm:$0x1]  ;;  %v3006_v6 = vor.u32 %v3005_v40, %v3002_v57  ;;  %v3033_v40 = vshll.u32 %v14736_v23, 16 }
 0x112   : > { %18327 = vst [vmem:[#allocation23_spill] sm:$0xff] %v14903_v10  ;;  %v3758_v16 = vrot.slane %v14928_v4, 5  ;;  %v3765_v10 = vrot.slane %v14937_v34, 5  ;;  %v14947_v57 = vrot.slane %v3009_v21, 5  ;;  %v13761_v21 = vld [vmem:[#allocation2 + $0xb4] sm:$0xff]  }
 0x113   : > { %v14953_v27 = vrot.slane %v3006_v6, 4  ;;  %v14955_v43 = vrot.slane %v3019_v18, 5  ;;  %v14975_v59 = vrot.slane %v3033_v40, 5  ;;  %v3037_v6 = vshrl.u32 %v14736_v23, 16  ;;  %v14995_v40 = vld [vmem:[#allocation2 + $0xbc] sm:$0x1] }
 0x114   : > { %v14959_v32 = vsel %vm14432_vm8, %v3757_v39, %v3758_v16  ;;  %v3043_v16 = vshll.u32 %v14738_v55, 16  ;;  %v11580_v39 = vcombine.low %v2940_v47, %v2950_v9  ;;  %v2988_v23 = vsel %vm14107_vm13, %v14909_v36, %v14865_v24  ;;  %v14993_v55 = vld [vmem:[#allocation2 + $0xb8] sm:$0xf]  ;;  %v14997_v47 = vld [vmem:[#allocation2 + $0xc4] sm:$0xf] }
 0x115   : > { %18331 = vst [vmem:[#allocation27_spill] sm:$0xff] %v14959_v32  ;;  %v3769_v24 = vrot.slane %v14993_v55, 5  ;;  %v3772_v36 = vrot.slane %v14995_v40, 5  ;;  %v3039_v50 = vrot.slane %v3037_v6, 4  ;;  %v3061_v32 = vshrl.u32 %v14745_v29, 16 }
 0x117   : > { %12674 = vmatmul.mubr.msk.bf16.gmra.mrb[20].mxu0 %vm1558_vm14, %v13758_v38  ;;  %v3762_v38 = vrot.slane %v14930_v14, 5 }
 0x118   : > { %12677 = vmatprep.mubr.msk.bf16.mxu0 %vm1558_vm14, %v13759_v12  ;;  %v13760_v12 = vld [vmem:[#allocation2 + $0xa8] sm:$0xff]  }
 0x119   : > { %v3764_v1 = vrot.slane %v3762_v38, 4  ;;  %v14963_v49 = vsel %vm14432_vm8, %v11625_v58, %v3762_v38  ;;  %v2894_v38 = vld [vmem:[#allocation2 + $0x48] sm:$0xf]  ;;  %v11626_v58 = vrot.slane %v3619_v2, 9  ;;  %v13762_v2 = vld [vmem:[#allocation2 + $0xc0] sm:$0xff]  }
 0x11a   : > { %18332 = vst [vmem:[#allocation28_spill] sm:$0xff] %v14963_v49  ;;  %v3048_v9 = vshrl.u32 %v2894_v38, 16  ;;  %v3051_v26 = vshll.u32 %v2894_v38, 16  ;;  %v3057_v49 = vshll.u32 %v14745_v29, 16  ;;  %v3072_v29 = vshrl.u32 %v2897_v60, 16 }
 0x11b   : > { %v14973_v18 = vsel %vm14432_vm8, %v3764_v1, %v3765_v10  ;;  %v2974_v10 = vsel %vm14107_vm13, %v14892_v45, %v14848_v56  ;;  %v3016_v56 = vor.u32 %v3015_v33, %v14947_v57  ;;  %v15005_v45 = vld [vmem:[#allocation2 + $0xc8] sm:$0x1]  ;;  %v3620_v1 = vld [vmem:[#allocation2 + $0xc0] sm:$0xe]  ;;  %v3771_v33 = vrot.slane %v3769_v24, 4 }
 0x11c   : > { %18333 = vst [vmem:[#allocation29_spill] sm:$0xff] %v14973_v18  ;;  %v3779_v54 = vrot.slane %v15005_v45, 5  ;;  %v11627_v18 = vrot.slane %v3620_v1, 9  ;;  %v15016_v31 = vsel %vm14432_vm8, %v11626_v58, %v3769_v24  ;;  %v3075_v1 = vshll.u32 %v2897_v60, 16 }
 0x11d   : > { %v15018_v22 = vrot.slane %v3016_v56, 4  ;;  %v15024_v6 = vsel %vm14432_vm8, %v3771_v33, %v3772_v36  ;;  %v3040_v58 = vor.u32 %v3039_v50, %v14975_v59  ;;  %v3050_v42 = vrot.slane %v3048_v9, 4 }
 0x11e   : > { %v3053_v53 = vrot.slane %v3051_v26, 5  ;;  %v15039_v33 = vrot.slane %v3057_v49, 5  ;;  %v3085_v60 = vshrl.u32 %v14785_v61, 16  ;;  %v11581_v24 = vcombine.low %v2964_v48, %v2974_v10  ;;  %v2900_v26 = vld [vmem:[#allocation2 + $0x60] sm:$0xf] }
 0x11f   : > { %12678 = vmatmul.mubr.msk.bf16.gmra.mrb[24].mxu0 %vm1558_vm14, %v13760_v12  ;;  %v3776_v12 = vrot.slane %v14997_v47, 5  ;;  %v3012_v49 = vsel %vm14107_vm13, %v14953_v27, %v14947_v57  ;;  %v3045_v50 = vrot.slane %v3043_v16, 5  ;;  %v3077_v9 = vrot.slane %v3075_v1, 5 }
 0x120   : > { %12681 = vmatprep.mubr.msk.bf16.mxu0 %vm1558_vm14, %v13761_v21  ;;  %v3031_v48 = vrot.slane %v3030_v15, 4  ;;  %v3054_v10 = vor.u32 %v3053_v53, %v3050_v42  ;;  %v3087_v57 = vrot.slane %v3085_v60, 4  ;;  %v3096_v27 = vshrl.u32 %v2900_v26, 16 }
 0x121   : > { %v3778_v21 = vrot.slane %v3776_v12, 4  ;;  %v15028_v38 = vsel %vm14432_vm8, %v11627_v18, %v3776_v12  ;;  %v3063_v18 = vrot.slane %v3061_v32, 4  ;;  %v3081_v12 = vshll.u32 %v14785_v61, 16 }
 0x122   : > { %v3074_v32 = vrot.slane %v3072_v29, 4  ;;  %v3022_v61 = vsel %vm14107_vm13, %v15018_v22, %v14955_v43  ;;  %v3099_v16 = vshll.u32 %v2900_v26, 16  ;;  %v3105_v29 = vshll.u32 %v14789_v63, 16 }
 0x123   : > { %v15034_v56 = vsel %vm14432_vm8, %v3778_v21, %v3779_v54  ;;  %v3880_v54 = vsel %vm1607_vm0, %v14688_v5, 0  ;;  %v11582_v21 = vcombine.low %v2988_v23, %v2998_v8  ;;  %v3067_v5 = vshll.u32 %v14752_v20, 16  ;;  %v2903_v23 = vld [vmem:[#allocation2 + $0x6c] sm:$0xf] }
 0x124   : > { %v3064_v8 = vor.u32 %v3063_v18, %v15039_v33  ;;  %v3109_v1 = vshrl.u32 %v14789_v63, 16  ;;  %v3078_v36 = vor.u32 %v3077_v9, %v3074_v32  ;;  %v3091_v22 = vshll.u32 %v14787_v52, 16  ;;  %v2906_v32 = vld [vmem:[#allocation2 + $0x78] sm:$0xf]  ;;  %v15073_v52 = vld [vmem:[%s18177_s1 + $0xc] sm:$0x3] }
 0x125   : > { %v3120_v15 = vshrl.u32 %v2903_v23, 16  ;;  %v3123_v43 = vshll.u32 %v2903_v23, 16  ;;  %v3036_v20 = vsel %vm14107_vm13, %v3031_v48, %v14975_v59  ;;  %v3129_v42 = vshll.u32 %v14833_v25, 16 }
 0x126   : > { %v3133_v53 = vshrl.u32 %v14833_v25, 16  ;;  %v3069_v60 = vrot.slane %v3067_v5, 5  ;;  %v3098_v59 = vrot.slane %v3096_v27, 4  ;;  %v3101_v9 = vrot.slane %v3099_v16, 5 }
 0x127   : > { %12682 = vmatmul.mubr.msk.bf16.gmra.mrb[28].mxu0 %vm1558_vm14, %v13762_v2  ;;  %v15057_v2 = vrot.slane %v3081_v12, 5  ;;  %v3065_v12 = vrot.slane %v3064_v8, 4  ;;  %v15076_v26 = vrot.slane %v3105_v29, 5  ;;  %v3111_v25 = vrot.slane %v3109_v1, 4 }
 0x128   : > { %12687 = vmatprep.mubr.msk.bf16.mxu0 %vm1558_vm14, %v11580_v39  ;;  %v3041_v39 = vrot.slane %v3040_v58, 4  ;;  %v3055_v58 = vrot.slane %v3054_v10, 4  ;;  %v3093_v48 = vrot.slane %v3091_v22, 5  ;;  %v3122_v10 = vrot.slane %v3120_v15, 4 }
 0x129   : > { %v3088_v63 = vor.u32 %v3087_v57, %v15057_v2  ;;  %v3125_v5 = vrot.slane %v3123_v43, 5  ;;  %v15079_v23 = vrot.slane %v3129_v42, 5  ;;  %v3144_v8 = vshrl.u32 %v2906_v32, 16  ;;  %v2909_v42 = vld [vmem:[#allocation2 + $0x84] sm:$0xf] }
 0x12a   : > { %v3046_v18 = vsel %vm14107_vm13, %v3041_v39, %v3045_v50  ;;  %v3079_v50 = vrot.slane %v3078_v36, 4  ;;  %v3135_v39 = vrot.slane %v3133_v53, 4  ;;  %v3147_v57 = vshll.u32 %v2906_v32, 16 }
 0x12b   : > { %v3115_v27 = vshll.u32 %v14793_v7, 16  ;;  %v3153_v16 = vshll.u32 %v14837_v41, 16  ;;  %v11584_v36 = vcombine.low %v3036_v20, %v3046_v18  ;;  %v3102_v29 = vor.u32 %v3101_v9, %v3098_v59 }
 0x12c   : > { %v3112_v1 = vor.u32 %v3111_v25, %v15076_v26  ;;  %v3060_v22 = vsel %vm14107_vm13, %v3055_v58, %v15039_v33  ;;  %v3070_v15 = vsel %vm14107_vm13, %v3065_v12, %v3069_v60  ;;  %v3084_v7 = vsel %vm14107_vm13, %v3079_v50, %v15057_v2 }
 0x12d   : > { %v3126_v43 = vor.u32 %v3125_v5, %v3122_v10  ;;  %v3149_v20 = vrot.slane %v3147_v57, 5  ;;  %v3117_v18 = vrot.slane %v3115_v27, 5  ;;  %v15099_v33 = vrot.slane %v3153_v16, 5  ;;  %v2912_v10 = vld [vmem:[#allocation2 + $0x90] sm:$0xf] }
 0x12e   : > { %v3103_v12 = vrot.slane %v3102_v29, 4  ;;  %v3113_v60 = vrot.slane %v3112_v1, 4  ;;  %v3168_v2 = vshrl.u32 %v2909_v42, 16  ;;  %v3181_v59 = vshrl.u32 %v14876_v19, 16 }
 0x12f   : > { %12688 = vmatmul.mubr.msk.bf16.vlgmr.msra.gmra.mrb[0].mxu0 %vm1558_vm14, %v11581_v24  ;;  %v3089_v24 = vrot.slane %v3088_v63, 4  ;;  %v3171_v63 = vshll.u32 %v2909_v42, 16  ;;  %v3127_v32 = vrot.slane %v3126_v43, 4  ;;  %v11585_v5 = vcombine.low %v3060_v22, %v3070_v15 }
 0x130   : > { %12720 = vmatpush3.bf16.msra.mxu0 %v3880_v54  ;;  %12691 = vmatprep.mubr.msk.bf16.mxu0 %vm1558_vm14, %v11582_v21  ;;  %v3157_v54 = vshrl.u32 %v14837_v41, 16  ;;  %v11583_v21 = vcombine.low %v3012_v49, %v3022_v61  ;;  %v3136_v41 = vor.u32 %v3135_v39, %v15079_v23  ;;  %v3139_v49 = vshll.u32 %v14835_v62, 16 }
 0x131   : > { %13716 = vmatprep.subr.msk.bf16.mxu0 %vm1607_vm0, %v15073_v52  ;;  %v3146_v61 = vrot.slane %v3144_v8, 4  ;;  %v3094_v53 = vsel %vm14107_vm13, %v3089_v24, %v3093_v48  ;;  %v3177_v62 = vshll.u32 %v14876_v19, 16  ;;  %v3163_v48 = vshll.u32 %v14840_v0, 16  ;;  %v2915_v0 = vld [vmem:[#allocation2 + $0x9c] sm:$0xf] }
 0x132   : > { %v3159_v58 = vrot.slane %v3157_v54, 4  ;;  %v3137_v9 = vrot.slane %v3136_v41, 4  ;;  %v3141_v25 = vrot.slane %v3139_v49, 5  ;;  %v11586_v39 = vcombine.low %v3084_v7, %v3094_v53 }
 0x133   : > { %v3150_v50 = vor.u32 %v3149_v20, %v3146_v61  ;;  %v3108_v57 = vsel %vm14107_vm13, %v3103_v12, %v15076_v26  ;;  %v3118_v24 = vsel %vm14107_vm13, %v3113_v60, %v3117_v18  ;;  %v3170_v27 = vrot.slane %v3168_v2, 4 }
 0x134   : > { %v3160_v8 = vor.u32 %v3159_v58, %v15099_v33  ;;  %v3173_v16 = vrot.slane %v3171_v63, 5  ;;  %v15112_v19 = vrot.slane %v3177_v62, 5  ;;  %v3183_v54 = vrot.slane %v3181_v59, 4 }
 0x135   : > { %v3132_v29 = vsel %vm14107_vm13, %v3127_v32, %v15079_v23  ;;  %v3142_v1 = vsel %vm14107_vm13, %v3137_v9, %v3141_v25  ;;  %v3151_v22 = vrot.slane %v3150_v50, 4  ;;  %v3165_v26 = vrot.slane %v3163_v48, 5  ;;  %v2918_v25 = vld [vmem:[#allocation2 + $0xa8] sm:$0xf] }
 0x136   : > { %v3161_v15 = vrot.slane %v3160_v8, 4  ;;  %v3187_v7 = vshll.u32 %v14878_v37, 16  ;;  %v3201_v43 = vshll.u32 %v14880_v13, 16  ;;  %v3205_v42 = vshrl.u32 %v14880_v13, 16 }
 0x137   : > { %12692 = vmatmul.mubr.msk.bf16.gmra.mrb[4].mxu0 %vm1558_vm14, %v11583_v21  ;;  %v3192_v21 = vshrl.u32 %v2912_v10, 16  ;;  %v3216_v41 = vshrl.u32 %v2915_v0, 16  ;;  %v3219_v49 = vshll.u32 %v2915_v0, 16  ;;  %v3225_v61 = vshll.u32 %v14926_v44, 16 }
 0x138   : > { %12695 = vmatprep.mubr.msk.bf16.mxu0 %vm1558_vm14, %v11584_v36  ;;  %v3195_v36 = vshll.u32 %v2912_v10, 16  ;;  %v3229_v23 = vshrl.u32 %v14926_v44, 16  ;;  %v3174_v20 = vor.u32 %v3173_v16, %v3170_v27  ;;  %v3184_v53 = vor.u32 %v3183_v54, %v15112_v19  ;;  %v2921_v27 = vld [vmem:[#allocation2 + $0xb4] sm:$0xf] }
 0x139   : > { %v3194_v18 = vrot.slane %v3192_v21, 4  ;;  %v11587_v37 = vcombine.low %v3108_v57, %v3118_v24  ;;  %v11588_v12 = vcombine.low %v3132_v29, %v3142_v1  ;;  %v3156_v13 = vsel %vm14107_vm13, %v3151_v22, %v15099_v33 }
 0x13a   : > { %v3197_v58 = vrot.slane %v3195_v36, 5  ;;  %v3166_v60 = vsel %vm14107_vm13, %v3161_v15, %v3165_v26  ;;  %v3189_v2 = vrot.slane %v3187_v7, 5  ;;  %v3203_v63 = vrot.slane %v3201_v43, 5 }
 0x13b   : > { %v3207_v32 = vrot.slane %v3205_v42, 4  ;;  %v3218_v44 = vrot.slane %v3216_v41, 4  ;;  %v3221_v62 = vrot.slane %v3219_v49, 5  ;;  %v3227_v59 = vrot.slane %v3225_v61, 5 }
 0x13c   : > { %v3231_v9 = vrot.slane %v3229_v23, 4  ;;  %v3175_v50 = vrot.slane %v3174_v20, 4  ;;  %v3185_v48 = vrot.slane %v3184_v53, 4  ;;  %v3198_v10 = vor.u32 %v3197_v58, %v3194_v18 }
 0x13d   : > { %v3208_v8 = vor.u32 %v3207_v32, %v3203_v63  ;;  %v3235_v33 = vshll.u32 %v14928_v4, 16  ;;  %v3240_v57 = vshrl.u32 %v2918_v25, 16  ;;  %v3243_v24 = vshll.u32 %v2918_v25, 16 }
 0x13e   : > { %v3222_v16 = vor.u32 %v3221_v62, %v3218_v44  ;;  %v3232_v54 = vor.u32 %v3231_v9, %v3227_v59  ;;  %v3249_v21 = vshll.u32 %v14930_v14, 16  ;;  %v3253_v36 = vshrl.u32 %v14930_v14, 16 }
 0x13f   : > { %12696 = vmatmul.mubr.msk.bf16.gmra.mrb[8].mxu0 %vm1558_vm14, %v11585_v5  ;;  %v3211_v5 = vshll.u32 %v14883_v35, 16  ;;  %v3180_v35 = vsel %vm14107_vm13, %v3175_v50, %v15112_v19  ;;  %v3190_v4 = vsel %vm14107_vm13, %v3185_v48, %v3189_v2  ;;  %v3199_v0 = vrot.slane %v3198_v10, 4 }
 0x140   : > { %12699 = vmatprep.mubr.msk.bf16.mxu0 %vm1558_vm14, %v11586_v39  ;;  %v11589_v39 = vcombine.low %v3156_v13, %v3166_v60  ;;  %v3264_v1 = vshrl.u32 %v2921_v27, 16  ;;  %v3267_v22 = vshll.u32 %v2921_v27, 16  ;;  %v3273_v26 = vshll.u32 %v14993_v55, 16 }
 0x141   : > { %v3213_v29 = vrot.slane %v3211_v5, 5  ;;  %v3277_v15 = vshrl.u32 %v14993_v55, 16  ;;  %v3209_v7 = vrot.slane %v3208_v8, 4  ;;  %v3237_v43 = vrot.slane %v3235_v33, 5 }
 0x142   : > { %v3242_v14 = vrot.slane %v3240_v57, 4  ;;  %v3245_v42 = vrot.slane %v3243_v24, 5  ;;  %v3223_v41 = vrot.slane %v3222_v16, 4  ;;  %v3233_v49 = vrot.slane %v3232_v54, 4 }
 0x143   : > { %v3251_v61 = vrot.slane %v3249_v21, 5  ;;  %v3255_v23 = vrot.slane %v3253_v36, 4  ;;  %v11590_v19 = vcombine.low %v3180_v35, %v3190_v4  ;;  %v3266_v20 = vrot.slane %v3264_v1, 4 }
 0x144   : > { %v3269_v53 = vrot.slane %v3267_v22, 5  ;;  %v3275_v18 = vrot.slane %v3273_v26, 5  ;;  %v3279_v58 = vrot.slane %v3277_v15, 4  ;;  %v3214_v55 = vsel %vm14107_vm13, %v3209_v7, %v3213_v29  ;;  %v3605_v22 = vld [vmem:[#allocation2 + $0xc] sm:$0xe] }
 0x145   : > { %v3246_v13 = vor.u32 %v3245_v42, %v3242_v14  ;;  %v3228_v60 = vsel %vm14107_vm13, %v3223_v41, %v3227_v59  ;;  %v3238_v2 = vsel %vm14107_vm13, %v3233_v49, %v3237_v43  ;;  %v3256_v32 = vor.u32 %v3255_v23, %v3251_v61  ;;  %v424_v42 = vld [vmem:[#allocation2 + $0xcc] sm:$0x1] }
 0x146   : > { %v3259_v44 = vshll.u32 %v14937_v34, 16  ;;  %v3301_v25 = vshrl.u32 %v14997_v47, 16  ;;  %v3270_v50 = vor.u32 %v3269_v53, %v3266_v20  ;;  %v3280_v48 = vor.u32 %v3279_v58, %v3275_v18 }
 0x147   : > { %12700 = vmatmul.mubr.msk.bf16.gmra.mrb[12].mxu0 %vm1558_vm14, %v11587_v37  ;;  %v2924_v37 = vld [vmem:[#allocation2 + $0xc0] sm:$0xf]  ;;  %v3283_v10 = vshll.u32 %v14995_v40, 16  ;;  %v11592_v59 = vcombine.low %v3228_v60, %v3238_v2  ;;  %v3257_v8 = vrot.slane %v3256_v32, 4  ;;  %v3307_v4 = vshll.u32 %v15005_v45, 16  ;;  %v18339_v60 = vld [vmem:[#allocation9_spill] sm:$0xff] }
 0x148   : > { %12703 = vmatprep.mubr.msk.bf16.mxu0 %vm1558_vm14, %v11588_v12  ;;  %v3204_v12 = vsel %vm14107_vm13, %v3199_v0, %v3203_v63  ;;  %v3288_v62 = vshrl.u32 %v2924_v37, 16  ;;  %v3291_v9 = vshll.u32 %v2924_v37, 16  ;;  %v3297_v63 = vshll.u32 %v14997_v47, 16  ;;  %v18335_v37 = vld [vmem:[#allocation6_spill] sm:$0xff]  ;;  %v18342_v32 = vld [vmem:[#allocation11_spill] sm:$0xff] }
 0x149   : > { %v11591_v5 = vcombine.low %v3204_v12, %v3214_v55  ;;  %v3261_v33 = vrot.slane %v3259_v44, 5  ;;  %v3303_v27 = vrot.slane %v3301_v25, 4  ;;  %v3271_v16 = vrot.slane %v3270_v50, 4  ;;  %v18336_v12 = vld [vmem:[#allocation7_spill] sm:$0xff]  ;;  %v18341_v2 = vld [vmem:[#allocation10_spill] sm:$0xff]  ;;  %v18350_v50 = vld [vmem:[#allocation16_spill] sm:$0xff] }
 0x14a   : > { %v3290_v57 = vrot.slane %v3288_v62, 4  ;;  %v3293_v24 = vrot.slane %v3291_v9, 5  ;;  %v3299_v34 = vrot.slane %v3297_v63, 5  ;;  %v3281_v54 = vrot.slane %v3280_v48, 4  ;;  %v18347_v9 = vld [vmem:[#allocation14_spill] sm:$0xff]  ;;  %v18348_v63 = vld [vmem:[#allocation15_spill] sm:$0xff] }
 0x14b   : > { %v3285_v21 = vrot.slane %v3283_v10, 5  ;;  %v3262_v40 = vsel %vm14107_vm13, %v3257_v8, %v3261_v33  ;;  %v3276_v0 = vsel %vm14107_vm13, %v3271_v16, %v3275_v18  ;;  %v3671_v1 = vrot.slane %v14718_v11, 5  ;;  %v11694_v18 = vld [vmem:[%s18177_s1 + $0xe] sm:$0x3]  ;;  %v18351_v48 = vld [vmem:[#allocation17_spill] sm:$0xff]  ;;  %v18356_v8 = vld [vmem:[#allocation20_spill] sm:$0xff] }
 0x14c   : > { %v3294_v36 = vor.u32 %v3293_v24, %v3290_v57  ;;  %v3304_v35 = vor.u32 %v3303_v27, %v3299_v34  ;;  %v3309_v14 = vrot.slane %v3307_v4, 5  ;;  %v11612_v41 = vrot.slane %v3605_v22, 9  ;;  %v18357_v33 = vld [vmem:[#allocation21_spill] sm:$0xff]  ;;  %v18359_v24 = vld [vmem:[#allocation22_spill] sm:$0xff]  ;;  %v18362_v16 = vld [vmem:[#allocation24_spill] sm:$0xff] }
 0x14d   : > { %v3286_v29 = vsel %vm14107_vm13, %v3281_v54, %v3285_v21  ;;  %v3673_v49 = vrot.slane %v3671_v1, 4  ;;  %v425_v45 = vsel %vm14008_vm6, 0, %v424_v42  ;;  %v4239_v53 = vsel %vm1607_vm0, %v15073_v52, 0  ;;  %v18363_v54 = vld [vmem:[#allocation25_spill] sm:$0xff]  ;;  %vm15586_vm6 = vmand %vm486_vm1, %vm371_vm3 }
 0x14e   : > { %v11594_v15 = vcombine.low %v3276_v0, %v3286_v29  ;;  %v3295_v7 = vrot.slane %v3294_v36, 4  ;;  %v3305_v43 = vrot.slane %v3304_v35, 4  ;;  %426 = vst [vmem:[#allocation2 + $0xcc] sm:$0x1] %v425_v45  ;;  %v18334_v58 = vcombine.low %v14697_v46, %v14711_v51  ;;  %v18344_v46 = vld [vmem:[#allocation12_spill] sm:$0xff]  ;;  %v18345_v51 = vld [vmem:[#allocation13_spill] sm:$0xff]  ;;  %vm15869_vm3 = vmand %vm486_vm1, %vm427_vm4 }
 0x14f   : > { %12704 = vmatmul.mubr.msk.bf16.gmra.mrb[16].mxu0 %vm1558_vm14, %v11589_v39  ;;  %v3247_v39 = vrot.slane %v3246_v13, 4  ;;  %v18337_v55 = vcombine.low %v18335_v37, %v18336_v12  ;;  %v18338_v13 = vld [vmem:[#allocation8_spill] sm:$0xff]  ;;  %v18343_v44 = vcombine.low %v18341_v2, %v18342_v32  ;;  %v18346_v62 = vcombine.low %v18344_v46, %v18345_v51  ;;  %v18369_v4 = vld [vmem:[#allocation29_spill] sm:$0xff]  ;;  %v13828_v45 = vld [vmem:[#allocation2 + $0x84] sm:$0xf] }
 0x150   : > { %12707 = vmatprep.mubr.msk.bf16.mxu0 %vm1558_vm14, %v11590_v19  ;;  %v3300_v11 = vsel %vm14107_vm13, %v3295_v7, %v3299_v34  ;;  %v3310_v23 = vsel %vm14107_vm13, %v3305_v43, %v3309_v14  ;;  %v3672_v19 = vsel %vm14432_vm8, %v11612_v41, %v3671_v1  ;;  %v18340_v52 = vcombine.low %v18338_v13, %v18339_v60  ;;  %v18360_v34 = vld [vmem:[#allocation23_spill] sm:$0xff]  ;;  %v18368_v35 = vld [vmem:[#allocation28_spill] sm:$0xff]  ;;  %v13763_v14 = vld [vmem:[#allocation2 + $0x18] sm:$0xff]  }
 0x151   : > { %v3252_v47 = vsel %vm14107_vm13, %v3247_v39, %v3251_v61  ;;  %v3674_v61 = vrot.slane %v14756_v28, 5  ;;  %v11595_v20 = vcombine.low %v3300_v11, %v3310_v23  ;;  %v18349_v25 = vcombine.low %v18347_v9, %v18348_v63  ;;  %v480_v29 = vld [vmem:[#allocation2 + $0xd4] sm:$0x1]  ;;  %v13827_v42 = vld [vmem:[#allocation2 + $0x78] sm:$0xf]  ;;  %v13764_v9 = vld [vmem:[#allocation2 + $0x24] sm:$0xff]  }
 0x152   : > { %v11593_v26 = vcombine.low %v3252_v47, %v3262_v40  ;;  %v18352_v10 = vcombine.low %v18350_v50, %v18351_v48  ;;  %v18358_v57 = vcombine.low %v18356_v8, %v18357_v33  ;;  %v18361_v27 = vcombine.low %v18359_v24, %v18360_v34  ;;  %v18365_v47 = vld [vmem:[#allocation26_spill] sm:$0xff]  ;;  %v18366_v40 = vld [vmem:[#allocation27_spill] sm:$0xff]  ;;  %v15262_v37 = vld [vmem:[#allocation2 + $0x7c] sm:$0xf] }
 0x153   : > { %v3675_v28 = vsel %vm14432_vm8, %v3673_v49, %v3674_v61  ;;  %v18364_v21 = vcombine.low %v18362_v16, %v18363_v54  ;;  %v18367_v36 = vcombine.low %v18365_v47, %v18366_v40  ;;  %v18370_v0 = vcombine.low %v18368_v35, %v18369_v4  ;;  %v4434_v61 = vld [vmem:[#allocation2 + $0x18] sm:$0xf]  ;;  %v4437_v2 = vld [vmem:[#allocation2 + $0x24] sm:$0xf]  ;;  %v15273_v46 = vld [vmem:[#allocation2 + $0x88] sm:$0xf] }
 0x154   : > { %v11629_v3 = vcombine.low %v3672_v19, %v3675_v28  ;;  %v18371_v1 = vcombine.low %v15016_v31, %v15024_v6  ;;  %v1365_v41 = vshrl.u32 %v13827_v42, 16  ;;  %v1368_v49 = vshll.u32 %v13827_v42, 16  ;;  %v4435_v6 = vld [vmem:[#allocation2 + $0x1c] sm:$0xf] }
 0x155   : > { %v1389_v11 = vshrl.u32 %v13828_v45, 16  ;;  %v1392_v23 = vshll.u32 %v13828_v45, 16  ;;  %v18373_v31 = vcombine.low %v15028_v38, %v15034_v56  ;;  %v4483_v38 = vshrl.u32 %v4434_v61, 16  ;;  %v13834_v47 = vld [vmem:[#allocation2 + $0x9c] sm:$0xf] }
 0x156   : > { %v4486_v56 = vshll.u32 %v4434_v61, 16  ;;  %v15267_v13 = vrot.slane %v1368_v49, 5  ;;  %v4492_v60 = vshll.u32 %v4435_v6, 16  ;;  %v4965_v48 = vsel %vm1607_vm0, %v11694_v18, 0  ;;  %v5163_v35 = vld [vmem:[#allocation2 + $0x3c] sm:$0xe] }
 0x157   : > { %12708 = vmatmul.mubr.msk.bf16.gmra.mrb[20].mxu0 %vm1558_vm14, %v11591_v5  ;;  %v18353_v5 = vld [vmem:[#allocation18_spill] sm:$0xff]  ;;  %v15269_v32 = vrot.slane %v1389_v11, 4  ;;  %v4507_v8 = vshrl.u32 %v4437_v2, 16  ;;  %v4510_v33 = vshll.u32 %v4437_v2, 16  ;;  %v1437_v40 = vshrl.u32 %v13834_v47, 16 }
 0x158   : > { %12711 = vmatprep.mubr.msk.bf16.mxu0 %vm1558_vm14, %v11592_v59  ;;  %v18354_v59 = vld [vmem:[#allocation19_spill] sm:$0xff]  ;;  %v15282_v24 = vrot.slane %v4492_v60, 5  ;;  %v13766_v49 = vld [vmem:[#allocation2 + $0x3c] sm:$0xff]  }
 0x159   : > { %v18355_v39 = vcombine.low %v18353_v5, %v18354_v59  ;;  %v4438_v5 = vld [vmem:[#allocation2 + $0x28] sm:$0xf]  ;;  %v4485_v59 = vrot.slane %v4483_v38, 4  ;;  %v4509_v22 = vrot.slane %v4507_v8, 4  ;;  %v15302_v61 = vld [vmem:[#allocation2 + $0x2c] sm:$0x1] }
 0x15a   : > { %v4516_v16 = vshll.u32 %v4438_v5, 16  ;;  %v4520_v54 = vshrl.u32 %v4438_v5, 16  ;;  %v13767_v38 = vld [vmem:[#allocation2 + $0x48] sm:$0xff]  }
 0x15c   : > { %v15304_v45 = vrot.slane %v4516_v16, 5  ;;  %v4522_v11 = vrot.slane %v4520_v54, 4  ;;  %v15332_v16 = vld [vmem:[#allocation2 + $0x5c] sm:$0x1]  ;;  %v13837_v54 = vld [vmem:[#allocation2 + $0xb4] sm:$0xf] }
 0x15e   : > { %v4523_v8 = vor.u32 %v4522_v11, %v15304_v45 }
 0x15f   : > { %12712 = vmatmul.mubr.msk.bf16.gmra.mrb[24].mxu0 %vm1558_vm14, %v11593_v26  ;;  %v481_v26 = vsel %vm14024_vm7, 0, %v480_v29  ;;  %v13835_v29 = vld [vmem:[#allocation2 + $0xa8] sm:$0xf]  ;;  %vm6803_vm7 = vcmask 1043456  }
 0x160   : > { %12715 = vmatprep.mubr.msk.bf16.mxu0 %vm1558_vm14, %v11594_v15  ;;  %482 = vst [vmem:[#allocation2 + $0xd4] sm:$0x1] %v481_v26  ;;  %v13826_v15 = vld [vmem:[#allocation2 + $0x6c] sm:$0xf]  ;;  %v4512_v26 = vrot.slane %v4510_v33, 5  ;;  %v1464_v2 = vshll.u32 %v13835_v29, 16 }
 0x161   : > { %v1341_v7 = vshrl.u32 %v13826_v15, 16  ;;  %v1344_v43 = vshll.u32 %v13826_v15, 16  ;;  %v11730_v15 = vrot.slane %v5163_v35, 9 }
 0x163   : > { %v15254_v19 = vrot.slane %v1341_v7, 4  ;;  %v15256_v28 = vrot.slane %v1344_v43, 5 }
 0x167   : > { %12716 = vmatmul.mubr.msk.bf16.gmra.mrb[28].mxu0 %vm1558_vm14, %v11595_v20  ;;  %v13829_v20 = vld [vmem:[#allocation2 + $0x90] sm:$0xf] }
 0x168   : > { %12721 = vmatprep.mubr.msk.bf16.mxu0 %vm1558_vm14, %v11629_v3  ;;  %v1413_v3 = vshrl.u32 %v13829_v20, 16 }
 0x16a   : > { %v15276_v63 = vrot.slane %v1413_v3, 4 }
 0x16f   : > { %12722 = vmatmul.mubr.msk.bf16.vlgmr.msra.gmra.mrb[0].mxu0 %vm1558_vm14, %v18334_v58 }
 0x170   : > { %12754 = vmatpush3.bf16.msra.mxu0 %v4239_v53  ;;  %12725 = vmatprep.mubr.msk.bf16.mxu0 %vm1558_vm14, %v18337_v55  ;;  %v15259_v53 = vld [vmem:[#allocation2 + $0x70] sm:$0xf]  ;;  %v15265_v55 = vrot.slane %v1365_v41, 4 }
 0x171   : > { %13717 = vmatprep.subr.msk.bf16.mxu0 %vm1607_vm0, %v11694_v18  ;;  %v15290_v18 = vld [vmem:[#allocation2 + $0x40] sm:$0xf] }
 0x172   : > { %v5247_v4 = vrot.slane %v15290_v18, 5 }
 0x174   : > { %v5249_v42 = vrot.slane %v5247_v4, 4 }
 0x177   : > { %12726 = vmatmul.mubr.msk.bf16.gmra.mrb[4].mxu0 %vm1558_vm14, %v18340_v52  ;;  %v4496_v52 = vshrl.u32 %v4435_v6, 16 }
 0x178   : > { %12729 = vmatprep.mubr.msk.bf16.mxu0 %vm1558_vm14, %v18343_v44  ;;  %v15271_v44 = vrot.slane %v1392_v23, 5  ;;  %v15308_v23 = vsel %vm14432_vm8, %v11730_v15, %v5247_v4  ;;  %v5264_v4 = vrot.slane %v15332_v16, 5 }
 0x179   : > { %v4498_v34 = vrot.slane %v4496_v52, 4  ;;  %18374 = vst [vmem:[#allocation6_spill] sm:$0xff] %v15308_v23  ;;  %v13843_v23 = vld [vmem:[#allocation2 + $0x74] sm:$0x1] }
 0x17b   : > { %v4499_v43 = vor.u32 %v4498_v34, %v15282_v24  ;;  %v15330_v34 = vld [vmem:[#allocation2 + $0x58] sm:$0xf] }
 0x17c   : > { %v5261_v35 = vrot.slane %v15330_v34, 5 }
 0x17f   : > { %12730 = vmatmul.mubr.msk.bf16.gmra.mrb[8].mxu0 %vm1558_vm14, %v18346_v62  ;;  %v1416_v62 = vshll.u32 %v13829_v20, 16  ;;  %v15314_v20 = vld [vmem:[#allocation2 + $0xa0] sm:$0xf] }
 0x180   : > { %12733 = vmatprep.mubr.msk.bf16.mxu0 %vm1558_vm14, %v18349_v25  ;;  %v15278_v25 = vld [vmem:[#allocation2 + $0x94] sm:$0xf] }
 0x181   : > { %v15300_v41 = vrot.slane %v1416_v62, 5  ;;  %v4513_v62 = vor.u32 %v4512_v26, %v4509_v22 }
 0x187   : > { %12734 = vmatmul.mubr.msk.bf16.gmra.mrb[12].mxu0 %vm1558_vm14, %v18352_v10  ;;  %v13765_v10 = vld [vmem:[#allocation2 + $0x30] sm:$0xff]  }
 0x188   : > { %12737 = vmatprep.mubr.msk.bf16.mxu0 %vm1558_vm14, %v18355_v39  ;;  %v4488_v39 = vrot.slane %v4486_v56, 5  ;;  %v4440_v56 = vld [vmem:[#allocation2 + $0x30] sm:$0xf] }
 0x189   : > { %v4531_v33 = vshrl.u32 %v4440_v56, 16 }
 0x18a   : > { %v4489_v7 = vor.u32 %v4488_v39, %v4485_v59  ;;  %v4526_v59 = vshll.u32 %v15302_v61, 16  ;;  %v15326_v39 = vld [vmem:[#allocation2 + $0x34] sm:$0xf] }
 0x18f   : > { %12738 = vmatmul.mubr.msk.bf16.gmra.mrb[16].mxu0 %vm1558_vm14, %v18358_v57  ;;  %v4436_v57 = vld [vmem:[#allocation2 + $0x20] sm:$0x1] }
 0x190   : > { %12741 = vmatprep.mubr.msk.bf16.mxu0 %vm1558_vm14, %v18361_v27  ;;  %v15287_v27 = vld [vmem:[%s18177_s1 + $0x10] sm:$0x3] }
 0x197   : > { %12742 = vmatmul.mubr.msk.bf16.gmra.mrb[20].mxu0 %vm1558_vm14, %v18364_v21  ;;  %v15292_v21 = vld [vmem:[#allocation2 + $0x44] sm:$0x1] }
 0x198   : > { %12745 = vmatprep.mubr.msk.bf16.mxu0 %vm1558_vm14, %v18367_v36  ;;  %v1440_v36 = vshll.u32 %v13834_v47, 16  ;;  %v1485_v47 = vshrl.u32 %v13837_v54, 16 }
 0x19a   : > { %v15312_v6 = vrot.slane %v1440_v36, 5  ;;  %v5165_v36 = vld [vmem:[#allocation2 + $0x54] sm:$0xe] }
 0x19b   : > { %v11732_v22 = vrot.slane %v5165_v36, 9 }
 0x19f   : > { %12746 = vmatmul.mubr.msk.bf16.gmra.mrb[24].mxu0 %vm1558_vm14, %v18370_v0  ;;  %v5250_v0 = vrot.slane %v15292_v21, 5 }
 0x1a0   : > { %12749 = vmatprep.mubr.msk.bf16.mxu0 %vm1558_vm14, %v18371_v1  ;;  %v1461_v1 = vshrl.u32 %v13835_v29, 16  ;;  %v4540_v29 = vshll.u32 %v15326_v39, 16 }
 0x1a1   : > { %v15319_v60 = vsel %vm14432_vm8, %v5249_v42, %v5250_v0  ;;  %v15337_v0 = vrot.slane %v4513_v62, 4  ;;  %v15348_v42 = vrot.slane %v4523_v8, 4  ;;  %v15354_v62 = vrot.slane %v1464_v2, 5 }
 0x1a2   : > { %18375 = vst [vmem:[#allocation7_spill] sm:$0xff] %v15319_v60  ;;  %v15321_v52 = vrot.slane %v1461_v1, 4  ;;  %v4544_v1 = vshrl.u32 %v15326_v39, 16  ;;  %v15366_v8 = vrot.slane %v1485_v47, 4 }
 0x1a4   : > { %v4546_v2 = vrot.slane %v4544_v1, 4 }
 0x1a7   : > { %12750 = vmatmul.mubr.msk.bf16.gmra.mrb[28].mxu0 %vm1558_vm14, %v18373_v31  ;;  %v15310_v31 = vrot.slane %v1437_v40, 4  ;;  %v1488_v40 = vshll.u32 %v13837_v54, 16  ;;  %v15356_v54 = vld [vmem:[#allocation2 + $0xac] sm:$0xf] }
 0x1a8   : > { %12755 = vmatprep.mubr.msk.bf16.mxu0 %vm1558_vm14, %v13763_v14  ;;  %v4502_v14 = vshll.u32 %v4436_v57, 16  ;;  %v4534_v57 = vshll.u32 %v4440_v56, 16  ;;  %v15352_v56 = vsel %vm14432_vm8, %v11732_v22, %v5261_v35 }
 0x1a9   : > { %18376 = vst [vmem:[#allocation8_spill] sm:$0xff] %v15352_v56  ;;  %v13771_v56 = vld [vmem:[#allocation2 + $0x78] sm:$0xff]  }
 0x1aa   : > { %v4504_v5 = vrot.slane %v4502_v14, 5  ;;  %v13768_v14 = vld [vmem:[#allocation2 + $0x54] sm:$0xff]   ;;  %v4536_v11 = vrot.slane %v4534_v57, 5  ;;  %v15370_v57 = vrot.slane %v4540_v29, 5  ;;  %v15389_v29 = vsel %vm1607_vm0, %v15287_v27, 0 }
 0x1af   : > { %12756 = vmatmul.mubr.msk.bf16.vlgmr.msra.gmra.mrb[0].mxu0 %vm1558_vm14, %v13764_v9 }
 0x1b0   : > { %12788 = vmatpush3.bf16.msra.mxu0 %v4965_v48  ;;  %12759 = vmatprep.mubr.msk.bf16.mxu0 %vm1558_vm14, %v13765_v10  ;;  %v4490_v48 = vrot.slane %v4489_v7, 4  ;;  %v4500_v10 = vrot.slane %v4499_v43, 4  ;;  %v15346_v7 = vrot.slane %v4526_v59, 5  ;;  %v5263_v43 = vrot.slane %v5261_v35, 4 }
 0x1b1   : > { %13718 = vmatprep.subr.msk.bf16.mxu0 %vm1607_vm0, %v15287_v27  ;;  %v15374_v35 = vrot.slane %v1488_v40, 5  ;;  %v4547_v27 = vor.u32 %v4546_v2, %v15370_v57 }
 0x1b2   : > { %v4495_v26 = vsel %vm14107_vm13, %v4490_v48, %v15282_v24  ;;  %v4505_v15 = vsel %vm14107_vm13, %v4500_v10, %v4504_v5  ;;  %v15359_v48 = vld [vmem:[#allocation2 + $0xb8] sm:$0xf]  ;;  %v13769_v5 = vld [vmem:[#allocation2 + $0x60] sm:$0xff]   ;;  %v15364_v59 = vsel %vm14432_vm8, %v5263_v43, %v5264_v4  ;;  %v4519_v4 = vsel %vm14107_vm13, %v15337_v0, %v15304_v45  ;;  %v5167_v0 = vld [vmem:[#allocation2 + $0x6c] sm:$0xe] }
 0x1b3   : > { %18377 = vst [vmem:[#allocation9_spill] sm:$0xff] %v15364_v59  ;;  %v15376_v22 = vcombine.low %v4495_v26, %v4505_v15  ;;  %v4529_v47 = vsel %vm14107_vm13, %v15348_v42, %v15346_v7  ;;  %v15391_v26 = vld [vmem:[#allocation2 + $0x70] sm:$0xf]  ;;  %v15393_v15 = vld [vmem:[#allocation2 + $0x74] sm:$0x1]  ;;  %v11734_v9 = vrot.slane %v5167_v0, 9 }
 0x1b4   : > { %v5278_v36 = vrot.slane %v15393_v15, 5  ;;  %v13840_v7 = vld [vmem:[#allocation2 + $0x60] sm:$0xf] }
 0x1b5   : > { %v1317_v42 = vshrl.u32 %v13840_v7, 16 }
 0x1b7   : > { %12760 = vmatmul.mubr.msk.bf16.gmra.mrb[4].mxu0 %vm1558_vm14, %v13766_v49  ;;  %v4533_v49 = vrot.slane %v4531_v33, 4  ;;  %v15368_v33 = vld [vmem:[#allocation2 + $0x38] sm:$0x1]  ;;  %v1319_v3 = vrot.slane %v1317_v42, 4 }
 0x1b8   : > { %12763 = vmatprep.mubr.msk.bf16.mxu0 %vm1558_vm14, %v13767_v38  ;;  %v4443_v38 = vld [vmem:[#allocation2 + $0x3c] sm:$0xf]  ;;  %v4550_v45 = vshll.u32 %v15368_v33, 16 }
 0x1b9   : > { %v4555_v43 = vshrl.u32 %v4443_v38, 16  ;;  %v4537_v40 = vor.u32 %v4536_v11, %v4533_v49  ;;  %v4558_v1 = vshll.u32 %v4443_v38, 16  ;;  %v1320_v49 = vshll.u32 %v13840_v7, 16  ;;  %v13841_v11 = vld [vmem:[#allocation2 + $0x64] sm:$0xf] }
 0x1ba   : > { %v1326_v38 = vshll.u32 %v13841_v11, 16  ;;  %v1330_v50 = vshrl.u32 %v13841_v11, 16  ;;  %v13842_v7 = vld [vmem:[#allocation2 + $0x68] sm:$0x1] }
 0x1bb   : > { %v4557_v10 = vrot.slane %v4555_v43, 4  ;;  %v4560_v51 = vrot.slane %v4558_v1, 5  ;;  %v1322_v58 = vrot.slane %v1320_v49, 5  ;;  %v4538_v60 = vrot.slane %v4537_v40, 4 }
 0x1bc   : > { %v1328_v59 = vrot.slane %v1326_v38, 5  ;;  %v1332_v0 = vrot.slane %v1330_v50, 4  ;;  %v1336_v43 = vshll.u32 %v13842_v7, 16  ;;  %v1347_v1 = vor.u32 %v15256_v28, %v15254_v19 }
 0x1bd   : > { %v1323_v11 = vor.u32 %v1322_v58, %v1319_v3  ;;  %v18378_v40 = vshrl.u32 %v15259_v53, 16  ;;  %v4564_v50 = vshll.u32 %v15290_v18, 16  ;;  %v4548_v58 = vrot.slane %v4547_v27, 4 }
 0x1be   : > { %v1338_v49 = vrot.slane %v1336_v43, 5  ;;  %v1348_v7 = vrot.slane %v1347_v1, 4  ;;  %v4552_v19 = vrot.slane %v4550_v45, 5  ;;  %v4568_v28 = vshrl.u32 %v15290_v18, 16  ;;  %v13772_v45 = vld [vmem:[#allocation2 + $0x84] sm:$0xff]  }
 0x1bf   : > { %12764 = vmatmul.mubr.msk.bf16.gmra.mrb[8].mxu0 %vm1558_vm14, %v13768_v14  ;;  %v5275_v14 = vrot.slane %v15391_v26, 5  ;;  %v1356_v38 = vrot.slane %v18378_v40, 4  ;;  %v4561_v1 = vor.u32 %v4560_v51, %v4557_v10  ;;  %v1374_v10 = vshll.u32 %v15262_v37, 16 }
 0x1c0   : > { %12767 = vmatprep.mubr.msk.bf16.mxu0 %vm1558_vm14, %v13769_v5  ;;  %v13770_v5 = vld [vmem:[#allocation2 + $0x6c] sm:$0xff]   ;;  %v15437_v40 = vrot.slane %v4568_v28, 4 }
 0x1c1   : > { %v5277_v24 = vrot.slane %v5275_v14, 4  ;;  %v15402_v12 = vsel %vm14432_vm8, %v11734_v9, %v5275_v14  ;;  %v1350_v9 = vshll.u32 %v15259_v53, 16  ;;  %v1333_v14 = vor.u32 %v1332_v0, %v1328_v59  ;;  %v15421_v53 = vld [vmem:[#allocation2 + $0x48] sm:$0xf] }
 0x1c2   : > { %v15419_v0 = vcombine.low %v4519_v4, %v4529_v47  ;;  %v15431_v4 = vrot.slane %v4564_v50, 5  ;;  %v4579_v51 = vshrl.u32 %v15421_v53, 16 }
 0x1c3   : > { %v15406_v2 = vsel %vm14432_vm8, %v5277_v24, %v5278_v36  ;;  %v1360_v24 = vshll.u32 %v13843_v23, 16  ;;  %v1324_v36 = vrot.slane %v1323_v11, 4  ;;  %v1352_v42 = vrot.slane %v1350_v9, 5  ;;  %v13773_v9 = vld [vmem:[#allocation2 + $0x90] sm:$0xff]  }
 0x1c4   : > { %v1334_v3 = vrot.slane %v1333_v14, 4  ;;  %v4543_v11 = vsel %vm14107_vm13, %v4538_v60, %v15370_v57  ;;  %v4553_v14 = vsel %vm14107_vm13, %v4548_v58, %v4552_v19  ;;  %v18379_v57 = vshrl.u32 %v15262_v37, 16 }
 0x1c5   : > { %v1329_v23 = vsel %vm14107_vm13, %v1324_v36, %v1328_v59  ;;  %v1362_v43 = vrot.slane %v1360_v24, 5  ;;  %v1353_v27 = vsel %vm14107_vm13, %v1348_v7, %v1352_v42  ;;  %v15448_v24 = vrot.slane %v4561_v1, 4  ;;  %v15467_v1 = vld [vmem:[#allocation2 + $0xa0] sm:$0xf] }
 0x1c6   : > { %v1339_v18 = vsel %vm14107_vm13, %v1334_v3, %v1338_v49  ;;  %v13844_v49 = vld [vmem:[#allocation2 + $0x80] sm:$0x1]  ;;  %v4582_v7 = vshll.u32 %v15421_v53, 16  ;;  %v1376_v19 = vrot.slane %v1374_v10, 5  ;;  %v1398_v37 = vshll.u32 %v15273_v46, 16  ;;  %v13775_v10 = vld [vmem:[#allocation2 + $0xa8] sm:$0xff]  }
 0x1c7   : > { %12768 = vmatmul.mubr.msk.bf16.gmra.mrb[12].mxu0 %vm1558_vm14, %v13770_v5  ;;  %v1357_v5 = vor.u32 %v1356_v38, %v1352_v42  ;;  %v11441_v47 = vcombine.low %v1329_v23, %v1339_v18  ;;  %v1380_v42 = vrot.slane %v18379_v57, 4  ;;  %v1384_v38 = vshll.u32 %v13844_v49, 16 }
 0x1c8   : > { %12771 = vmatprep.mubr.msk.bf16.mxu0 %vm1558_vm14, %v13771_v56  ;;  %v4574_v56 = vshll.u32 %v15292_v21, 16  ;;  %v1371_v21 = vor.u32 %v15267_v13, %v15265_v55  ;;  %v1395_v55 = vor.u32 %v15271_v44, %v15269_v32  ;;  %v15455_v13 = vld [vmem:[#allocation2 + $0x4c] sm:$0xf]  ;;  %v15460_v28 = vcombine.low %v4543_v11, %v4553_v14 }
 0x1c9   : > { %v1358_v59 = vrot.slane %v1357_v5, 4  ;;  %12567 = vmatprep.mubr.msk.bf16.mxu1 %vm1558_vm14, %v11441_v47  ;;  %v18380_v23 = vshrl.u32 %v15273_v46, 16  ;;  %v13845_v44 = vld [vmem:[#allocation2 + $0x8c] sm:$0x1]  ;;  %v4571_v53 = vor.u32 %v15437_v40, %v15431_v4  ;;  %v1386_v18 = vrot.slane %v1384_v38, 5  ;;  %v13774_v46 = vld [vmem:[#allocation2 + $0x9c] sm:$0xff]  }
 0x1ca   : > { %v15450_v50 = vrot.slane %v4574_v56, 5  ;;  %v1372_v58 = vrot.slane %v1371_v21, 4  ;;  %v1396_v3 = vrot.slane %v1395_v55, 4  ;;  %v1408_v5 = vshll.u32 %v13845_v44, 16 }
 0x1cb   : > { %v1363_v60 = vsel %vm14107_vm13, %v1358_v59, %v1362_v43  ;;  %v1404_v32 = vrot.slane %v18380_v23, 4  ;;  %v5171_v43 = vld [vmem:[#allocation2 + $0x9c] sm:$0xe]  ;;  %v1381_v56 = vor.u32 %v1380_v42, %v1376_v19  ;;  %v15469_v47 = vrot.slane %v4579_v51, 4 }
 0x1cc   : > { %v11442_v36 = vcombine.low %v1353_v27, %v1363_v60  ;;  %v4588_v11 = vshll.u32 %v15455_v13, 16  ;;  %v11738_v27 = vrot.slane %v5171_v43, 9  ;;  %v5303_v59 = vrot.slane %v15467_v1, 5  ;;  %v15504_v43 = vld [vmem:[#allocation2 + $0x50] sm:$0x1] }
 0x1cd   : > { %v1377_v14 = vsel %vm14107_vm13, %v1372_v58, %v1376_v19  ;;  %v1382_v21 = vrot.slane %v1381_v56, 4  ;;  %v1410_v60 = vrot.slane %v1408_v5, 5  ;;  %v1419_v55 = vor.u32 %v15300_v41, %v15276_v63 }
 0x1ce   : > { %12568 = vmatmul.mubr.msk.bf16.vlgmr.msra.gmra.mrb[0].mxu1 %vm1558_vm14, %v11442_v36  ;;  %v15481_v51 = vsel %vm14432_vm8, %v11738_v27, %v5303_v59  ;;  %v5305_v42 = vrot.slane %v5303_v59, 4  ;;  %v1422_v58 = vshll.u32 %v15278_v25, 16  ;;  %v15489_v19 = vrot.slane %v4582_v7, 5 }
 0x1cf   : > { %12772 = vmatmul.mubr.msk.bf16.gmra.mrb[16].mxu0 %vm1558_vm14, %v13772_v45  ;;  %v1400_v45 = vrot.slane %v1398_v37, 5  ;;  %v1387_v38 = vsel %vm14107_vm13, %v1382_v21, %v1386_v18  ;;  %v4449_v37 = vld [vmem:[#allocation2 + $0x54] sm:$0xf]  ;;  %v4592_v5 = vshrl.u32 %v15455_v13, 16  ;;  %v1420_v7 = vrot.slane %v1419_v55, 4  ;;  %v13777_v55 = vld [vmem:[#allocation2 + $0xc0] sm:$0xff]  }
 0x1d0   : > { %12775 = vmatprep.mubr.msk.bf16.mxu0 %vm1558_vm14, %v13773_v9  ;;  %v15473_v9 = vld [vmem:[#allocation2 + $0xa4] sm:$0x1]  ;;  %v13846_v18 = vld [vmem:[#allocation2 + $0x98] sm:$0x1]  ;;  %v1443_v27 = vor.u32 %v15312_v6, %v15310_v31  ;;  %v4603_v59 = vshrl.u32 %v4449_v37, 16  ;;  %v15519_v6 = vrot.slane %v4588_v11, 5 }
 0x1d1   : > { %v1405_v40 = vor.u32 %v1404_v32, %v1400_v45  ;;  %v1401_v57 = vsel %vm14107_vm13, %v1396_v3, %v1400_v45  ;;  %v5306_v49 = vrot.slane %v15473_v9, 5  ;;  %v11443_v3 = vcombine.low %v1377_v14, %v1387_v38  ;;  %v13776_v31 = vld [vmem:[#allocation2 + $0xb4] sm:$0xff]  }
 0x1d2   : > { %v18381_v32 = vshrl.u32 %v15278_v25, 16  ;;  %v1424_v25 = vrot.slane %v1422_v58, 5  ;;  %v1432_v45 = vshll.u32 %v13846_v18, 16  ;;  %v18382_v14 = vshrl.u32 %v15314_v20, 16 }
 0x1d3   : > { %v1406_v36 = vrot.slane %v1405_v40, 4  ;;  %v15493_v23 = vsel %vm14432_vm8, %v5305_v42, %v5306_v49  ;;  %12571 = vmatprep.mubr.msk.bf16.mxu1 %vm1558_vm14, %v11443_v3  ;;  %v13847_v40 = vld [vmem:[#allocation2 + $0xa4] sm:$0x1]  ;;  %v4598_v38 = vshll.u32 %v15504_v43, 16  ;;  %v4585_v58 = vor.u32 %v15489_v19, %v15469_v47 }
 0x1d4   : > { %v1428_v44 = vrot.slane %v18381_v32, 4  ;;  %v11755_v41 = vcombine.low %v15481_v51, %v15493_v23  ;;  %v1452_v21 = vrot.slane %v18382_v14, 4  ;;  %v1434_v49 = vrot.slane %v1432_v45, 5 }
 0x1d5   : > { %v1411_v63 = vsel %vm14107_vm13, %v1406_v36, %v1410_v60  ;;  %v1456_v60 = vshll.u32 %v13847_v40, 16  ;;  %v4606_v3 = vshll.u32 %v4449_v37, 16  ;;  %v4612_v45 = vshll.u32 %v15330_v34, 16 }
 0x1d6   : > { %v11444_v56 = vcombine.low %v1401_v57, %v1411_v63  ;;  %v15516_v57 = vrot.slane %v4571_v53, 4  ;;  %v1429_v42 = vor.u32 %v1428_v44, %v1424_v25  ;;  %v1425_v53 = vsel %vm14107_vm13, %v1420_v7, %v1424_v25 }
 0x1d7   : > { %12776 = vmatmul.mubr.msk.bf16.gmra.mrb[20].mxu0 %vm1558_vm14, %v13774_v46  ;;  %v1446_v46 = vshll.u32 %v15314_v20, 16  ;;  %v1444_v20 = vrot.slane %v1443_v27, 4  ;;  %v15526_v63 = vrot.slane %v4592_v5, 4  ;;  %v15528_v44 = vrot.slane %v4603_v59, 4 }
 0x1d8   : > { %12779 = vmatprep.mubr.msk.bf16.mxu0 %vm1558_vm14, %v13775_v10  ;;  %v4567_v10 = vsel %vm14107_vm13, %v15448_v24, %v15431_v4  ;;  %12572 = vmatmul.mubr.msk.bf16.gmra.mrb[4].mxu1 %vm1558_vm14, %v11444_v56  ;;  %v1430_v32 = vrot.slane %v1429_v42, 4  ;;  %v1458_v11 = vrot.slane %v1456_v60, 5  ;;  %v4577_v18 = vsel %vm14107_vm13, %v15516_v57, %v15450_v50  ;;  %v13848_v60 = vld [vmem:[#allocation2 + $0xb0] sm:$0x1] }
 0x1d9   : > { %v1448_v36 = vrot.slane %v1446_v46, 5  ;;  %v1467_v19 = vor.u32 %v15354_v62, %v15321_v52  ;;  %v1470_v25 = vshll.u32 %v15356_v54, 16  ;;  %v15544_v27 = vrot.slane %v4598_v38, 5 }
 0x1da   : > { %v1435_v47 = vsel %vm14107_vm13, %v1430_v32, %v1434_v49  ;;  %v15546_v59 = vrot.slane %v4606_v3, 5  ;;  %v4616_v46 = vshrl.u32 %v15330_v34, 16  ;;  %v18383_v14 = vshrl.u32 %v15356_v54, 16  ;;  %v4452_v49 = vld [vmem:[#allocation2 + $0x60] sm:$0xf] }
 0x1db   : > { %v1453_v56 = vor.u32 %v1452_v21, %v1448_v36  ;;  %v11445_v37 = vcombine.low %v1425_v53, %v1435_v47  ;;  %v1449_v5 = vsel %vm14107_vm13, %v1444_v20, %v1448_v36  ;;  %v1468_v21 = vrot.slane %v1467_v19, 4  ;;  %v13778_v36 = vld [vmem:[#allocation2 + $0xcc] sm:$0xff]   ;;  %v15561_v3 = vld [vmem:[#allocation2 + $0x64] sm:$0xf] }
 0x1dc   : > { %v1476_v52 = vrot.slane %v18383_v14, 4  ;;  %v1472_v40 = vrot.slane %v1470_v25, 5  ;;  %v1480_v42 = vshll.u32 %v13848_v60, 16  ;;  %v1491_v38 = vor.u32 %v15374_v35, %v15366_v8  ;;  %v500_v60 = vld [vmem:[#allocation3 + $0x18] sm:$0x1] }
 0x1dd   : > { %v1454_v7 = vrot.slane %v1453_v56, 4  ;;  %12575 = vmatprep.mubr.msk.bf16.mxu1 %vm1558_vm14, %v11445_v37  ;;  %v1494_v20 = vshll.u32 %v15359_v48, 16  ;;  %v18384_v34 = vshrl.u32 %v15359_v48, 16  ;;  %v13849_v56 = vld [vmem:[#allocation2 + $0xbc] sm:$0x1]  ;;  %v15563_v47 = vrot.slane %v4612_v45, 5 }
 0x1de   : > { %v1477_v53 = vor.u32 %v1476_v52, %v1472_v40  ;;  %v1482_v32 = vrot.slane %v1480_v42, 5  ;;  %v4618_v19 = vrot.slane %v4616_v46, 4  ;;  %v1492_v8 = vrot.slane %v1491_v38, 4  ;;  %v4455_v42 = vld [vmem:[#allocation2 + $0x6c] sm:$0xf] }
 0x1df   : > { %12780 = vmatmul.mubr.msk.bf16.gmra.mrb[24].mxu0 %vm1558_vm14, %v13776_v31  ;;  %v1459_v62 = vsel %vm14107_vm13, %v1454_v7, %v1458_v11  ;;  %v1500_v54 = vrot.slane %v18384_v34, 4  ;;  %v1504_v11 = vshll.u32 %v13849_v56, 16  ;;  %v1496_v35 = vrot.slane %v1494_v20, 5  ;;  %v4458_v20 = vld [vmem:[#allocation2 + $0x78] sm:$0xf] }
 0x1e0   : > { %12783 = vmatprep.mubr.msk.bf16.mxu0 %vm1558_vm14, %v13777_v55  ;;  %v11446_v31 = vcombine.low %v1449_v5, %v1459_v62  ;;  %v4595_v55 = vor.u32 %v15526_v63, %v15519_v6  ;;  %v4627_v37 = vshrl.u32 %v4452_v49, 16  ;;  %v4630_v48 = vshll.u32 %v4452_v49, 16 }
 0x1e1   : > { %v1473_v5 = vsel %vm14107_vm13, %v1468_v21, %v1472_v40  ;;  %v1478_v7 = vrot.slane %v1477_v53, 4  ;;  %v4636_v63 = vshll.u32 %v15561_v3, 16  ;;  %v4640_v25 = vshrl.u32 %v15561_v3, 16  ;;  %v15580_v40 = vld [vmem:[#allocation2 + $0x68] sm:$0x1] }
 0x1e2   : > { %12576 = vmatmul.mubr.msk.bf16.gmra.mrb[8].mxu1 %vm1558_vm14, %v11446_v31  ;;  %v1501_v14 = vor.u32 %v1500_v54, %v1496_v35  ;;  %v1506_v52 = vrot.slane %v1504_v11, 5  ;;  %v15571_v45 = vrot.slane %v4585_v58, 4  ;;  %v4609_v46 = vor.u32 %v15546_v59, %v15528_v44 }
 0x1e3   : > { %v1483_v62 = vsel %vm14107_vm13, %v1478_v7, %v1482_v32  ;;  %v4622_v21 = vshll.u32 %v15332_v16, 16  ;;  %v1497_v58 = vsel %vm14107_vm13, %v1492_v8, %v1496_v35  ;;  %v18385_v44 = vmov 0  ;;  %v15599_v32 = vld [vmem:[#allocation2 + $0x7c] sm:$0xf] }
 0x1e4   : > { %v11447_v49 = vcombine.low %v1473_v5, %v1483_v62  ;;  %v1502_v31 = vrot.slane %v1501_v14, 4  ;;  %v18386_v44 = vsel %vm15586_vm6, 4294967295, %v18385_v44  ;;  %v18388_v59 = vmov 0  }
 0x1e5   : > { %18387 = vst [vmem:[#allocation10_spill] sm:$0xff] %v18386_v44  ;;  %487 = vst.msk [vmem:[#allocation3 + $0x8] sm:$0x1] %vm486_vm1, %v18388_v59  ;;  %v4596_v16 = vrot.slane %v4595_v55, 4  ;;  %v4629_v38 = vrot.slane %v4627_v37, 4  ;;  %v501_v34 = vsel %vm15586_vm6, 0, %v500_v60  ;;  %v4591_v7 = vsel %vm14107_vm13, %v15571_v45, %v15519_v6 }
 0x1e6   : > { %491 = vst.msk [vmem:[#allocation3 + $0xd4] sm:$0x1] %vm486_vm1, %v18388_v59  ;;  %v4632_v54 = vrot.slane %v4630_v48, 5  ;;  %v4642_v53 = vrot.slane %v4640_v25, 4  ;;  %12579 = vmatprep.mubr.msk.bf16.mxu1 %vm1558_vm14, %v11447_v49  ;;  %v1507_v56 = vsel %vm14107_vm13, %v1502_v31, %v1506_v52  ;;  %502 = vst [vmem:[#allocation3 + $0x18] sm:$0x1] %v501_v34 }
 0x1e7   : > { %12784 = vmatmul.mubr.msk.bf16.gmra.mrb[28].mxu0 %vm1558_vm14, %v13778_v36  ;;  %v15597_v36 = vrot.slane %v4636_v63, 5  ;;  %v4646_v55 = vshll.u32 %v15580_v40, 16  ;;  %v4651_v11 = vshrl.u32 %v4455_v42, 16  ;;  %v11448_v8 = vcombine.low %v1497_v58, %v1507_v56  ;;  %v15622_v58 = vld [vmem:[#allocation2 + $0x88] sm:$0xf] }
 0x1e8   : > { %12789 = vmatprep.mubr.msk.bf16.mxu0 %vm1558_vm14, %v15376_v22  ;;  %v4619_v22 = vor.u32 %v4618_v19, %v15563_v47  ;;  %v4654_v19 = vshll.u32 %v4455_v42, 16  ;;  %v4660_v35 = vshll.u32 %v15391_v26, 16  ;;  %v4664_v37 = vshrl.u32 %v15391_v26, 16  ;;  %v4461_v42 = vld [vmem:[#allocation2 + $0x84] sm:$0xf] }
 0x1e9   : > { %v4675_v48 = vshrl.u32 %v4458_v20, 16  ;;  %v4678_v5 = vshll.u32 %v4458_v20, 16  ;;  %v15611_v63 = vrot.slane %v4609_v46, 4  ;;  %v4684_v25 = vshll.u32 %v15599_v32, 16 }
 0x1ea   : > { %v4688_v14 = vshrl.u32 %v15599_v32, 16  ;;  %12580 = vmatmul.mubr.msk.bf16.gmra.mrb[12].mxu1 %vm1558_vm14, %v11448_v8  ;;  %v4601_v52 = vsel %vm14107_vm13, %v4596_v16, %v15544_v27  ;;  %v4624_v26 = vrot.slane %v4622_v21, 5  ;;  %v4633_v62 = vor.u32 %v4632_v54, %v4629_v38  ;;  %v15631_v54 = vld [vmem:[#allocation2 + $0x80] sm:$0x1] }
 0x1eb   : > { %v4643_v60 = vor.u32 %v4642_v53, %v15597_v36  ;;  %v4620_v6 = vrot.slane %v4619_v22, 4  ;;  %v4648_v45 = vrot.slane %v4646_v55, 5  ;;  %v4653_v46 = vrot.slane %v4651_v11, 4 }
 0x1ec   : > { %v4656_v49 = vrot.slane %v4654_v19, 5  ;;  %v15627_v27 = vrot.slane %v4660_v35, 5  ;;  %v4666_v21 = vrot.slane %v4664_v37, 4  ;;  %v4677_v31 = vrot.slane %v4675_v48, 4  ;;  %v4464_v35 = vld [vmem:[#allocation2 + $0x90] sm:$0xf] }
 0x1ed   : > { %v4680_v59 = vrot.slane %v4678_v5, 5  ;;  %v15629_v16 = vrot.slane %v4684_v25, 5  ;;  %v4690_v38 = vrot.slane %v4688_v14, 4  ;;  %v4702_v22 = vshll.u32 %v4461_v42, 16  ;;  %v15653_v37 = vld [vmem:[#allocation2 + $0x94] sm:$0xf] }
 0x1ee   : > { %v4634_v20 = vrot.slane %v4633_v62, 4  ;;  %v4644_v34 = vrot.slane %v4643_v60, 4  ;;  %v4708_v53 = vshll.u32 %v15622_v58, 16  ;;  %v11699_v56 = vcombine.low %v4591_v7, %v4601_v52  ;;  %v15662_v5 = vld [vmem:[#allocation2 + $0x8c] sm:$0x1] }
 0x1ef   : > { %12790 = vmatmul.mubr.msk.bf16.vlgmr.msra.gmra.mrb[0].mxu0 %vm1558_vm14, %v15419_v0  ;;  %v4699_v0 = vshrl.u32 %v4461_v42, 16  ;;  %v4615_v55 = vsel %vm14107_vm13, %v15611_v63, %v15563_v47  ;;  %v4625_v11 = vsel %vm14107_vm13, %v4620_v6, %v4624_v26  ;;  %v4657_v19 = vor.u32 %v4656_v49, %v4653_v46  ;;  %v4467_v49 = vld [vmem:[#allocation2 + $0x9c] sm:$0xf] }
 0x1f0   : > { %12822 = vmatpush3.bf16.msra.mxu0 %v15389_v29  ;;  %12793 = vmatprep.mubr.msk.bf16.mxu0 %vm1558_vm14, %v15460_v28  ;;  %v4712_v29 = vshrl.u32 %v15622_v58, 16  ;;  %v11698_v28 = vcombine.low %v4567_v10, %v4577_v18  ;;  %v4667_v8 = vor.u32 %v4666_v21, %v15627_v27  ;;  %v4670_v50 = vshll.u32 %v15393_v15, 16 }
 0x1f1   : > { %v4681_v57 = vor.u32 %v4680_v59, %v4677_v31  ;;  %v4691_v4 = vor.u32 %v4690_v38, %v15629_v16  ;;  %v4694_v24 = vshll.u32 %v15631_v54, 16  ;;  %v4701_v10 = vrot.slane %v4699_v0, 4  ;;  %v15672_v38 = vld [vmem:[#allocation2 + $0x98] sm:$0x1] }
 0x1f2   : > { %v4704_v18 = vrot.slane %v4702_v22, 5  ;;  %v4639_v47 = vsel %vm14107_vm13, %v4634_v20, %v15597_v36  ;;  %v4649_v48 = vsel %vm14107_vm13, %v4644_v34, %v4648_v45  ;;  %v15664_v15 = vrot.slane %v4708_v53, 5 }
 0x1f3   : > { %v4714_v7 = vrot.slane %v4712_v29, 4  ;;  %v4723_v63 = vshrl.u32 %v4464_v35, 16  ;;  %v4726_v25 = vshll.u32 %v4464_v35, 16  ;;  %v4732_v14 = vshll.u32 %v15653_v37, 16 }
 0x1f4   : > { %v4736_v52 = vshrl.u32 %v15653_v37, 16  ;;  %v4658_v26 = vrot.slane %v4657_v19, 4  ;;  %v4668_v36 = vrot.slane %v4667_v8, 4  ;;  %v4672_v62 = vrot.slane %v4670_v50, 5 }
 0x1f5   : > { %v4682_v60 = vrot.slane %v4681_v57, 4  ;;  %v4692_v42 = vrot.slane %v4691_v4, 4  ;;  %v4696_v6 = vrot.slane %v4694_v24, 5  ;;  %v4705_v45 = vor.u32 %v4704_v18, %v4701_v10 }
 0x1f6   : > { %v4718_v46 = vshll.u32 %v15662_v5, 16  ;;  %v11700_v21 = vcombine.low %v4615_v55, %v4625_v11  ;;  %v11701_v31 = vcombine.low %v4639_v47, %v4649_v48  ;;  %v4715_v59 = vor.u32 %v4714_v7, %v15664_v15  ;;  %v4470_v55 = vld [vmem:[#allocation2 + $0xa8] sm:$0xf]  ;;  %v15681_v11 = vld [vmem:[#allocation2 + $0xac] sm:$0xf] }
 0x1f7   : > { %12794 = vmatmul.mubr.msk.bf16.gmra.mrb[4].mxu0 %vm1558_vm14, %v11698_v28  ;;  %v4725_v0 = vrot.slane %v4723_v63, 4  ;;  %v4728_v22 = vrot.slane %v4726_v25, 5  ;;  %v15674_v20 = vrot.slane %v4732_v14, 5  ;;  %v4738_v34 = vrot.slane %v4736_v52, 4 }
 0x1f8   : > { %12797 = vmatprep.mubr.msk.bf16.mxu0 %vm1558_vm14, %v11699_v56  ;;  %v4663_v53 = vsel %vm14107_vm13, %v4658_v26, %v15627_v27  ;;  %v4673_v29 = vsel %vm14107_vm13, %v4668_v36, %v4672_v62  ;;  %v4747_v28 = vshrl.u32 %v4467_v49, 16  ;;  %v4750_v56 = vshll.u32 %v4467_v49, 16 }
 0x1f9   : > { %v4687_v19 = vsel %vm14107_vm13, %v4682_v60, %v15629_v16  ;;  %v4697_v8 = vsel %vm14107_vm13, %v4692_v42, %v4696_v6  ;;  %v4706_v50 = vrot.slane %v4705_v45, 4  ;;  %v4720_v57 = vrot.slane %v4718_v46, 5  ;;  %v15703_v42 = vld [vmem:[#allocation2 + $0xb0] sm:$0x1] }
 0x1fa   : > { %v4716_v35 = vrot.slane %v4715_v59, 4  ;;  %v4742_v27 = vshll.u32 %v15672_v38, 16  ;;  %v4756_v4 = vshll.u32 %v15467_v1, 16  ;;  %v4760_v24 = vshrl.u32 %v15467_v1, 16 }
 0x1fb   : > { %v4771_v10 = vshrl.u32 %v4470_v55, 16  ;;  %v4774_v18 = vshll.u32 %v4470_v55, 16  ;;  %v4780_v47 = vshll.u32 %v15681_v11, 16  ;;  %v4784_v16 = vshrl.u32 %v15681_v11, 16  ;;  %v4476_v55 = vld [vmem:[#allocation2 + $0xc0] sm:$0xf] }
 0x1fc   : > { %v4729_v48 = vor.u32 %v4728_v22, %v4725_v0  ;;  %v4739_v7 = vor.u32 %v4738_v34, %v15674_v20  ;;  %v4749_v63 = vrot.slane %v4747_v28, 4  ;;  %v4752_v25 = vrot.slane %v4750_v56, 5  ;;  %v15708_v22 = vld [vmem:[#allocation2 + $0xb8] sm:$0xf] }
 0x1fd   : > { %v11702_v14 = vcombine.low %v4663_v53, %v4673_v29  ;;  %v11703_v52 = vcombine.low %v4687_v19, %v4697_v8  ;;  %v4711_v1 = vsel %vm14107_vm13, %v4706_v50, %v15664_v15  ;;  %v4721_v26 = vsel %vm14107_vm13, %v4716_v35, %v4720_v57  ;;  %v15712_v19 = vld [vmem:[#allocation2 + $0xc4] sm:$0xf] }
 0x1fe   : > { %v4744_v36 = vrot.slane %v4742_v27, 5  ;;  %v15701_v62 = vrot.slane %v4756_v4, 5  ;;  %v4762_v60 = vrot.slane %v4760_v24, 4  ;;  %v4773_v6 = vrot.slane %v4771_v10, 4 }
 0x1ff   : > { %12798 = vmatmul.mubr.msk.bf16.gmra.mrb[8].mxu0 %vm1558_vm14, %v11700_v21  ;;  %v4776_v45 = vrot.slane %v4774_v18, 5  ;;  %v15705_v46 = vrot.slane %v4780_v47, 5  ;;  %v4786_v49 = vrot.slane %v4784_v16, 4  ;;  %v4473_v21 = vld [vmem:[#allocation2 + $0xb4] sm:$0xf]  ;;  %v4740_v59 = vrot.slane %v4739_v7, 4 }
 0x200   : > { %12801 = vmatprep.mubr.msk.bf16.mxu0 %vm1558_vm14, %v11701_v31  ;;  %v4730_v31 = vrot.slane %v4729_v48, 4  ;;  %v4753_v0 = vor.u32 %v4752_v25, %v4749_v63  ;;  %v4766_v15 = vshll.u32 %v15473_v9, 16  ;;  %v4790_v34 = vshll.u32 %v15703_v42, 16 }
 0x201   : > { %v11704_v53 = vcombine.low %v4711_v1, %v4721_v26  ;;  %v4763_v29 = vor.u32 %v4762_v60, %v15701_v62  ;;  %v4795_v28 = vshrl.u32 %v4473_v21, 16  ;;  %v4798_v56 = vshll.u32 %v4473_v21, 16  ;;  %v15726_v60 = vld [vmem:[#allocation2 + $0xbc] sm:$0x1] }
 0x202   : > { %v4777_v8 = vor.u32 %v4776_v45, %v4773_v6  ;;  %v4787_v50 = vor.u32 %v4786_v49, %v15705_v46  ;;  %v4804_v57 = vshll.u32 %v15708_v22, 16  ;;  %v4808_v9 = vshrl.u32 %v15708_v22, 16 }
 0x203   : > { %v4735_v35 = vsel %vm14107_vm13, %v4730_v31, %v15674_v20  ;;  %v4745_v27 = vsel %vm14107_vm13, %v4740_v59, %v4744_v36  ;;  %v4754_v4 = vrot.slane %v4753_v0, 4  ;;  %v4768_v24 = vrot.slane %v4766_v15, 5  ;;  %v4479_v36 = vld [vmem:[#allocation2 + $0xcc] sm:$0xf]  ;;  %v15728_v31 = vld [vmem:[#allocation2 + $0xd0] sm:$0xf] }
 0x204   : > { %v4819_v10 = vshrl.u32 %v4476_v55, 16  ;;  %v4822_v18 = vshll.u32 %v4476_v55, 16  ;;  %v4828_v47 = vshll.u32 %v15712_v19, 16  ;;  %v4832_v16 = vshrl.u32 %v15712_v19, 16 }
 0x205   : > { %v4764_v48 = vrot.slane %v4763_v29, 4  ;;  %v4792_v7 = vrot.slane %v4790_v34, 5  ;;  %v4797_v63 = vrot.slane %v4795_v28, 4  ;;  %v4800_v25 = vrot.slane %v4798_v56, 5  ;;  %v15735_v34 = vld [vmem:[#allocation2 + $0xc8] sm:$0x1] }
 0x206   : > { %v4806_v1 = vrot.slane %v4804_v57, 5  ;;  %v4810_v26 = vrot.slane %v4808_v9, 4  ;;  %v11705_v20 = vcombine.low %v4735_v35, %v4745_v27  ;;  %v4821_v6 = vrot.slane %v4819_v10, 4 }
 0x207   : > { %12802 = vmatmul.mubr.msk.bf16.gmra.mrb[12].mxu0 %vm1558_vm14, %v11702_v14  ;;  %v4778_v14 = vrot.slane %v4777_v8, 4  ;;  %v4824_v45 = vrot.slane %v4822_v18, 5  ;;  %v4830_v49 = vrot.slane %v4828_v47, 5  ;;  %v4834_v21 = vrot.slane %v4832_v16, 4 }
 0x208   : > { %12805 = vmatprep.mubr.msk.bf16.mxu0 %vm1558_vm14, %v11703_v52  ;;  %v4788_v52 = vrot.slane %v4787_v50, 4  ;;  %v4759_v59 = vsel %vm14107_vm13, %v4754_v4, %v15701_v62  ;;  %v4769_v0 = vsel %vm14107_vm13, %v4764_v48, %v4768_v24  ;;  %v4801_v15 = vor.u32 %v4800_v25, %v4797_v63 }
 0x209   : > { %v4783_v29 = vsel %vm14107_vm13, %v4778_v14, %v15705_v46  ;;  %v4811_v56 = vor.u32 %v4810_v26, %v4806_v1  ;;  %v4814_v55 = vshll.u32 %v15726_v60, 16  ;;  %v4843_v62 = vshrl.u32 %v4479_v36, 16  ;;  %v15748_v14 = vld [vmem:[#allocation2 + $0xd4] sm:$0x1] }
 0x20a   : > { %v4793_v28 = vsel %vm14107_vm13, %v4788_v52, %v4792_v7  ;;  %v4846_v8 = vshll.u32 %v4479_v36, 16  ;;  %v4852_v50 = vshll.u32 %v15728_v31, 16  ;;  %v4856_v57 = vshrl.u32 %v15728_v31, 16 }
 0x20b   : > { %v4825_v9 = vor.u32 %v4824_v45, %v4821_v6  ;;  %v4838_v35 = vshll.u32 %v15735_v34, 16  ;;  %v11706_v27 = vcombine.low %v4759_v59, %v4769_v0  ;;  %v11707_v46 = vcombine.low %v4783_v29, %v4793_v28  ;;  %v13850_v59 = vld [vmem:[#allocation2 + $0x1c] sm:$0xf] }
 0x20c   : > { %v4802_v4 = vrot.slane %v4801_v15, 4  ;;  %v4812_v24 = vrot.slane %v4811_v56, 4  ;;  %v4816_v10 = vrot.slane %v4814_v55, 5  ;;  %v4845_v18 = vrot.slane %v4843_v62, 4  ;;  %v5160_v15 = vld [vmem:[#allocation2 + $0x18] sm:$0xe] }
 0x20d   : > { %v4848_v47 = vrot.slane %v4846_v8, 5  ;;  %v4854_v16 = vrot.slane %v4852_v50, 5  ;;  %v4858_v48 = vrot.slane %v4856_v57, 4  ;;  %v4826_v7 = vrot.slane %v4825_v9, 4  ;;  %v13851_v50 = vld [vmem:[#allocation2 + $0x20] sm:$0x1] }
 0x20e   : > { %v4840_v25 = vrot.slane %v4838_v35, 5  ;;  %v4807_v52 = vsel %vm14107_vm13, %v4802_v4, %v4806_v1  ;;  %v4817_v26 = vsel %vm14107_vm13, %v4812_v24, %v4816_v10  ;;  %v4862_v6 = vshll.u32 %v15748_v14, 16  ;;  %v5161_v4 = vld [vmem:[#allocation2 + $0x24] sm:$0xe]  ;;  %v5162_v10 = vld [vmem:[#allocation2 + $0x30] sm:$0xe] }
 0x20f   : > { %12806 = vmatmul.mubr.msk.bf16.gmra.mrb[16].mxu0 %vm1558_vm14, %v11704_v53  ;;  %v4835_v53 = vor.u32 %v4834_v21, %v4830_v49  ;;  %v4859_v36 = vor.u32 %v4858_v48, %v4854_v16  ;;  %v4831_v45 = vsel %vm14107_vm13, %v4826_v7, %v4830_v49  ;;  %v5226_v0 = vrot.slane %v13850_v59, 5 }
 0x210   : > { %12809 = vmatprep.mubr.msk.bf16.mxu0 %vm1558_vm14, %v11705_v20  ;;  %v4849_v20 = vor.u32 %v4848_v47, %v4845_v18  ;;  %v11708_v29 = vcombine.low %v4807_v52, %v4817_v26  ;;  %v4864_v55 = vrot.slane %v4862_v6, 5  ;;  %v11727_v62 = vrot.slane %v5160_v15, 9  ;;  %v5164_v6 = vld [vmem:[#allocation2 + $0x48] sm:$0xe] }
 0x211   : > { %v4836_v63 = vrot.slane %v4835_v53, 4  ;;  %v4860_v56 = vrot.slane %v4859_v36, 4  ;;  %v5228_v8 = vrot.slane %v5226_v0, 4  ;;  %v5229_v57 = vrot.slane %v13851_v50, 5  ;;  %v13852_v53 = vld [vmem:[#allocation2 + $0x28] sm:$0xf] }
 0x212   : > { %v4850_v28 = vrot.slane %v4849_v20, 4  ;;  %v5233_v35 = vrot.slane %v13852_v53, 5  ;;  %v5240_v24 = vrot.slane %v15326_v39, 5  ;;  %v11728_v48 = vrot.slane %v5161_v4, 9  ;;  %v18393_v4 = vld [vmem:[#allocation9_spill] sm:$0xff] }
 0x213   : > { %v4841_v21 = vsel %vm14107_vm13, %v4836_v63, %v4840_v25  ;;  %v4865_v9 = vsel %vm14107_vm13, %v4860_v56, %v4864_v55  ;;  %v11729_v63 = vrot.slane %v5162_v10, 9  ;;  %v5243_v52 = vrot.slane %v15368_v33, 5 }
 0x214   : > { %v11709_v1 = vcombine.low %v4831_v45, %v4841_v21  ;;  %v4855_v49 = vsel %vm14107_vm13, %v4850_v28, %v4854_v16  ;;  %v5235_v7 = vrot.slane %v5233_v35, 4  ;;  %v5236_v16 = vrot.slane %v15302_v61, 5 }
 0x215   : > { %v11710_v18 = vcombine.low %v4855_v49, %v4865_v9  ;;  %v5242_v25 = vrot.slane %v5240_v24, 4  ;;  %v5234_v26 = vsel %vm14432_vm8, %v11728_v48, %v5233_v35  ;;  %v5241_v20 = vsel %vm14432_vm8, %v11729_v63, %v5240_v24  ;;  %v5168_v9 = vld [vmem:[#allocation2 + $0x78] sm:$0xe] }
 0x216   : > { %v5237_v39 = vsel %vm14432_vm8, %v5235_v7, %v5236_v16  ;;  %v5254_v36 = vrot.slane %v15455_v13, 5  ;;  %v11731_v21 = vrot.slane %v5164_v6, 9  ;;  %v5166_v13 = vld [vmem:[#allocation2 + $0x60] sm:$0xe]  ;;  %v11735_v35 = vrot.slane %v5168_v9, 9 }
 0x217   : > { %12810 = vmatmul.mubr.msk.bf16.gmra.mrb[20].mxu0 %vm1558_vm14, %v11706_v27  ;;  %v5227_v27 = vsel %vm14432_vm8, %v11727_v62, %v5226_v0  ;;  %v5244_v61 = vsel %vm14432_vm8, %v5242_v25, %v5243_v52  ;;  %v11745_v33 = vcombine.low %v5234_v26, %v5237_v39  ;;  %v5257_v0 = vrot.slane %v15504_v43, 5  ;;  %v18390_v43 = vld [vmem:[#allocation7_spill] sm:$0xff]  ;;  %v5170_v7 = vld [vmem:[#allocation2 + $0x90] sm:$0xe]  ;;  %v497_v9 = vld [vmem:[#allocation3 + $0xc] sm:$0x1] }
 0x218   : > { %12813 = vmatprep.mubr.msk.bf16.mxu0 %vm1558_vm14, %v11707_v46  ;;  %v5230_v46 = vsel %vm14432_vm8, %v5228_v8, %v5229_v57  ;;  %v11746_v45 = vcombine.low %v5241_v20, %v5244_v61  ;;  %v5256_v59 = vrot.slane %v5254_v36, 4  ;;  %v5255_v15 = vsel %vm14432_vm8, %v11731_v21, %v5254_v36  ;;  %v18389_v8 = vld [vmem:[#allocation6_spill] sm:$0xff]  ;;  %v5172_v36 = vld [vmem:[#allocation2 + $0xa8] sm:$0xe] }
 0x219   : > { %v11744_v47 = vcombine.low %v5227_v27, %v5230_v46  ;;  %v11733_v56 = vrot.slane %v5166_v13, 9  ;;  %v5271_v62 = vrot.slane %v15580_v40, 5  ;;  %v18391_v50 = vcombine.low %v18389_v8, %v18390_v43  ;;  %v18392_v46 = vld [vmem:[#allocation8_spill] sm:$0xff]  ;;  %v5175_v43 = vld [vmem:[#allocation2 + $0xcc] sm:$0xe] }
 0x21a   : > { %v5285_v40 = vrot.slane %v15631_v54, 5  ;;  %v18394_v24 = vcombine.low %v18392_v46, %v18393_v4  ;;  %v5289_v10 = vrot.slane %v15622_v58, 5  ;;  %v5296_v48 = vrot.slane %v15653_v37, 5  ;;  %v506_v4 = vld [vmem:[#allocation3 + $0x30] sm:$0x1] }
 0x21b   : > { %v5292_v25 = vrot.slane %v15662_v5, 5  ;;  %v11737_v52 = vrot.slane %v5170_v7, 9  ;;  %v5299_v39 = vrot.slane %v15672_v38, 5  ;;  %v18395_v58 = vcombine.low %v15402_v12, %v15406_v2 }
 0x21c   : > { %v5291_v63 = vrot.slane %v5289_v10, 4  ;;  %v5298_v26 = vrot.slane %v5296_v48, 4  ;;  %v5310_v38 = vrot.slane %v15681_v11, 5  ;;  %v11739_v6 = vrot.slane %v5172_v36, 9  ;;  %v5173_v11 = vld [vmem:[#allocation2 + $0xb4] sm:$0xe] }
 0x21d   : > { %v5297_v5 = vsel %vm14432_vm8, %v11737_v52, %v5296_v48  ;;  %v5317_v21 = vrot.slane %v15708_v22, 5  ;;  %v11740_v13 = vrot.slane %v5173_v11, 9  ;;  %v5331_v8 = vrot.slane %v15728_v31, 5  ;;  %v11810_v48 = vld [vmem:[%s18180_s4 + $0x4] sm:$0xf] }
 0x21e   : > { %v5293_v20 = vsel %vm14432_vm8, %v5291_v63, %v5292_v25  ;;  %v5300_v61 = vsel %vm14432_vm8, %v5298_v26, %v5299_v39  ;;  %13719 = vmatprep.subr.msk.bf16.mxu1 %vm6803_vm7, %v11810_v48  ;;  %v6805_v7 = vsel %vm6803_vm7, %v11810_v48, 0  ;;  %v512_v63 = vld [vmem:[#allocation3 + $0x48] sm:$0x1]  ;;  %v509_v52 = vld [vmem:[#allocation3 + $0x3c] sm:$0x1] }
 0x21f   : > { %12814 = vmatmul.mubr.msk.bf16.gmra.mrb[24].mxu0 %vm1558_vm14, %v11708_v29  ;;  %v5258_v29 = vsel %vm14432_vm8, %v5256_v59, %v5257_v0  ;;  %v11754_v2 = vcombine.low %v5297_v5, %v5300_v61  ;;  %v5311_v59 = vsel %vm14432_vm8, %v11739_v6, %v5310_v38  ;;  %v5318_v22 = vsel %vm14432_vm8, %v11740_v13, %v5317_v21  ;;  %v567_v39 = vld [vmem:[#allocation3 + $0x50] sm:$0x1]  ;;  %v515_v6 = vld [vmem:[#allocation3 + $0x54] sm:$0x1]  ;;  %v570_v13 = vld [vmem:[#allocation3 + $0x5c] sm:$0x1] }
 0x220   : > { %12817 = vmatprep.mubr.msk.bf16.mxu0 %vm1558_vm14, %v11709_v1  ;;  %v5268_v1 = vrot.slane %v15561_v3, 5  ;;  %v11748_v28 = vcombine.low %v5255_v15, %v5258_v29  ;;  %v5282_v3 = vrot.slane %v15599_v32, 5  ;;  %v5324_v15 = vrot.slane %v15712_v19, 5  ;;  %v5174_v29 = vld [vmem:[#allocation2 + $0xc0] sm:$0xe]  ;;  %12856 = vmatpush3.bf16.msra.mxu1 %v6805_v7 }
 0x221   : > { %v513_v25 = vsel %vm15586_vm6, 0, %v512_v63  ;;  %v510_v26 = vsel %vm15586_vm6, 0, %v509_v52  ;;  %v530_v7 = vld [vmem:[#allocation3 + $0x90] sm:$0x1] }
 0x222   : > { %v5270_v55 = vrot.slane %v5268_v1, 4  ;;  %v5269_v57 = vsel %vm14432_vm8, %v11733_v56, %v5268_v1  ;;  %v5284_v27 = vrot.slane %v5282_v3, 4  ;;  %v11741_v56 = vrot.slane %v5174_v29, 9  ;;  %514 = vst [vmem:[#allocation3 + $0x48] sm:$0x1] %v513_v25 }
 0x223   : > { %511 = vst [vmem:[#allocation3 + $0x3c] sm:$0x1] %v510_v26  ;;  %v6272_v29 = vld [vmem:[#allocation3 + $0x4] sm:$0xf]  ;;  %v585_v25 = vld [vmem:[#allocation3 + $0x98] sm:$0x1] }
 0x224   : > { %v5272_v49 = vsel %vm14432_vm8, %v5270_v55, %v5271_v62  ;;  %v5286_v32 = vsel %vm14432_vm8, %v5284_v27, %v5285_v40  ;;  %v5326_v55 = vrot.slane %v5324_v15, 4  ;;  %v5327_v62 = vrot.slane %v15735_v34, 5  ;;  %v552_v40 = vld [vmem:[#allocation3 + $0x14] sm:$0x1]  ;;  %v582_v26 = vld [vmem:[#allocation3 + $0x8c] sm:$0x1] }
 0x225   : > { %v11750_v53 = vcombine.low %v5269_v57, %v5272_v49  ;;  %v5334_v57 = vrot.slane %v15748_v14, 5  ;;  %v18396_v14 = vmov 0  ;;  %v553_v46 = vsel %vm15869_vm3, 0, %v552_v40 }
 0x226   : > { %v5328_v34 = vsel %vm14432_vm8, %v5326_v55, %v5327_v62  ;;  %v18397_v14 = vsel %vm15869_vm3, 4294967295, %v18396_v14  ;;  %554 = vst [vmem:[#allocation3 + $0x14] sm:$0x1] %v553_v46  ;;  %v6334_v55 = vshrl.u32 %v6272_v29, 16  ;;  %v571_v62 = vsel %vm15869_vm3, 0, %v570_v13 }
 0x227   : > { %12818 = vmatmul.mubr.msk.bf16.gmra.mrb[28].mxu0 %vm1558_vm14, %v11710_v18  ;;  %v5283_v18 = vsel %vm14432_vm8, %v11735_v35, %v5282_v3  ;;  %18398 = vst [vmem:[#allocation11_spill] sm:$0xff] %v18397_v14  ;;  %v555_v35 = vld [vmem:[#allocation3 + $0x20] sm:$0x1]  ;;  %572 = vst [vmem:[#allocation3 + $0x5c] sm:$0x1] %v571_v62  ;;  %v586_v52 = vsel %vm15869_vm3, 0, %v585_v25 }
 0x228   : > { %12823 = vmatprep.mubr.msk.bf16.mxu0 %vm1558_vm14, %v11744_v47  ;;  %v5169_v47 = vld [vmem:[#allocation2 + $0x84] sm:$0xe]  ;;  %v11752_v54 = vcombine.low %v5283_v18, %v5286_v32  ;;  %v556_v27 = vsel %vm15869_vm3, 0, %v555_v35  ;;  %v561_v32 = vld [vmem:[#allocation3 + $0x38] sm:$0x1] }
 0x229   : > { %v11736_v16 = vrot.slane %v5169_v47, 9  ;;  %557 = vst [vmem:[#allocation3 + $0x20] sm:$0x1] %v556_v27  ;;  %v562_v47 = vsel %vm15869_vm3, 0, %v561_v32  ;;  %v579_v27 = vld [vmem:[#allocation3 + $0x80] sm:$0x1] }
 0x22a   : > { %563 = vst [vmem:[#allocation3 + $0x38] sm:$0x1] %v562_v47  ;;  %v580_v46 = vsel %vm15869_vm3, 0, %v579_v27  ;;  %v15940_v47 = vld [vmem:[%s18180_s4] sm:$0xf] }
 0x22b   : > { %v5290_v37 = vsel %vm14432_vm8, %v11736_v16, %v5289_v10  ;;  %v503_v10 = vld [vmem:[#allocation3 + $0x24] sm:$0x1]  ;;  %581 = vst [vmem:[#allocation3 + $0x80] sm:$0x1] %v580_v46  ;;  %13720 = vmatprep.subr.msk.bf16.mxu1 %vm6803_vm7, %v15940_v47  ;;  %587 = vst [vmem:[#allocation3 + $0x98] sm:$0x1] %v586_v52 }
 0x22c   : > { %v11753_v12 = vcombine.low %v5290_v37, %v5293_v20  ;;  %v504_v18 = vsel %vm15586_vm6, 0, %v503_v10  ;;  %v568_v37 = vsel %vm15869_vm3, 0, %v567_v39  ;;  %v564_v20 = vld [vmem:[#allocation3 + $0x44] sm:$0x1]  ;;  %v542_v13 = vld [vmem:[#allocation3 + $0xc0] sm:$0x1] }
 0x22d   : > { %505 = vst [vmem:[#allocation3 + $0x24] sm:$0x1] %v504_v18  ;;  %569 = vst [vmem:[#allocation3 + $0x50] sm:$0x1] %v568_v37  ;;  %v565_v61 = vsel %vm15869_vm3, 0, %v564_v20 }
 0x22e   : > { %566 = vst [vmem:[#allocation3 + $0x44] sm:$0x1] %v565_v61  ;;  %v536_v61 = vld [vmem:[#allocation3 + $0xa8] sm:$0x1] }
 0x22f   : > { %12824 = vmatmul.mubr.msk.bf16.vlgmr.msra.gmra.mrb[0].mxu0 %vm1558_vm14, %v11745_v33  ;;  %v5312_v33 = vrot.slane %v5310_v38, 4  ;;  %v549_v38 = vld [vmem:[#allocation3 + $0x8] sm:$0x1] }
 0x230   : > { %12827 = vmatprep.mubr.msk.bf16.mxu0 %vm1558_vm14, %v11746_v45  ;;  %v5313_v45 = vrot.slane %v15703_v42, 5  ;;  %v5320_v42 = vrot.slane %v15726_v60, 5  ;;  %v5325_v60 = vsel %vm14432_vm8, %v11741_v56, %v5324_v15  ;;  %v550_v36 = vsel %vm15869_vm3, 0, %v549_v38  ;;  %v597_v62 = vld [vmem:[#allocation3 + $0xc8] sm:$0x1] }
 0x231   : > { %v11758_v23 = vcombine.low %v5325_v60, %v5328_v34  ;;  %551 = vst [vmem:[#allocation3 + $0x8] sm:$0x1] %v550_v36  ;;  %v6330_v56 = vshll.u32 %v6272_v29, 16  ;;  %v6336_v34 = vrot.slane %v6334_v55, 4  ;;  %v537_v38 = vsel %vm15586_vm6, 0, %v536_v61 }
 0x232   : > { %v5314_v0 = vsel %vm14432_vm8, %v5312_v33, %v5313_v45  ;;  %v516_v33 = vsel %vm15586_vm6, 0, %v515_v6  ;;  %v573_v45 = vld [vmem:[#allocation3 + $0x68] sm:$0x1]  ;;  %538 = vst [vmem:[#allocation3 + $0xa8] sm:$0x1] %v537_v38 }
 0x233   : > { %v11756_v1 = vcombine.low %v5311_v59, %v5314_v0  ;;  %517 = vst [vmem:[#allocation3 + $0x54] sm:$0x1] %v516_v33  ;;  %v574_v59 = vsel %vm15869_vm3, 0, %v573_v45  ;;  %v6332_v60 = vrot.slane %v6330_v56, 5  ;;  %v533_v36 = vld [vmem:[#allocation3 + $0x9c] sm:$0x1] }
 0x234   : > { %575 = vst [vmem:[#allocation3 + $0x68] sm:$0x1] %v574_v59  ;;  %v588_v33 = vld [vmem:[#allocation3 + $0xa4] sm:$0x1]  ;;  %v539_v56 = vld [vmem:[#allocation3 + $0xb4] sm:$0x1] }
 0x235   : > { %v589_v59 = vsel %vm15869_vm3, 0, %v588_v33  ;;  %v540_v55 = vsel %vm15586_vm6, 0, %v539_v56  ;;  %v6166_v56 = vld [vmem:[#allocation3 + $0x18] sm:$0xf] }
 0x236   : > { %590 = vst [vmem:[#allocation3 + $0xa4] sm:$0x1] %v589_v59  ;;  %541 = vst [vmem:[#allocation3 + $0xb4] sm:$0x1] %v540_v55 }
 0x237   : > { %12828 = vmatmul.mubr.msk.bf16.gmra.mrb[4].mxu0 %vm1558_vm14, %v18391_v50  ;;  %v5333_v50 = vrot.slane %v5331_v8, 4 }
 0x238   : > { %12831 = vmatprep.mubr.msk.bf16.mxu0 %vm1558_vm14, %v11748_v28  ;;  %v5319_v28 = vrot.slane %v5317_v21, 4 }
 0x239   : > { %v5335_v49 = vsel %vm14432_vm8, %v5333_v50, %v5334_v57 }
 0x23a   : > { %v5321_v19 = vsel %vm14432_vm8, %v5319_v28, %v5320_v42 }
 0x23b   : > { %v11757_v51 = vcombine.low %v5318_v22, %v5321_v19  ;;  %v6304_v19 = vld [vmem:[#allocation3 + $0x8] sm:$0x1] }
 0x23f   : > { %12832 = vmatmul.mubr.msk.bf16.gmra.mrb[8].mxu0 %vm1558_vm14, %v18394_v24  ;;  %v507_v24 = vsel %vm15586_vm6, 0, %v506_v4 }
 0x240   : > { %12835 = vmatprep.mubr.msk.bf16.mxu0 %vm1558_vm14, %v11750_v53  ;;  %v498_v53 = vsel %vm15586_vm6, 0, %v497_v9  ;;  %508 = vst [vmem:[#allocation3 + $0x30] sm:$0x1] %v507_v24  ;;  %v576_v24 = vld [vmem:[#allocation3 + $0x74] sm:$0x1] }
 0x241   : > { %499 = vst [vmem:[#allocation3 + $0xc] sm:$0x1] %v498_v53  ;;  %v577_v18 = vsel %vm15869_vm3, 0, %v576_v24 }
 0x242   : > { %578 = vst [vmem:[#allocation3 + $0x74] sm:$0x1] %v577_v18 }
 0x247   : > { %12836 = vmatmul.mubr.msk.bf16.gmra.mrb[12].mxu0 %vm1558_vm14, %v18395_v58  ;;  %v494_v58 = vld [vmem:[#allocation3] sm:$0x1] }
 0x248   : > { %12839 = vmatprep.mubr.msk.bf16.mxu0 %vm1558_vm14, %v11752_v54  ;;  %v558_v54 = vld [vmem:[#allocation3 + $0x2c] sm:$0x1]  ;;  %v495_v5 = vsel %vm15586_vm6, 0, %v494_v58  ;;  %v583_v58 = vsel %vm15869_vm3, 0, %v582_v26 }
 0x249   : > { %v559_v16 = vsel %vm15869_vm3, 0, %v558_v54  ;;  %496 = vst [vmem:[#allocation3] sm:$0x1] %v495_v5  ;;  %v531_v54 = vsel %vm15586_vm6, 0, %v530_v7  ;;  %584 = vst [vmem:[#allocation3 + $0x8c] sm:$0x1] %v583_v58 }
 0x24a   : > { %560 = vst [vmem:[#allocation3 + $0x2c] sm:$0x1] %v559_v16  ;;  %532 = vst [vmem:[#allocation3 + $0x90] sm:$0x1] %v531_v54  ;;  %v527_v16 = vld [vmem:[#allocation3 + $0x84] sm:$0x1] }
 0x24b   : > { %v528_v63 = vsel %vm15586_vm6, 0, %v527_v16  ;;  %v16006_v16 = vsel %vm6803_vm7, %v15940_v47, 0 }
 0x24c   : > { %529 = vst [vmem:[#allocation3 + $0x84] sm:$0x1] %v528_v63 }
 0x24f   : > { %12840 = vmatmul.mubr.msk.bf16.gmra.mrb[16].mxu0 %vm1558_vm14, %v11753_v12  ;;  %v518_v12 = vld [vmem:[#allocation3 + $0x60] sm:$0x1] }
 0x250   : > { %12843 = vmatprep.mubr.msk.bf16.mxu0 %vm1558_vm14, %v11754_v2  ;;  %v519_v2 = vsel %vm15586_vm6, 0, %v518_v12  ;;  %v6271_v11 = vld [vmem:[#allocation3] sm:$0xf]  ;;  %v591_v12 = vld [vmem:[#allocation3 + $0xb0] sm:$0x1] }
 0x251   : > { %520 = vst [vmem:[#allocation3 + $0x60] sm:$0x1] %v519_v2  ;;  %v6324_v42 = vshll.u32 %v6271_v11, 16  ;;  %v534_v2 = vsel %vm15586_vm6, 0, %v533_v36  ;;  %v592_v6 = vsel %vm15869_vm3, 0, %v591_v12 }
 0x252   : > { %535 = vst [vmem:[#allocation3 + $0x9c] sm:$0x1] %v534_v2  ;;  %593 = vst [vmem:[#allocation3 + $0xb0] sm:$0x1] %v592_v6 }
 0x257   : > { %12844 = vmatmul.mubr.msk.bf16.gmra.mrb[20].mxu0 %vm1558_vm14, %v11755_v41  ;;  %v11742_v41 = vrot.slane %v5175_v43, 9  ;;  %v6340_v43 = vshll.u32 %v6304_v19, 16  ;;  %v598_v19 = vsel %vm15869_vm3, 0, %v597_v62 }
 0x258   : > { %12847 = vmatprep.mubr.msk.bf16.mxu0 %vm1558_vm14, %v11756_v1  ;;  %v6321_v1 = vshrl.u32 %v6271_v11, 16  ;;  %599 = vst [vmem:[#allocation3 + $0xc8] sm:$0x1] %v598_v19 }
 0x259   : > { %v5332_v31 = vsel %vm14432_vm8, %v11742_v41, %v5331_v8  ;;  %v6326_v8 = vrot.slane %v6324_v42, 5  ;;  %v6342_v41 = vrot.slane %v6340_v43, 5  ;;  %v543_v42 = vsel %vm15586_vm6, 0, %v542_v13  ;;  %v15994_v43 = vld [vmem:[%s18179_s3] ss:$0 sm:$0xff] }
 0x25a   : > { %v11759_v3 = vcombine.low %v5332_v31, %v5335_v49  ;;  %v6323_v22 = vrot.slane %v6321_v1, 4  ;;  %v524_v31 = vld [vmem:[#allocation3 + $0x78] sm:$0x1]  ;;  %544 = vst [vmem:[#allocation3 + $0xc0] sm:$0x1] %v543_v42 }
 0x25b   : > { %v525_v49 = vsel %vm15586_vm6, 0, %v524_v31 }
 0x25c   : > { %526 = vst [vmem:[#allocation3 + $0x78] sm:$0x1] %v525_v49 }
 0x25f   : > { %12848 = vmatmul.mubr.msk.bf16.gmra.mrb[24].mxu0 %vm1558_vm14, %v11757_v51  ;;  %v6327_v51 = vor.u32 %v6326_v8, %v6323_v22  ;;  %v594_v22 = vld [vmem:[#allocation3 + $0xbc] sm:$0x1] }
 0x260   : > { %12851 = vmatprep.mubr.msk.bf16.mxu0 %vm1558_vm14, %v11758_v23  ;;  %v6337_v23 = vor.u32 %v6336_v34, %v6332_v60  ;;  %v595_v8 = vsel %vm15869_vm3, 0, %v594_v22 }
 0x261   : > { %v6328_v50 = vrot.slane %v6327_v51, 4  ;;  %596 = vst [vmem:[#allocation3 + $0xbc] sm:$0x1] %v595_v8 }
 0x262   : > { %v6338_v57 = vrot.slane %v6337_v23, 4 }
 0x263   : > { %v6333_v9 = vsel %vm14107_vm13, %v6328_v50, %v6332_v60  ;;  %v15989_v60 = vld [vmem:[%s18178_s2] ss:$0 sm:$0xff] }
 0x264   : > { %v6343_v53 = vsel %vm14107_vm13, %v6338_v57, %v6342_v41 }
 0x265   : > { %v11811_v40 = vcombine.low %v6333_v9, %v6343_v53 }
 0x267   : > { %12852 = vmatmul.mubr.msk.bf16.gmra.mrb[28].mxu0 %vm1558_vm14, %v11759_v3  ;;  %v521_v3 = vld [vmem:[#allocation3 + $0x6c] sm:$0x1]  ;;  %12857 = vmatprep.mubr.msk.bf16.mxu1 %vm6754_vm9, %v11811_v40 }
 0x268   : > { %v522_v35 = vsel %vm15586_vm6, 0, %v521_v3 }
 0x269   : > { %523 = vst [vmem:[#allocation3 + $0x6c] sm:$0x1] %v522_v35 }
 0x2a1   : > { %v15906_v21 = vpop.f32.mrb[0].mxu1 }
 0x2a2   : > { %v15910_v0 = vpop.f32.mrb[1].mxu1 }
 0x2a3   : > { %v15912_v15 = vpop.f32.mrb[2].mxu1 }
 0x2a4   : > { %v15914_v28 = vpop.f32.mrb[3].mxu1 }
 0x2ab   : > { %v15928_v4 = vpop.f32.mrb[4].mxu1 }
 0x2ac   : > { %v15931_v10 = vpop.f32.mrb[5].mxu1 }
 0x2ad   : > { %v15935_v32 = vpop.f32.mrb[6].mxu1 }
 0x2ae   : > { %v15942_v48 = vpop.f32.mrb[7].mxu1 }
 0x2b5   : > { %v15952_v39 = vpop.f32.mrb[8].mxu1 }
 0x2b6   : > { %v15956_v37 = vpop.f32.mrb[9].mxu1 }
 0x2b7   : > { %v15958_v20 = vpop.f32.mrb[10].mxu1 }
 0x2b8   : > { %v15960_v5 = vpop.f32.mrb[11].mxu1 }
 0x2bd   : > { %v15968_v45 = vpop.f32.mrb[12].mxu1 }
 0x2be   : > { %v15972_v11 = vpop.f32.mrb[13].mxu1 }
 0x2bf   : > { %v15974_v29 = vpop.f32.mrb[14].mxu1 }
 0x2c0   : > { %v15976_v1 = vpop.f32.mrb[15].mxu1 }
 0x302   : > { %v12825_v34 = vpop.f32.mrb[0].mxu0 }
 0x303   : > { %v5639_v51 = vmul.f32 %v12825_v34, %v15989_v60  ;;  %v5471_v23 = vpop.f32.mrb[1].mxu0 }
 0x304   : > { %v5637_v41 = vmul.f32 %v15989_v60, %v5471_v23  ;;  %v12826_v50 = vpop.f32.mrb[2].mxu0 }
 0x305   : > { %v5678_v57 = vadd.f32 %v15994_v43, %v5639_v51  ;;  %v5640_v31 = vmul.f32 %v12826_v50, %v15989_v60  ;;  %v5474_v49 = vpop.f32.mrb[3].mxu0  ;;  %v6159_v51 = vld [vmem:[#allocation3 + $0xc] sm:$0xf] }
 0x306   : > { %v5676_v3 = vadd.f32 %v15994_v43, %v5637_v41  ;;  %v5638_v9 = vmul.f32 %v15989_v60, %v5474_v49 }
 0x307   : > { %v5710_v53 = vmax.f32 %v5678_v57, 0.0  ;;  %v5679_v35 = vadd.f32 %v15994_v43, %v5640_v31  ;;  %v6170_v31 = vld [vmem:[#allocation3 + $0x20] sm:$0x1] }
 0x308   : > { %v5708_v27 = vmax.f32 %v5676_v3, 0.0  ;;  %v5677_v40 = vadd.f32 %v15994_v43, %v5638_v9 }
 0x309   : > { %v12196_v46 = vpack.c.bf16 %v5710_v53, %v5710_v53  ;;  %v5711_v24 = vmax.f32 %v5679_v35, 0.0 }
 0x30a   : > { %v12194_v18 = vpack.c.bf16 %v5708_v27, %v5708_v27  ;;  %v5709_v7 = vmax.f32 %v5677_v40, 0.0  ;;  %v12829_v54 = vpop.f32.mrb[4].mxu0  ;;  %v6163_v27 = vld [vmem:[#allocation3 + $0x14] sm:$0x1] }
 0x30b   : > { %v5854_v63 = vshrl.u32 %v12196_v46, 16  ;;  %v5857_v25 = vshll.u32 %v12196_v46, 16  ;;  %v12197_v52 = vpack.c.bf16 %v5711_v24, %v5711_v24  ;;  %v5643_v26 = vmul.f32 %v12829_v54, %v15989_v60  ;;  %v5487_v58 = vpop.f32.mrb[5].mxu0 }
 0x30c   : > { %v5837_v61 = vshrl.u32 %v12194_v18, 16  ;;  %v5840_v38 = vshll.u32 %v12194_v18, 16  ;;  %v12195_v36 = vpack.c.bf16 %v5709_v7, %v5709_v7  ;;  %v5641_v12 = vmul.f32 %v15989_v60, %v5487_v58  ;;  %v12830_v2 = vpop.f32.mrb[6].mxu0 }
 0x30d   : > { %v5856_v6 = vrot.slane %v5854_v63, 7  ;;  %v5862_v33 = vshrl.u32 %v12197_v52, 16  ;;  %v5865_v59 = vshll.u32 %v12197_v52, 16  ;;  %v5682_v13 = vadd.f32 %v15994_v43, %v5643_v26  ;;  %v5490_v42 = vpop.f32.mrb[7].mxu0 }
 0x30e   : > { %v5839_v55 = vrot.slane %v5837_v61, 7  ;;  %v5845_v62 = vshrl.u32 %v12195_v36, 16  ;;  %v5848_v22 = vshll.u32 %v12195_v36, 16  ;;  %v5680_v19 = vadd.f32 %v15994_v43, %v5641_v12 }
 0x30f   : > { %v5859_v8 = vor.u32 %v5857_v25, %v5856_v6  ;;  %v5860_v34 = vrot.slane %v5856_v6, 4  ;;  %v5864_v23 = vrot.slane %v5862_v33, 7  ;;  %v5714_v41 = vmax.f32 %v5682_v13, 0.0 }
 0x310   : > { %v5842_v50 = vor.u32 %v5840_v38, %v5839_v55  ;;  %v5843_v57 = vrot.slane %v5839_v55, 4  ;;  %v5847_v49 = vrot.slane %v5845_v62, 7  ;;  %v5712_v3 = vmax.f32 %v5680_v19, 0.0 }
 0x311   : > { %v6167_v9 = vsel %vm16013_vm10, %v5859_v8, %v6166_v56  ;;  %v5867_v53 = vor.u32 %v5865_v59, %v5864_v23  ;;  %v5869_v35 = vrot.slane %v5864_v23, 4  ;;  %v12200_v40 = vpack.c.bf16 %v5714_v41, %v5714_v41 }
 0x312   : > { %6168 = vst [vmem:[#allocation3 + $0x18] sm:$0xf] %v6167_v9  ;;  %v6160_v46 = vsel %vm16013_vm10, %v5842_v50, %v6159_v51  ;;  %v5850_v24 = vor.u32 %v5848_v22, %v5847_v49  ;;  %v5852_v18 = vrot.slane %v5847_v49, 4  ;;  %v12198_v7 = vpack.c.bf16 %v5712_v3, %v5712_v3  ;;  %v12833_v54 = vpop.f32.mrb[8].mxu0  ;;  %v6180_v22 = vld [vmem:[#allocation3 + $0x30] sm:$0xf] }
 0x313   : > { %6161 = vst [vmem:[#allocation3 + $0xc] sm:$0xf] %v6160_v46  ;;  %v5868_v25 = vsel %vm14080_vm11, %v5860_v34, %v5867_v53  ;;  %v6171_v52 = vsel %vm15586_vm6, %v5869_v35, %v6170_v31  ;;  %v5888_v26 = vshrl.u32 %v12200_v40, 16  ;;  %v5891_v58 = vshll.u32 %v12200_v40, 16  ;;  %v5503_v61 = vpop.f32.mrb[9].mxu0 }
 0x314   : > { %6169 = vst.msk [vmem:[#allocation3 + $0x1c] sm:$0xf] %vm483_vm5, %v5868_v25  ;;  %6172 = vst [vmem:[#allocation3 + $0x20] sm:$0x1] %v6171_v52  ;;  %v5851_v38 = vsel %vm14080_vm11, %v5843_v57, %v5850_v24  ;;  %v6164_v36 = vsel %vm15586_vm6, %v5852_v18, %v6163_v27  ;;  %v5871_v12 = vshrl.u32 %v12198_v7, 16  ;;  %v5874_v6 = vshll.u32 %v12198_v7, 16 }
 0x315   : > { %v12834_v33 = vpop.f32.mrb[10].mxu0  ;;  %6162 = vst.msk [vmem:[#allocation3 + $0x10] sm:$0xf] %vm483_vm5, %v5851_v38  ;;  %6165 = vst [vmem:[#allocation3 + $0x14] sm:$0x1] %v6164_v36  ;;  %v16032_v59 = vrot.slane %v5888_v26, 7  ;;  %v5644_v13 = vmul.f32 %v12830_v2, %v15989_v60  ;;  %v5642_v56 = vmul.f32 %v15989_v60, %v5490_v42  ;;  %v5647_v55 = vmul.f32 %v12833_v54, %v15989_v60 }
 0x316   : > { %v5506_v62 = vpop.f32.mrb[11].mxu0  ;;  %v16037_v19 = vrot.slane %v5871_v12, 7  ;;  %v5645_v8 = vmul.f32 %v15989_v60, %v5503_v61  ;;  %v5648_v34 = vmul.f32 %v12834_v33, %v15989_v60  ;;  %v6173_v50 = vld [vmem:[#allocation3 + $0x24] sm:$0xf] }
 0x317   : > { %v5646_v51 = vmul.f32 %v15989_v60, %v5506_v62  ;;  %v5893_v23 = vor.u32 %v5891_v58, %v16032_v59  ;;  %v5894_v41 = vrot.slane %v16032_v59, 4  ;;  %v5683_v2 = vadd.f32 %v15994_v43, %v5644_v13  ;;  %v6184_v62 = vld [vmem:[#allocation3 + $0x38] sm:$0x1] }
 0x318   : > { %v5681_v42 = vadd.f32 %v15994_v43, %v5642_v56  ;;  %v5876_v57 = vor.u32 %v5874_v6, %v16037_v19  ;;  %v5877_v31 = vrot.slane %v16037_v19, 4  ;;  %v5686_v49 = vadd.f32 %v15994_v43, %v5647_v55 }
 0x319   : > { %v5684_v3 = vadd.f32 %v15994_v43, %v5645_v8  ;;  %v6181_v9 = vsel %vm16013_vm10, %v5893_v23, %v6180_v22  ;;  %v5715_v53 = vmax.f32 %v5683_v2, 0.0  ;;  %v5687_v27 = vadd.f32 %v15994_v43, %v5648_v34  ;;  %v6177_v22 = vld [vmem:[#allocation3 + $0x2c] sm:$0x1]  ;;  %v6194_v2 = vld [vmem:[#allocation3 + $0x48] sm:$0xf] }
 0x31a   : > { %v5713_v35 = vmax.f32 %v5681_v42, 0.0  ;;  %6182 = vst [vmem:[#allocation3 + $0x30] sm:$0xf] %v6181_v9  ;;  %v6174_v40 = vsel %vm16013_vm10, %v5876_v57, %v6173_v50  ;;  %v5718_v46 = vmax.f32 %v5686_v49, 0.0  ;;  %v5685_v18 = vadd.f32 %v15994_v43, %v5646_v51  ;;  %v12837_v7 = vpop.f32.mrb[12].mxu0 }
 0x31b   : > { %v5716_v24 = vmax.f32 %v5684_v3, 0.0  ;;  %6175 = vst [vmem:[#allocation3 + $0x24] sm:$0xf] %v6174_v40  ;;  %v12201_v54 = vpack.c.bf16 %v5715_v53, %v5715_v53  ;;  %v5719_v52 = vmax.f32 %v5687_v27, 0.0  ;;  %v5651_v26 = vmul.f32 %v12837_v7, %v15989_v60  ;;  %v5519_v58 = vpop.f32.mrb[13].mxu0 }
 0x31c   : > { %v12199_v25 = vpack.c.bf16 %v5713_v35, %v5713_v35  ;;  %v12204_v61 = vpack.c.bf16 %v5718_v46, %v5718_v46  ;;  %v5717_v36 = vmax.f32 %v5685_v18, 0.0  ;;  %v5649_v12 = vmul.f32 %v15989_v60, %v5519_v58  ;;  %v12838_v6 = vpop.f32.mrb[14].mxu0 }
 0x31d   : > { %v12202_v38 = vpack.c.bf16 %v5716_v24, %v5716_v24  ;;  %v5896_v33 = vshrl.u32 %v12201_v54, 16  ;;  %v5899_v59 = vshll.u32 %v12201_v54, 16  ;;  %v5522_v55 = vpop.f32.mrb[15].mxu0  ;;  %v12205_v42 = vpack.c.bf16 %v5719_v52, %v5719_v52  ;;  %v6187_v24 = vld [vmem:[#allocation3 + $0x3c] sm:$0xf] }
 0x31e   : > { %v5879_v13 = vshrl.u32 %v12199_v25, 16  ;;  %v5882_v56 = vshll.u32 %v12199_v25, 16  ;;  %v5922_v19 = vshrl.u32 %v12204_v61, 16  ;;  %v5925_v8 = vshll.u32 %v12204_v61, 16 }
 0x31f   : > { %v5905_v34 = vshrl.u32 %v12202_v38, 16  ;;  %v5908_v51 = vshll.u32 %v12202_v38, 16  ;;  %v5898_v23 = vrot.slane %v5896_v33, 7  ;;  %v12203_v57 = vpack.c.bf16 %v5717_v36, %v5717_v36 }
 0x320   : > { %v5881_v50 = vrot.slane %v5879_v13, 7  ;;  %v5924_v49 = vrot.slane %v5922_v19, 7  ;;  %v5690_v9 = vadd.f32 %v15994_v43, %v5651_v26  ;;  %v5688_v53 = vadd.f32 %v15994_v43, %v5649_v12 }
 0x321   : > { %v5907_v3 = vrot.slane %v5905_v34, 7  ;;  %v5901_v35 = vor.u32 %v5899_v59, %v5898_v23  ;;  %v5903_v27 = vrot.slane %v5898_v23, 4  ;;  %v5930_v33 = vshrl.u32 %v12205_v42, 16 }
 0x322   : > { %v5884_v40 = vor.u32 %v5882_v56, %v5881_v50  ;;  %v5886_v46 = vrot.slane %v5881_v50, 4  ;;  %v5927_v18 = vor.u32 %v5925_v8, %v5924_v49  ;;  %v5928_v7 = vrot.slane %v5924_v49, 4  ;;  %v12841_v58 = vpop.f32.mrb[16].mxu0  ;;  %v6198_v50 = vld [vmem:[#allocation3 + $0x50] sm:$0x1] }
 0x323   : > { %v5910_v54 = vor.u32 %v5908_v51, %v5907_v3  ;;  %v5911_v25 = vrot.slane %v5907_v3, 4  ;;  %v5902_v52 = vsel %vm14080_vm11, %v5894_v41, %v5901_v35  ;;  %v6185_v61 = vsel %vm15586_vm6, %v5903_v27, %v6184_v62  ;;  %v5535_v36 = vpop.f32.mrb[17].mxu0 }
 0x324   : > { %v5885_v26 = vsel %vm14080_vm11, %v5877_v31, %v5884_v40  ;;  %v6178_v38 = vsel %vm15586_vm6, %v5886_v46, %v6177_v22  ;;  %6183 = vst.msk [vmem:[#allocation3 + $0x34] sm:$0xf] %vm483_vm5, %v5902_v52  ;;  %6186 = vst [vmem:[#allocation3 + $0x38] sm:$0x1] %v6185_v61  ;;  %v6195_v12 = vsel %vm16013_vm10, %v5927_v18, %v6194_v2  ;;  %v5933_v59 = vshll.u32 %v12205_v42, 16  ;;  %v12842_v13 = vpop.f32.mrb[18].mxu0 }
 0x325   : > { %6176 = vst.msk [vmem:[#allocation3 + $0x28] sm:$0xf] %vm483_vm5, %v5885_v26  ;;  %6179 = vst [vmem:[#allocation3 + $0x2c] sm:$0x1] %v6178_v38  ;;  %v6188_v41 = vsel %vm16013_vm10, %v5910_v54, %v6187_v24  ;;  %v5913_v31 = vshrl.u32 %v12203_v57, 16  ;;  %v5916_v56 = vshll.u32 %v12203_v57, 16  ;;  %v5652_v34 = vmul.f32 %v12838_v6, %v15989_v60 }
 0x326   : > { %6196 = vst [vmem:[#allocation3 + $0x48] sm:$0xf] %v6195_v12  ;;  %6189 = vst [vmem:[#allocation3 + $0x3c] sm:$0xf] %v6188_v41  ;;  %v5722_v62 = vmax.f32 %v5690_v9, 0.0  ;;  %v5720_v22 = vmax.f32 %v5688_v53, 0.0  ;;  %v5650_v51 = vmul.f32 %v15989_v60, %v5522_v55  ;;  %v13197_v23 = vadd.f32 %v12841_v58, %v15906_v21 }
 0x327   : > { %v16074_v19 = vpop.f32.mrb[19].mxu0  ;;  %v5932_v8 = vrot.slane %v5930_v33, 7  ;;  %v5915_v2 = vrot.slane %v5913_v31, 7  ;;  %v13198_v3 = vadd.f32 %v5535_v36, %v15910_v0  ;;  %v6191_v57 = vld [vmem:[#allocation3 + $0x44] sm:$0x1]  ;;  %v5691_v9 = vadd.f32 %v15994_v43, %v5652_v34 }
 0x328   : > { %v12208_v49 = vpack.c.bf16 %v5722_v62, %v5722_v62  ;;  %v12206_v42 = vpack.c.bf16 %v5720_v22, %v5720_v22  ;;  %v5689_v53 = vadd.f32 %v15994_v43, %v5650_v51  ;;  %v5655_v41 = vmul.f32 %v13197_v23, %v15989_v60 }
 0x329   : > { %v5935_v35 = vor.u32 %v5933_v59, %v5932_v8  ;;  %v5937_v27 = vrot.slane %v5932_v8, 4  ;;  %v5918_v40 = vor.u32 %v5916_v56, %v5915_v2  ;;  %v5920_v46 = vrot.slane %v5915_v2, 4  ;;  %v6201_v56 = vld [vmem:[#allocation3 + $0x54] sm:$0xf] }
 0x32a   : > { %v5956_v6 = vshrl.u32 %v12208_v49, 16  ;;  %v5959_v24 = vshll.u32 %v12208_v49, 16  ;;  %v5939_v18 = vshrl.u32 %v12206_v42, 16  ;;  %v5942_v54 = vshll.u32 %v12206_v42, 16  ;;  %v16086_v0 = vpop.f32.mrb[20].mxu0 }
 0x32b   : > { %v5936_v21 = vsel %vm14080_vm11, %v5928_v7, %v5935_v35  ;;  %v6199_v55 = vsel %vm15586_vm6, %v5937_v27, %v6198_v50  ;;  %v5919_v58 = vsel %vm14080_vm11, %v5911_v25, %v5918_v40  ;;  %v6192_v52 = vsel %vm15586_vm6, %v5920_v46, %v6191_v57  ;;  %v16093_v38 = vpop.f32.mrb[21].mxu0  ;;  %v6208_v7 = vld [vmem:[#allocation3 + $0x60] sm:$0xf]  ;;  %v6273_v35 = vld [vmem:[#allocation3 + $0xc] sm:$0xf] }
 0x32c   : > { %6197 = vst.msk [vmem:[#allocation3 + $0x4c] sm:$0xf] %vm483_vm5, %v5936_v21  ;;  %6200 = vst [vmem:[#allocation3 + $0x50] sm:$0x1] %v6199_v55  ;;  %v5958_v61 = vrot.slane %v5956_v6, 7  ;;  %v5723_v26 = vmax.f32 %v5691_v9, 0.0  ;;  %v5653_v33 = vmul.f32 %v13198_v3, %v15989_v60  ;;  %v13199_v22 = vadd.f32 %v12842_v13, %v15912_v15 }
 0x32d   : > { %6190 = vst.msk [vmem:[#allocation3 + $0x40] sm:$0xf] %vm483_vm5, %v5919_v58  ;;  %6193 = vst [vmem:[#allocation3 + $0x44] sm:$0x1] %v6192_v52  ;;  %v5941_v36 = vrot.slane %v5939_v18, 7  ;;  %v5721_v12 = vmax.f32 %v5689_v53, 0.0  ;;  %v5694_v2 = vadd.f32 %v15994_v43, %v5655_v41  ;;  %v13200_v46 = vadd.f32 %v16074_v19, %v15914_v28 }
 0x32e   : > { %v16098_v59 = vpop.f32.mrb[22].mxu0  ;;  %v5961_v25 = vor.u32 %v5959_v24, %v5958_v61  ;;  %v5962_v31 = vrot.slane %v5958_v61, 4  ;;  %v12209_v62 = vpack.c.bf16 %v5723_v26, %v5723_v26  ;;  %v5692_v3 = vadd.f32 %v15994_v43, %v5653_v33  ;;  %v6212_v6 = vld [vmem:[#allocation3 + $0x68] sm:$0x1]  ;;  %v6205_v61 = vld [vmem:[#allocation3 + $0x5c] sm:$0x1] }
 0x32f   : > { %v16101_v8 = vpop.f32.mrb[23].mxu0  ;;  %v5944_v34 = vor.u32 %v5942_v54, %v5941_v36  ;;  %v5945_v51 = vrot.slane %v5941_v36, 4  ;;  %v12207_v50 = vpack.c.bf16 %v5721_v12, %v5721_v12  ;;  %v5726_v57 = vmax.f32 %v5694_v2, 0.0 }
 0x330   : > { %v6209_v23 = vsel %vm16013_vm10, %v5961_v25, %v6208_v7  ;;  %v5964_v49 = vshrl.u32 %v12209_v62, 16  ;;  %v5967_v42 = vshll.u32 %v12209_v62, 16  ;;  %v5724_v53 = vmax.f32 %v5692_v3, 0.0  ;;  %v6222_v62 = vld [vmem:[#allocation3 + $0x78] sm:$0xf] }
 0x331   : > { %6210 = vst [vmem:[#allocation3 + $0x60] sm:$0xf] %v6209_v23  ;;  %v6202_v27 = vsel %vm16013_vm10, %v5944_v34, %v6201_v56  ;;  %v5947_v15 = vshrl.u32 %v12207_v50, 16  ;;  %v5950_v13 = vshll.u32 %v12207_v50, 16  ;;  %v5656_v40 = vmul.f32 %v13199_v22, %v15989_v60  ;;  %v6274_v50 = vld [vmem:[#allocation3 + $0x10] sm:$0xf] }
 0x332   : > { %6203 = vst [vmem:[#allocation3 + $0x54] sm:$0xf] %v6202_v27  ;;  %v5966_v9 = vrot.slane %v5964_v49, 7  ;;  %v12212_v21 = vpack.c.bf16 %v5726_v57, %v5726_v57  ;;  %v6345_v55 = vshrl.u32 %v6273_v35, 16  ;;  %v6348_v18 = vshll.u32 %v6273_v35, 16  ;;  %v16112_v54 = vpop.f32.mrb[24].mxu0 }
 0x333   : > { %v5949_v24 = vrot.slane %v5947_v15, 7  ;;  %v12210_v26 = vpack.c.bf16 %v5724_v53, %v5724_v53  ;;  %v5695_v7 = vadd.f32 %v15994_v43, %v5656_v40  ;;  %v16115_v36 = vpop.f32.mrb[25].mxu0  ;;  %v5654_v27 = vmul.f32 %v13200_v46, %v15989_v60  ;;  %v6275_v57 = vld [vmem:[#allocation3 + $0x18] sm:$0xf] }
 0x334   : > { %v5969_v58 = vor.u32 %v5967_v42, %v5966_v9  ;;  %v5971_v52 = vrot.slane %v5966_v9, 4  ;;  %v5990_v33 = vshrl.u32 %v12212_v21, 16  ;;  %v5993_v25 = vshll.u32 %v12212_v21, 16  ;;  %v16117_v28 = vpop.f32.mrb[26].mxu0 }
 0x335   : > { %v5952_v12 = vor.u32 %v5950_v13, %v5949_v24  ;;  %v5954_v41 = vrot.slane %v5949_v24, 4  ;;  %v5973_v22 = vshrl.u32 %v12210_v26, 16  ;;  %v5976_v34 = vshll.u32 %v12210_v26, 16  ;;  %v16123_v2 = vpop.f32.mrb[27].mxu0  ;;  %v6276_v24 = vld [vmem:[#allocation3 + $0x1c] sm:$0xf] }
 0x336   : > { %v5970_v19 = vsel %vm14080_vm11, %v5962_v31, %v5969_v58  ;;  %v6213_v56 = vsel %vm15586_vm6, %v5971_v52, %v6212_v6  ;;  %v5992_v42 = vrot.slane %v5990_v33, 7  ;;  %v6215_v31 = vld [vmem:[#allocation3 + $0x6c] sm:$0xf]  ;;  %v5727_v3 = vmax.f32 %v5695_v7, 0.0 }
 0x337   : > { %6211 = vst.msk [vmem:[#allocation3 + $0x64] sm:$0xf] %vm483_vm5, %v5970_v19  ;;  %6214 = vst [vmem:[#allocation3 + $0x68] sm:$0x1] %v6213_v56  ;;  %v5953_v23 = vsel %vm14080_vm11, %v5945_v51, %v5952_v12  ;;  %v6206_v49 = vsel %vm15586_vm6, %v5954_v41, %v6205_v61  ;;  %v16131_v35 = vrot.slane %v5973_v22, 7  ;;  %v6347_v15 = vrot.slane %v6345_v55, 4 }
 0x338   : > { %6204 = vst.msk [vmem:[#allocation3 + $0x58] sm:$0xf] %vm483_vm5, %v5953_v23  ;;  %6207 = vst [vmem:[#allocation3 + $0x5c] sm:$0x1] %v6206_v49  ;;  %v6350_v13 = vrot.slane %v6348_v18, 5  ;;  %v5995_v9 = vor.u32 %v5993_v25, %v5992_v42  ;;  %v5996_v53 = vrot.slane %v5992_v42, 4  ;;  %v12213_v40 = vpack.c.bf16 %v5727_v3, %v5727_v3 }
 0x339   : > { %v6305_v51 = vld [vmem:[#allocation3 + $0x14] sm:$0x1]  ;;  %v6354_v6 = vshll.u32 %v6274_v50, 16  ;;  %v5978_v21 = vor.u32 %v5976_v34, %v16131_v35  ;;  %v5979_v58 = vrot.slane %v16131_v35, 4  ;;  %v5693_v52 = vadd.f32 %v15994_v43, %v5654_v27  ;;  %v6226_v49 = vld [vmem:[#allocation3 + $0x80] sm:$0x1] }
 0x33a   : > { %v6351_v61 = vor.u32 %v6350_v13, %v6347_v15  ;;  %v6223_v26 = vsel %vm16013_vm10, %v5995_v9, %v6222_v62  ;;  %v5998_v46 = vshrl.u32 %v12213_v40, 16  ;;  %v6001_v55 = vshll.u32 %v12213_v40, 16  ;;  %v16139_v7 = vpop.f32.mrb[28].mxu0  ;;  %v6306_v9 = vld [vmem:[#allocation3 + $0x20] sm:$0x1] }
 0x33b   : > { %v6356_v18 = vrot.slane %v6354_v6, 5  ;;  %6224 = vst [vmem:[#allocation3 + $0x78] sm:$0xf] %v6223_v26  ;;  %v6216_v12 = vsel %vm16013_vm10, %v5978_v21, %v6215_v31  ;;  %v5725_v41 = vmax.f32 %v5693_v52, 0.0  ;;  %v6358_v25 = vshrl.u32 %v6274_v50, 16  ;;  %v16143_v19 = vpop.f32.mrb[29].mxu0 }
 0x33c   : > { %v6352_v33 = vrot.slane %v6351_v61, 4  ;;  %6217 = vst [vmem:[#allocation3 + $0x6c] sm:$0xf] %v6216_v12  ;;  %v6000_v56 = vrot.slane %v5998_v46, 7  ;;  %v6364_v22 = vshll.u32 %v6305_v51, 16  ;;  %v6369_v34 = vshrl.u32 %v6275_v57, 16 }
 0x33d   : > { %v6372_v23 = vshll.u32 %v6275_v57, 16  ;;  %v16145_v62 = vpop.f32.mrb[30].mxu0  ;;  %v12211_v42 = vpack.c.bf16 %v5725_v41, %v5725_v41  ;;  %v6360_v35 = vrot.slane %v6358_v25, 4  ;;  %v6378_v27 = vshll.u32 %v6276_v24, 16  ;;  %v6219_v12 = vld [vmem:[#allocation3 + $0x74] sm:$0x1] }
 0x33e   : > { %v6357_v3 = vsel %vm14107_vm13, %v6352_v33, %v6356_v18  ;;  %v16149_v31 = vpop.f32.mrb[31].mxu0  ;;  %v6003_v15 = vor.u32 %v6001_v55, %v6000_v56  ;;  %v6005_v50 = vrot.slane %v6000_v56, 4  ;;  %v6366_v13 = vrot.slane %v6364_v22, 5 }
 0x33f   : > { %v6371_v40 = vrot.slane %v6369_v34, 4  ;;  %v5981_v6 = vshrl.u32 %v12211_v42, 16  ;;  %v5984_v51 = vshll.u32 %v12211_v42, 16  ;;  %v6361_v21 = vor.u32 %v6360_v35, %v6356_v18  ;;  %v6277_v34 = vld [vmem:[#allocation3 + $0x24] sm:$0xf] }
 0x340   : > { %v6374_v57 = vrot.slane %v6372_v23, 5  ;;  %v6004_v52 = vsel %vm14080_vm11, %v5996_v53, %v6003_v15  ;;  %v6227_v61 = vsel %vm15586_vm6, %v6005_v50, %v6226_v49  ;;  %v6380_v26 = vrot.slane %v6378_v27, 5  ;;  %v6278_v35 = vld [vmem:[#allocation3 + $0x28] sm:$0xf] }
 0x341   : > { %v6382_v46 = vshrl.u32 %v6276_v24, 16  ;;  %6225 = vst.msk [vmem:[#allocation3 + $0x7c] sm:$0xf] %vm483_vm5, %v6004_v52  ;;  %6228 = vst [vmem:[#allocation3 + $0x80] sm:$0x1] %v6227_v61  ;;  %v5983_v55 = vrot.slane %v5981_v6, 7  ;;  %v13201_v18 = vadd.f32 %v16086_v0, %v15928_v4  ;;  %v13202_v53 = vadd.f32 %v16093_v38, %v15931_v10 }
 0x342   : > { %v6362_v41 = vrot.slane %v6361_v21, 4  ;;  %v6375_v33 = vor.u32 %v6374_v57, %v6371_v40  ;;  %v6388_v25 = vshll.u32 %v6306_v9, 16  ;;  %v13203_v22 = vadd.f32 %v16098_v59, %v15935_v32  ;;  %v16175_v38 = vld [vmem:[%s18180_s4 + $0x8] sm:$0xf] }
 0x343   : > { %v6384_v56 = vrot.slane %v6382_v46, 4  ;;  %v5986_v24 = vor.u32 %v5984_v51, %v5983_v55  ;;  %v5988_v23 = vrot.slane %v5983_v55, 4  ;;  %v5659_v9 = vmul.f32 %v13201_v18, %v15989_v60  ;;  %v6307_v46 = vld [vmem:[#allocation3 + $0x2c] sm:$0x1] }
 0x344   : > { %v6367_v49 = vsel %vm14107_vm13, %v6362_v41, %v6366_v13  ;;  %v6376_v42 = vrot.slane %v6375_v33, 4  ;;  %v6390_v50 = vrot.slane %v6388_v25, 5  ;;  %v5657_v0 = vmul.f32 %v13202_v53, %v15989_v60 }
 0x345   : > { %v11812_v27 = vcombine.low %v6357_v3, %v6367_v49  ;;  %v6385_v15 = vor.u32 %v6384_v56, %v6380_v26  ;;  %v5987_v4 = vsel %vm14080_vm11, %v5979_v58, %v5986_v24  ;;  %v6220_v10 = vsel %vm15586_vm6, %v5988_v23, %v6219_v12 }
 0x346   : > { %v6381_v32 = vsel %vm14107_vm13, %v6376_v42, %v6380_v26  ;;  %6218 = vst.msk [vmem:[#allocation3 + $0x70] sm:$0xf] %vm483_vm5, %v5987_v4  ;;  %6221 = vst [vmem:[#allocation3 + $0x74] sm:$0x1] %v6220_v10  ;;  %v5698_v58 = vadd.f32 %v15994_v43, %v5659_v9  ;;  %v5660_v3 = vmul.f32 %v13203_v22, %v15989_v60  ;;  %v6393_v6 = vshrl.u32 %v6277_v34, 16 }
 0x347   : > { %12858 = vmatmul.mubr.msk.bf16.vlgmr.msra.gmra.mrb[16].mxu1 %vm6754_vm9, %v11812_v27  ;;  %v6386_v59 = vrot.slane %v6385_v15, 4  ;;  %v13204_v13 = vadd.f32 %v16101_v8, %v15942_v48  ;;  %v5696_v40 = vadd.f32 %v15994_v43, %v5657_v0  ;;  %v6396_v51 = vshll.u32 %v6277_v34, 16  ;;  %v6236_v42 = vld [vmem:[#allocation3 + $0x90] sm:$0xf]  ;;  %v6229_v10 = vld [vmem:[#allocation3 + $0x84] sm:$0xf] }
 0x348   : > { %12890 = vmatpush3.bf16.msra.mxu1 %v16006_v16  ;;  %v6402_v21 = vshll.u32 %v6278_v35, 16  ;;  %v5730_v52 = vmax.f32 %v5698_v58, 0.0  ;;  %v5699_v61 = vadd.f32 %v15994_v43, %v5660_v3  ;;  %v6395_v16 = vrot.slane %v6393_v6, 4  ;;  %v6240_v3 = vld [vmem:[#allocation3 + $0x98] sm:$0x1] }
 0x349   : > { %v6391_v57 = vsel %vm14107_vm13, %v6386_v59, %v6390_v50  ;;  %v5658_v26 = vmul.f32 %v13204_v13, %v15989_v60  ;;  %13721 = vmatprep.subr.msk.bf16.mxu1 %vm6803_vm7, %v16175_v38  ;;  %v5728_v8 = vmax.f32 %v5696_v40, 0.0  ;;  %v6398_v55 = vrot.slane %v6396_v51, 5  ;;  %v16195_v6 = vld [vmem:[#allocation3 + $0x30] sm:$0xf] }
 0x34a   : > { %v11813_v48 = vcombine.low %v6381_v32, %v6391_v57  ;;  %v12216_v12 = vpack.c.bf16 %v5730_v52, %v5730_v52  ;;  %v5731_v41 = vmax.f32 %v5699_v61, 0.0  ;;  %v6404_v25 = vrot.slane %v6402_v21, 5 }
 0x34b   : > { %v5697_v33 = vadd.f32 %v15994_v43, %v5658_v26  ;;  %v12214_v56 = vpack.c.bf16 %v5728_v8, %v5728_v8  ;;  %v6399_v18 = vor.u32 %v6398_v55, %v6395_v16  ;;  %v6406_v53 = vshrl.u32 %v6278_v35, 16 }
 0x34c   : > { %12861 = vmatprep.mubr.msk.bf16.mxu1 %vm6754_vm9, %v11813_v48  ;;  %v6412_v22 = vshll.u32 %v6307_v46, 16  ;;  %v6024_v34 = vshrl.u32 %v12216_v12, 16  ;;  %v6027_v24 = vshll.u32 %v12216_v12, 16  ;;  %v12217_v23 = vpack.c.bf16 %v5731_v41, %v5731_v41  ;;  %v6233_v48 = vld [vmem:[#allocation3 + $0x8c] sm:$0x1] }
 0x34d   : > { %v5729_v49 = vmax.f32 %v5697_v33, 0.0  ;;  %v6007_v27 = vshrl.u32 %v12214_v56, 16  ;;  %v6010_v15 = vshll.u32 %v12214_v56, 16  ;;  %v6400_v50 = vrot.slane %v6399_v18, 4  ;;  %v16199_v33 = vld [vmem:[#allocation3 + $0x34] sm:$0xf] }
 0x34e   : > { %v6408_v9 = vrot.slane %v6406_v53, 4  ;;  %v6026_v4 = vrot.slane %v6024_v34, 7  ;;  %v6032_v32 = vshrl.u32 %v12217_v23, 16  ;;  %v6035_v0 = vshll.u32 %v12217_v23, 16  ;;  %v6308_v18 = vld [vmem:[#allocation3 + $0x38] sm:$0x1] }
 0x34f   : > { %v12215_v59 = vpack.c.bf16 %v5729_v49, %v5729_v49  ;;  %v6009_v58 = vrot.slane %v6007_v27, 7  ;;  %v6405_v35 = vsel %vm14107_vm13, %v6400_v50, %v6404_v25  ;;  %v6414_v40 = vrot.slane %v6412_v22, 5 }
 0x350   : > { %v6409_v13 = vor.u32 %v6408_v9, %v6404_v25  ;;  %v6029_v51 = vor.u32 %v6027_v24, %v6026_v4  ;;  %v6030_v21 = vrot.slane %v6026_v4, 4  ;;  %v6034_v57 = vrot.slane %v6032_v32, 7 }
 0x351   : > { %v6015_v52 = vshrl.u32 %v12215_v59, 16  ;;  %v6012_v61 = vor.u32 %v6010_v15, %v6009_v58  ;;  %v6013_v26 = vrot.slane %v6009_v58, 4  ;;  %v6018_v46 = vshll.u32 %v12215_v59, 16 }
 0x352   : > { %v6410_v8 = vrot.slane %v6409_v13, 4  ;;  %v6237_v16 = vsel %vm16013_vm10, %v6029_v51, %v6236_v42  ;;  %v6037_v55 = vor.u32 %v6035_v0, %v6034_v57  ;;  %v6039_v12 = vrot.slane %v6034_v57, 4  ;;  %v16218_v0 = vld [vmem:[#allocation3 + $0x3c] sm:$0xf] }
 0x353   : > { %v6017_v41 = vrot.slane %v6015_v52, 7  ;;  %6238 = vst [vmem:[#allocation3 + $0x90] sm:$0xf] %v6237_v16  ;;  %v6230_v25 = vsel %vm16013_vm10, %v6012_v61, %v6229_v10  ;;  %v6417_v53 = vshrl.u32 %v16195_v6, 16  ;;  %v6420_v22 = vshll.u32 %v16195_v6, 16 }
 0x354   : > { %v6415_v56 = vsel %vm14107_vm13, %v6410_v8, %v6414_v40  ;;  %6231 = vst [vmem:[#allocation3 + $0x84] sm:$0xf] %v6230_v25  ;;  %v6038_v34 = vsel %vm14080_vm11, %v6030_v21, %v6037_v55  ;;  %v6241_v24 = vsel %vm15586_vm6, %v6039_v12, %v6240_v3  ;;  %v6426_v50 = vshll.u32 %v16199_v33, 16 }
 0x355   : > { %v6020_v23 = vor.u32 %v6018_v46, %v6017_v41  ;;  %v6022_v49 = vrot.slane %v6017_v41, 4  ;;  %6239 = vst.msk [vmem:[#allocation3 + $0x94] sm:$0xf] %vm483_vm5, %v6038_v34  ;;  %6242 = vst [vmem:[#allocation3 + $0x98] sm:$0x1] %v6241_v24  ;;  %v11814_v42 = vcombine.low %v6405_v35, %v6415_v56  ;;  %v6419_v27 = vrot.slane %v6417_v53, 4 }
 0x356   : > { %v6422_v15 = vrot.slane %v6420_v22, 5  ;;  %v6430_v10 = vshrl.u32 %v16199_v33, 16  ;;  %v6436_v32 = vshll.u32 %v6308_v18, 16  ;;  %v6428_v58 = vrot.slane %v6426_v50, 5  ;;  %v16248_v50 = vld [vmem:[#allocation3 + $0x48] sm:$0xf] }
 0x357   : > { %v6021_v9 = vsel %vm14080_vm11, %v6013_v26, %v6020_v23  ;;  %v6234_v4 = vsel %vm15586_vm6, %v6022_v49, %v6233_v48  ;;  %12862 = vmatmul.mubr.msk.bf16.gmra.mrb[20].mxu1 %vm6754_vm9, %v11814_v42  ;;  %v13205_v3 = vadd.f32 %v16112_v54, %v15952_v39  ;;  %v13206_v35 = vadd.f32 %v16115_v36, %v15956_v37  ;;  %v16235_v54 = vld [vmem:[#allocation3 + $0x40] sm:$0xf] }
 0x358   : > { %6232 = vst.msk [vmem:[#allocation3 + $0x88] sm:$0xf] %vm483_vm5, %v6021_v9  ;;  %6235 = vst [vmem:[#allocation3 + $0x8c] sm:$0x1] %v6234_v4  ;;  %v6423_v59 = vor.u32 %v6422_v15, %v6419_v27  ;;  %v6432_v13 = vrot.slane %v6430_v10, 4  ;;  %v6438_v40 = vrot.slane %v6436_v32, 5  ;;  %v13207_v51 = vadd.f32 %v16117_v28, %v15958_v20 }
 0x359   : > { %v13208_v21 = vadd.f32 %v16123_v2, %v15960_v5  ;;  %v5663_v52 = vmul.f32 %v13205_v3, %v15989_v60  ;;  %v5661_v61 = vmul.f32 %v13206_v35, %v15989_v60  ;;  %v6441_v26 = vshrl.u32 %v16218_v0, 16 }
 0x35a   : > { %v6424_v57 = vrot.slane %v6423_v59, 4  ;;  %v6433_v46 = vor.u32 %v6432_v13, %v6428_v58  ;;  %v5664_v39 = vmul.f32 %v13207_v51, %v15989_v60  ;;  %v6444_v36 = vshll.u32 %v16218_v0, 16  ;;  %v16251_v59 = vld [vmem:[#allocation3 + $0x44] sm:$0x1]  ;;  %v6250_v51 = vld [vmem:[#allocation3 + $0xa8] sm:$0xf] }
 0x35b   : > { %v5662_v37 = vmul.f32 %v13208_v21, %v15989_v60  ;;  %v5702_v5 = vadd.f32 %v15994_v43, %v5663_v52  ;;  %v5700_v28 = vadd.f32 %v15994_v43, %v5661_v61  ;;  %v6443_v2 = vrot.slane %v6441_v26, 4 }
 0x35c   : > { %v6429_v20 = vsel %vm14107_vm13, %v6424_v57, %v6428_v58  ;;  %v6434_v48 = vrot.slane %v6433_v46, 4  ;;  %v5703_v8 = vadd.f32 %v15994_v43, %v5664_v39  ;;  %v6446_v55 = vrot.slane %v6444_v36, 5  ;;  %v6243_v57 = vld [vmem:[#allocation3 + $0x9c] sm:$0xf]  ;;  %v6254_v46 = vld [vmem:[#allocation3 + $0xb0] sm:$0x1] }
 0x35d   : > { %v5701_v16 = vadd.f32 %v15994_v43, %v5662_v37  ;;  %v5734_v12 = vmax.f32 %v5702_v5, 0.0  ;;  %v5732_v60 = vmax.f32 %v5700_v28, 0.0  ;;  %v6450_v41 = vshll.u32 %v16235_v54, 16 }
 0x35e   : > { %v6454_v25 = vshrl.u32 %v16235_v54, 16  ;;  %v6439_v56 = vsel %vm14107_vm13, %v6434_v48, %v6438_v40  ;;  %v5735_v18 = vmax.f32 %v5703_v8, 0.0  ;;  %v6447_v22 = vor.u32 %v6446_v55, %v6443_v2  ;;  %v6247_v48 = vld [vmem:[#allocation3 + $0xa4] sm:$0x1] }
 0x35f   : > { %v5733_v53 = vmax.f32 %v5701_v16, 0.0  ;;  %v11815_v34 = vcombine.low %v6429_v20, %v6439_v56  ;;  %v12220_v24 = vpack.c.bf16 %v5734_v12, %v5734_v12  ;;  %v12218_v23 = vpack.c.bf16 %v5732_v60, %v5732_v60  ;;  %v16257_v60 = vld [vmem:[#allocation3 + $0x4c] sm:$0xf] }
 0x360   : > { %v6452_v49 = vrot.slane %v6450_v41, 5  ;;  %v12221_v42 = vpack.c.bf16 %v5735_v18, %v5735_v18  ;;  %v6448_v43 = vrot.slane %v6447_v22, 4  ;;  %v6456_v15 = vrot.slane %v6454_v25, 4 }
 0x361   : > { %v12219_v27 = vpack.c.bf16 %v5733_v53, %v5733_v53  ;;  %12865 = vmatprep.mubr.msk.bf16.mxu1 %vm6754_vm9, %v11815_v34  ;;  %v6058_v9 = vshrl.u32 %v12220_v24, 16  ;;  %v6061_v4 = vshll.u32 %v12220_v24, 16  ;;  %v6041_v10 = vshrl.u32 %v12218_v23, 16  ;;  %v16263_v53 = vld [vmem:[#allocation3 + $0x50] sm:$0x1] }
 0x362   : > { %v6044_v32 = vshll.u32 %v12218_v23, 16  ;;  %v6066_v58 = vshrl.u32 %v12221_v42, 16  ;;  %v6069_v3 = vshll.u32 %v12221_v42, 16  ;;  %v6453_v52 = vsel %vm14107_vm13, %v6448_v43, %v6452_v49 }
 0x363   : > { %v6049_v35 = vshrl.u32 %v12219_v27, 16  ;;  %v6052_v13 = vshll.u32 %v12219_v27, 16  ;;  %v6060_v40 = vrot.slane %v6058_v9, 7  ;;  %v6043_v21 = vrot.slane %v6041_v10, 7 }
 0x364   : > { %v6457_v61 = vor.u32 %v6456_v15, %v6452_v49  ;;  %v6068_v26 = vrot.slane %v6066_v58, 7  ;;  %v6460_v37 = vshll.u32 %v16251_v59, 16  ;;  %v6465_v36 = vshrl.u32 %v16248_v50, 16 }
 0x365   : > { %v6051_v39 = vrot.slane %v6049_v35, 7  ;;  %v6063_v20 = vor.u32 %v6061_v4, %v6060_v40  ;;  %v6064_v5 = vrot.slane %v6060_v40, 4  ;;  %v6046_v28 = vor.u32 %v6044_v32, %v6043_v21  ;;  %v16283_v32 = vld [vmem:[#allocation3 + $0x54] sm:$0xf] }
 0x366   : > { %v6047_v2 = vrot.slane %v6043_v21, 4  ;;  %v6071_v8 = vor.u32 %v6069_v3, %v6068_v26  ;;  %v6073_v16 = vrot.slane %v6068_v26, 4  ;;  %v6458_v56 = vrot.slane %v6457_v61, 4  ;;  %v13853_v21 = vld [vmem:[%s18178_s2] ss:$0 sm:$0xff] }
 0x367   : > { %v6054_v55 = vor.u32 %v6052_v13, %v6051_v39  ;;  %v6056_v12 = vrot.slane %v6051_v39, 4  ;;  %v6251_v41 = vsel %vm16013_vm10, %v6063_v20, %v6250_v51  ;;  %v6244_v25 = vsel %vm16013_vm10, %v6046_v28, %v6243_v57 }
 0x368   : > { %v6462_v18 = vrot.slane %v6460_v37, 5  ;;  %6252 = vst [vmem:[#allocation3 + $0xa8] sm:$0xf] %v6251_v41  ;;  %6245 = vst [vmem:[#allocation3 + $0x9c] sm:$0xf] %v6244_v25  ;;  %v6072_v22 = vsel %vm14080_vm11, %v6064_v5, %v6071_v8  ;;  %v6255_v34 = vsel %vm15586_vm6, %v6073_v16, %v6254_v46  ;;  %v6467_v42 = vrot.slane %v6465_v36, 4 }
 0x369   : > { %v6055_v24 = vsel %vm14080_vm11, %v6047_v2, %v6054_v55  ;;  %v6248_v23 = vsel %vm15586_vm6, %v6056_v12, %v6247_v48  ;;  %6253 = vst.msk [vmem:[#allocation3 + $0xac] sm:$0xf] %vm483_vm5, %v6072_v22  ;;  %6256 = vst [vmem:[#allocation3 + $0xb0] sm:$0x1] %v6255_v34  ;;  %v6468_v27 = vshll.u32 %v16248_v50, 16  ;;  %v6474_v43 = vshll.u32 %v16257_v60, 16 }
 0x36a   : > { %6246 = vst.msk [vmem:[#allocation3 + $0xa0] sm:$0xf] %vm483_vm5, %v6055_v24  ;;  %6249 = vst [vmem:[#allocation3 + $0xa4] sm:$0x1] %v6248_v23  ;;  %v6463_v49 = vsel %vm14107_vm13, %v6458_v56, %v6462_v18  ;;  %v6478_v9 = vshrl.u32 %v16257_v60, 16  ;;  %v6484_v4 = vshll.u32 %v16263_v53, 16  ;;  %v13209_v10 = vadd.f32 %v16139_v7, %v15968_v45 }
 0x36b   : > { %v11816_v15 = vcombine.low %v6453_v52, %v6463_v49  ;;  %v6470_v58 = vrot.slane %v6468_v27, 5  ;;  %v6476_v3 = vrot.slane %v6474_v43, 5  ;;  %v13210_v35 = vadd.f32 %v16143_v19, %v15972_v11  ;;  %v16299_v46 = vld [vmem:[#allocation3 + $0x58] sm:$0xf]  ;;  %v16307_v24 = vld [vmem:[#allocation3 + $0x5c] sm:$0x1] }
 0x36c   : > { %v13211_v13 = vadd.f32 %v16145_v62, %v15974_v29  ;;  %v6480_v40 = vrot.slane %v6478_v9, 4  ;;  %v6486_v51 = vrot.slane %v6484_v4, 5  ;;  %v5667_v57 = vmul.f32 %v13853_v21, %v13209_v10  ;;  %v13854_v29 = vld [vmem:[%s18179_s3] ss:$0 sm:$0xff]  ;;  %v16311_v49 = vld [vmem:[#allocation3 + $0x60] sm:$0xf] }
 0x36d   : > { %12866 = vmatmul.mubr.msk.bf16.gmra.mrb[24].mxu1 %vm6754_vm9, %v11816_v15  ;;  %v13212_v45 = vadd.f32 %v16149_v31, %v15976_v1  ;;  %v6471_v7 = vor.u32 %v6470_v58, %v6467_v42  ;;  %v5665_v52 = vmul.f32 %v13853_v21, %v13210_v35  ;;  %v6489_v11 = vshrl.u32 %v16283_v32, 16  ;;  %v6264_v9 = vld [vmem:[#allocation3 + $0xc0] sm:$0xf] }
 0x36e   : > { %v5668_v61 = vmul.f32 %v13853_v21, %v13211_v13  ;;  %v6481_v19 = vor.u32 %v6480_v40, %v6476_v3  ;;  %v5706_v62 = vadd.f32 %v13854_v29, %v5667_v57  ;;  %v6492_v39 = vshll.u32 %v16283_v32, 16  ;;  %v6257_v13 = vld [vmem:[#allocation3 + $0xb4] sm:$0xf] }
 0x36f   : > { %v5666_v26 = vmul.f32 %v13853_v21, %v13212_v45  ;;  %v6472_v37 = vrot.slane %v6471_v7, 4  ;;  %v5704_v36 = vadd.f32 %v13854_v29, %v5665_v52  ;;  %v6491_v1 = vrot.slane %v6489_v11, 4 }
 0x370   : > { %v5707_v20 = vadd.f32 %v13854_v29, %v5668_v61  ;;  %v6482_v31 = vrot.slane %v6481_v19, 4  ;;  %v5738_v5 = vmax.f32 %v5706_v62, 0.0  ;;  %v6494_v2 = vrot.slane %v6492_v39, 5  ;;  %v6268_v19 = vld [vmem:[#allocation3 + $0xc8] sm:$0x1] }
 0x371   : > { %v5705_v28 = vadd.f32 %v13854_v29, %v5666_v26  ;;  %v6477_v48 = vsel %vm14107_vm13, %v6472_v37, %v6476_v3  ;;  %v5736_v8 = vmax.f32 %v5704_v36, 0.0  ;;  %v6498_v55 = vshll.u32 %v16299_v46, 16  ;;  %v16848_v14 = vld [vmem:[#allocation3 + $0xa0] sm:$0xf] }
 0x372   : > { %v5739_v16 = vmax.f32 %v5707_v20, 0.0  ;;  %v6487_v12 = vsel %vm14107_vm13, %v6482_v31, %v6486_v51  ;;  %v12224_v41 = vpack.c.bf16 %v5738_v5, %v5738_v5  ;;  %v6495_v56 = vor.u32 %v6494_v2, %v6491_v1  ;;  %v6261_v20 = vld [vmem:[#allocation3 + $0xbc] sm:$0x1]  ;;  %v16325_v2 = vld [vmem:[#allocation3 + $0x64] sm:$0xf] }
 0x373   : > { %v5737_v25 = vmax.f32 %v5705_v28, 0.0  ;;  %v11817_v18 = vcombine.low %v6477_v48, %v6487_v12  ;;  %v12222_v22 = vpack.c.bf16 %v5736_v8, %v5736_v8  ;;  %v16309_v23 = vrot.slane %v6498_v55, 5  ;;  %v16327_v48 = vld [vmem:[#allocation3 + $0x68] sm:$0x1] }
 0x374   : > { %v12225_v34 = vpack.c.bf16 %v5739_v16, %v5739_v16  ;;  %v6092_v42 = vshrl.u32 %v12224_v41, 16  ;;  %v6095_v27 = vshll.u32 %v12224_v41, 16  ;;  %v16313_v15 = vrot.slane %v6495_v56, 4  ;;  %v16335_v41 = vld [vmem:[#allocation3 + $0x6c] sm:$0xf] }
 0x375   : > { %v12223_v43 = vpack.c.bf16 %v5737_v25, %v5737_v25  ;;  %12869 = vmatprep.mubr.msk.bf16.mxu1 %vm6754_vm9, %v11817_v18  ;;  %v6075_v4 = vshrl.u32 %v12222_v22, 16  ;;  %v6078_v10 = vshll.u32 %v12222_v22, 16  ;;  %v6502_v7 = vshrl.u32 %v16299_v46, 16  ;;  %v16337_v25 = vld [vmem:[#allocation3 + $0x70] sm:$0xf] }
 0x376   : > { %v6100_v58 = vshrl.u32 %v12225_v34, 16  ;;  %v6103_v3 = vshll.u32 %v12225_v34, 16  ;;  %v6094_v35 = vrot.slane %v6092_v42, 7  ;;  %v6501_v21 = vsel %vm14107_vm13, %v16313_v15, %v16309_v23  ;;  %v16350_v15 = vld [vmem:[#allocation3 + $0x78] sm:$0xf] }
 0x377   : > { %v6083_v40 = vshrl.u32 %v12223_v43, 16  ;;  %v6086_v51 = vshll.u32 %v12223_v43, 16  ;;  %v6077_v57 = vrot.slane %v6075_v4, 7  ;;  %v6508_v52 = vshll.u32 %v16307_v24, 16 }
 0x378   : > { %v6102_v45 = vrot.slane %v6100_v58, 7  ;;  %v6097_v61 = vor.u32 %v6095_v27, %v6094_v35  ;;  %v6098_v11 = vrot.slane %v6094_v35, 4  ;;  %v6513_v62 = vshrl.u32 %v16311_v49, 16 }
 0x379   : > { %v6085_v29 = vrot.slane %v6083_v40, 7  ;;  %v6080_v26 = vor.u32 %v6078_v10, %v6077_v57  ;;  %v6081_v39 = vrot.slane %v6077_v57, 4  ;;  %v6504_v28 = vrot.slane %v6502_v7, 4  ;;  %v16355_v10 = vld [vmem:[#allocation3 + $0x7c] sm:$0xf] }
 0x37a   : > { %v6105_v37 = vor.u32 %v6103_v3, %v6102_v45  ;;  %v6107_v36 = vrot.slane %v6102_v45, 4  ;;  %v6265_v1 = vsel %vm16013_vm10, %v6097_v61, %v6264_v9  ;;  %v6510_v12 = vrot.slane %v6508_v52, 5  ;;  %v16357_v40 = vld [vmem:[#allocation3 + $0x74] sm:$0x1] }
 0x37b   : > { %v6088_v31 = vor.u32 %v6086_v51, %v6085_v29  ;;  %v6090_v5 = vrot.slane %v6085_v29, 4  ;;  %6266 = vst [vmem:[#allocation3 + $0xc0] sm:$0xf] %v6265_v1  ;;  %v6258_v8 = vsel %vm16013_vm10, %v6080_v26, %v6257_v13  ;;  %v6505_v18 = vor.u32 %v6504_v28, %v16309_v23  ;;  %v16366_v1 = vld [vmem:[#allocation3 + $0x80] sm:$0x1] }
 0x37c   : > { %v6106_v16 = vsel %vm14080_vm11, %v6098_v11, %v6105_v37  ;;  %v6269_v55 = vsel %vm15586_vm6, %v6107_v36, %v6268_v19  ;;  %6259 = vst [vmem:[#allocation3 + $0xb4] sm:$0xf] %v6258_v8  ;;  %v6515_v22 = vrot.slane %v6513_v62, 4  ;;  %v6516_v34 = vshll.u32 %v16311_v49, 16 }
 0x37d   : > { %6267 = vst.msk [vmem:[#allocation3 + $0xc4] sm:$0xf] %vm483_vm5, %v6106_v16  ;;  %6270 = vst [vmem:[#allocation3 + $0xc8] sm:$0x1] %v6269_v55  ;;  %v6089_v56 = vsel %vm14080_vm11, %v6081_v39, %v6088_v31  ;;  %v6262_v47 = vsel %vm15586_vm6, %v6090_v5, %v6261_v20  ;;  %v6522_v42 = vshll.u32 %v16325_v2, 16  ;;  %v6526_v27 = vshrl.u32 %v16325_v2, 16 }
 0x37e   : > { %6260 = vst.msk [vmem:[#allocation3 + $0xb8] sm:$0xf] %vm483_vm5, %v6089_v56  ;;  %6263 = vst [vmem:[#allocation3 + $0xbc] sm:$0x1] %v6262_v47  ;;  %v6532_v43 = vshll.u32 %v16327_v48, 16  ;;  %v6506_v63 = vrot.slane %v6505_v18, 4 }
 0x37f   : > { %v6537_v9 = vshrl.u32 %v16335_v41, 16  ;;  %v6540_v4 = vshll.u32 %v16335_v41, 16  ;;  %v6546_v23 = vshll.u32 %v16337_v25, 16  ;;  %v6518_v58 = vrot.slane %v6516_v34, 5  ;;  %v16369_v16 = vld [vmem:[#allocation3 + $0x84] sm:$0xf] }
 0x380   : > { %v6524_v3 = vrot.slane %v6522_v42, 5  ;;  %v6528_v35 = vrot.slane %v6526_v27, 4  ;;  %v6534_v13 = vrot.slane %v6532_v43, 5  ;;  %v6511_v51 = vsel %vm14107_vm13, %v6506_v63, %v6510_v12  ;;  %v16375_v18 = vld [vmem:[#allocation3 + $0x88] sm:$0xf] }
 0x381   : > { %v6539_v57 = vrot.slane %v6537_v9, 4  ;;  %v6542_v45 = vrot.slane %v6540_v4, 5  ;;  %v6548_v7 = vrot.slane %v6546_v23, 5  ;;  %v11818_v52 = vcombine.low %v6501_v21, %v6511_v51  ;;  %v16380_v43 = vld [vmem:[#allocation3 + $0x90] sm:$0xf] }
 0x382   : > { %v6519_v61 = vor.u32 %v6518_v58, %v6515_v22  ;;  %v6529_v11 = vor.u32 %v6528_v35, %v6524_v3  ;;  %v6550_v19 = vshrl.u32 %v16337_v25, 16  ;;  %v6556_v62 = vshll.u32 %v16357_v40, 16  ;;  %v16386_v35 = vld [vmem:[#allocation3 + $0x8c] sm:$0x1] }
 0x383   : > { %v6543_v29 = vor.u32 %v6542_v45, %v6539_v57  ;;  %v6561_v26 = vshrl.u32 %v16350_v15, 16  ;;  %v6564_v39 = vshll.u32 %v16350_v15, 16  ;;  %12870 = vmatmul.mubr.msk.bf16.gmra.mrb[28].mxu1 %vm6754_vm9, %v11818_v52  ;;  %v6570_v21 = vshll.u32 %v16355_v10, 16 }
 0x384   : > { %v6520_v37 = vrot.slane %v6519_v61, 4  ;;  %v6530_v36 = vrot.slane %v6529_v11, 4  ;;  %v6552_v20 = vrot.slane %v6550_v19, 4  ;;  %v6558_v5 = vrot.slane %v6556_v62, 5  ;;  %v16392_v61 = vld [vmem:[#allocation3 + $0x94] sm:$0xf] }
 0x385   : > { %v6544_v31 = vrot.slane %v6543_v29, 4  ;;  %v6563_v28 = vrot.slane %v6561_v26, 4  ;;  %v6566_v8 = vrot.slane %v6564_v39, 5  ;;  %v6572_v47 = vrot.slane %v6570_v21, 5 }
 0x386   : > { %v6525_v55 = vsel %vm14107_vm13, %v6520_v37, %v6524_v3  ;;  %v6535_v12 = vsel %vm14107_vm13, %v6530_v36, %v6534_v13  ;;  %v6553_v56 = vor.u32 %v6552_v20, %v6548_v7  ;;  %v6574_v27 = vshrl.u32 %v16355_v10, 16  ;;  %v16397_v36 = vld [vmem:[#allocation3 + $0x98] sm:$0x1] }
 0x387   : > { %v11819_v22 = vcombine.low %v6525_v55, %v6535_v12  ;;  %v6549_v34 = vsel %vm14107_vm13, %v6544_v31, %v6548_v7  ;;  %v6567_v42 = vor.u32 %v6566_v8, %v6563_v28  ;;  %v6580_v9 = vshll.u32 %v16366_v1, 16  ;;  %v16404_v8 = vld [vmem:[#allocation3 + $0x9c] sm:$0xf] }
 0x388   : > { %v6554_v63 = vrot.slane %v6553_v56, 4  ;;  %v6585_v4 = vshrl.u32 %v16369_v16, 16  ;;  %v6588_v23 = vshll.u32 %v16369_v16, 16  ;;  %v6576_v3 = vrot.slane %v6574_v27, 4 }
 0x389   : > { %12873 = vmatprep.mubr.msk.bf16.mxu1 %vm6754_vm9, %v11819_v22  ;;  %v6568_v58 = vrot.slane %v6567_v42, 4  ;;  %v6594_v13 = vshll.u32 %v16375_v18, 16  ;;  %v6598_v51 = vshrl.u32 %v16375_v18, 16  ;;  %v6582_v45 = vrot.slane %v6580_v9, 5  ;;  %v16406_v22 = vld [vmem:[#allocation3 + $0xa0] sm:$0xf] }
 0x38a   : > { %v6559_v57 = vsel %vm14107_vm13, %v6554_v63, %v6558_v5  ;;  %v6587_v7 = vrot.slane %v6585_v4, 4  ;;  %v6590_v52 = vrot.slane %v6588_v23, 5  ;;  %v6577_v29 = vor.u32 %v6576_v3, %v6572_v47  ;;  %v16410_v9 = vld [vmem:[#allocation3 + $0xa4] sm:$0x1] }
 0x38b   : > { %v11820_v11 = vcombine.low %v6549_v34, %v6559_v57  ;;  %v6573_v19 = vsel %vm14107_vm13, %v6568_v58, %v6572_v47  ;;  %v6596_v62 = vrot.slane %v6594_v13, 5  ;;  %v6600_v39 = vrot.slane %v6598_v51, 4  ;;  %v16415_v13 = vld [vmem:[#allocation3 + $0xa8] sm:$0xf] }
 0x38c   : > { %v6591_v26 = vor.u32 %v6590_v52, %v6587_v7  ;;  %v6604_v37 = vshll.u32 %v16386_v35, 16  ;;  %v6609_v20 = vshrl.u32 %v16380_v43, 16  ;;  %v6578_v21 = vrot.slane %v6577_v29, 4 }
 0x38d   : > { %12874 = vmatmul.mubr.msk.bf16.gmra.mrb[32].mxu1 %vm6754_vm9, %v11820_v11  ;;  %v6612_v31 = vshll.u32 %v16380_v43, 16  ;;  %v6618_v5 = vshll.u32 %v16392_v61, 16  ;;  %v6622_v28 = vshrl.u32 %v16392_v61, 16  ;;  %v6601_v12 = vor.u32 %v6600_v39, %v6596_v62 }
 0x38e   : > { %v6592_v55 = vrot.slane %v6591_v26, 4  ;;  %v6606_v56 = vrot.slane %v6604_v37, 5  ;;  %v6611_v47 = vrot.slane %v6609_v20, 4  ;;  %v6583_v34 = vsel %vm14107_vm13, %v6578_v21, %v6582_v45 }
 0x38f   : > { %v6614_v42 = vrot.slane %v6612_v31, 5  ;;  %v6620_v27 = vrot.slane %v6618_v5, 5  ;;  %v6624_v63 = vrot.slane %v6622_v28, 4  ;;  %v11821_v4 = vcombine.low %v6573_v19, %v6583_v34  ;;  %v16425_v28 = vld [vmem:[#allocation3 + $0xac] sm:$0xf] }
 0x390   : > { %v6597_v23 = vsel %vm14107_vm13, %v6592_v55, %v6596_v62  ;;  %v6602_v58 = vrot.slane %v6601_v12, 4  ;;  %v6628_v3 = vshll.u32 %v16397_v36, 16  ;;  %v6633_v7 = vshrl.u32 %v16404_v8, 16 }
 0x391   : > { %v6615_v51 = vor.u32 %v6614_v42, %v6611_v47  ;;  %v6625_v57 = vor.u32 %v6624_v63, %v6620_v27  ;;  %v6636_v45 = vshll.u32 %v16404_v8, 16  ;;  %12877 = vmatprep.mubr.msk.bf16.mxu1 %vm6754_vm9, %v11821_v4  ;;  %v6642_v19 = vshll.u32 %v16406_v22, 16  ;;  %v16436_v42 = vld [vmem:[#allocation3 + $0xb4] sm:$0xf] }
 0x392   : > { %v6607_v52 = vsel %vm14107_vm13, %v6602_v58, %v6606_v56  ;;  %v6630_v11 = vrot.slane %v6628_v3, 5  ;;  %v6646_v29 = vshrl.u32 %v16406_v22, 16  ;;  %v6635_v37 = vrot.slane %v6633_v7, 4  ;;  %v16432_v56 = vld [vmem:[#allocation3 + $0xb0] sm:$0x1] }
 0x393   : > { %v11822_v62 = vcombine.low %v6597_v23, %v6607_v52  ;;  %v6616_v26 = vrot.slane %v6615_v51, 4  ;;  %v6626_v39 = vrot.slane %v6625_v57, 4  ;;  %v6638_v20 = vrot.slane %v6636_v45, 5 }
 0x394   : > { %v6644_v21 = vrot.slane %v6642_v19, 5  ;;  %v6648_v31 = vrot.slane %v6646_v29, 4  ;;  %v6652_v5 = vshll.u32 %v16410_v9, 16  ;;  %v6657_v47 = vshrl.u32 %v16415_v13, 16 }
 0x395   : > { %12878 = vmatmul.mubr.msk.bf16.gmra.mrb[36].mxu1 %vm6754_vm9, %v11822_v62  ;;  %v6621_v55 = vsel %vm14107_vm13, %v6616_v26, %v6620_v27  ;;  %v6631_v12 = vsel %vm14107_vm13, %v6626_v39, %v6630_v11  ;;  %v6660_v34 = vshll.u32 %v16415_v13, 16  ;;  %v6639_v4 = vor.u32 %v6638_v20, %v6635_v37  ;;  %v16443_v26 = vld [vmem:[#allocation3 + $0xb8] sm:$0xf] }
 0x396   : > { %v11823_v63 = vcombine.low %v6621_v55, %v6631_v12  ;;  %v6649_v23 = vor.u32 %v6648_v31, %v6644_v21  ;;  %v6654_v58 = vrot.slane %v6652_v5, 5  ;;  %v6659_v3 = vrot.slane %v6657_v47, 4  ;;  %v16450_v31 = vld [vmem:[#allocation3 + $0xbc] sm:$0x1] }
 0x397   : > { %v6662_v51 = vrot.slane %v6660_v34, 5  ;;  %v6666_v57 = vshll.u32 %v16425_v28, 16  ;;  %v6670_v27 = vshrl.u32 %v16425_v28, 16  ;;  %v6640_v7 = vrot.slane %v6639_v4, 4 }
 0x398   : > { %12881 = vmatprep.mubr.msk.bf16.mxu1 %vm6754_vm9, %v11823_v63  ;;  %v6650_v45 = vrot.slane %v6649_v23, 4  ;;  %v6676_v52 = vshll.u32 %v16432_v56, 16  ;;  %v6681_v11 = vshrl.u32 %v16436_v42, 16  ;;  %v6684_v39 = vshll.u32 %v16436_v42, 16 }
 0x399   : > { %v6663_v19 = vor.u32 %v6662_v51, %v6659_v3  ;;  %v6668_v29 = vrot.slane %v6666_v57, 5  ;;  %v6672_v62 = vrot.slane %v6670_v27, 4  ;;  %v6645_v37 = vsel %vm14107_vm13, %v6640_v7, %v6644_v21 }
 0x39a   : > { %v6655_v20 = vsel %vm14107_vm13, %v6650_v45, %v6654_v58  ;;  %v6683_v5 = vrot.slane %v6681_v11, 4  ;;  %v6686_v34 = vrot.slane %v6684_v39, 5  ;;  %v6690_v63 = vshll.u32 %v16443_v26, 16 }
 0x39b   : > { %v11824_v55 = vcombine.low %v6645_v37, %v6655_v20  ;;  %v6664_v12 = vrot.slane %v6663_v19, 4  ;;  %v6673_v47 = vor.u32 %v6672_v62, %v6668_v29  ;;  %v6694_v4 = vshrl.u32 %v16443_v26, 16 }
 0x39c   : > { %v6678_v3 = vrot.slane %v6676_v52, 5  ;;  %v6687_v51 = vor.u32 %v6686_v34, %v6683_v5  ;;  %v6700_v21 = vshll.u32 %v16450_v31, 16  ;;  %v6692_v57 = vrot.slane %v6690_v63, 5  ;;  %v7269_v34 = vld [vmem:[#allocation3 + $0x6c] sm:$0xe] }
 0x39d   : > { %12882 = vmatmul.mubr.msk.bf16.gmra.mrb[40].mxu1 %vm6754_vm9, %v11824_v55  ;;  %v6674_v23 = vrot.slane %v6673_v47, 4  ;;  %v6696_v58 = vrot.slane %v6694_v4, 4  ;;  %v6669_v27 = vsel %vm14107_vm13, %v6664_v12, %v6668_v29  ;;  %v11850_v39 = vcombine.low %v16283_v32, %v16299_v46 }
 0x39e   : > { %v6688_v11 = vrot.slane %v6687_v51, 4  ;;  %v6702_v62 = vrot.slane %v6700_v21, 5  ;;  %v11851_v52 = vcombine.low %v16311_v49, %v16325_v2  ;;  %v7373_v55 = vrot.slane %v16337_v25, 5 }
 0x39f   : > { %v6679_v7 = vsel %vm14107_vm13, %v6674_v23, %v6678_v3  ;;  %v6697_v19 = vor.u32 %v6696_v58, %v6692_v57  ;;  %v13855_v23 = vld [vmem:[#allocation3] sm:$0xf]  ;;  %v16483_v3 = vld [vmem:[#allocation3 + $0x4] sm:$0xf]  ;;  %v13857_v58 = vld [vmem:[#allocation3 + $0xc] sm:$0xf]  ;;  %v18404_v32 = vcombine.low %v16369_v16, %v16375_v18 }
 0x3a0   : > { %v11825_v45 = vcombine.low %v6669_v27, %v6679_v7  ;;  %v6693_v63 = vsel %vm14107_vm13, %v6688_v11, %v6692_v57  ;;  %v11843_v51 = vcombine.low %v13855_v23, %v16483_v3  ;;  %v16488_v27 = vld [vmem:[#allocation3 + $0x10] sm:$0xf]  ;;  %v7519_v57 = vsel %vm6803_vm7, %v16175_v38, 0  ;;  %v13859_v11 = vld [vmem:[#allocation3 + $0x18] sm:$0xf] }
 0x3a1   : > { %v6698_v37 = vrot.slane %v6697_v19, 4  ;;  %v11844_v7 = vcombine.low %v13857_v58, %v16488_v27  ;;  %v16493_v19 = vld [vmem:[#allocation3 + $0x1c] sm:$0xf]  ;;  %v7268_v38 = vld [vmem:[#allocation3 + $0x60] sm:$0xe]  ;;  %v7375_v5 = vrot.slane %v7373_v55, 4 }
 0x3a2   : > { %12885 = vmatprep.mubr.msk.bf16.mxu1 %vm6754_vm9, %v11825_v45  ;;  %v7267_v45 = vld [vmem:[#allocation3 + $0x54] sm:$0xe]  ;;  %v13861_v23 = vld [vmem:[#allocation3 + $0x24] sm:$0xf]  ;;  %v11883_v12 = vrot.slane %v7268_v38, 9  ;;  %v7380_v38 = vrot.slane %v16355_v10, 5 }
 0x3a3   : > { %v6703_v4 = vsel %vm14107_vm13, %v6698_v37, %v6702_v62  ;;  %v11845_v62 = vcombine.low %v13859_v11, %v16493_v19  ;;  %v16499_v37 = vld [vmem:[%s18180_s4 + $0xc] sm:$0xf]  ;;  %v7362_v11 = vrot.slane %v16307_v24, 5  ;;  %v7369_v24 = vrot.slane %v16327_v48, 5 }
 0x3a4   : > { %v11826_v21 = vcombine.low %v6693_v63, %v6703_v4  ;;  %v7359_v63 = vrot.slane %v16299_v46, 5  ;;  %v11882_v4 = vrot.slane %v7267_v45, 9  ;;  %v7404_v29 = vrot.slane %v16410_v9, 5 }
 0x3a5   : > { %v7411_v20 = vrot.slane %v16432_v56, 5  ;;  %v18405_v46 = vcombine.low %v16380_v43, %v16392_v61  ;;  %v7310_v49 = vrot.slane %v16483_v3, 5  ;;  %v7317_v43 = vrot.slane %v16488_v27, 5 }
 0x3a6   : > { %12886 = vmatmul.mubr.msk.bf16.gmra.mrb[44].mxu1 %vm6754_vm9, %v11826_v21  ;;  %v7361_v58 = vrot.slane %v7359_v63, 4  ;;  %v16516_v45 = vsel %vm14432_vm8, %v11882_v4, %v7359_v63  ;;  %v7271_v63 = vld [vmem:[#allocation3 + $0x84] sm:$0xe] }
 0x3a7   : > { %12891 = vmatprep.mubr.msk.bf16.mxu1 %vm6754_vm9, %v11843_v51  ;;  %v16504_v51 = vld [vmem:[#allocation3 + $0x28] sm:$0xf] }
 0x3a8   : > { %v11846_v21 = vcombine.low %v13861_v23, %v16504_v51  ;;  %v7270_v23 = vld [vmem:[#allocation3 + $0x78] sm:$0xe]  ;;  %v16521_v47 = vsel %vm14432_vm8, %v7361_v58, %v7362_v11 }
 0x3a9   : > { %v11885_v58 = vrot.slane %v7270_v23, 9  ;;  %v7382_v23 = vrot.slane %v7380_v38, 4 }
 0x3ae   : > { %12892 = vmatmul.mubr.msk.bf16.vlgmr.msra.gmra.mrb[16].mxu1 %vm6754_vm9, %v11844_v7  ;;  %v11847_v7 = vcombine.low %v16195_v6, %v16199_v33  ;;  %v7273_v6 = vld [vmem:[#allocation3 + $0x9c] sm:$0xe] }
 0x3af   : > { %12924 = vmatpush3.bf16.msra.mxu1 %v7519_v57  ;;  %12895 = vmatprep.mubr.msk.bf16.mxu1 %vm6754_vm9, %v11845_v62  ;;  %v11848_v57 = vcombine.low %v16218_v0, %v16235_v54  ;;  %v7366_v62 = vrot.slane %v16325_v2, 5  ;;  %v11884_v0 = vrot.slane %v7269_v34, 9  ;;  %v7376_v54 = vrot.slane %v16357_v40, 5  ;;  %v7260_v2 = vld [vmem:[#allocation3] sm:$0xe] }
 0x3b0   : > { %13722 = vmatprep.subr.msk.bf16.mxu1 %vm6803_vm7, %v16499_v37  ;;  %v7383_v34 = vrot.slane %v16366_v1, 5  ;;  %v7387_v40 = vrot.slane %v16375_v18, 5 }
 0x3b1   : > { %v7368_v33 = vrot.slane %v7366_v62, 4  ;;  %v16530_v4 = vsel %vm14432_vm8, %v11883_v12, %v7366_v62  ;;  %v16539_v11 = vsel %vm14432_vm8, %v11884_v0, %v7373_v55  ;;  %v16548_v62 = vsel %vm14432_vm8, %v7375_v5, %v7376_v54 }
 0x3b2   : > { %v11849_v55 = vcombine.low %v16248_v50, %v16257_v60  ;;  %v7389_v0 = vrot.slane %v7387_v40, 4  ;;  %v16558_v12 = vsel %vm14432_vm8, %v11885_v58, %v7380_v38  ;;  %v16562_v5 = vsel %vm14432_vm8, %v7382_v23, %v7383_v34  ;;  %v7274_v38 = vld [vmem:[#allocation3 + $0xa8] sm:$0xe] }
 0x3b3   : > { %v16535_v48 = vsel %vm14432_vm8, %v7368_v33, %v7369_v24  ;;  %v11886_v24 = vrot.slane %v7271_v63, 9  ;;  %v7272_v33 = vld [vmem:[#allocation3 + $0x90] sm:$0xe]  ;;  %v7394_v50 = vrot.slane %v16392_v61, 5  ;;  %v7401_v58 = vrot.slane %v16406_v22, 5 }
 0x3b4   : > { %v11887_v63 = vrot.slane %v7272_v33, 9  ;;  %v7275_v33 = vld [vmem:[#allocation3 + $0xb4] sm:$0xe]  ;;  %v7324_v61 = vrot.slane %v16493_v19, 5  ;;  %v7331_v19 = vrot.slane %v16504_v51, 5 }
 0x3b5   : > { %v7396_v23 = vrot.slane %v7394_v50, 4  ;;  %v7403_v54 = vrot.slane %v7401_v58, 4  ;;  %v16684_v51 = vld [vmem:[%s18180_s4 + $0x10] sm:$0xf] }
 0x3b6   : > { %12896 = vmatmul.mubr.msk.bf16.gmra.mrb[20].mxu1 %vm6754_vm9, %v11846_v21  ;;  %v7390_v21 = vrot.slane %v16386_v35, 5  ;;  %v16581_v1 = vsel %vm14432_vm8, %v11887_v63, %v7394_v50  ;;  %v8809_v50 = vld [vmem:[#allocation3 + $0x90] sm:$0xe] }
 0x3b7   : > { %12899 = vmatprep.mubr.msk.bf16.mxu1 %vm6754_vm9, %v11847_v7  ;;  %v16566_v7 = vsel %vm14432_vm8, %v11886_v24, %v7387_v40  ;;  %v7397_v40 = vrot.slane %v16397_v36, 5  ;;  %v11888_v24 = vrot.slane %v7273_v6, 9  ;;  %v11889_v36 = vrot.slane %v7274_v38, 9 }
 0x3b8   : > { %v16573_v35 = vsel %vm14432_vm8, %v7389_v0, %v7390_v21  ;;  %v7408_v0 = vrot.slane %v16425_v28, 5  ;;  %v7415_v6 = vrot.slane %v16443_v26, 5  ;;  %v16598_v9 = vsel %vm14432_vm8, %v7403_v54, %v7404_v29 }
 0x3b9   : > { %v16587_v21 = vsel %vm14432_vm8, %v7396_v23, %v7397_v40  ;;  %v16591_v34 = vsel %vm14432_vm8, %v11888_v24, %v7401_v58  ;;  %v11890_v58 = vrot.slane %v7275_v33, 9  ;;  %v7418_v38 = vrot.slane %v16450_v31, 5 }
 0x3ba   : > { %v7410_v63 = vrot.slane %v7408_v0, 4  ;;  %v7417_v40 = vrot.slane %v7415_v6, 4  ;;  %v16608_v24 = vsel %vm14432_vm8, %v11889_v36, %v7408_v0  ;;  %v18403_v54 = vcombine.low %v16350_v15, %v16355_v10  ;;  %v7262_v36 = vld [vmem:[#allocation3 + $0x18] sm:$0xe] }
 0x3bb   : > { %v18406_v15 = vcombine.low %v16404_v8, %v16406_v22  ;;  %v18407_v10 = vcombine.low %v16415_v13, %v16425_v28  ;;  %v7319_v0 = vrot.slane %v7317_v43, 4  ;;  %v18408_v8 = vcombine.low %v16436_v42, %v16443_v26  ;;  %v7261_v22 = vld [vmem:[#allocation3 + $0xc] sm:$0xe]  ;;  %v13864_v28 = vld [vmem:[#allocation3 + $0x14] sm:$0x1] }
 0x3bc   : > { %v16612_v29 = vsel %vm14432_vm8, %v7410_v63, %v7411_v20  ;;  %v16622_v31 = vsel %vm14432_vm8, %v7417_v40, %v7418_v38  ;;  %v18402_v20 = vcombine.low %v16335_v41, %v16337_v25  ;;  %v11875_v41 = vrot.slane %v7260_v2, 9  ;;  %v13866_v26 = vld [vmem:[#allocation3 + $0x34] sm:$0xf] }
 0x3bd   : > { %v7312_v25 = vrot.slane %v7310_v49, 4  ;;  %v7326_v13 = vrot.slane %v7324_v61, 4  ;;  %v7320_v33 = vrot.slane %v13864_v28, 5  ;;  %v11877_v40 = vrot.slane %v7262_v36, 9 }
 0x3be   : > { %12900 = vmatmul.mubr.msk.bf16.gmra.mrb[24].mxu1 %vm6754_vm9, %v11848_v57  ;;  %v16618_v57 = vsel %vm14432_vm8, %v11890_v58, %v7415_v6  ;;  %v7311_v16 = vsel %vm14432_vm8, %v11875_v41, %v7310_v49  ;;  %v13865_v6 = vld [vmem:[#allocation3 + $0x20] sm:$0x1]  ;;  %v11876_v58 = vrot.slane %v7261_v22, 9  ;;  %v7338_v38 = vrot.slane %v13866_v26, 5  ;;  %v7263_v41 = vld [vmem:[#allocation3 + $0x24] sm:$0xe] }
 0x3bf   : > { %12903 = vmatprep.mubr.msk.bf16.mxu1 %vm6754_vm9, %v11849_v55  ;;  %v7327_v63 = vrot.slane %v13865_v6, 5  ;;  %v7321_v27 = vsel %vm14432_vm8, %v7319_v0, %v7320_v33  ;;  %v7333_v2 = vrot.slane %v7331_v19, 4  ;;  %v7265_v6 = vld [vmem:[#allocation3 + $0x3c] sm:$0xe] }
 0x3c1   : > { %v7328_v42 = vsel %vm14432_vm8, %v7326_v13, %v7327_v63 }
 0x3c6   : > { %12904 = vmatmul.mubr.msk.bf16.gmra.mrb[28].mxu1 %vm6754_vm9, %v11850_v39  ;;  %v13863_v39 = vld [vmem:[#allocation3 + $0x8] sm:$0x1] }
 0x3c7   : > { %12907 = vmatprep.mubr.msk.bf16.mxu1 %vm6754_vm9, %v11851_v52  ;;  %v7313_v52 = vrot.slane %v13863_v39, 5  ;;  %v13867_v39 = vld [vmem:[#allocation3 + $0x2c] sm:$0x1] }
 0x3c9   : > { %v7314_v18 = vsel %vm14432_vm8, %v7312_v25, %v7313_v52  ;;  %v7340_v25 = vrot.slane %v7338_v38, 4  ;;  %v7334_v52 = vrot.slane %v13867_v39, 5 }
 0x3ca   : > { %v11892_v3 = vcombine.low %v7311_v16, %v7314_v18  ;;  %v11878_v16 = vrot.slane %v7263_v41, 9  ;;  %v18409_v41 = vcombine.low %v16516_v45, %v16521_v47 }
 0x3cb   : > { %v7335_v18 = vsel %vm14432_vm8, %v7333_v2, %v7334_v52  ;;  %v16719_v2 = vld [vmem:[#allocation3 + $0x38] sm:$0x1]  ;;  %v8801_v52 = vld [vmem:[#allocation3 + $0x30] sm:$0xe] }
 0x3cc   : > { %v7332_v22 = vsel %vm14432_vm8, %v11878_v16, %v7331_v19  ;;  %v8802_v16 = vld [vmem:[#allocation3 + $0x3c] sm:$0xe] }
 0x3cd   : > { %v11895_v13 = vcombine.low %v7332_v22, %v7335_v18  ;;  %v16734_v18 = vld [vmem:[#allocation3 + $0x44] sm:$0x1] }
 0x3ce   : > { %12908 = vmatmul.mubr.msk.bf16.gmra.mrb[32].mxu1 %vm6754_vm9, %v18402_v20  ;;  %v7318_v20 = vsel %vm14432_vm8, %v11876_v58, %v7317_v43  ;;  %v13869_v43 = vld [vmem:[#allocation3 + $0x40] sm:$0xf]  ;;  %v7348_v58 = vrot.slane %v16251_v59, 5  ;;  %v16713_v59 = vld [vmem:[#allocation3 + $0x28] sm:$0xf] }
 0x3cf   : > { %12911 = vmatprep.mubr.msk.bf16.mxu1 %vm6754_vm9, %v18403_v54  ;;  %v11893_v54 = vcombine.low %v7318_v20, %v7321_v27  ;;  %v7266_v27 = vld [vmem:[#allocation3 + $0x48] sm:$0xe]  ;;  %v8878_v39 = vrot.slane %v16713_v59, 5 }
 0x3d1   : > { %v8880_v47 = vrot.slane %v8878_v39, 4 }
 0x3d6   : > { %12912 = vmatmul.mubr.msk.bf16.gmra.mrb[36].mxu1 %vm6754_vm9, %v18404_v32  ;;  %v7877_v32 = vsel %vm6803_vm7, %v16499_v37, 0  ;;  %v7264_v37 = vld [vmem:[#allocation3 + $0x30] sm:$0xe] }
 0x3d7   : > { %12915 = vmatprep.mubr.msk.bf16.mxu1 %vm6754_vm9, %v18405_v46  ;;  %v7325_v46 = vsel %vm14432_vm8, %v11877_v40, %v7324_v61  ;;  %v7345_v61 = vrot.slane %v13869_v43, 5  ;;  %v11880_v40 = vrot.slane %v7265_v6, 9  ;;  %v16736_v43 = vld [vmem:[#allocation3 + $0x50] sm:$0x1] }
 0x3d8   : > { %v11894_v49 = vcombine.low %v7325_v46, %v7328_v42  ;;  %v11881_v42 = vrot.slane %v7266_v27, 9  ;;  %v16715_v46 = vld [vmem:[#allocation3 + $0x2c] sm:$0x1]  ;;  %v8804_v27 = vld [vmem:[#allocation3 + $0x54] sm:$0xe] }
 0x3d9   : > { %v7347_v36 = vrot.slane %v7345_v61, 4  ;;  %v8881_v45 = vrot.slane %v16715_v46, 5 }
 0x3db   : > { %v7349_v19 = vsel %vm14432_vm8, %v7347_v36, %v7348_v58  ;;  %v16750_v22 = vsel %vm14432_vm8, %v8880_v47, %v8881_v45  ;;  %v11996_v45 = vrot.slane %v8804_v27, 9  ;;  %v8807_v27 = vld [vmem:[#allocation3 + $0x78] sm:$0xe] }
 0x3dc   : > { %18412 = vst [vmem:[#allocation13_spill] sm:$0xff] %v16750_v22  ;;  %v13795_v22 = vld [vmem:[#allocation3 + $0x60] sm:$0xff]  }
 0x3de   : > { %12916 = vmatmul.mubr.msk.bf16.gmra.mrb[40].mxu1 %vm6754_vm9, %v18406_v15  ;;  %v13868_v15 = vld [vmem:[#allocation3 + $0x38] sm:$0x1] }
 0x3df   : > { %12919 = vmatprep.mubr.msk.bf16.mxu1 %vm6754_vm9, %v18407_v10  ;;  %v7341_v10 = vrot.slane %v13868_v15, 5  ;;  %v16732_v15 = vld [vmem:[#allocation3 + $0x40] sm:$0xf] }
 0x3e1   : > { %v7342_v0 = vsel %vm14432_vm8, %v7340_v25, %v7341_v10  ;;  %v16725_v25 = vld [vmem:[#allocation3 + $0x4c] sm:$0xf] }
 0x3e2   : > { %v8899_v58 = vrot.slane %v16725_v25, 5 }
 0x3e6   : > { %12920 = vmatmul.mubr.msk.bf16.gmra.mrb[44].mxu1 %vm6754_vm9, %v18408_v8  ;;  %v7352_v8 = vrot.slane %v16257_v60, 5  ;;  %v7355_v60 = vrot.slane %v16263_v53, 5  ;;  %v8800_v53 = vld [vmem:[#allocation3 + $0x24] sm:$0xe] }
 0x3e7   : > { %12925 = vmatprep.mubr.msk.bf16.mxu1 %vm6754_vm9, %v11892_v3  ;;  %v11879_v3 = vrot.slane %v7264_v37, 9  ;;  %v18410_v37 = vcombine.low %v16530_v4, %v16535_v48  ;;  %v11992_v10 = vrot.slane %v8800_v53, 9  ;;  %v11993_v4 = vrot.slane %v8801_v52, 9 }
 0x3e8   : > { %v7354_v63 = vrot.slane %v7352_v8, 4  ;;  %v8902_v53 = vrot.slane %v16736_v43, 5  ;;  %v18416_v52 = vcombine.low %v16539_v11, %v16548_v62  ;;  %v18419_v11 = vcombine.low %v16558_v12, %v16562_v5  ;;  %v16798_v62 = vld [vmem:[#allocation3 + $0x74] sm:$0x1]  ;;  %v8808_v12 = vld [vmem:[#allocation3 + $0x84] sm:$0xe] }
 0x3e9   : > { %v7339_v28 = vsel %vm14432_vm8, %v11879_v3, %v7338_v38  ;;  %v7346_v38 = vsel %vm14432_vm8, %v11880_v40, %v7345_v61  ;;  %v16739_v61 = vld [vmem:[#allocation3 + $0x58] sm:$0xf]  ;;  %v16743_v3 = vsel %vm14432_vm8, %v11992_v10, %v8878_v39  ;;  %v16760_v40 = vld [vmem:[#allocation3 + $0x68] sm:$0x1]  ;;  %v8805_v39 = vld [vmem:[#allocation3 + $0x60] sm:$0xe] }
 0x3ea   : > { %v11896_v33 = vcombine.low %v7339_v28, %v7342_v0  ;;  %v7356_v26 = vsel %vm14432_vm8, %v7354_v63, %v7355_v60  ;;  %v11897_v20 = vcombine.low %v7346_v38, %v7349_v19  ;;  %18411 = vst [vmem:[#allocation12_spill] sm:$0xff] %v16743_v3  ;;  %v8803_v0 = vld [vmem:[#allocation3 + $0x48] sm:$0xe]  ;;  %v11994_v28 = vrot.slane %v8802_v16, 9  ;;  %v16758_v60 = vld [vmem:[#allocation3 + $0x64] sm:$0xf] }
 0x3eb   : > { %v8895_v63 = vrot.slane %v16734_v18, 5  ;;  %v11995_v38 = vrot.slane %v8803_v0, 9  ;;  %v16830_v0 = vld [vmem:[#allocation3 + $0x94] sm:$0xf]  ;;  %v16832_v10 = vld [vmem:[#allocation3 + $0x98] sm:$0x1] }
 0x3ec   : > { %v8188_v3 = vshll.u32 %v16715_v46, 16 }
 0x3ed   : > { %v16792_v47 = vsel %vm14432_vm8, %v11995_v38, %v8899_v58 }
 0x3ee   : > { %12926 = vmatmul.mubr.msk.bf16.vlgmr.msra.gmra.mrb[16].mxu1 %vm6754_vm9, %v11893_v54  ;;  %v7353_v54 = vsel %vm14432_vm8, %v11881_v42, %v7352_v8  ;;  %v16746_v8 = vld [vmem:[#allocation3 + $0x5c] sm:$0x1]  ;;  %18418 = vst [vmem:[#allocation18_spill] sm:$0xff] %v16792_v47 }
 0x3ef   : > { %12958 = vmatpush3.bf16.msra.mxu1 %v7877_v32  ;;  %12929 = vmatprep.mubr.msk.bf16.mxu1 %vm6754_vm9, %v11894_v49  ;;  %v11898_v32 = vcombine.low %v7353_v54, %v7356_v26  ;;  %v16717_v49 = vld [vmem:[#allocation3 + $0x34] sm:$0xf] }
 0x3f0   : > { %13723 = vmatprep.subr.msk.bf16.mxu1 %vm6803_vm7, %v16684_v51  ;;  %v8885_v48 = vrot.slane %v16717_v49, 5 }
 0x3f2   : > { %v8887_v6 = vrot.slane %v8885_v48, 4  ;;  %v16764_v19 = vsel %vm14432_vm8, %v11993_v4, %v8885_v48  ;;  %v8806_v4 = vld [vmem:[#allocation3 + $0x6c] sm:$0xe]  ;;  %v16800_v48 = vld [vmem:[#allocation3 + $0x80] sm:$0x1] }
 0x3f3   : > { %18413 = vst [vmem:[#allocation14_spill] sm:$0xff] %v16764_v19  ;;  %v8930_v56 = vrot.slane %v16800_v48, 5 }
 0x3f6   : > { %12930 = vmatmul.mubr.msk.bf16.gmra.mrb[20].mxu1 %vm6754_vm9, %v11895_v13  ;;  %v8888_v13 = vrot.slane %v16719_v2, 5 }
 0x3f7   : > { %12933 = vmatprep.mubr.msk.bf16.mxu1 %vm6754_vm9, %v11896_v33  ;;  %v8892_v33 = vrot.slane %v16732_v15, 5 }
 0x3f8   : > { %v16774_v54 = vsel %vm14432_vm8, %v8887_v6, %v8888_v13  ;;  %v16809_v6 = vld [vmem:[#allocation3 + $0x88] sm:$0xf] }
 0x3f9   : > { %v16768_v42 = vsel %vm14432_vm8, %v11994_v28, %v8892_v33  ;;  %v8894_v26 = vrot.slane %v8892_v33, 4  ;;  %18415 = vst [vmem:[#allocation16_spill] sm:$0xff] %v16774_v54  ;;  %v8909_v33 = vrot.slane %v16746_v8, 5  ;;  %v8934_v23 = vrot.slane %v16809_v6, 5 }
 0x3fa   : > { %18414 = vst [vmem:[#allocation15_spill] sm:$0xff] %v16768_v42 }
 0x3fb   : > { %v16788_v16 = vsel %vm14432_vm8, %v8894_v26, %v8895_v63  ;;  %v11997_v63 = vrot.slane %v8805_v39, 9  ;;  %v16818_v26 = vld [vmem:[#allocation3 + $0x8c] sm:$0x1]  ;;  %v8923_v39 = vrot.slane %v16798_v62, 5 }
 0x3fc   : > { %18417 = vst [vmem:[#allocation17_spill] sm:$0xff] %v16788_v16  ;;  %v8178_v16 = vshll.u32 %v16713_v59, 16 }
 0x3fe   : > { %12934 = vmatmul.mubr.msk.bf16.gmra.mrb[24].mxu1 %vm6754_vm9, %v11897_v20  ;;  %v16770_v20 = vld [vmem:[#allocation3 + $0x7c] sm:$0xf] }
 0x3ff   : > { %12937 = vmatprep.mubr.msk.bf16.mxu1 %vm6754_vm9, %v11898_v32  ;;  %v8901_v32 = vrot.slane %v8899_v58, 4  ;;  %v8913_v58 = vrot.slane %v16758_v60, 5 }
 0x401   : > { %v16806_v13 = vsel %vm14432_vm8, %v8901_v32, %v8902_v53  ;;  %v8916_v32 = vrot.slane %v16760_v40, 5  ;;  %v11998_v53 = vrot.slane %v8806_v4, 9 }
 0x402   : > { %18420 = vst [vmem:[#allocation19_spill] sm:$0xff] %v16806_v13 }
 0x406   : > { %12938 = vmatmul.mubr.msk.bf16.gmra.mrb[28].mxu1 %vm6754_vm9, %v18409_v41  ;;  %v8906_v41 = vrot.slane %v16739_v61, 5 }
 0x407   : > { %12941 = vmatprep.mubr.msk.bf16.mxu1 %vm6754_vm9, %v18410_v37  ;;  %v16782_v37 = vld [vmem:[#allocation3 + $0x70] sm:$0xf] }
 0x408   : > { %v8908_v28 = vrot.slane %v8906_v41, 4  ;;  %v16815_v5 = vsel %vm14432_vm8, %v11996_v45, %v8906_v41  ;;  %v8915_v41 = vrot.slane %v8913_v58, 4  ;;  %v8927_v45 = vrot.slane %v16770_v20, 5 }
 0x409   : > { %18421 = vst [vmem:[#allocation20_spill] sm:$0xff] %v16815_v5 }
 0x40a   : > { %v16822_v38 = vsel %vm14432_vm8, %v8908_v28, %v8909_v33  ;;  %v16836_v28 = vsel %vm14432_vm8, %v11997_v63, %v8913_v58  ;;  %v16844_v36 = vsel %vm14432_vm8, %v8915_v41, %v8916_v32  ;;  %v8929_v55 = vrot.slane %v8927_v45, 4  ;;  %v16864_v41 = vld [vmem:[#allocation3 + $0xa4] sm:$0x1]  ;;  %v16888_v63 = vld [vmem:[#allocation3 + $0xb8] sm:$0xf] }
 0x40b   : > { %18422 = vst [vmem:[#allocation21_spill] sm:$0xff] %v16822_v38  ;;  %18423 = vst [vmem:[#allocation22_spill] sm:$0xff] %v16836_v28  ;;  %v12000_v32 = vrot.slane %v8808_v12, 9  ;;  %v16866_v38 = vld [vmem:[#allocation3 + $0xac] sm:$0xf]  ;;  %v8937_v12 = vrot.slane %v16818_v26, 5 }
 0x40c   : > { %18425 = vst [vmem:[#allocation24_spill] sm:$0xff] %v16844_v36  ;;  %v16910_v36 = vld [vmem:[#allocation3 + $0xc4] sm:$0xf]  ;;  %v8962_v28 = vrot.slane %v16888_v63, 5 }
 0x40e   : > { %12942 = vmatmul.mubr.msk.bf16.gmra.mrb[32].mxu1 %vm6754_vm9, %v18416_v52  ;;  %v8920_v52 = vrot.slane %v16782_v37, 5  ;;  %v8964_v5 = vrot.slane %v8962_v28, 4 }
 0x40f   : > { %12945 = vmatprep.mubr.msk.bf16.mxu1 %vm6754_vm9, %v18419_v11  ;;  %v11999_v11 = vrot.slane %v8807_v27, 9 }
 0x410   : > { %v16840_v4 = vsel %vm14432_vm8, %v11998_v53, %v8920_v52  ;;  %v8922_v33 = vrot.slane %v8920_v52, 4  ;;  %v8810_v53 = vld [vmem:[#allocation3 + $0x9c] sm:$0xe]  ;;  %v18428_v52 = vcombine.low %v16566_v7, %v16573_v35  ;;  %v16879_v7 = vld [vmem:[#allocation3 + $0xb0] sm:$0x1] }
 0x411   : > { %18424 = vst [vmem:[#allocation23_spill] sm:$0xff] %v16840_v4  ;;  %v16858_v27 = vsel %vm14432_vm8, %v11999_v11, %v8927_v45  ;;  %v8936_v11 = vrot.slane %v8934_v23, 4  ;;  %v18430_v45 = vcombine.low %v16581_v1, %v16587_v21  ;;  %v8944_v21 = vrot.slane %v16832_v10, 5 }
 0x412   : > { %v16854_v58 = vsel %vm14432_vm8, %v8922_v33, %v8923_v39  ;;  %18427 = vst [vmem:[#allocation26_spill] sm:$0xff] %v16858_v27  ;;  %v16872_v39 = vsel %vm14432_vm8, %v8929_v55, %v8930_v56  ;;  %v16885_v33 = vsel %vm14432_vm8, %v12000_v32, %v8934_v23  ;;  %v8941_v56 = vrot.slane %v16830_v0, 5  ;;  %v8811_v55 = vld [vmem:[#allocation3 + $0xa8] sm:$0xe]  ;;  %v16900_v27 = vld [vmem:[#allocation3 + $0xbc] sm:$0x1] }
 0x413   : > { %18426 = vst [vmem:[#allocation25_spill] sm:$0xff] %v16854_v58  ;;  %18429 = vst [vmem:[#allocation27_spill] sm:$0xff] %v16872_v39  ;;  %v16892_v1 = vsel %vm14432_vm8, %v8936_v11, %v8937_v12  ;;  %v8948_v58 = vrot.slane %v16848_v14, 5  ;;  %v8955_v32 = vrot.slane %v16866_v38, 5  ;;  %v8812_v39 = vld [vmem:[#allocation3 + $0xb4] sm:$0xe] }
 0x414   : > { %18431 = vst [vmem:[#allocation28_spill] sm:$0xff] %v16885_v33  ;;  %18432 = vst [vmem:[#allocation29_spill] sm:$0xff] %v16892_v1  ;;  %v8943_v23 = vrot.slane %v8941_v56, 4  ;;  %v12003_v4 = vrot.slane %v8811_v55, 9  ;;  %v8958_v33 = vrot.slane %v16879_v7, 5  ;;  %v12004_v55 = vrot.slane %v8812_v39, 9 }
 0x415   : > { %18433 = vst [vmem:[#allocation4_spill] sm:$0xff] %v16900_v27  ;;  %v8950_v12 = vrot.slane %v8948_v58, 4  ;;  %v8957_v1 = vrot.slane %v8955_v32, 4  ;;  %v8969_v39 = vrot.slane %v16910_v36, 5 }
 0x416   : > { %12946 = vmatmul.mubr.msk.bf16.gmra.mrb[36].mxu1 %vm6754_vm9, %v18428_v52  ;;  %v12001_v52 = vrot.slane %v8809_v50, 9  ;;  %v8951_v50 = vrot.slane %v16864_v41, 5  ;;  %v16914_v35 = vsel %vm14432_vm8, %v8943_v23, %v8944_v21 }
 0x417   : > { %12949 = vmatprep.mubr.msk.bf16.mxu1 %vm6754_vm9, %v18430_v45  ;;  %v12002_v45 = vrot.slane %v8810_v53, 9  ;;  %18436 = vst [vmem:[#allocation8_spill] sm:$0xff] %v16914_v35  ;;  %v16934_v23 = vsel %vm14432_vm8, %v8957_v1, %v8958_v33  ;;  %v8813_v35 = vld [vmem:[#allocation3 + $0xc0] sm:$0xe]  ;;  %v16950_v33 = vsel %vm14432_vm8, %v12004_v55, %v8962_v28  ;;  %v8603_v55 = vsel %vm6803_vm7, %v16684_v51, 0  ;;  %v13791_v51 = vld [vmem:[#allocation3 + $0x30] sm:$0xff]  }
 0x418   : > { %v16904_v11 = vsel %vm14432_vm8, %v12001_v52, %v8941_v56  ;;  %v16922_v56 = vsel %vm14432_vm8, %v8950_v12, %v8951_v50  ;;  %18440 = vst [vmem:[#allocation31_spill] sm:$0xff] %v16934_v23  ;;  %v8965_v52 = vrot.slane %v16900_v27, 5  ;;  %v18441_v50 = vcombine.low %v16591_v34, %v16598_v9  ;;  %18443 = vst [vmem:[#allocation32_spill] sm:$0xff] %v16950_v33  ;;  %v8075_v28 = vld [vmem:[#allocation3 + $0x18] sm:$0xf]  ;;  %v13793_v33 = vld [vmem:[#allocation3 + $0x48] sm:$0xff]  }
 0x419   : > { %18434 = vst [vmem:[#allocation6_spill] sm:$0xff] %v16904_v11  ;;  %v16908_v53 = vsel %vm14432_vm8, %v12002_v45, %v8948_v58  ;;  %18437 = vst [vmem:[#allocation9_spill] sm:$0xff] %v16922_v56  ;;  %v16926_v58 = vsel %vm14432_vm8, %v12003_v4, %v8955_v32  ;;  %v16928_v45 = vld [vmem:[#allocation3 + $0xc8] sm:$0x1]  ;;  %v18442_v32 = vcombine.low %v16608_v24, %v16612_v29  ;;  %v12005_v9 = vrot.slane %v8813_v35, 9  ;;  %v13789_v35 = vld [vmem:[#allocation3 + $0x18] sm:$0xff]  }
 0x41a   : > { %18435 = vst [vmem:[#allocation7_spill] sm:$0xff] %v16908_v53  ;;  %18438 = vst [vmem:[#allocation5_spill] sm:$0xff] %v16926_v58  ;;  %v16954_v1 = vsel %vm14432_vm8, %v8964_v5, %v8965_v52  ;;  %v8971_v12 = vrot.slane %v8969_v39, 4  ;;  %v13788_v5 = vld [vmem:[#allocation3 + $0xc] sm:$0xff]   ;;  %v18447_v52 = vcombine.low %v16618_v57, %v16622_v31  ;;  %v8145_v21 = vshrl.u32 %v8075_v28, 16 }
 0x41b   : > { %18439 = vst [vmem:[#allocation30_spill] sm:$0xff] %v16928_v45  ;;  %18444 = vst [vmem:[#allocation33_spill] sm:$0xff] %v16954_v1  ;;  %v16961_v24 = vsel %vm14432_vm8, %v12005_v9, %v8969_v39  ;;  %v13790_v39 = vld [vmem:[#allocation3 + $0x24] sm:$0xff]   ;;  %v8072_v57 = vld [vmem:[#allocation3 + $0xc] sm:$0xf] }
 0x41c   : > { %18445 = vst [vmem:[#allocation34_spill] sm:$0xff] %v16961_v24  ;;  %v16985_v31 = vld [vmem:[#allocation3 + $0x10] sm:$0xf]  ;;  %v8121_v9 = vshrl.u32 %v8072_v57, 16  ;;  %v16995_v1 = vld [vmem:[#allocation3 + $0x14] sm:$0x1] }
 0x41d   : > { %18448 = vst [vmem:[#allocation36_spill] sm:$0xff] %v16985_v31  ;;  %18450 = vst [vmem:[#allocation38_spill] sm:$0xff] %v16995_v1  ;;  %v8147_v56 = vrot.slane %v8145_v21, 4  ;;  %v9655_v27 = vld [vmem:[#allocation3 + $0x88] sm:$0xf] }
 0x41e   : > { %12950 = vmatmul.mubr.msk.bf16.gmra.mrb[40].mxu1 %vm6754_vm9, %v18441_v50  ;;  %v8972_v50 = vrot.slane %v16928_v45, 5 }
 0x41f   : > { %12953 = vmatprep.mubr.msk.bf16.mxu1 %vm6754_vm9, %v18442_v32  ;;  %v16979_v32 = vld [vmem:[%s18180_s4 + $0x14] sm:$0xf] }
 0x420   : > { %v16965_v29 = vsel %vm14432_vm8, %v8971_v12, %v8972_v50  ;;  %v8124_v12 = vshll.u32 %v8072_v57, 16  ;;  %v8130_v50 = vshll.u32 %v16985_v31, 16 }
 0x421   : > { %18446 = vst [vmem:[#allocation35_spill] sm:$0xff] %v16965_v29  ;;  %v8148_v29 = vshll.u32 %v8075_v28, 16 }
 0x422   : > { %v8132_v34 = vrot.slane %v8130_v50, 5 }
 0x423   : > { %v8150_v53 = vrot.slane %v8148_v29, 5 }
 0x425   : > { %v8151_v13 = vor.u32 %v8150_v53, %v8147_v56 }
 0x426   : > { %12954 = vmatmul.mubr.msk.bf16.gmra.mrb[44].mxu1 %vm6754_vm9, %v18447_v52  ;;  %v13792_v52 = vld [vmem:[#allocation3 + $0x3c] sm:$0xff]  }
 0x427   : > { %12959 = vmatprep.mubr.msk.bf16.mxu1 %vm6754_vm9, %v13788_v5  ;;  %v8134_v5 = vshrl.u32 %v16985_v31, 16  ;;  %v17170_v31 = vld [vmem:[#allocation3 + $0x58] sm:$0xf] }
 0x428   : > { %18464 = vst [vmem:[#allocation52_spill] sm:$0xff] %v17170_v31 }
 0x429   : > { %v8136_v4 = vrot.slane %v8134_v5, 4 }
 0x42b   : > { %v8137_v58 = vor.u32 %v8136_v4, %v8132_v34 }
 0x42e   : > { %12960 = vmatmul.mubr.msk.bf16.vlgmr.msra.gmra.mrb[16].mxu1 %vm6754_vm9, %v13789_v35  ;;  %v16990_v35 = vld [vmem:[#allocation3 + $0x1c] sm:$0xf] }
 0x42f   : > { %12992 = vmatpush3.bf16.msra.mxu1 %v8603_v55  ;;  %12963 = vmatprep.mubr.msk.bf16.mxu1 %vm6754_vm9, %v13790_v39  ;;  %18449 = vst [vmem:[#allocation37_spill] sm:$0xff] %v16990_v35  ;;  %v8123_v55 = vrot.slane %v8121_v9, 4  ;;  %v8126_v39 = vrot.slane %v8124_v12, 5  ;;  %v8154_v57 = vshll.u32 %v16990_v35, 16  ;;  %v8158_v24 = vshrl.u32 %v16990_v35, 16  ;;  %v13794_v9 = vld [vmem:[#allocation3 + $0x54] sm:$0xff]  }
 0x430   : > { %13724 = vmatprep.subr.msk.bf16.mxu1 %vm6803_vm7, %v16979_v32  ;;  %v8140_v12 = vshll.u32 %v16995_v1, 16  ;;  %v13798_v35 = vld [vmem:[#allocation3 + $0x84] sm:$0xff]  }
 0x431   : > { %v8127_v23 = vor.u32 %v8126_v39, %v8123_v55  ;;  %v17000_v50 = vrot.slane %v8154_v57, 5  ;;  %v8160_v28 = vrot.slane %v8158_v24, 4  ;;  %v8081_v55 = vld [vmem:[#allocation3 + $0x30] sm:$0xf]  ;;  %v8138_v39 = vrot.slane %v8137_v58, 4 }
 0x432   : > { %v8142_v29 = vrot.slane %v8140_v12, 5  ;;  %v8182_v57 = vshrl.u32 %v16713_v59, 16  ;;  %v8193_v24 = vshrl.u32 %v8081_v55, 16  ;;  %v8196_v42 = vshll.u32 %v8081_v55, 16  ;;  %v8084_v12 = vld [vmem:[#allocation3 + $0x3c] sm:$0xf] }
 0x433   : > { %v8128_v4 = vrot.slane %v8127_v23, 4  ;;  %v8161_v47 = vor.u32 %v8160_v28, %v17000_v50  ;;  %v13796_v23 = vld [vmem:[#allocation3 + $0x6c] sm:$0xff]   ;;  %v8152_v58 = vrot.slane %v8151_v13, 4  ;;  %v17014_v28 = vrot.slane %v8178_v16, 5 }
 0x434   : > { %v8143_v56 = vsel %vm14107_vm13, %v8138_v39, %v8142_v29  ;;  %v8184_v55 = vrot.slane %v8182_v57, 4  ;;  %v8220_v13 = vshll.u32 %v8084_v12, 16  ;;  %v8226_v39 = vshll.u32 %v16732_v15, 16 }
 0x435   : > { %v8133_v53 = vsel %vm14107_vm13, %v8128_v4, %v8132_v34  ;;  %v8162_v59 = vrot.slane %v8161_v47, 4  ;;  %v8217_v4 = vshrl.u32 %v8084_v12, 16  ;;  %v8230_v16 = vshrl.u32 %v16732_v15, 16 }
 0x436   : > { %12964 = vmatmul.mubr.msk.bf16.gmra.mrb[20].mxu1 %vm6754_vm9, %v13791_v51  ;;  %v16997_v51 = vld [vmem:[#allocation3 + $0x20] sm:$0x1]  ;;  %v17023_v47 = vcombine.low %v8133_v53, %v8143_v56  ;;  %v8157_v46 = vsel %vm14107_vm13, %v8152_v58, %v17000_v50  ;;  %v8250_v57 = vshll.u32 %v16725_v25, 16  ;;  %v8212_v53 = vshll.u32 %v16719_v2, 16 }
 0x437   : > { %12967 = vmatprep.mubr.msk.bf16.mxu1 %vm6754_vm9, %v13792_v52  ;;  %18451 = vst [vmem:[#allocation39_spill] sm:$0xff] %v16997_v51  ;;  %v8078_v52 = vld [vmem:[#allocation3 + $0x24] sm:$0xf]  ;;  %v8164_v5 = vshll.u32 %v16997_v51, 16  ;;  %v8219_v56 = vrot.slane %v8217_v4, 4  ;;  %v8222_v50 = vrot.slane %v8220_v13, 5 }
 0x438   : > { %v8169_v11 = vshrl.u32 %v8078_v52, 16  ;;  %v8172_v21 = vshll.u32 %v8078_v52, 16  ;;  %v17035_v58 = vrot.slane %v8226_v39, 5  ;;  %v8232_v12 = vrot.slane %v8230_v16, 4 }
 0x439   : > { %v8166_v54 = vrot.slane %v8164_v5, 5  ;;  %v8198_v5 = vrot.slane %v8196_v42, 5  ;;  %v8190_v4 = vrot.slane %v8188_v3, 5  ;;  %v8214_v39 = vrot.slane %v8212_v53, 5 }
 0x43a   : > { %v8171_v19 = vrot.slane %v8169_v11, 4  ;;  %v8174_v52 = vrot.slane %v8172_v21, 5  ;;  %v8195_v11 = vrot.slane %v8193_v24, 4  ;;  %v8254_v24 = vshrl.u32 %v16725_v25, 16 }
 0x43b   : > { %v8167_v42 = vsel %vm14107_vm13, %v8162_v59, %v8166_v54  ;;  %v17037_v25 = vrot.slane %v8250_v57, 5  ;;  %v8233_v16 = vor.u32 %v8232_v12, %v17035_v58 }
 0x43c   : > { %v8175_v29 = vor.u32 %v8174_v52, %v8171_v19  ;;  %v8199_v15 = vor.u32 %v8198_v5, %v8195_v11  ;;  %v8256_v44 = vrot.slane %v8254_v24, 4  ;;  %v8278_v11 = vshrl.u32 %v16739_v61, 16 }
 0x43d   : > { %v17042_v2 = vcombine.low %v8157_v46, %v8167_v42  ;;  %v8223_v24 = vor.u32 %v8222_v50, %v8219_v56  ;;  %v8234_v53 = vrot.slane %v8233_v16, 4  ;;  %v8260_v56 = vshll.u32 %v16736_v43, 16 }
 0x43e   : > { %12968 = vmatmul.mubr.msk.bf16.gmra.mrb[24].mxu1 %vm6754_vm9, %v13793_v33  ;;  %v8202_v33 = vshll.u32 %v16717_v49, 16  ;;  %v8176_v5 = vrot.slane %v8175_v29, 4  ;;  %v8200_v13 = vrot.slane %v8199_v15, 4  ;;  %v8257_v46 = vor.u32 %v8256_v44, %v17037_v25  ;;  %v13799_v44 = vld [vmem:[#allocation3 + $0x90] sm:$0xff]  }
 0x43f   : > { %12971 = vmatprep.mubr.msk.bf16.mxu1 %vm6754_vm9, %v13794_v9  ;;  %v8206_v9 = vshrl.u32 %v16717_v49, 16  ;;  %v8087_v49 = vld [vmem:[#allocation3 + $0x48] sm:$0xf]  ;;  %v8280_v29 = vrot.slane %v8278_v11, 4  ;;  %v8302_v15 = vshrl.u32 %v16758_v60, 16 }
 0x440   : > { %v17018_v51 = vrot.slane %v8202_v33, 5  ;;  %v8244_v21 = vshll.u32 %v8087_v49, 16  ;;  %v8090_v33 = vld [vmem:[#allocation3 + $0x54] sm:$0xf] }
 0x441   : > { %v8208_v34 = vrot.slane %v8206_v9, 4  ;;  %v8185_v9 = vor.u32 %v8184_v55, %v17014_v28  ;;  %v8265_v52 = vshrl.u32 %v8090_v33, 16  ;;  %v8268_v59 = vshll.u32 %v8090_v33, 16 }
 0x442   : > { %v8246_v19 = vrot.slane %v8244_v21, 5  ;;  %v8274_v55 = vshll.u32 %v16739_v61, 16  ;;  %v8093_v21 = vld [vmem:[#allocation3 + $0x60] sm:$0xf]  ;;  %v8205_v50 = vsel %vm14107_vm13, %v8200_v13, %v17018_v51 }
 0x443   : > { %v8267_v33 = vrot.slane %v8265_v52, 4  ;;  %v8270_v61 = vrot.slane %v8268_v59, 5  ;;  %v8289_v3 = vshrl.u32 %v8093_v21, 16  ;;  %v8224_v52 = vrot.slane %v8223_v24, 4 }
 0x444   : > { %v17048_v42 = vrot.slane %v8274_v55, 5  ;;  %v8258_v59 = vrot.slane %v8257_v46, 4  ;;  %v8326_v46 = vshrl.u32 %v16782_v37, 16 }
 0x445   : > { %v8291_v43 = vrot.slane %v8289_v3, 4  ;;  %v8229_v24 = vsel %vm14107_vm13, %v8224_v52, %v17035_v58 }
 0x446   : > { %12972 = vmatmul.mubr.msk.bf16.gmra.mrb[28].mxu1 %vm6754_vm9, %v13795_v22  ;;  %v8241_v22 = vshrl.u32 %v8087_v49, 16  ;;  %v13797_v49 = vld [vmem:[#allocation3 + $0x78] sm:$0xff]   ;;  %v8281_v55 = vor.u32 %v8280_v29, %v17048_v42  ;;  %v13801_v29 = vld [vmem:[#allocation3 + $0xa8] sm:$0xff]   ;;  %v17113_v52 = vrot.slane %v8326_v46, 4 }
 0x447   : > { %12975 = vmatprep.mubr.msk.bf16.mxu1 %vm6754_vm9, %v13796_v23  ;;  %v8209_v23 = vor.u32 %v8208_v34, %v17018_v51  ;;  %v8186_v34 = vrot.slane %v8185_v9, 4  ;;  %v8292_v9 = vshll.u32 %v8093_v21, 16  ;;  %v8284_v21 = vshll.u32 %v16746_v8, 16 }
 0x448   : > { %v8243_v54 = vrot.slane %v8241_v22, 4  ;;  %v8236_v22 = vshll.u32 %v16734_v18, 16  ;;  %v8181_v18 = vsel %vm14107_vm13, %v8176_v5, %v17014_v28 }
 0x449   : > { %v8210_v57 = vrot.slane %v8209_v23, 4  ;;  %v8191_v23 = vsel %vm14107_vm13, %v8186_v34, %v8190_v4  ;;  %v8294_v11 = vrot.slane %v8292_v9, 5  ;;  %v8304_v34 = vrot.slane %v8302_v15, 4  ;;  %v17089_v15 = vld [vmem:[#allocation3 + $0x1c] sm:$0xf] }
 0x44a   : > { %v8247_v1 = vor.u32 %v8246_v19, %v8243_v54  ;;  %v8096_v54 = vld [vmem:[#allocation3 + $0x6c] sm:$0xf]  ;;  %v13800_v19 = vld [vmem:[#allocation3 + $0x9c] sm:$0xff]   ;;  %v8262_v4 = vrot.slane %v8260_v56, 5  ;;  %v17070_v16 = vcombine.low %v8181_v18, %v8191_v23  ;;  %v17086_v9 = vrot.slane %v8281_v55, 4  ;;  %18452 = vst [vmem:[#allocation40_spill] sm:$0xff] %v17089_v15 }
 0x44b   : > { %v8215_v12 = vsel %vm14107_vm13, %v8210_v57, %v8214_v39  ;;  %v8313_v13 = vshrl.u32 %v8096_v54, 16  ;;  %v8316_v39 = vshll.u32 %v8096_v54, 16  ;;  %v8099_v57 = vld [vmem:[#allocation3 + $0x78] sm:$0xf]  ;;  %v17098_v56 = vld [vmem:[#allocation3 + $0x20] sm:$0x1] }
 0x44c   : > { %v8248_v28 = vrot.slane %v8247_v1, 4  ;;  %v17072_v1 = vcombine.low %v8205_v50, %v8215_v12  ;;  %v13802_v18 = vld [vmem:[#allocation3 + $0xb4] sm:$0xff]   ;;  %18453 = vst [vmem:[#allocation41_spill] sm:$0xff] %v17098_v56  ;;  %v17106_v12 = vrot.slane %v8284_v21, 5  ;;  %v17148_v54 = vld [vmem:[#allocation3 + $0x40] sm:$0xf] }
 0x44d   : > { %v17094_v23 = vrot.slane %v8313_v13, 4  ;;  %v17118_v55 = vld [vmem:[#allocation3 + $0x34] sm:$0xf]  ;;  %v10354_v13 = vld [vmem:[#allocation3 + $0x24] sm:$0xe]  ;;  %18458 = vst [vmem:[#allocation46_spill] sm:$0xff] %v17148_v54 }
 0x44e   : > { %12976 = vmatmul.mubr.msk.bf16.gmra.mrb[32].mxu1 %vm6754_vm9, %v13797_v49  ;;  %v8238_v49 = vrot.slane %v8236_v22, 5  ;;  %v8253_v58 = vsel %vm14107_vm13, %v8248_v28, %v17037_v25  ;;  %v10353_v25 = vld [vmem:[#allocation3 + $0x18] sm:$0xe]  ;;  %v8346_v28 = vshll.u32 %v16770_v20, 16  ;;  %18456 = vst [vmem:[#allocation44_spill] sm:$0xff] %v17118_v55 }
 0x44f   : > { %12979 = vmatprep.mubr.msk.bf16.mxu1 %vm6754_vm9, %v13798_v35  ;;  %v8298_v35 = vshll.u32 %v16758_v60, 16  ;;  %v8271_v60 = vor.u32 %v8270_v61, %v8267_v33  ;;  %v8263_v33 = vsel %vm14107_vm13, %v8258_v59, %v8262_v4  ;;  %v8322_v61 = vshll.u32 %v16782_v37, 16  ;;  %v17116_v59 = vld [vmem:[#allocation3 + $0x2c] sm:$0x1]  ;;  %v17158_v50 = vld [vmem:[#allocation3 + $0x50] sm:$0x1] }
 0x450   : > { %v8239_v51 = vsel %vm14107_vm13, %v8234_v53, %v8238_v49  ;;  %v17096_v53 = vrot.slane %v8316_v39, 5  ;;  %v8337_v37 = vshrl.u32 %v8099_v57, 16  ;;  %v8340_v49 = vshll.u32 %v8099_v57, 16  ;;  %18455 = vst [vmem:[#allocation43_spill] sm:$0xff] %v17116_v59  ;;  %v17152_v21 = vld [vmem:[#allocation3 + $0x4c] sm:$0xf] }
 0x451   : > { %v17065_v5 = vrot.slane %v8298_v35, 5  ;;  %v17074_v22 = vrot.slane %v8271_v60, 4  ;;  %v17084_v3 = vcombine.low %v8229_v24, %v8239_v51  ;;  %v8295_v35 = vor.u32 %v8294_v11, %v8291_v43  ;;  %v17108_v60 = vld [vmem:[#allocation3 + $0x28] sm:$0xf]  ;;  %v17129_v51 = vld [vmem:[#allocation3 + $0x84] sm:$0xf] }
 0x452   : > { %18454 = vst [vmem:[#allocation42_spill] sm:$0xff] %v17108_v60  ;;  %v10419_v4 = vrot.slane %v17089_v15, 5  ;;  %v17136_v57 = vrot.slane %v8337_v37, 4  ;;  %v17138_v24 = vld [vmem:[#allocation3 + $0x38] sm:$0x1]  ;;  %18460 = vst [vmem:[#allocation48_spill] sm:$0xff] %v17152_v21 }
 0x453   : > { %v8305_v8 = vor.u32 %v8304_v34, %v17065_v5  ;;  %v17125_v11 = vrot.slane %v8295_v35, 4  ;;  %18457 = vst [vmem:[#allocation45_spill] sm:$0xff] %v17138_v24  ;;  %v10426_v35 = vrot.slane %v17108_v60, 5  ;;  %v17150_v37 = vld [vmem:[#allocation3 + $0x44] sm:$0x1]  ;;  %18462 = vst [vmem:[#allocation50_spill] sm:$0xff] %v17158_v50 }
 0x454   : > { %v10421_v46 = vrot.slane %v10419_v4, 4  ;;  %18459 = vst [vmem:[#allocation47_spill] sm:$0xff] %v17150_v37  ;;  %v10433_v39 = vrot.slane %v17118_v55, 5  ;;  %v13803_v60 = vld [vmem:[#allocation3 + $0xc0] sm:$0xff]   ;;  %v10436_v45 = vrot.slane %v17138_v24, 5 }
 0x455   : > { %v17127_v34 = vrot.slane %v8305_v8, 4  ;;  %v10355_v8 = vld [vmem:[#allocation3 + $0x30] sm:$0xe] }
 0x456   : > { %12980 = vmatmul.mubr.msk.bf16.gmra.mrb[36].mxu1 %vm6754_vm9, %v13799_v44  ;;  %v17100_v44 = vcombine.low %v8253_v58, %v8263_v33  ;;  %v12105_v33 = vrot.slane %v10353_v25, 9  ;;  %v17146_v58 = vrot.slane %v8346_v28, 5  ;;  %v12106_v25 = vrot.slane %v10354_v13, 9 }
 0x457   : > { %12983 = vmatprep.mubr.msk.bf16.mxu1 %vm6754_vm9, %v13800_v19  ;;  %v17111_v19 = vrot.slane %v8322_v61, 5  ;;  %v17140_v61 = vrot.slane %v8340_v49, 5  ;;  %v10429_v28 = vrot.slane %v17116_v59, 5  ;;  %v12107_v13 = vrot.slane %v10355_v8, 9  ;;  %v17183_v59 = vld [vmem:[#allocation3 + $0x5c] sm:$0x1] }
 0x458   : > { %v17156_v49 = vsel %vm14432_vm8, %v12105_v33, %v10419_v4  ;;  %v10357_v33 = vld [vmem:[#allocation3 + $0x48] sm:$0xe]  ;;  %v10435_v15 = vrot.slane %v10433_v39, 4  ;;  %18467 = vst [vmem:[#allocation55_spill] sm:$0xff] %v17183_v59  ;;  %v10447_v8 = vrot.slane %v17152_v21, 5 }
 0x459   : > { %18461 = vst [vmem:[#allocation49_spill] sm:$0xff] %v17156_v49  ;;  %v17189_v4 = vsel %vm14432_vm8, %v12107_v13, %v10433_v39  ;;  %v10443_v49 = vrot.slane %v17150_v37, 5  ;;  %v12109_v24 = vrot.slane %v10357_v33, 9  ;;  %v10454_v13 = vrot.slane %v17170_v31, 5  ;;  %v10360_v21 = vld [vmem:[#allocation3 + $0x6c] sm:$0xe] }
 0x45a   : > { %18468 = vst [vmem:[#allocation56_spill] sm:$0xff] %v17189_v4  ;;  %v10457_v37 = vrot.slane %v17183_v59, 5 }
 0x45b   : > { %v18551_v30 = vld [vmem:[#allocation47_spill] sm:$0xff] }
 0x45e   : > { %12984 = vmatmul.mubr.msk.bf16.gmra.mrb[40].mxu1 %vm6754_vm9, %v13801_v29  ;;  %v10422_v29 = vrot.slane %v17098_v56, 5  ;;  %v10356_v56 = vld [vmem:[#allocation3 + $0x3c] sm:$0xe] }
 0x45f   : > { %12987 = vmatprep.mubr.msk.bf16.mxu1 %vm6754_vm9, %v13802_v18  ;;  %v10428_v18 = vrot.slane %v10426_v35, 4 }
 0x460   : > { %v17162_v43 = vsel %vm14432_vm8, %v10421_v46, %v10422_v29  ;;  %v17172_v46 = vld [vmem:[#allocation3 + $0x64] sm:$0xf]  ;;  %v17176_v29 = vsel %vm14432_vm8, %v12106_v25, %v10426_v35  ;;  %v10440_v35 = vrot.slane %v17148_v54, 5  ;;  %v10358_v25 = vld [vmem:[#allocation3 + $0x54] sm:$0xe] }
 0x461   : > { %18463 = vst [vmem:[#allocation51_spill] sm:$0xff] %v17162_v43  ;;  %18465 = vst [vmem:[#allocation53_spill] sm:$0xff] %v17176_v29  ;;  %v17180_v55 = vsel %vm14432_vm8, %v10428_v18, %v10429_v28  ;;  %v12108_v43 = vrot.slane %v10356_v56, 9  ;;  %v17193_v18 = vld [vmem:[#allocation3 + $0x68] sm:$0x1]  ;;  %v17197_v28 = vsel %vm14432_vm8, %v10435_v15, %v10436_v45  ;;  %v10449_v56 = vrot.slane %v10447_v8, 4 }
 0x462   : > { %18466 = vst [vmem:[#allocation54_spill] sm:$0xff] %v17180_v55  ;;  %18469 = vst [vmem:[#allocation57_spill] sm:$0xff] %v17193_v18  ;;  %v10442_v39 = vrot.slane %v10440_v35, 4  ;;  %v10359_v55 = vld [vmem:[#allocation3 + $0x60] sm:$0xe]  ;;  %v10461_v31 = vrot.slane %v17172_v46, 5 }
 0x463   : > { %18470 = vst [vmem:[#allocation58_spill] sm:$0xff] %v17197_v28  ;;  %v17207_v29 = vld [vmem:[#allocation3 + $0x70] sm:$0xf]  ;;  %v9650_v45 = vld [vmem:[#allocation3 + $0x74] sm:$0x1]  ;;  %v17213_v33 = vsel %vm14432_vm8, %v12108_v43, %v10440_v35  ;;  %v12110_v28 = vrot.slane %v10358_v25, 9 }
 0x464   : > { %18471 = vst [vmem:[#allocation59_spill] sm:$0xff] %v17207_v29  ;;  %v17209_v15 = vld [vmem:[#allocation3 + $0x7c] sm:$0xf]  ;;  %18473 = vst [vmem:[#allocation61_spill] sm:$0xff] %v17213_v33  ;;  %v17221_v4 = vsel %vm14432_vm8, %v10442_v39, %v10443_v49  ;;  %v9653_v54 = vld [vmem:[#allocation3 + $0x80] sm:$0x1] }
 0x465   : > { %18472 = vst [vmem:[#allocation60_spill] sm:$0xff] %v17209_v15  ;;  %18475 = vst [vmem:[#allocation63_spill] sm:$0xff] %v17221_v4  ;;  %v12111_v49 = vrot.slane %v10359_v55, 9  ;;  %v9656_v35 = vld [vmem:[#allocation3 + $0x8c] sm:$0x1]  ;;  %v10463_v43 = vrot.slane %v10461_v31, 4 }
 0x466   : > { %12988 = vmatmul.mubr.msk.bf16.gmra.mrb[44].mxu1 %vm6754_vm9, %v13803_v60  ;;  %v10450_v60 = vrot.slane %v17158_v50, 5  ;;  %v10456_v50 = vrot.slane %v10454_v13, 4  ;;  %v17235_v25 = vld [vmem:[#allocation3 + $0x94] sm:$0xf]  ;;  %v10464_v4 = vrot.slane %v17193_v18, 5 }
 0x467   : > { %12993 = vmatprep.mubr.msk.bf16.mxu1 %vm6754_vm9, %v17023_v47  ;;  %v17217_v47 = vsel %vm14432_vm8, %v12109_v24, %v10447_v8  ;;  %v17233_v8 = vsel %vm14432_vm8, %v12110_v28, %v10454_v13  ;;  %18478 = vst [vmem:[#allocation66_spill] sm:$0xff] %v17235_v25  ;;  %v12112_v28 = vrot.slane %v10360_v21, 9  ;;  %v10468_v13 = vrot.slane %v17207_v29, 5  ;;  %v10362_v33 = vld [vmem:[#allocation3 + $0x84] sm:$0xe] }
 0x468   : > { %18474 = vst [vmem:[#allocation62_spill] sm:$0xff] %v17217_v47  ;;  %v17229_v24 = vsel %vm14432_vm8, %v10449_v56, %v10450_v60  ;;  %18477 = vst [vmem:[#allocation65_spill] sm:$0xff] %v17233_v8  ;;  %v17241_v59 = vsel %vm14432_vm8, %v10456_v50, %v10457_v37  ;;  %v10361_v56 = vld [vmem:[#allocation3 + $0x78] sm:$0xe]  ;;  %v9073_v60 = vsel %vm6803_vm7, %v16979_v32, 0  ;;  %v17256_v37 = vsel %vm14432_vm8, %v12111_v49, %v10461_v31 }
 0x469   : > { %18476 = vst [vmem:[#allocation64_spill] sm:$0xff] %v17229_v24  ;;  %18479 = vst [vmem:[#allocation67_spill] sm:$0xff] %v17241_v59  ;;  %v17252_v39 = vld [vmem:[%s18180_s4 + $0x18] sm:$0xf]  ;;  %v9659_v50 = vld [vmem:[#allocation3 + $0x98] sm:$0x1]  ;;  %v17260_v32 = vsel %vm14432_vm8, %v10463_v43, %v10464_v4  ;;  %v17271_v4 = vsel %vm14432_vm8, %v12112_v28, %v10468_v13 }
 0x46a   : > { %18480 = vst [vmem:[#allocation68_spill] sm:$0xff] %v17256_v37  ;;  %18481 = vst [vmem:[#allocation69_spill] sm:$0xff] %v17260_v32  ;;  %v10471_v24 = vrot.slane %v9650_v45, 5  ;;  %v10475_v21 = vrot.slane %v17209_v15, 5  ;;  %v10470_v59 = vrot.slane %v10468_v13, 4  ;;  %v12113_v8 = vrot.slane %v10361_v56, 9 }
 0x46b   : > { %v10478_v47 = vrot.slane %v9653_v54, 5  ;;  %v10363_v18 = vld [vmem:[#allocation3 + $0x90] sm:$0xe]  ;;  %v9664_v31 = vld [vmem:[#allocation3 + $0xac] sm:$0xf]  ;;  %v12114_v43 = vrot.slane %v10362_v33, 9 }
 0x46c   : > { %v10477_v45 = vrot.slane %v10475_v21, 4  ;;  %v10482_v49 = vrot.slane %v9655_v27, 5  ;;  %v9662_v55 = vld [vmem:[#allocation3 + $0xa4] sm:$0x1]  ;;  %v17277_v54 = vsel %vm14432_vm8, %v10470_v59, %v10471_v24  ;;  %v10485_v56 = vrot.slane %v9656_v35, 5 }
 0x46d   : > { %v9665_v28 = vld [vmem:[#allocation3 + $0xb0] sm:$0x1]  ;;  %v12115_v32 = vrot.slane %v10363_v18, 9  ;;  %v10364_v37 = vld [vmem:[#allocation3 + $0x9c] sm:$0xe]  ;;  %v18484_v59 = vshrl.u32 %v16770_v20, 16 }
 0x46e   : > { %12994 = vmatmul.mubr.msk.bf16.vlgmr.msra.gmra.mrb[16].mxu1 %vm6754_vm9, %v17042_v2  ;;  %v9661_v2 = vld [vmem:[#allocation3 + $0xa0] sm:$0xf]  ;;  %v17288_v33 = vsel %vm14432_vm8, %v10477_v45, %v10478_v47  ;;  %v10484_v13 = vrot.slane %v10482_v49, 4  ;;  %v9667_v15 = vld [vmem:[#allocation3 + $0xb8] sm:$0xf]  ;;  %v17298_v27 = vsel %vm14432_vm8, %v12114_v43, %v10482_v49  ;;  %v10503_v43 = vrot.slane %v9664_v31, 5 }
 0x46f   : > { %13026 = vmatpush3.bf16.msra.mxu1 %v9073_v60  ;;  %12997 = vmatprep.mubr.msk.bf16.mxu1 %vm6754_vm9, %v17070_v16  ;;  %v17281_v16 = vsel %vm14432_vm8, %v12113_v8, %v10475_v21  ;;  %v10489_v60 = vrot.slane %v17235_v25, 5  ;;  %18483 = vst [vmem:[#allocation71_spill] sm:$0xff] %v17288_v33  ;;  %v17292_v24 = vrot.slane %v18484_v59, 4  ;;  %v10492_v21 = vrot.slane %v9659_v50, 5  ;;  %v10365_v25 = vld [vmem:[#allocation3 + $0xa8] sm:$0xe] }
 0x470   : > { %13725 = vmatprep.subr.msk.bf16.mxu1 %vm6803_vm7, %v17252_v39  ;;  %18482 = vst [vmem:[#allocation70_spill] sm:$0xff] %v17281_v16  ;;  %v9670_v29 = vld [vmem:[#allocation3 + $0xc4] sm:$0xf]  ;;  %v17302_v18 = vsel %vm14432_vm8, %v10484_v13, %v10485_v56  ;;  %v10496_v47 = vrot.slane %v9661_v2, 5  ;;  %v9668_v45 = vld [vmem:[#allocation3 + $0xbc] sm:$0x1] }
 0x471   : > { %v10491_v35 = vrot.slane %v10489_v60, 4  ;;  %v17306_v20 = vsel %vm14432_vm8, %v12115_v32, %v10489_v60  ;;  %v12131_v50 = vcombine.low %v17298_v27, %v17302_v18  ;;  %v12116_v8 = vrot.slane %v10364_v37, 9  ;;  %v10366_v49 = vld [vmem:[#allocation3 + $0xb4] sm:$0xe]  ;;  %v9671_v33 = vld [vmem:[#allocation3 + $0xc8] sm:$0x1] }
 0x472   : > { %v10498_v13 = vrot.slane %v10496_v47, 4  ;;  %v10499_v16 = vrot.slane %v9662_v55, 5  ;;  %v12117_v32 = vrot.slane %v10365_v25, 9  ;;  %v10505_v60 = vrot.slane %v10503_v43, 4  ;;  %v10367_v37 = vld [vmem:[#allocation3 + $0xc0] sm:$0xe] }
 0x473   : > { %v17312_v59 = vsel %vm14432_vm8, %v10491_v35, %v10492_v21  ;;  %v17320_v2 = vsel %vm14432_vm8, %v12116_v8, %v10496_v47  ;;  %v10506_v35 = vrot.slane %v9665_v28, 5  ;;  %v10510_v21 = vrot.slane %v9667_v15, 5  ;;  %v18567_v17 = vld [vmem:[#allocation61_spill] sm:$0xff] }
 0x474   : > { %v17326_v31 = vsel %vm14432_vm8, %v10498_v13, %v10499_v16  ;;  %v17330_v25 = vsel %vm14432_vm8, %v12117_v32, %v10503_v43  ;;  %v10517_v55 = vrot.slane %v9670_v29, 5  ;;  %v10513_v47 = vrot.slane %v9668_v45, 5 }
 0x475   : > { %v12133_v8 = vcombine.low %v17320_v2, %v17326_v31  ;;  %v17336_v15 = vsel %vm14432_vm8, %v10505_v60, %v10506_v35  ;;  %v10512_v28 = vrot.slane %v10510_v21, 4  ;;  %v12119_v16 = vrot.slane %v10367_v37, 9 }
 0x476   : > { %12998 = vmatmul.mubr.msk.bf16.gmra.mrb[20].mxu1 %vm6754_vm9, %v17072_v1  ;;  %v12118_v1 = vrot.slane %v10366_v49, 9  ;;  %v10519_v13 = vrot.slane %v10517_v55, 4  ;;  %v10520_v56 = vrot.slane %v9671_v33, 5  ;;  %v8370_v43 = vshll.u32 %v16809_v6, 16 }
 0x477   : > { %13001 = vmatprep.mubr.msk.bf16.mxu1 %vm6754_vm9, %v17084_v3  ;;  %v12134_v3 = vcombine.low %v17330_v25, %v17336_v15  ;;  %v8374_v49 = vshrl.u32 %v16809_v6, 16  ;;  %v17348_v32 = vsel %vm14432_vm8, %v10512_v28, %v10513_v47  ;;  %v8364_v45 = vshll.u32 %v17129_v51, 16 }
 0x478   : > { %v17344_v29 = vsel %vm14432_vm8, %v12118_v1, %v10510_v21  ;;  %v17355_v33 = vsel %vm14432_vm8, %v12119_v16, %v10517_v55  ;;  %v17359_v6 = vsel %vm14432_vm8, %v10519_v13, %v10520_v56  ;;  %v18485_v35 = vor.u32 %v17096_v53, %v17094_v23 }
 0x479   : > { %v12135_v60 = vcombine.low %v17344_v29, %v17348_v32  ;;  %v18486_v37 = vor.u32 %v17113_v52, %v17111_v19  ;;  %v8353_v28 = vor.u32 %v17292_v24, %v17146_v58  ;;  %v12136_v47 = vcombine.low %v17355_v33, %v17359_v6 }
 0x47a   : > { %v8320_v21 = vrot.slane %v18485_v35, 4  ;;  %v18487_v56 = vsel %vm14107_vm13, %v17086_v9, %v17106_v12  ;;  %v18488_v23 = vsel %vm14107_vm13, %v17074_v22, %v17048_v42  ;;  %v18489_v52 = vshll.u32 %v16760_v40, 16  ;;  %v8105_v12 = vld [vmem:[#allocation3 + $0x90] sm:$0xf] }
 0x47b   : > { %v8330_v1 = vrot.slane %v18486_v37, 4  ;;  %v11964_v53 = vcombine.low %v18488_v23, %v18487_v56  ;;  %v18490_v24 = vshll.u32 %v16798_v62, 16  ;;  %v8356_v13 = vshll.u32 %v16800_v48, 16 }
 0x47c   : > { %v8310_v55 = vrot.slane %v18489_v52, 5  ;;  %v17388_v35 = vrot.slane %v8370_v43, 5  ;;  %v8376_v9 = vrot.slane %v8374_v49, 4  ;;  %v8301_v40 = vsel %vm14107_vm13, %v17125_v11, %v17065_v5 }
 0x47d   : > { %v8334_v16 = vrot.slane %v18490_v24, 5  ;;  %v8343_v42 = vor.u32 %v17140_v61, %v17136_v57  ;;  %v18491_v22 = vshrl.u32 %v17129_v51, 16  ;;  %v8325_v43 = vsel %vm14107_vm13, %v8320_v21, %v17111_v19  ;;  %v8108_v61 = vld [vmem:[#allocation3 + $0x9c] sm:$0xf] }
 0x47e   : > { %13002 = vmatmul.mubr.msk.bf16.gmra.mrb[24].mxu1 %vm6754_vm9, %v17100_v44  ;;  %v8366_v44 = vrot.slane %v8364_v45, 5  ;;  %v8311_v48 = vsel %vm14107_vm13, %v17127_v34, %v8310_v55  ;;  %v8354_v37 = vrot.slane %v8353_v28, 4  ;;  %v8385_v5 = vshrl.u32 %v8105_v12, 16 }
 0x47f   : > { %13005 = vmatprep.mubr.msk.bf16.mxu1 %vm6754_vm9, %v11964_v53  ;;  %v8363_v62 = vrot.slane %v18491_v22, 4  ;;  %v8335_v49 = vsel %vm14107_vm13, %v8330_v1, %v8334_v16  ;;  %v8388_v11 = vshll.u32 %v8105_v12, 16  ;;  %v8394_v57 = vshll.u32 %v16830_v0, 16 }
 0x480   : > { %v8398_v51 = vshrl.u32 %v16830_v0, 16  ;;  %v8358_v45 = vrot.slane %v8356_v13, 5  ;;  %v8377_v56 = vor.u32 %v8376_v9, %v17388_v35  ;;  %v8418_v34 = vshll.u32 %v16848_v14, 16 }
 0x481   : > { %v8422_v23 = vshrl.u32 %v16848_v14, 16  ;;  %v11965_v53 = vcombine.low %v8301_v40, %v8311_v48  ;;  %v11966_v19 = vcombine.low %v8325_v43, %v8335_v49  ;;  %v8344_v21 = vrot.slane %v8343_v42, 4  ;;  %v8111_v43 = vld [vmem:[#allocation3 + $0xa8] sm:$0xf] }
 0x482   : > { %v8367_v52 = vor.u32 %v8366_v44, %v8363_v62  ;;  %v8359_v1 = vsel %vm14107_vm13, %v8354_v37, %v8358_v45  ;;  %v8380_v28 = vshll.u32 %v16818_v26, 16  ;;  %v8409_v55 = vshrl.u32 %v8108_v61, 16 }
 0x483   : > { %v8412_v24 = vshll.u32 %v8108_v61, 16  ;;  %v8387_v0 = vrot.slane %v8385_v5, 4  ;;  %v8390_v16 = vrot.slane %v8388_v11, 5  ;;  %v8396_v13 = vrot.slane %v8394_v57, 5  ;;  %v8114_v57 = vld [vmem:[#allocation3 + $0xb4] sm:$0xf] }
 0x484   : > { %v8400_v12 = vrot.slane %v8398_v51, 4  ;;  %v8378_v9 = vrot.slane %v8377_v56, 4  ;;  %v8420_v22 = vrot.slane %v8418_v34, 5  ;;  %v8424_v14 = vrot.slane %v8422_v23, 4 }
 0x485   : > { %v8349_v40 = vsel %vm14107_vm13, %v8344_v21, %v17146_v58  ;;  %v8368_v42 = vrot.slane %v8367_v52, 4  ;;  %v8382_v26 = vrot.slane %v8380_v28, 5  ;;  %v8411_v44 = vrot.slane %v8409_v55, 4 }
 0x486   : > { %13006 = vmatmul.mubr.msk.bf16.gmra.mrb[28].mxu1 %vm6754_vm9, %v11965_v53  ;;  %v11967_v62 = vcombine.low %v8349_v40, %v8359_v1  ;;  %v8414_v48 = vrot.slane %v8412_v24, 5  ;;  %v8391_v49 = vor.u32 %v8390_v16, %v8387_v0  ;;  %v8401_v37 = vor.u32 %v8400_v12, %v8396_v13 }
 0x487   : > { %13009 = vmatprep.mubr.msk.bf16.mxu1 %vm6754_vm9, %v11966_v19  ;;  %v8442_v5 = vshll.u32 %v16866_v38, 16  ;;  %v8446_v11 = vshrl.u32 %v16866_v38, 16  ;;  %v8383_v51 = vsel %vm14107_vm13, %v8378_v9, %v8382_v26  ;;  %v8425_v61 = vor.u32 %v8424_v14, %v8420_v22  ;;  %v8117_v26 = vld [vmem:[#allocation3 + $0xc0] sm:$0xf] }
 0x488   : > { %v8466_v45 = vshll.u32 %v16888_v63, 16  ;;  %v8470_v58 = vshrl.u32 %v16888_v63, 16  ;;  %v8373_v56 = vsel %vm14107_vm13, %v8368_v42, %v17388_v35  ;;  %v8404_v34 = vshll.u32 %v16832_v10, 16 }
 0x489   : > { %v8433_v23 = vshrl.u32 %v8111_v43, 16  ;;  %v8436_v53 = vshll.u32 %v8111_v43, 16  ;;  %v8415_v19 = vor.u32 %v8414_v48, %v8411_v44  ;;  %v8428_v38 = vshll.u32 %v16864_v41, 16 }
 0x48a   : > { %v8457_v21 = vshrl.u32 %v8114_v57, 16  ;;  %v8460_v52 = vshll.u32 %v8114_v57, 16  ;;  %v11968_v1 = vcombine.low %v8373_v56, %v8383_v51  ;;  %v8402_v28 = vrot.slane %v8401_v37, 4 }
 0x48b   : > { %v8444_v55 = vrot.slane %v8442_v5, 5  ;;  %v8448_v24 = vrot.slane %v8446_v11, 4  ;;  %v8392_v63 = vrot.slane %v8391_v49, 4  ;;  %v8426_v0 = vrot.slane %v8425_v61, 4 }
 0x48c   : > { %v8468_v16 = vrot.slane %v8466_v45, 5  ;;  %v8472_v12 = vrot.slane %v8470_v58, 4  ;;  %v8406_v10 = vrot.slane %v8404_v34, 5  ;;  %v8435_v35 = vrot.slane %v8433_v23, 4  ;;  %v18492_v34 = vld [vmem:[#allocation4_spill] sm:$0xff] }
 0x48d   : > { %v8438_v9 = vrot.slane %v8436_v53, 5  ;;  %v8416_v14 = vrot.slane %v8415_v19, 4  ;;  %v8430_v40 = vrot.slane %v8428_v38, 5  ;;  %v8459_v41 = vrot.slane %v8457_v21, 4 }
 0x48e   : > { %13010 = vmatmul.mubr.msk.bf16.gmra.mrb[32].mxu1 %vm6754_vm9, %v11967_v62  ;;  %v8462_v42 = vrot.slane %v8460_v52, 5  ;;  %v8407_v44 = vsel %vm14107_vm13, %v8402_v28, %v8406_v10  ;;  %v8449_v48 = vor.u32 %v8448_v24, %v8444_v55  ;;  %v8490_v62 = vshll.u32 %v16910_v36, 16 }
 0x48f   : > { %13013 = vmatprep.mubr.msk.bf16.mxu1 %vm6754_vm9, %v11968_v1  ;;  %v8494_v43 = vshrl.u32 %v16910_v36, 16  ;;  %v8397_v49 = vsel %vm14107_vm13, %v8392_v63, %v8396_v13  ;;  %v8431_v37 = vsel %vm14107_vm13, %v8426_v0, %v8430_v40  ;;  %v8473_v5 = vor.u32 %v8472_v12, %v8468_v16  ;;  %v18493_v12 = vld [vmem:[#allocation36_spill] sm:$0xff] }
 0x490   : > { %v8439_v11 = vor.u32 %v8438_v9, %v8435_v35  ;;  %v8452_v57 = vshll.u32 %v16879_v7, 16  ;;  %v8481_v51 = vshrl.u32 %v8117_v26, 16  ;;  %v8484_v61 = vshll.u32 %v8117_v26, 16 }
 0x491   : > { %v11969_v45 = vcombine.low %v8397_v49, %v8407_v44  ;;  %v8421_v58 = vsel %vm14107_vm13, %v8416_v14, %v8420_v22  ;;  %v8463_v56 = vor.u32 %v8462_v42, %v8459_v41  ;;  %v8476_v23 = vshll.u32 %v18492_v34, 16  ;;  %v18494_v14 = vld [vmem:[#allocation30_spill] sm:$0xff] }
 0x492   : > { %v11970_v36 = vcombine.low %v8421_v58, %v8431_v37  ;;  %v8450_v53 = vrot.slane %v8449_v48, 4  ;;  %v8492_v19 = vrot.slane %v8490_v62, 5  ;;  %v8496_v13 = vrot.slane %v8494_v43, 4  ;;  %v8798_v49 = vld [vmem:[#allocation3 + $0xc] sm:$0xe] }
 0x493   : > { %v8474_v38 = vrot.slane %v8473_v5, 4  ;;  %v8440_v21 = vrot.slane %v8439_v11, 4  ;;  %v8454_v7 = vrot.slane %v8452_v57, 5  ;;  %v8483_v52 = vrot.slane %v8481_v51, 4  ;;  %v545_v37 = vld [vmem:[#allocation3 + $0xcc] sm:$0x1] }
 0x494   : > { %v8486_v1 = vrot.slane %v8484_v61, 5  ;;  %v8464_v28 = vrot.slane %v8463_v56, 4  ;;  %v8478_v24 = vrot.slane %v8476_v23, 5  ;;  %v8497_v63 = vor.u32 %v8496_v13, %v8492_v19  ;;  %v18495_v5 = vld [vmem:[#allocation38_spill] sm:$0xff]  ;;  %v8799_v13 = vld [vmem:[#allocation3 + $0x18] sm:$0xe] }
 0x495   : > { %v8455_v22 = vsel %vm14107_vm13, %v8450_v53, %v8454_v7  ;;  %v8864_v10 = vrot.slane %v18493_v12, 5  ;;  %v8445_v35 = vsel %vm14107_vm13, %v8440_v21, %v8444_v55  ;;  %v8500_v40 = vshll.u32 %v18494_v14, 16  ;;  %v10901_v7 = vld [vmem:[%s18183_s7] sm:$0x3]  ;;  %v18505_v14 = vld [vmem:[#allocation15_spill] sm:$0xff]  ;;  %v18518_v11 = vld [vmem:[#allocation25_spill] sm:$0xff] }
 0x496   : > { %13014 = vmatmul.mubr.msk.bf16.gmra.mrb[36].mxu1 %vm6754_vm9, %v11969_v45  ;;  %v8479_v0 = vsel %vm14107_vm13, %v8474_v38, %v8478_v24  ;;  %v8487_v9 = vor.u32 %v8486_v1, %v8483_v52  ;;  %v11971_v41 = vcombine.low %v8445_v35, %v8455_v22  ;;  %v8469_v42 = vsel %vm14107_vm13, %v8464_v28, %v8468_v16  ;;  %v18497_v16 = vld [vmem:[#allocation37_spill] sm:$0xff]  ;;  %v18498_v38 = vld [vmem:[#allocation39_spill] sm:$0xff]  ;;  %v18502_v35 = vld [vmem:[#allocation14_spill] sm:$0xff] }
 0x497   : > { %13017 = vmatprep.mubr.msk.bf16.mxu1 %vm6754_vm9, %v11970_v36  ;;  %v11972_v26 = vcombine.low %v8469_v42, %v8479_v0  ;;  %v8498_v44 = vrot.slane %v8497_v63, 4  ;;  %v8866_v48 = vrot.slane %v8864_v10, 4  ;;  %v8502_v43 = vrot.slane %v8500_v40, 5  ;;  %13728 = vmatprep.subr.msk.bf16.mxu0 %vm1607_vm0, %v10901_v7  ;;  %v12072_v22 = vld [vmem:[%s18180_s4 + $0x1c] sm:$0xf]  ;;  %v18499_v63 = vld [vmem:[#allocation12_spill] sm:$0xff] }
 0x498   : > { %v8488_v62 = vrot.slane %v8487_v9, 4  ;;  %v8867_v55 = vrot.slane %v18495_v5, 5  ;;  %v546_v57 = vsel %vm15586_vm6, 0, %v545_v37  ;;  %v8871_v61 = vrot.slane %v18497_v16, 5  ;;  %v18500_v0 = vld [vmem:[#allocation13_spill] sm:$0xff]  ;;  %v18503_v9 = vld [vmem:[#allocation16_spill] sm:$0xff] }
 0x499   : > { %v8503_v51 = vsel %vm14107_vm13, %v8498_v44, %v8502_v43  ;;  %547 = vst [vmem:[#allocation3 + $0xcc] sm:$0x1] %v546_v57  ;;  %v11990_v45 = vrot.slane %v8798_v49, 9  ;;  %v8874_v21 = vrot.slane %v18498_v38, 5  ;;  %v9432_v24 = vsel %vm6803_vm7, %v17252_v39, 0  ;;  %v18506_v40 = vld [vmem:[#allocation17_spill] sm:$0xff] }
 0x49a   : > { %v8868_v58 = vsel %vm14432_vm8, %v8866_v48, %v8867_v55  ;;  %v8493_v56 = vsel %vm14107_vm13, %v8488_v62, %v8492_v19  ;;  %v8873_v53 = vrot.slane %v8871_v61, 4  ;;  %v11991_v19 = vrot.slane %v8799_v13, 9  ;;  %v18508_v42 = vld [vmem:[#allocation18_spill] sm:$0xff]  ;;  %v18511_v48 = vld [vmem:[#allocation20_spill] sm:$0xff]  ;;  %v18512_v62 = vld [vmem:[#allocation21_spill] sm:$0xff] }
 0x49b   : > { %v11973_v34 = vcombine.low %v8493_v56, %v8503_v51  ;;  %v8865_v23 = vsel %vm14432_vm8, %v11990_v45, %v8864_v10  ;;  %v18501_v12 = vcombine.low %v18499_v63, %v18500_v0  ;;  %v11031_v10 = vsel %vm1607_vm0, %v10901_v7, 0  ;;  %v18514_v49 = vld [vmem:[#allocation22_spill] sm:$0xff]  ;;  %v18515_v37 = vld [vmem:[#allocation24_spill] sm:$0xff]  ;;  %v18517_v55 = vld [vmem:[#allocation23_spill] sm:$0xff] }
 0x49c   : > { %v12007_v36 = vcombine.low %v8865_v23, %v8868_v58  ;;  %v8875_v52 = vsel %vm14432_vm8, %v8873_v53, %v8874_v21  ;;  %v8872_v1 = vsel %vm14432_vm8, %v11991_v19, %v8871_v61  ;;  %13162 = vmatpush3.bf16.msra.mxu0 %v11031_v10  ;;  %v18504_v39 = vcombine.low %v18502_v35, %v18503_v9  ;;  %v18520_v51 = vld [vmem:[#allocation26_spill] sm:$0xff]  ;;  %v18521_v16 = vld [vmem:[#allocation27_spill] sm:$0xff]  ;;  %v18523_v45 = vld [vmem:[#allocation28_spill] sm:$0xff] }
 0x49d   : > { %v12008_v28 = vcombine.low %v8872_v1, %v8875_v52  ;;  %v18513_v43 = vcombine.low %v18511_v48, %v18512_v62  ;;  %v18516_v5 = vcombine.low %v18514_v49, %v18515_v37  ;;  %v18519_v57 = vcombine.low %v18517_v55, %v18518_v11  ;;  %v18524_v58 = vld [vmem:[#allocation29_spill] sm:$0xff]  ;;  %v18527_v23 = vld [vmem:[#allocation8_spill] sm:$0xff]  ;;  %v18529_v53 = vld [vmem:[#allocation7_spill] sm:$0xff] }
 0x49e   : > { %13018 = vmatmul.mubr.msk.bf16.gmra.mrb[40].mxu1 %vm6754_vm9, %v11971_v41  ;;  %v18507_v41 = vcombine.low %v18505_v14, %v18506_v40  ;;  %v18522_v61 = vcombine.low %v18520_v51, %v18521_v16  ;;  %v18525_v56 = vcombine.low %v18523_v45, %v18524_v58  ;;  %v18530_v13 = vld [vmem:[#allocation9_spill] sm:$0xff]  ;;  %v18533_v7 = vld [vmem:[#allocation31_spill] sm:$0xff]  ;;  %v18535_v52 = vld [vmem:[#allocation32_spill] sm:$0xff]  ;;  %v10158_v48 = vsel %vm6803_vm7, %v12072_v22, 0 }
 0x49f   : > { %13021 = vmatprep.mubr.msk.bf16.mxu1 %vm6754_vm9, %v11972_v26  ;;  %v18509_v26 = vld [vmem:[#allocation19_spill] sm:$0xff]  ;;  %v18531_v38 = vcombine.low %v18529_v53, %v18530_v13  ;;  %v18532_v21 = vld [vmem:[#allocation5_spill] sm:$0xff]  ;;  %v18539_v10 = vld [vmem:[#allocation34_spill] sm:$0xff] }
 0x4a0   : > { %v18510_v44 = vcombine.low %v18508_v42, %v18509_v26  ;;  %v18534_v19 = vcombine.low %v18532_v21, %v18533_v7  ;;  %v18536_v1 = vld [vmem:[#allocation33_spill] sm:$0xff]  ;;  %v18540_v35 = vld [vmem:[#allocation35_spill] sm:$0xff]  ;;  %v13871_v14 = vld [vmem:[%s14051_s22 + $0x4] sm:$0xf] }
 0x4a1   : > { %v18541_v9 = vcombine.low %v18539_v10, %v18540_v35  ;;  %v13873_v42 = vld [vmem:[%s14051_s22 + $0xc] sm:$0xf]  ;;  %v13874_v49 = vld [vmem:[%s14051_s22 + $0x10] sm:$0xf]  ;;  %v13875_v37 = vld [vmem:[%s14051_s22 + $0x14] sm:$0xf] }
 0x4a2   : > { %v13806_v62 = vld [vmem:[#allocation3 + $0x30] sm:$0xff]   ;;  %v13876_v55 = vld [vmem:[%s14051_s22 + $0x18] sm:$0xf]  ;;  %v13808_v51 = vld [vmem:[#allocation3 + $0x48] sm:$0xff]  }
 0x4a3   : > { %v13878_v16 = vld [vmem:[%s14051_s22 + $0x20] sm:$0xf]  ;;  %v13880_v58 = vld [vmem:[%s14051_s22 + $0x28] sm:$0xf]  ;;  %v13882_v53 = vld [vmem:[%s14051_s22 + $0x30] sm:$0xf] }
 0x4a4   : > { %v13883_v13 = vld [vmem:[%s14051_s22 + $0x34] sm:$0xf]  ;;  %v13884_v21 = vld [vmem:[%s14051_s22 + $0x38] sm:$0xf]  ;;  %v13885_v7 = vld [vmem:[%s14051_s22 + $0x3c] sm:$0xf] }
 0x4a5   : > { %v13887_v63 = vld [vmem:[%s14051_s22 + $0x44] sm:$0xf]  ;;  %v13889_v10 = vld [vmem:[%s14051_s22 + $0x4c] sm:$0xf] }
 0x4a6   : > { %13022 = vmatmul.mubr.msk.bf16.gmra.mrb[44].mxu1 %vm6754_vm9, %v11973_v34  ;;  %v18526_v34 = vld [vmem:[#allocation6_spill] sm:$0xff] }
 0x4a7   : > { %13027 = vmatprep.mubr.msk.bf16.mxu1 %vm6754_vm9, %v12007_v36  ;;  %v18528_v36 = vcombine.low %v18526_v34, %v18527_v23  ;;  %v13809_v23 = vld [vmem:[#allocation3 + $0x54] sm:$0xff]  }
 0x4ae   : > { %13028 = vmatmul.mubr.msk.bf16.vlgmr.msra.gmra.mrb[16].mxu1 %vm6754_vm9, %v12008_v28  ;;  %v18537_v28 = vcombine.low %v18535_v52, %v18536_v1  ;;  %v13811_v52 = vld [vmem:[#allocation3 + $0x6c] sm:$0xff]   ;;  %v13812_v1 = vld [vmem:[#allocation3 + $0x78] sm:$0xff]  }
 0x4af   : > { %13060 = vmatpush3.bf16.msra.mxu1 %v9432_v24  ;;  %13031 = vmatprep.mubr.msk.bf16.mxu1 %vm6754_vm9, %v18501_v12  ;;  %v600_v24 = vld [vmem:[#allocation3 + $0xd4] sm:$0x1]  ;;  %v13804_v12 = vld [vmem:[#allocation3 + $0x18] sm:$0xff]  }
 0x4b0   : > { %13726 = vmatprep.subr.msk.bf16.mxu1 %vm6803_vm7, %v12072_v22  ;;  %v601_v0 = vsel %vm15869_vm3, 0, %v600_v24  ;;  %v13877_v22 = vld [vmem:[%s14051_s22 + $0x1c] sm:$0xf]  ;;  %v13886_v24 = vld [vmem:[%s14051_s22 + $0x40] sm:$0xf] }
 0x4b1   : > { %602 = vst [vmem:[#allocation3 + $0xd4] sm:$0x1] %v601_v0  ;;  %v12159_v11 = vcombine.low %v13876_v55, %v13877_v22  ;;  %v12164_v0 = vcombine.low %v13886_v24, %v13887_v63  ;;  %v13890_v22 = vld [vmem:[%s14051_s22 + $0x50] sm:$0xf] }
 0x4b6   : > { %13032 = vmatmul.mubr.msk.bf16.gmra.mrb[20].mxu1 %vm6754_vm9, %v18504_v39  ;;  %v13870_v39 = vld [vmem:[%s14051_s22] sm:$0xf] }
 0x4b7   : > { %13035 = vmatprep.mubr.msk.bf16.mxu1 %vm6754_vm9, %v18507_v41  ;;  %v12156_v40 = vcombine.low %v13870_v39, %v13871_v14  ;;  %v13872_v41 = vld [vmem:[%s14051_s22 + $0x8] sm:$0xf] }
 0x4b8   : > { %v12157_v26 = vcombine.low %v13872_v41, %v13873_v42  ;;  %v9630_v42 = vld [vmem:[#allocation3 + $0x24] sm:$0xf] }
 0x4b9   : > { %13163 = vmatprep.mubr.msk.bf16.mxu0 %vm1558_vm14, %v12156_v40  ;;  %v9703_v55 = vshll.u32 %v9630_v42, 16 }
 0x4ba   : > { %13164 = vmatmul.mubr.msk.bf16.vlgmr.msra.gmra.mrb[32].mxu0 %vm1558_vm14, %v12157_v26  ;;  %v13813_v26 = vld [vmem:[#allocation3 + $0x84] sm:$0xff]  }
 0x4be   : > { %13036 = vmatmul.mubr.msk.bf16.gmra.mrb[24].mxu1 %vm6754_vm9, %v18510_v44  ;;  %v13805_v44 = vld [vmem:[#allocation3 + $0x24] sm:$0xff]  }
 0x4bf   : > { %13039 = vmatprep.mubr.msk.bf16.mxu1 %vm6754_vm9, %v18513_v43  ;;  %v17559_v43 = vld [vmem:[%s18180_s4 + $0x20] sm:$0xf] }
 0x4c6   : > { %13040 = vmatmul.mubr.msk.bf16.gmra.mrb[28].mxu1 %vm6754_vm9, %v18516_v5  ;;  %v12158_v5 = vcombine.low %v13874_v49, %v13875_v37 }
 0x4c7   : > { %13043 = vmatprep.mubr.msk.bf16.mxu1 %vm6754_vm9, %v18519_v57  ;;  %v13807_v57 = vld [vmem:[#allocation3 + $0x3c] sm:$0xff]  }
 0x4c8   : > { %13167 = vmatprep.mubr.msk.bf16.mxu0 %vm1558_vm14, %v12158_v5  ;;  %v9700_v5 = vshrl.u32 %v9630_v42, 16  ;;  %v13896_v42 = vld [vmem:[%s14051_s22 + $0x68] sm:$0xf] }
 0x4c9   : > { %13168 = vmatmul.mubr.msk.bf16.gmra.mrb[36].mxu0 %vm1558_vm14, %v12159_v11  ;;  %v13891_v11 = vld [vmem:[%s14051_s22 + $0x54] sm:$0xf] }
 0x4ce   : > { %13044 = vmatmul.mubr.msk.bf16.gmra.mrb[32].mxu1 %vm6754_vm9, %v18522_v61  ;;  %v13879_v61 = vld [vmem:[%s14051_s22 + $0x24] sm:$0xf] }
 0x4cf   : > { %13047 = vmatprep.mubr.msk.bf16.mxu1 %vm6754_vm9, %v18525_v56  ;;  %v12160_v45 = vcombine.low %v13878_v16, %v13879_v61  ;;  %v13881_v56 = vld [vmem:[%s14051_s22 + $0x2c] sm:$0xf]  ;;  %v13893_v16 = vld [vmem:[%s14051_s22 + $0x5c] sm:$0xf] }
 0x4d0   : > { %v12161_v34 = vcombine.low %v13880_v58, %v13881_v56  ;;  %v18543_v58 = vld [vmem:[#allocation42_spill] sm:$0xff] }
 0x4d1   : > { %13171 = vmatprep.mubr.msk.bf16.mxu0 %vm1558_vm14, %v12160_v45  ;;  %v9709_v56 = vshll.u32 %v18543_v58, 16 }
 0x4d2   : > { %13172 = vmatmul.mubr.msk.bf16.gmra.mrb[40].mxu0 %vm1558_vm14, %v12161_v34  ;;  %v9713_v34 = vshrl.u32 %v18543_v58, 16 }
 0x4d6   : > { %13048 = vmatmul.mubr.msk.bf16.gmra.mrb[36].mxu1 %vm6754_vm9, %v18528_v36  ;;  %v13810_v36 = vld [vmem:[#allocation3 + $0x60] sm:$0xff]  }
 0x4d7   : > { %13051 = vmatprep.mubr.msk.bf16.mxu1 %vm6754_vm9, %v18531_v38  ;;  %v12162_v38 = vcombine.low %v13882_v53, %v13883_v13  ;;  %v9702_v13 = vrot.slane %v9700_v5, 4 }
 0x4d9   : > { %13175 = vmatprep.mubr.msk.bf16.mxu0 %vm1558_vm14, %v12162_v38  ;;  %v9705_v38 = vrot.slane %v9703_v55, 5 }
 0x4de   : > { %13052 = vmatmul.mubr.msk.bf16.gmra.mrb[40].mxu1 %vm6754_vm9, %v18534_v19  ;;  %v12163_v19 = vcombine.low %v13884_v21, %v13885_v7  ;;  %v9633_v21 = vld [vmem:[#allocation3 + $0x30] sm:$0xf]  ;;  %v13815_v7 = vld [vmem:[#allocation3 + $0x9c] sm:$0xff]  }
 0x4df   : > { %13055 = vmatprep.mubr.msk.bf16.mxu1 %vm6754_vm9, %v18537_v28  ;;  %v9627_v28 = vld [vmem:[#allocation3 + $0x18] sm:$0xf] }
 0x4e0   : > { %13176 = vmatmul.mubr.msk.bf16.gmra.mrb[44].mxu0 %vm1558_vm14, %v12163_v19  ;;  %v9676_v40 = vshrl.u32 %v9627_v28, 16  ;;  %v9679_v41 = vshll.u32 %v9627_v28, 16  ;;  %v13816_v28 = vld [vmem:[#allocation3 + $0xa8] sm:$0xff]  }
 0x4e1   : > { %13179 = vmatprep.mubr.msk.bf16.mxu0 %vm1558_vm14, %v12164_v0  ;;  %v9706_v0 = vor.u32 %v9705_v38, %v9702_v13  ;;  %v13818_v38 = vld [vmem:[#allocation3 + $0xc0] sm:$0xff]  }
 0x4e2   : > { %v9678_v49 = vrot.slane %v9676_v40, 4  ;;  %v9681_v37 = vrot.slane %v9679_v41, 5  ;;  %v13895_v40 = vld [vmem:[%s14051_s22 + $0x64] sm:$0xf] }
 0x4e4   : > { %v9682_v53 = vor.u32 %v9681_v37, %v9678_v49  ;;  %v18546_v37 = vld [vmem:[#allocation44_spill] sm:$0xff] }
 0x4e5   : > { %v9733_v5 = vshll.u32 %v18546_v37, 16  ;;  %v9737_v55 = vshrl.u32 %v18546_v37, 16  ;;  %v9642_v37 = vld [vmem:[#allocation3 + $0x54] sm:$0xf] }
 0x4e6   : > { %13056 = vmatmul.mubr.msk.bf16.gmra.mrb[44].mxu1 %vm6754_vm9, %v18541_v9  ;;  %v18542_v9 = vld [vmem:[#allocation40_spill] sm:$0xff]  ;;  %v9683_v63 = vrot.slane %v9682_v53, 4  ;;  %v18547_v53 = vld [vmem:[#allocation45_spill] sm:$0xff] }
 0x4e7   : > { %13061 = vmatprep.mubr.msk.bf16.mxu1 %vm6754_vm9, %v13804_v12  ;;  %v13888_v12 = vld [vmem:[%s14051_s22 + $0x48] sm:$0xf]  ;;  %v9685_v39 = vshll.u32 %v18542_v9, 16  ;;  %v9689_v14 = vshrl.u32 %v18542_v9, 16  ;;  %v9743_v13 = vshll.u32 %v18547_v53, 16 }
 0x4e8   : > { %v12165_v35 = vcombine.low %v13888_v12, %v13889_v10  ;;  %v9724_v12 = vshrl.u32 %v9633_v21, 16  ;;  %v9727_v10 = vshll.u32 %v9633_v21, 16  ;;  %v18545_v9 = vld [vmem:[#allocation43_spill] sm:$0xff] }
 0x4ea   : > { %13180 = vmatmul.mubr.msk.bf16.gmra.mrb[48].mxu0 %vm1558_vm14, %v12165_v35  ;;  %v9636_v35 = vld [vmem:[#allocation3 + $0x3c] sm:$0xf] }
 0x4ee   : > { %13062 = vmatmul.mubr.msk.bf16.vlgmr.msra.gmra.mrb[16].mxu1 %vm6754_vm9, %v13805_v44  ;;  %v9687_v44 = vrot.slane %v9685_v39, 5  ;;  %v9719_v39 = vshll.u32 %v18545_v9, 16  ;;  %v17652_v9 = vld [vmem:[#allocation3 + $0xd4] sm:$0x1] }
 0x4ef   : > { %13094 = vmatpush3.bf16.msra.mxu1 %v10158_v48  ;;  %13065 = vmatprep.mubr.msk.bf16.mxu1 %vm6754_vm9, %v13806_v62  ;;  %v9691_v48 = vrot.slane %v9689_v14, 4  ;;  %v13814_v62 = vld [vmem:[#allocation3 + $0x90] sm:$0xff]   ;;  %v13894_v14 = vld [vmem:[%s14051_s22 + $0x60] sm:$0xf] }
 0x4f0   : > { %13727 = vmatprep.subr.msk.bf16.mxu1 %vm6803_vm7, %v17559_v43  ;;  %v12168_v41 = vcombine.low %v13894_v14, %v13895_v40  ;;  %v17630_v58 = vrot.slane %v9719_v39, 5  ;;  %v13898_v39 = vld [vmem:[%s14051_s22 + $0x70] sm:$0xf]  ;;  %v13899_v14 = vld [vmem:[%s14051_s22 + $0x74] sm:$0xf] }
 0x4f1   : > { %v9692_v45 = vor.u32 %v9691_v48, %v9687_v44  ;;  %v12170_v40 = vcombine.low %v13898_v39, %v13899_v14  ;;  %v9796_v39 = vshrl.u32 %v9642_v37, 16  ;;  %v9645_v14 = vld [vmem:[#allocation3 + $0x60] sm:$0xf] }
 0x4f3   : > { %v9693_v19 = vrot.slane %v9692_v45, 4 }
 0x4f6   : > { %13066 = vmatmul.mubr.msk.bf16.gmra.mrb[20].mxu1 %vm6754_vm9, %v13807_v57  ;;  %v12166_v57 = vcombine.low %v13890_v22, %v13891_v11  ;;  %v9748_v22 = vshrl.u32 %v9636_v35, 16  ;;  %v9751_v11 = vshll.u32 %v9636_v35, 16  ;;  %v17650_v35 = vld [vmem:[#allocation3 + $0xd0] sm:$0xf] }
 0x4f7   : > { %13069 = vmatprep.mubr.msk.bf16.mxu1 %vm6754_vm9, %v13808_v51  ;;  %v13892_v51 = vld [vmem:[%s14051_s22 + $0x58] sm:$0xf] }
 0x4f8   : > { %v12167_v61 = vcombine.low %v13892_v51, %v13893_v16  ;;  %13183 = vmatprep.mubr.msk.bf16.mxu0 %vm1558_vm14, %v12166_v57  ;;  %v9688_v57 = vsel %vm14107_vm13, %v9683_v63, %v9687_v44  ;;  %v17625_v51 = vrot.slane %v9706_v0, 4  ;;  %v9726_v16 = vrot.slane %v9724_v12, 4  ;;  %v9639_v44 = vld [vmem:[#allocation3 + $0x48] sm:$0xf]  ;;  %v18549_v0 = vld [vmem:[#allocation48_spill] sm:$0xff] }
 0x4f9   : > { %v17637_v21 = vrot.slane %v9748_v22, 4  ;;  %v9781_v12 = vshll.u32 %v18549_v0, 16  ;;  %v9775_v53 = vshll.u32 %v9639_v44, 16 }
 0x4fa   : > { %13184 = vmatmul.mubr.msk.bf16.gmra.mrb[52].mxu0 %vm1558_vm14, %v12167_v61  ;;  %v9729_v61 = vrot.slane %v9727_v10, 5  ;;  %v9785_v10 = vshrl.u32 %v18549_v0, 16  ;;  %v9745_v0 = vrot.slane %v9743_v13, 5 }
 0x4fb   : > { %13187 = vmatprep.mubr.msk.bf16.mxu0 %vm1558_vm14, %v12168_v41  ;;  %v13900_v41 = vld [vmem:[%s14051_s22 + $0x78] sm:$0xf] }
 0x4fc   : > { %v9730_v63 = vor.u32 %v9729_v61, %v9726_v16  ;;  %v9772_v16 = vshrl.u32 %v9639_v44, 16 }
 0x4fe   : > { %13070 = vmatmul.mubr.msk.bf16.gmra.mrb[24].mxu1 %vm6754_vm9, %v13809_v23  ;;  %v18544_v23 = vld [vmem:[#allocation41_spill] sm:$0xff] }
 0x4ff   : > { %13073 = vmatprep.mubr.msk.bf16.mxu1 %vm6754_vm9, %v13810_v36  ;;  %v9695_v36 = vshll.u32 %v18544_v23, 16  ;;  %v17634_v23 = vrot.slane %v9733_v5, 5  ;;  %v18550_v5 = vld [vmem:[#allocation52_spill] sm:$0xff] }
 0x500   : > { %v9809_v22 = vshrl.u32 %v18550_v5, 16 }
 0x501   : > { %v9697_v24 = vrot.slane %v9695_v36, 5  ;;  %v9739_v36 = vrot.slane %v9737_v55, 4  ;;  %v9805_v55 = vshll.u32 %v18550_v5, 16 }
 0x506   : > { %13074 = vmatmul.mubr.msk.bf16.gmra.mrb[28].mxu1 %vm6754_vm9, %v13811_v52  ;;  %v17608_v52 = vrot.slane %v9709_v56, 5  ;;  %v13817_v56 = vld [vmem:[#allocation3 + $0xb4] sm:$0xff]  }
 0x507   : > { %13077 = vmatprep.mubr.msk.bf16.mxu1 %vm6754_vm9, %v13812_v1  ;;  %v9715_v1 = vrot.slane %v9713_v34, 4 }
 0x509   : > { %v9716_v49 = vor.u32 %v9715_v1, %v17608_v52 }
 0x50b   : > { %v17632_v34 = vrot.slane %v9716_v49, 4  ;;  %v9740_v49 = vor.u32 %v9739_v36, %v17634_v23 }
 0x50d   : > { %v9722_v44 = vsel %vm14107_vm13, %v17632_v34, %v17630_v58  ;;  %v9741_v13 = vrot.slane %v9740_v49, 4  ;;  %v9777_v58 = vrot.slane %v9775_v53, 5  ;;  %v9823_v49 = vshll.u32 %v9645_v14, 16 }
 0x50e   : > { %13078 = vmatmul.mubr.msk.bf16.gmra.mrb[32].mxu1 %vm6754_vm9, %v13813_v26  ;;  %v13897_v26 = vld [vmem:[%s14051_s22 + $0x6c] sm:$0xf] }
 0x50f   : > { %13081 = vmatprep.mubr.msk.bf16.mxu1 %vm6754_vm9, %v13814_v62  ;;  %v12169_v48 = vcombine.low %v13896_v42, %v13897_v26  ;;  %v9698_v62 = vsel %vm14107_vm13, %v9693_v19, %v9697_v24  ;;  %v18548_v19 = vld [vmem:[#allocation46_spill] sm:$0xff]  ;;  %v9712_v24 = vsel %vm14107_vm13, %v17625_v51, %v17608_v52  ;;  %v13901_v42 = vld [vmem:[%s14051_s22 + $0x7c] sm:$0xf]  ;;  %v10524_v52 = vrot.slane %v17650_v35, 5 }
 0x510   : > { %v17628_v45 = vcombine.low %v9688_v57, %v9698_v62  ;;  %v9757_v1 = vshll.u32 %v18548_v19, 16  ;;  %v12171_v26 = vcombine.low %v13900_v41, %v13901_v42  ;;  %v10527_v62 = vrot.slane %v17652_v9, 5 }
 0x511   : > { %13188 = vmatmul.mubr.msk.bf16.gmra.mrb[56].mxu0 %vm1558_vm14, %v12169_v48  ;;  %v10368_v48 = vld [vmem:[#allocation3 + $0xcc] sm:$0xe]  ;;  %v10526_v61 = vrot.slane %v10524_v52, 4  ;;  %v9731_v41 = vrot.slane %v9730_v63, 4  ;;  %v9820_v63 = vshrl.u32 %v9645_v14, 16  ;;  %v12074_v5 = vcombine.low %v9712_v24, %v9722_v44  ;;  %v18553_v24 = vld [vmem:[#allocation55_spill] sm:$0xff] }
 0x512   : > { %v17664_v57 = vrot.slane %v9757_v1, 5  ;;  %13191 = vmatprep.mubr.msk.bf16.mxu0 %vm1558_vm14, %v12170_v40  ;;  %v9799_v1 = vshll.u32 %v9642_v37, 16  ;;  %v10628_v14 = vsel %vm6803_vm7, %v17559_v43, 0  ;;  %v9651_v43 = vld [vmem:[#allocation3 + $0x78] sm:$0xf] }
 0x513   : > { %v9822_v44 = vrot.slane %v9820_v63, 4 }
 0x514   : > { %v9801_v37 = vrot.slane %v9799_v1, 5 }
 0x516   : > { %13082 = vmatmul.mubr.msk.bf16.gmra.mrb[36].mxu1 %vm6754_vm9, %v13815_v7  ;;  %v17639_v7 = vrot.slane %v9751_v11, 5  ;;  %v12120_v11 = vrot.slane %v10368_v48, 9 }
 0x517   : > { %13085 = vmatprep.mubr.msk.bf16.mxu1 %vm6754_vm9, %v13816_v28  ;;  %v9761_v28 = vshrl.u32 %v18548_v19, 16  ;;  %v9787_v19 = vrot.slane %v9785_v10, 4  ;;  %v9811_v10 = vrot.slane %v9809_v22, 4  ;;  %v9736_v22 = vsel %vm14107_vm13, %v9731_v41, %v17634_v23 }
 0x518   : > { %v17672_v36 = vsel %vm14432_vm8, %v12120_v11, %v10524_v52  ;;  %v9754_v42 = vor.u32 %v17639_v7, %v17637_v21  ;;  %v9774_v52 = vrot.slane %v9772_v16, 4  ;;  %v9829_v7 = vshll.u32 %v17172_v46, 16  ;;  %v18552_v16 = vld [vmem:[#allocation50_spill] sm:$0xff] }
 0x519   : > { %v9763_v51 = vrot.slane %v9761_v28, 4  ;;  %13192 = vmatmul.mubr.msk.bf16.gmra.mrb[60].mxu0 %vm1558_vm14, %v12171_v26  ;;  %v17676_v28 = vsel %vm14432_vm8, %v10526_v61, %v10527_v62  ;;  %v9767_v26 = vshll.u32 %v18551_v30, 16  ;;  %v9798_v62 = vrot.slane %v9796_v39, 4 }
 0x51a   : > { %v12137_v40 = vcombine.low %v17672_v36, %v17676_v28  ;;  %v9755_v11 = vrot.slane %v9754_v42, 4  ;;  %v9791_v61 = vshll.u32 %v18552_v16, 16  ;;  %v9778_v53 = vor.u32 %v9777_v58, %v9774_v52  ;;  %v18554_v16 = vld [vmem:[#allocation59_spill] sm:$0xff] }
 0x51b   : > { %v9764_v48 = vor.u32 %v9763_v51, %v17664_v57  ;;  %v9769_v51 = vrot.slane %v9767_v26, 5  ;;  %v9802_v1 = vor.u32 %v9801_v37, %v9798_v62  ;;  %v17706_v41 = vrot.slane %v9829_v7, 5  ;;  %v18555_v7 = vld [vmem:[#allocation57_spill] sm:$0xff] }
 0x51c   : > { %v9793_v26 = vrot.slane %v9791_v61, 5  ;;  %v9779_v37 = vrot.slane %v9778_v53, 4  ;;  %v9868_v61 = vshrl.u32 %v9651_v43, 16 }
 0x51e   : > { %13086 = vmatmul.mubr.msk.bf16.gmra.mrb[40].mxu1 %vm6754_vm9, %v13817_v56  ;;  %v13819_v56 = vld [vmem:[#allocation3 + $0xcc] sm:$0xff]  }
 0x51f   : > { %13089 = vmatprep.mubr.msk.bf16.mxu1 %vm6754_vm9, %v13818_v38  ;;  %v17667_v38 = vrot.slane %v9781_v12, 5  ;;  %v17682_v12 = vrot.slane %v9805_v55, 5  ;;  %v9833_v55 = vshrl.u32 %v17172_v46, 16  ;;  %v9648_v46 = vld [vmem:[#allocation3 + $0x6c] sm:$0xf] }
 0x520   : > { %v9844_v58 = vshrl.u32 %v9648_v46, 16 }
 0x521   : > { %v9788_v34 = vor.u32 %v9787_v19, %v17667_v38  ;;  %v9812_v21 = vor.u32 %v9811_v10, %v17682_v12  ;;  %v9815_v19 = vshll.u32 %v18553_v24, 16  ;;  %v9825_v10 = vrot.slane %v9823_v49, 5 }
 0x522   : > { %v9835_v42 = vrot.slane %v9833_v55, 4  ;;  %v9803_v49 = vrot.slane %v9802_v1, 4  ;;  %v9839_v55 = vshll.u32 %v18555_v7, 16  ;;  %v9846_v24 = vrot.slane %v9844_v58, 4  ;;  %v13904_v7 = vld [vmem:[#allocation3 + $0x94] sm:$0xf] }
 0x523   : > { %v9789_v39 = vrot.slane %v9788_v34, 4  ;;  %v9813_v23 = vrot.slane %v9812_v21, 4  ;;  %v9817_v52 = vrot.slane %v9815_v19, 5  ;;  %v9847_v34 = vshll.u32 %v9648_v46, 16 }
 0x524   : > { %v9826_v21 = vor.u32 %v9825_v10, %v9822_v44  ;;  %v9784_v1 = vsel %vm14107_vm13, %v9779_v37, %v17667_v38  ;;  %v9808_v44 = vsel %vm14107_vm13, %v9803_v49, %v17682_v12 }
 0x525   : > { %v9794_v63 = vsel %vm14107_vm13, %v9789_v39, %v9793_v26 }
 0x526   : > { %13090 = vmatmul.mubr.msk.bf16.gmra.mrb[44].mxu1 %vm6754_vm9, %v13819_v56  ;;  %v9765_v56 = vrot.slane %v9764_v48, 4  ;;  %v9760_v48 = vsel %vm14107_vm13, %v9755_v11, %v17664_v57  ;;  %v9836_v57 = vor.u32 %v9835_v42, %v17706_v41  ;;  %v12077_v10 = vcombine.low %v9784_v1, %v9794_v63  ;;  %v9654_v42 = vld [vmem:[#allocation3 + $0x84] sm:$0xf] }
 0x527   : > { %13095 = vmatprep.mubr.msk.bf16.mxu1 %vm6754_vm9, %v17628_v45  ;;  %v9746_v45 = vsel %vm14107_vm13, %v9741_v13, %v9745_v0  ;;  %v9853_v0 = vshll.u32 %v18554_v16, 16  ;;  %v9857_v13 = vshrl.u32 %v18554_v16, 16  ;;  %v9870_v16 = vrot.slane %v9868_v61, 4 }
 0x528   : > { %v12075_v30 = vcombine.low %v9736_v22, %v9746_v45  ;;  %v9770_v62 = vsel %vm14107_vm13, %v9765_v56, %v9769_v51  ;;  %v9871_v45 = vshll.u32 %v9651_v43, 16  ;;  %v9849_v51 = vrot.slane %v9847_v34, 5  ;;  %v18556_v56 = vld [vmem:[#allocation60_spill] sm:$0xff] }
 0x529   : > { %v17723_v22 = vrot.slane %v9853_v0, 5  ;;  %v9859_v11 = vrot.slane %v9857_v13, 4  ;;  %v9877_v53 = vshll.u32 %v18556_v56, 16  ;;  %v9881_v19 = vshrl.u32 %v18556_v56, 16  ;;  %v9657_v13 = vld [vmem:[#allocation3 + $0x90] sm:$0xf] }
 0x52a   : > { %v12076_v39 = vcombine.low %v9760_v48, %v9770_v62  ;;  %v9873_v0 = vrot.slane %v9871_v45, 5  ;;  %v9850_v48 = vor.u32 %v9849_v51, %v9846_v24  ;;  %v9892_v12 = vshrl.u32 %v9654_v42, 16  ;;  %v13903_v62 = vld [vmem:[#allocation3 + $0x88] sm:$0xf] }
 0x52b   : > { %v9860_v26 = vor.u32 %v9859_v11, %v17723_v22  ;;  %v17735_v58 = vrot.slane %v9877_v53, 5  ;;  %v9883_v34 = vrot.slane %v9881_v19, 4  ;;  %v9895_v43 = vshll.u32 %v9654_v42, 16  ;;  %v13905_v19 = vld [vmem:[#allocation3 + $0x80] sm:$0x1] }
 0x52c   : > { %v9901_v37 = vshll.u32 %v13903_v62, 16  ;;  %v9905_v63 = vshrl.u32 %v13903_v62, 16  ;;  %v9916_v49 = vshrl.u32 %v9657_v13, 16  ;;  %v9874_v24 = vor.u32 %v9873_v0, %v9870_v16 }
 0x52d   : > { %v9861_v45 = vrot.slane %v9860_v26, 4  ;;  %v9851_v51 = vrot.slane %v9850_v48, 4  ;;  %v9884_v53 = vor.u32 %v9883_v34, %v17735_v58  ;;  %v9894_v1 = vrot.slane %v9892_v12, 4 }
 0x52e   : > { %13096 = vmatmul.mubr.msk.bf16.vlgmr.msra.gmra.mrb[16].mxu1 %vm6754_vm9, %v12074_v5  ;;  %v9818_v5 = vsel %vm14107_vm13, %v9813_v23, %v9817_v52  ;;  %v9841_v23 = vrot.slane %v9839_v55, 5  ;;  %v13902_v52 = vld [vmem:[#allocation3 + $0x74] sm:$0x1]  ;;  %v9929_v55 = vshrl.u32 %v13904_v7, 16  ;;  %v9907_v42 = vrot.slane %v9905_v63, 4 }
 0x52f   : > { %13128 = vmatpush3.bf16.msra.mxu1 %v10628_v14  ;;  %13099 = vmatprep.mubr.msk.bf16.mxu1 %vm6754_vm9, %v12075_v30  ;;  %v12078_v46 = vcombine.low %v9808_v44, %v9818_v5  ;;  %v9827_v14 = vrot.slane %v9826_v21, 4  ;;  %v9837_v30 = vrot.slane %v9836_v57, 4  ;;  %v9863_v38 = vshll.u32 %v13902_v52, 16  ;;  %v18557_v21 = vld [vmem:[#allocation66_spill] sm:$0xff] }
 0x530   : > { %v9919_v5 = vshll.u32 %v9657_v13, 16  ;;  %v9925_v57 = vshll.u32 %v18557_v21, 16  ;;  %v9897_v44 = vrot.slane %v9895_v43, 5  ;;  %v9918_v13 = vrot.slane %v9916_v49, 4 }
 0x531   : > { %v9832_v11 = vsel %vm14107_vm13, %v9827_v14, %v17706_v41  ;;  %v9842_v61 = vsel %vm14107_vm13, %v9837_v30, %v9841_v23  ;;  %v9865_v56 = vrot.slane %v9863_v38, 5  ;;  %v9931_v41 = vrot.slane %v9929_v55, 4  ;;  %v9660_v14 = vld [vmem:[#allocation3 + $0x9c] sm:$0xf]  ;;  %v9663_v55 = vld [vmem:[#allocation3 + $0xa8] sm:$0xf] }
 0x532   : > { %v9921_v52 = vrot.slane %v9919_v5, 5  ;;  %v17747_v62 = vrot.slane %v9925_v57, 5  ;;  %v12079_v23 = vcombine.low %v9832_v11, %v9842_v61  ;;  %v9875_v26 = vrot.slane %v9874_v24, 4  ;;  %v13906_v5 = vld [vmem:[#allocation3 + $0x8c] sm:$0x1] }
 0x533   : > { %v9866_v30 = vsel %vm14107_vm13, %v9861_v45, %v9865_v56  ;;  %v9856_v16 = vsel %vm14107_vm13, %v9851_v51, %v17723_v22  ;;  %v9885_v0 = vrot.slane %v9884_v53, 4  ;;  %v9898_v48 = vor.u32 %v9897_v44, %v9894_v1  ;;  %v13907_v22 = vld [vmem:[#allocation3 + $0xa0] sm:$0xf]  ;;  %v13908_v61 = vld [vmem:[#allocation3 + $0x98] sm:$0x1] }
 0x534   : > { %v9940_v34 = vshrl.u32 %v9660_v14, 16  ;;  %v9943_v12 = vshll.u32 %v9660_v14, 16  ;;  %v12080_v43 = vcombine.low %v9856_v16, %v9866_v30  ;;  %v9922_v63 = vor.u32 %v9921_v52, %v9918_v13  ;;  %v13909_v24 = vld [vmem:[#allocation3 + $0xac] sm:$0xf] }
 0x535   : > { %v9932_v49 = vor.u32 %v9931_v41, %v17747_v62  ;;  %v9911_v21 = vshll.u32 %v13906_v5, 16  ;;  %v9949_v57 = vshll.u32 %v13907_v22, 16  ;;  %v9953_v7 = vshrl.u32 %v13907_v22, 16  ;;  %v13911_v22 = vld [vmem:[#allocation3 + $0xb8] sm:$0xf] }
 0x536   : > { %13100 = vmatmul.mubr.msk.bf16.gmra.mrb[20].mxu1 %vm6754_vm9, %v12076_v39  ;;  %v9887_v39 = vshll.u32 %v13905_v19, 16  ;;  %v9935_v45 = vshll.u32 %v13908_v61, 16  ;;  %v9973_v51 = vshll.u32 %v13909_v24, 16  ;;  %v9977_v56 = vshrl.u32 %v13909_v24, 16  ;;  %v13912_v61 = vld [vmem:[#allocation3 + $0xc4] sm:$0xf] }
 0x537   : > { %13103 = vmatprep.mubr.msk.bf16.mxu1 %vm6754_vm9, %v12077_v10  ;;  %v17745_v10 = vrot.slane %v9901_v37, 5  ;;  %v9899_v53 = vrot.slane %v9898_v48, 4  ;;  %v9945_v1 = vrot.slane %v9943_v12, 5  ;;  %v9923_v44 = vrot.slane %v9922_v63, 4  ;;  %v13910_v12 = vld [vmem:[#allocation3 + $0xa4] sm:$0x1] }
 0x538   : > { %v9889_v37 = vrot.slane %v9887_v39, 5  ;;  %v9942_v39 = vrot.slane %v9940_v34, 4  ;;  %v9967_v13 = vshll.u32 %v9663_v55, 16  ;;  %v9913_v41 = vrot.slane %v9911_v21, 5 }
 0x539   : > { %v9908_v38 = vor.u32 %v9907_v42, %v17745_v10  ;;  %v9964_v42 = vshrl.u32 %v9663_v55, 16  ;;  %v17763_v14 = vrot.slane %v9949_v57, 5  ;;  %v9937_v30 = vrot.slane %v9935_v45, 5 }
 0x53a   : > { %v9890_v11 = vsel %vm14107_vm13, %v9885_v0, %v9889_v37  ;;  %v9979_v16 = vrot.slane %v9977_v56, 4  ;;  %v9666_v0 = vld [vmem:[#allocation3 + $0xb4] sm:$0xf]  ;;  %v9904_v48 = vsel %vm14107_vm13, %v9899_v53, %v17745_v10  ;;  %v9946_v34 = vor.u32 %v9945_v1, %v9942_v39  ;;  %v13913_v39 = vld [vmem:[#allocation3 + $0xb0] sm:$0x1] }
 0x53b   : > { %v9909_v19 = vrot.slane %v9908_v38, 4  ;;  %v9959_v37 = vshll.u32 %v13910_v12, 16  ;;  %v9988_v21 = vshrl.u32 %v9666_v0, 16  ;;  %v9997_v10 = vshll.u32 %v13911_v22, 16 }
 0x53c   : > { %v10001_v57 = vshrl.u32 %v13911_v22, 16  ;;  %v10021_v45 = vshll.u32 %v13912_v61, 16  ;;  %v10025_v24 = vshrl.u32 %v13912_v61, 16  ;;  %v9947_v56 = vrot.slane %v9946_v34, 4 }
 0x53d   : > { %v9914_v38 = vsel %vm14107_vm13, %v9909_v19, %v9913_v41  ;;  %v9961_v53 = vrot.slane %v9959_v37, 5  ;;  %v9983_v1 = vshll.u32 %v13913_v39, 16  ;;  %v9999_v41 = vrot.slane %v9997_v10, 5 }
 0x53e   : > { %13104 = vmatmul.mubr.msk.bf16.gmra.mrb[24].mxu1 %vm6754_vm9, %v12078_v46  ;;  %v9880_v46 = vsel %vm14107_vm13, %v9875_v26, %v17735_v58  ;;  %v9933_v58 = vrot.slane %v9932_v49, 4  ;;  %v17766_v26 = vrot.slane %v9973_v51, 5  ;;  %v9966_v49 = vrot.slane %v9964_v42, 4  ;;  %v9672_v42 = vld [vmem:[#allocation3 + $0xcc] sm:$0xf] }
 0x53f   : > { %13107 = vmatprep.mubr.msk.bf16.mxu1 %vm6754_vm9, %v12079_v23  ;;  %v12081_v52 = vcombine.low %v9880_v46, %v9890_v11  ;;  %v9955_v23 = vrot.slane %v9953_v7, 4  ;;  %v9969_v46 = vrot.slane %v9967_v13, 5  ;;  %v9669_v7 = vld [vmem:[#allocation3 + $0xc0] sm:$0xf]  ;;  %v9991_v11 = vshll.u32 %v9666_v0, 16 }
 0x540   : > { %v9938_v63 = vsel %vm14107_vm13, %v9933_v58, %v9937_v30  ;;  %v9980_v55 = vor.u32 %v9979_v16, %v17766_v26  ;;  %v12082_v51 = vcombine.low %v9904_v48, %v9914_v38  ;;  %v10015_v58 = vshll.u32 %v9669_v7, 16 }
 0x541   : > { %v9956_v5 = vor.u32 %v9955_v23, %v17763_v14  ;;  %v9970_v19 = vor.u32 %v9969_v46, %v9966_v49  ;;  %v10003_v23 = vrot.slane %v10001_v57, 4  ;;  %v9993_v16 = vrot.slane %v9991_v11, 5 }
 0x542   : > { %v9981_v30 = vrot.slane %v9980_v55, 4  ;;  %v10023_v0 = vrot.slane %v10021_v45, 5  ;;  %v10027_v12 = vrot.slane %v10025_v24, 4  ;;  %v10036_v48 = vshrl.u32 %v9672_v42, 16 }
 0x543   : > { %v9957_v13 = vrot.slane %v9956_v5, 4  ;;  %v10039_v38 = vshll.u32 %v9672_v42, 16  ;;  %v10045_v34 = vshll.u32 %v17650_v35, 16  ;;  %v10049_v37 = vshrl.u32 %v17650_v35, 16 }
 0x544   : > { %v10017_v46 = vrot.slane %v10015_v58, 5  ;;  %v9952_v5 = vsel %vm14107_vm13, %v9947_v56, %v17763_v14  ;;  %v10004_v22 = vor.u32 %v10003_v23, %v9999_v41  ;;  %v10028_v11 = vor.u32 %v10027_v12, %v10023_v0  ;;  %v13915_v56 = vld [vmem:[#allocation3 + $0xc8] sm:$0x1] }
 0x545   : > { %v10038_v35 = vrot.slane %v10036_v48, 4  ;;  %v10041_v61 = vrot.slane %v10039_v38, 5  ;;  %v10047_v45 = vrot.slane %v10045_v34, 5  ;;  %v10051_v24 = vrot.slane %v10049_v37, 4 }
 0x546   : > { %13108 = vmatmul.mubr.msk.bf16.gmra.mrb[28].mxu1 %vm6754_vm9, %v12080_v43  ;;  %v9928_v43 = vsel %vm14107_vm13, %v9923_v44, %v17747_v62  ;;  %v10012_v44 = vshrl.u32 %v9669_v7, 16  ;;  %v13914_v7 = vld [vmem:[#allocation3 + $0xbc] sm:$0x1]  ;;  %v10005_v39 = vrot.slane %v10004_v22, 4  ;;  %v18562_v22 = vld [vmem:[#allocation54_spill] sm:$0xff] }
 0x547   : > { %13111 = vmatprep.mubr.msk.bf16.mxu1 %vm6754_vm9, %v12081_v52  ;;  %v12083_v62 = vcombine.low %v9928_v43, %v9938_v63  ;;  %v9990_v52 = vrot.slane %v9988_v21, 4  ;;  %v9971_v43 = vrot.slane %v9970_v19, 4  ;;  %v9985_v63 = vrot.slane %v9983_v1, 5 }
 0x548   : > { %v10014_v49 = vrot.slane %v10012_v44, 4  ;;  %v9962_v21 = vsel %vm14107_vm13, %v9957_v13, %v9961_v53  ;;  %v10007_v55 = vshll.u32 %v13914_v7, 16  ;;  %v10031_v53 = vshll.u32 %v13915_v56, 16  ;;  %v18565_v7 = vld [vmem:[#allocation58_spill] sm:$0xff]  ;;  %v18576_v56 = vld [vmem:[#allocation68_spill] sm:$0xff] }
 0x549   : > { %v9986_v10 = vsel %vm14107_vm13, %v9981_v30, %v9985_v63  ;;  %v9994_v57 = vor.u32 %v9993_v16, %v9990_v52  ;;  %v9976_v14 = vsel %vm14107_vm13, %v9971_v43, %v17766_v26  ;;  %v10029_v44 = vrot.slane %v10028_v11, 4  ;;  %v18568_v11 = vld [vmem:[#allocation63_spill] sm:$0xff] }
 0x54a   : > { %v12085_v19 = vcombine.low %v9976_v14, %v9986_v10  ;;  %v10009_v1 = vrot.slane %v10007_v55, 5  ;;  %v10042_v42 = vor.u32 %v10041_v61, %v10038_v35  ;;  %v10052_v13 = vor.u32 %v10051_v24, %v10047_v45  ;;  %v18570_v61 = vld [vmem:[#allocation62_spill] sm:$0xff]  ;;  %v18574_v14 = vld [vmem:[#allocation67_spill] sm:$0xff] }
 0x54b   : > { %v9995_v58 = vrot.slane %v9994_v57, 4  ;;  %v10055_v52 = vshll.u32 %v17652_v9, 16  ;;  %v10033_v30 = vrot.slane %v10031_v53, 5  ;;  %v18564_v57 = vld [vmem:[#allocation56_spill] sm:$0xff]  ;;  %v18569_v35 = vcombine.low %v18567_v17, %v18568_v11  ;;  %v18577_v53 = vld [vmem:[#allocation69_spill] sm:$0xff] }
 0x54c   : > { %v10010_v26 = vsel %vm14107_vm13, %v10005_v39, %v10009_v1  ;;  %v10043_v48 = vrot.slane %v10042_v42, 4  ;;  %v10053_v38 = vrot.slane %v10052_v13, 4  ;;  %v18566_v55 = vcombine.low %v18564_v57, %v18565_v7  ;;  %v18580_v1 = vld [vmem:[#allocation70_spill] sm:$0xff] }
 0x54d   : > { %v10034_v16 = vsel %vm14107_vm13, %v10029_v44, %v10033_v30  ;;  %v10000_v12 = vsel %vm14107_vm13, %v9995_v58, %v9999_v41  ;;  %v10057_v34 = vrot.slane %v10055_v52, 5  ;;  %v18558_v41 = vld [vmem:[#allocation49_spill] sm:$0xff]  ;;  %v18579_v39 = vcombine.low %v17271_v4, %v17277_v54  ;;  %v18581_v44 = vld [vmem:[#allocation71_spill] sm:$0xff] }
 0x54e   : > { %13112 = vmatmul.mubr.msk.bf16.gmra.mrb[32].mxu1 %vm6754_vm9, %v12082_v51  ;;  %v12084_v51 = vcombine.low %v9952_v5, %v9962_v21  ;;  %v12086_v37 = vcombine.low %v10000_v12, %v10010_v26  ;;  %v10048_v9 = vsel %vm14107_vm13, %v10043_v48, %v10047_v45  ;;  %v18559_v5 = vld [vmem:[#allocation51_spill] sm:$0xff]  ;;  %v18571_v45 = vld [vmem:[#allocation64_spill] sm:$0xff]  ;;  %v18582_v58 = vcombine.low %v18580_v1, %v18581_v44 }
 0x54f   : > { %13115 = vmatprep.mubr.msk.bf16.mxu1 %vm6754_vm9, %v12083_v62  ;;  %v10018_v62 = vor.u32 %v10017_v46, %v10014_v49  ;;  %v10058_v49 = vsel %vm14107_vm13, %v10053_v38, %v10057_v34  ;;  %v18560_v21 = vcombine.low %v18558_v41, %v18559_v5  ;;  %v18572_v24 = vcombine.low %v18570_v61, %v18571_v45  ;;  %v17949_v41 = vld [vmem:[%s18182_s6] ss:$0 sm:$0xff] }
 0x550   : > { %v12088_v46 = vcombine.low %v10048_v9, %v10058_v49  ;;  %v18583_v42 = vcombine.low %v17306_v20, %v17312_v59  ;;  %v17944_v49 = vld [vmem:[%s18181_s5] ss:$0 sm:$0xff] }
 0x551   : > { %v10019_v23 = vrot.slane %v10018_v62, 4 }
 0x553   : > { %v10024_v43 = vsel %vm14107_vm13, %v10019_v23, %v10023_v0  ;;  %v18561_v0 = vld [vmem:[#allocation53_spill] sm:$0xff] }
 0x554   : > { %v12087_v63 = vcombine.low %v10024_v43, %v10034_v16  ;;  %v18563_v10 = vcombine.low %v18561_v0, %v18562_v22 }
 0x556   : > { %13116 = vmatmul.mubr.msk.bf16.gmra.mrb[36].mxu1 %vm6754_vm9, %v12084_v51  ;;  %v18573_v51 = vld [vmem:[#allocation65_spill] sm:$0xff] }
 0x557   : > { %13119 = vmatprep.mubr.msk.bf16.mxu1 %vm6754_vm9, %v12085_v19  ;;  %v18575_v62 = vcombine.low %v18573_v51, %v18574_v14  ;;  %v18578_v19 = vcombine.low %v18576_v56, %v18577_v53 }
 0x55e   : > { %13120 = vmatmul.mubr.msk.bf16.gmra.mrb[40].mxu1 %vm6754_vm9, %v12086_v37  ;;  %v17932_v37 = vld [vmem:[%s18184_s8] ss:$0 sm:$0xff] }
 0x55f   : > { %13123 = vmatprep.mubr.msk.bf16.mxu1 %vm6754_vm9, %v12087_v63  ;;  %v17938_v63 = vld [vmem:[%s18185_s9] ss:$0 sm:$0xff] }
 0x566   : > { %13124 = vmatmul.mubr.msk.bf16.gmra.mrb[44].mxu1 %vm6754_vm9, %v12088_v46 }
 0x567   : > { %13129 = vmatprep.mubr.msk.bf16.mxu1 %vm6754_vm9, %v18560_v21 }
 0x56e   : > { %13130 = vmatmul.mubr.msk.bf16.vlgmr.msra.gmra.mrb[16].mxu1 %vm6754_vm9, %v18563_v10 }
 0x56f   : > { %13133 = vmatprep.mubr.msk.bf16.mxu1 %vm6754_vm9, %v18566_v55 }
 0x576   : > { %13134 = vmatmul.mubr.msk.bf16.gmra.mrb[20].mxu1 %vm6754_vm9, %v18569_v35 }
 0x577   : > { %13137 = vmatprep.mubr.msk.bf16.mxu1 %vm6754_vm9, %v18572_v24 }
 0x57e   : > { %13138 = vmatmul.mubr.msk.bf16.gmra.mrb[24].mxu1 %vm6754_vm9, %v18575_v62 }
 0x57f   : > { %13141 = vmatprep.mubr.msk.bf16.mxu1 %vm6754_vm9, %v18578_v19 }
 0x586   : > { %13142 = vmatmul.mubr.msk.bf16.gmra.mrb[28].mxu1 %vm6754_vm9, %v18579_v39 }
 0x587   : > { %13145 = vmatprep.mubr.msk.bf16.mxu1 %vm6754_vm9, %v18582_v58 }
 0x58d   : > { %v13165_v4 = vpop.f32.mrb[32].mxu0 }
 0x58e   : > { %13146 = vmatmul.mubr.msk.bf16.gmra.mrb[32].mxu1 %vm6754_vm9, %v12131_v50  ;;  %v11067_v54 = vpop.f32.mrb[33].mxu0  ;;  %v11203_v43 = vmul.f32 %v13165_v4, %v17932_v37 }
 0x58f   : > { %13149 = vmatprep.mubr.msk.bf16.mxu1 %vm6754_vm9, %v18583_v42  ;;  %v13166_v27 = vpop.f32.mrb[34].mxu0  ;;  %v11201_v9 = vmul.f32 %v17932_v37, %v11067_v54 }
 0x590   : > { %v11070_v18 = vpop.f32.mrb[35].mxu0  ;;  %v11242_v5 = vadd.f32 %v17938_v63, %v11203_v43  ;;  %v11204_v21 = vmul.f32 %v13166_v27, %v17932_v37 }
 0x591   : > { %v11240_v10 = vadd.f32 %v17938_v63, %v11201_v9  ;;  %v11202_v57 = vmul.f32 %v17932_v37, %v11070_v18 }
 0x592   : > { %v11243_v24 = vadd.f32 %v17938_v63, %v11204_v21 }
 0x593   : > { %v11241_v56 = vadd.f32 %v17938_v63, %v11202_v57 }
 0x596   : > { %13150 = vmatmul.mubr.msk.bf16.gmra.mrb[36].mxu1 %vm6754_vm9, %v12133_v8 }
 0x597   : > { %13153 = vmatprep.mubr.msk.bf16.mxu1 %vm6754_vm9, %v12134_v3 }
 0x59c   : > { %v13169_v20 = vpop.f32.mrb[36].mxu0 }
 0x59d   : > { %v11083_v50 = vpop.f32.mrb[37].mxu0  ;;  %v11207_v62 = vmul.f32 %v13169_v20, %v17932_v37 }
 0x59e   : > { %13154 = vmatmul.mubr.msk.bf16.gmra.mrb[40].mxu1 %vm6754_vm9, %v12135_v60  ;;  %v17877_v59 = vpop.f32.mrb[38].mxu0  ;;  %v11205_v39 = vmul.f32 %v17932_v37, %v11083_v50 }
 0x59f   : > { %13157 = vmatprep.mubr.msk.bf16.mxu1 %vm6754_vm9, %v12136_v47  ;;  %v17879_v2 = vpop.f32.mrb[39].mxu0  ;;  %v11246_v27 = vadd.f32 %v17938_v63, %v11207_v62  ;;  %v11208_v18 = vmul.f32 %v17877_v59, %v17932_v37 }
 0x5a0   : > { %v11244_v9 = vadd.f32 %v17938_v63, %v11205_v39 }
 0x5a5   : > { %v17881_v31 = vpop.f32.mrb[40].mxu0 }
 0x5a6   : > { %13158 = vmatmul.mubr.msk.bf16.gmra.mrb[44].mxu1 %vm6754_vm9, %v12137_v40  ;;  %v17883_v25 = vpop.f32.mrb[41].mxu0 }
 0x5a7   : > { %v17885_v8 = vpop.f32.mrb[42].mxu0 }
 0x5a8   : > { %v17887_v15 = vpop.f32.mrb[43].mxu0 }
 0x5b3   : > { %v17889_v3 = vpop.f32.mrb[44].mxu0 }
 0x5b4   : > { %v17891_v29 = vpop.f32.mrb[45].mxu0 }
 0x5b5   : > { %v17893_v32 = vpop.f32.mrb[46].mxu0 }
 0x5b6   : > { %v17895_v60 = vpop.f32.mrb[47].mxu0 }
 0x5bd   : > { %v17897_v33 = vpop.f32.mrb[48].mxu0 }
 0x5be   : > { %v17899_v6 = vpop.f32.mrb[49].mxu0 }
 0x5bf   : > { %v17901_v47 = vpop.f32.mrb[50].mxu0 }
 0x5c0   : > { %v17903_v36 = vpop.f32.mrb[51].mxu0 }
 0x5cd   : > { %v17905_v28 = vpop.f32.mrb[52].mxu0 }
 0x5ce   : > { %v17907_v40 = vpop.f32.mrb[53].mxu0 }
 0x5cf   : > { %v17909_v13 = vpop.f32.mrb[54].mxu0 }
 0x5d0   : > { %v17911_v52 = vpop.f32.mrb[55].mxu0 }
 0x5e4   : > { %v17913_v23 = vpop.f32.mrb[56].mxu0 }
 0x5e5   : > { %v17915_v30 = vpop.f32.mrb[57].mxu0 }
 0x5e6   : > { %v17917_v26 = vpop.f32.mrb[58].mxu0 }
 0x5e7   : > { %v17919_v16 = vpop.f32.mrb[59].mxu0 }
 0x5ec   : > { %v17921_v12 = vpop.f32.mrb[60].mxu0 }
 0x5ed   : > { %v17923_v48 = vpop.f32.mrb[61].mxu0 }
 0x5ee   : > { %v17925_v38 = vpop.f32.mrb[62].mxu0 }
 0x5ef   : > { %v17927_v34 = vpop.f32.mrb[63].mxu0 }
 0x641   : > { %v13131_v46 = vpop.f32.mrb[16].mxu1 }
 0x642   : > { %v10832_v0 = vmul.f32 %v13131_v46, %v17944_v49  ;;  %v10664_v22 = vpop.f32.mrb[17].mxu1  ;;  %v11206_v46 = vmul.f32 %v17932_v37, %v17879_v2 }
 0x643   : > { %v10830_v7 = vmul.f32 %v17944_v49, %v10664_v22  ;;  %v13132_v55 = vpop.f32.mrb[18].mxu1 }
 0x644   : > { %v10871_v17 = vadd.f32 %v17949_v41, %v10832_v0  ;;  %v10833_v11 = vmul.f32 %v13132_v55, %v17944_v49  ;;  %v10667_v35 = vpop.f32.mrb[19].mxu1 }
 0x645   : > { %v10869_v61 = vadd.f32 %v17949_v41, %v10830_v7  ;;  %v10831_v45 = vmul.f32 %v17944_v49, %v10667_v35  ;;  %v11247_v7 = vadd.f32 %v17938_v63, %v11208_v18 }
 0x646   : > { %v11274_v51 = vadd.f32 %v11242_v5, %v10871_v17  ;;  %v10872_v14 = vadd.f32 %v17949_v41, %v10833_v11  ;;  %v11211_v17 = vmul.f32 %v17881_v31, %v17932_v37  ;;  %v11245_v11 = vadd.f32 %v17938_v63, %v11206_v46 }
 0x647   : > { %v11272_v53 = vadd.f32 %v11240_v10, %v10869_v61  ;;  %v10870_v19 = vadd.f32 %v17949_v41, %v10831_v45  ;;  %v11209_v45 = vmul.f32 %v17932_v37, %v17883_v25 }
 0x648   : > { %v11306_v1 = vmax.f32 %v11274_v51, 0.0  ;;  %v11275_v44 = vadd.f32 %v11243_v24, %v10872_v14  ;;  %v11250_v31 = vadd.f32 %v17938_v63, %v11211_v17 }
 0x649   : > { %v11304_v58 = vmax.f32 %v11272_v53, 0.0  ;;  %v11273_v42 = vadd.f32 %v11241_v56, %v10870_v19  ;;  %v13135_v4 = vpop.f32.mrb[20].mxu1  ;;  %v11212_v19 = vmul.f32 %v17885_v8, %v17932_v37 }
 0x64a   : > { %11338 = vst.msk [vmem:[%s17968_s14 + $0x10] sm:$0xff] %vm6754_vm9, %v11306_v1  ;;  %v11307_v54 = vmax.f32 %v11275_v44, 0.0  ;;  %v10836_v20 = vmul.f32 %v13135_v4, %v17944_v49  ;;  %v10680_v43 = vpop.f32.mrb[21].mxu1  ;;  %v11248_v44 = vadd.f32 %v17938_v63, %v11209_v45 }
 0x64b   : > { %11336 = vst.msk [vmem:[%s17968_s14] sm:$0xff] %vm6754_vm9, %v11304_v58  ;;  %v11305_v50 = vmax.f32 %v11273_v42, 0.0  ;;  %v10834_v5 = vmul.f32 %v17944_v49, %v10680_v43  ;;  %v13136_v21 = vpop.f32.mrb[22].mxu1  ;;  %v11210_v58 = vmul.f32 %v17932_v37, %v17887_v15  ;;  %v11251_v43 = vadd.f32 %v17938_v63, %v11212_v19 }
 0x64c   : > { %11339 = vst.msk [vmem:[%s17968_s14 + $0x18] sm:$0xff] %vm6754_vm9, %v11307_v54  ;;  %v10875_v0 = vadd.f32 %v17949_v41, %v10836_v20  ;;  %v10837_v59 = vmul.f32 %v13136_v21, %v17944_v49  ;;  %v10683_v22 = vpop.f32.mrb[23].mxu1  ;;  %v11219_v19 = vmul.f32 %v17897_v33, %v17932_v37 }
 0x64d   : > { %11337 = vst.msk [vmem:[%s17968_s14 + $0x8] sm:$0xff] %vm6754_vm9, %v11305_v50  ;;  %v10873_v10 = vadd.f32 %v17949_v41, %v10834_v5  ;;  %v10835_v57 = vmul.f32 %v17944_v49, %v10683_v22  ;;  %v11249_v46 = vadd.f32 %v17938_v63, %v11210_v58 }
 0x64e   : > { %v11278_v2 = vadd.f32 %v11246_v27, %v10875_v0  ;;  %v10876_v55 = vadd.f32 %v17949_v41, %v10837_v59  ;;  %v11213_v0 = vmul.f32 %v17932_v37, %v17891_v29  ;;  %v11258_v33 = vadd.f32 %v17938_v63, %v11219_v19 }
 0x64f   : > { %v11276_v35 = vadd.f32 %v11244_v9, %v10873_v10  ;;  %v10874_v61 = vadd.f32 %v17949_v41, %v10835_v57  ;;  %v11215_v9 = vmul.f32 %v17889_v3, %v17932_v37 }
 0x650   : > { %v11310_v24 = vmax.f32 %v11278_v2, 0.0  ;;  %v11279_v51 = vadd.f32 %v11247_v7, %v10876_v55  ;;  %v11216_v55 = vmul.f32 %v17893_v32, %v17932_v37 }
 0x651   : > { %v11308_v14 = vmax.f32 %v11276_v35, 0.0  ;;  %v11277_v62 = vadd.f32 %v11245_v11, %v10874_v61  ;;  %v13139_v56 = vpop.f32.mrb[24].mxu1  ;;  %v11254_v3 = vadd.f32 %v17938_v63, %v11215_v9  ;;  %v11252_v35 = vadd.f32 %v17938_v63, %v11213_v0 }
 0x652   : > { %11342 = vst.msk [vmem:[%s17968_s14 + $0x30] sm:$0xff] %vm6754_vm9, %v11310_v24  ;;  %v11311_v53 = vmax.f32 %v11279_v51, 0.0  ;;  %v10840_v39 = vmul.f32 %v13139_v56, %v17944_v49  ;;  %v10696_v1 = vpop.f32.mrb[25].mxu1  ;;  %v11214_v61 = vmul.f32 %v17932_v37, %v17895_v60 }
 0x653   : > { %11340 = vst.msk [vmem:[%s17968_s14 + $0x20] sm:$0xff] %vm6754_vm9, %v11308_v14  ;;  %v11309_v25 = vmax.f32 %v11277_v62, 0.0  ;;  %v10838_v42 = vmul.f32 %v17944_v49, %v10696_v1  ;;  %v13140_v4 = vpop.f32.mrb[26].mxu1 }
 0x654   : > { %11343 = vst.msk [vmem:[%s17968_s14 + $0x38] sm:$0xff] %vm6754_vm9, %v11311_v53  ;;  %v10879_v54 = vadd.f32 %v17949_v41, %v10840_v39  ;;  %v10841_v8 = vmul.f32 %v13140_v4, %v17944_v49  ;;  %v10699_v27 = vpop.f32.mrb[27].mxu1  ;;  %v11255_v53 = vadd.f32 %v17938_v63, %v11216_v55  ;;  %v11253_v39 = vadd.f32 %v17938_v63, %v11214_v61 }
 0x655   : > { %11341 = vst.msk [vmem:[%s17968_s14 + $0x28] sm:$0xff] %vm6754_vm9, %v11309_v25  ;;  %v10877_v18 = vadd.f32 %v17949_v41, %v10838_v42  ;;  %v10839_v20 = vmul.f32 %v17944_v49, %v10699_v27  ;;  %v11221_v55 = vmul.f32 %v17932_v37, %v17907_v40 }
 0x656   : > { %v11282_v15 = vadd.f32 %v11250_v31, %v10879_v54  ;;  %v10880_v50 = vadd.f32 %v17949_v41, %v10841_v8 }
 0x657   : > { %v11280_v5 = vadd.f32 %v11248_v44, %v10877_v18  ;;  %v10878_v21 = vadd.f32 %v17949_v41, %v10839_v20  ;;  %v11217_v44 = vmul.f32 %v17932_v37, %v17899_v6  ;;  %v11220_v18 = vmul.f32 %v17901_v47, %v17932_v37 }
 0x658   : > { %v11314_v59 = vmax.f32 %v11282_v15, 0.0  ;;  %v11283_v22 = vadd.f32 %v11251_v43, %v10880_v50  ;;  %v11218_v50 = vmul.f32 %v17932_v37, %v17903_v36 }
 0x659   : > { %v11312_v10 = vmax.f32 %v11280_v5, 0.0  ;;  %v11281_v57 = vadd.f32 %v11249_v46, %v10878_v21  ;;  %v13143_v7 = vpop.f32.mrb[28].mxu1  ;;  %v11256_v15 = vadd.f32 %v17938_v63, %v11217_v44  ;;  %v11227_v44 = vmul.f32 %v17913_v23, %v17932_v37 }
 0x65a   : > { %11346 = vst.msk [vmem:[%s17968_s14 + $0x50] sm:$0xff] %vm6754_vm9, %v11314_v59  ;;  %v11315_v2 = vmax.f32 %v11283_v22, 0.0  ;;  %v10844_v17 = vmul.f32 %v13143_v7, %v17944_v49  ;;  %v10712_v11 = vpop.f32.mrb[29].mxu1  ;;  %v11259_v22 = vadd.f32 %v17938_v63, %v11220_v18  ;;  %v11257_v7 = vadd.f32 %v17938_v63, %v11218_v50 }
 0x65b   : > { %11344 = vst.msk [vmem:[%s17968_s14 + $0x40] sm:$0xff] %vm6754_vm9, %v11312_v10  ;;  %v11313_v29 = vmax.f32 %v11281_v57, 0.0  ;;  %v10842_v45 = vmul.f32 %v17944_v49, %v10712_v11  ;;  %v13144_v24 = vpop.f32.mrb[30].mxu1  ;;  %v11223_v57 = vmul.f32 %v17905_v28, %v17932_v37  ;;  %v11266_v23 = vadd.f32 %v17938_v63, %v11227_v44 }
 0x65c   : > { %11347 = vst.msk [vmem:[%s17968_s14 + $0x58] sm:$0xff] %vm6754_vm9, %v11315_v2  ;;  %v10883_v51 = vadd.f32 %v17949_v41, %v10844_v17  ;;  %v10845_v32 = vmul.f32 %v13144_v24, %v17944_v49  ;;  %v10715_v14 = vpop.f32.mrb[31].mxu1  ;;  %v11224_v24 = vmul.f32 %v17909_v13, %v17932_v37 }
 0x65d   : > { %11345 = vst.msk [vmem:[%s17968_s14 + $0x48] sm:$0xff] %vm6754_vm9, %v11313_v29  ;;  %v10881_v62 = vadd.f32 %v17949_v41, %v10842_v45  ;;  %v10843_v56 = vmul.f32 %v17944_v49, %v10715_v14  ;;  %v11262_v28 = vadd.f32 %v17938_v63, %v11223_v57  ;;  %v11260_v14 = vadd.f32 %v17938_v63, %v11221_v55 }
 0x65e   : > { %v11286_v60 = vadd.f32 %v11254_v3, %v10883_v51  ;;  %v10884_v31 = vadd.f32 %v17949_v41, %v10845_v32  ;;  %v11231_v57 = vmul.f32 %v17921_v12, %v17932_v37  ;;  %v11229_v55 = vmul.f32 %v17932_v37, %v17923_v48 }
 0x65f   : > { %v11284_v1 = vadd.f32 %v11252_v35, %v10881_v62  ;;  %v10882_v25 = vadd.f32 %v17949_v41, %v10843_v56  ;;  %v11222_v62 = vmul.f32 %v17932_v37, %v17911_v52 }
 0x660   : > { %v11318_v58 = vmax.f32 %v11286_v60, 0.0  ;;  %v11287_v42 = vadd.f32 %v11255_v53, %v10884_v31  ;;  %v11270_v12 = vadd.f32 %v17938_v63, %v11231_v57 }
 0x661   : > { %v11316_v4 = vmax.f32 %v11284_v1, 0.0  ;;  %v11285_v54 = vadd.f32 %v11253_v39, %v10882_v25  ;;  %v13147_v8 = vpop.f32.mrb[32].mxu1  ;;  %v11263_v1 = vadd.f32 %v17938_v63, %v11224_v24 }
 0x662   : > { %11350 = vst.msk [vmem:[%s17968_s14 + $0x70] sm:$0xff] %vm6754_vm9, %v11318_v58  ;;  %v11319_v27 = vmax.f32 %v11287_v42, 0.0  ;;  %v10848_v20 = vmul.f32 %v13147_v8, %v17944_v49  ;;  %v10728_v43 = vpop.f32.mrb[33].mxu1  ;;  %v11261_v58 = vadd.f32 %v17938_v63, %v11222_v62 }
 0x663   : > { %11348 = vst.msk [vmem:[%s17968_s14 + $0x60] sm:$0xff] %vm6754_vm9, %v11316_v4  ;;  %v11317_v6 = vmax.f32 %v11285_v54, 0.0  ;;  %v10846_v9 = vmul.f32 %v17944_v49, %v10728_v43  ;;  %v13148_v46 = vpop.f32.mrb[34].mxu1  ;;  %v11225_v54 = vmul.f32 %v17932_v37, %v17915_v30 }
 0x664   : > { %11351 = vst.msk [vmem:[%s17968_s14 + $0x78] sm:$0xff] %vm6754_vm9, %v11319_v27  ;;  %v10887_v5 = vadd.f32 %v17949_v41, %v10848_v20  ;;  %v10849_v47 = vmul.f32 %v13148_v46, %v17944_v49  ;;  %v10731_v21 = vpop.f32.mrb[35].mxu1  ;;  %v11226_v46 = vmul.f32 %v17932_v37, %v17919_v16 }
 0x665   : > { %11349 = vst.msk [vmem:[%s17968_s14 + $0x68] sm:$0xff] %vm6754_vm9, %v11317_v6  ;;  %v10885_v0 = vadd.f32 %v17949_v41, %v10846_v9  ;;  %v10847_v59 = vmul.f32 %v17944_v49, %v10731_v21  ;;  %v11228_v6 = vmul.f32 %v17917_v26, %v17932_v37  ;;  %v11264_v9 = vadd.f32 %v17938_v63, %v11225_v54 }
 0x666   : > { %v11290_v36 = vadd.f32 %v11258_v33, %v10887_v5  ;;  %v10888_v10 = vadd.f32 %v17949_v41, %v10849_v47 }
 0x667   : > { %v11288_v2 = vadd.f32 %v11256_v15, %v10885_v0  ;;  %v10886_v3 = vadd.f32 %v17949_v41, %v10847_v59 }
 0x668   : > { %v11322_v17 = vmax.f32 %v11290_v36, 0.0  ;;  %v11291_v11 = vadd.f32 %v11259_v22, %v10888_v10  ;;  %v11267_v36 = vadd.f32 %v17938_v63, %v11228_v6 }
 0x669   : > { %v11320_v29 = vmax.f32 %v11288_v2, 0.0  ;;  %v11289_v35 = vadd.f32 %v11257_v7, %v10886_v3  ;;  %v13151_v61 = vpop.f32.mrb[36].mxu1  ;;  %v11265_v7 = vadd.f32 %v17938_v63, %v11226_v46 }
 0x66a   : > { %11354 = vst.msk [vmem:[%s17968_s14 + $0x90] sm:$0xff] %vm6754_vm9, %v11322_v17  ;;  %v11323_v45 = vmax.f32 %v11291_v11, 0.0  ;;  %v10852_v51 = vmul.f32 %v13151_v61, %v17944_v49  ;;  %v10744_v32 = vpop.f32.mrb[37].mxu1 }
 0x66b   : > { %11352 = vst.msk [vmem:[%s17968_s14 + $0x80] sm:$0xff] %vm6754_vm9, %v11320_v29  ;;  %v11321_v40 = vmax.f32 %v11289_v35, 0.0  ;;  %v10850_v56 = vmul.f32 %v17944_v49, %v10744_v32  ;;  %v13152_v53 = vpop.f32.mrb[38].mxu1  ;;  %v11268_v32 = vadd.f32 %v17938_v63, %v11229_v55 }
 0x66c   : > { %11355 = vst.msk [vmem:[%s17968_s14 + $0x98] sm:$0xff] %vm6754_vm9, %v11323_v45  ;;  %v10891_v60 = vadd.f32 %v17949_v41, %v10852_v51  ;;  %v10853_v13 = vmul.f32 %v13152_v53, %v17944_v49  ;;  %v10747_v31 = vpop.f32.mrb[39].mxu1 }
 0x66d   : > { %11353 = vst.msk [vmem:[%s17968_s14 + $0x88] sm:$0xff] %vm6754_vm9, %v11321_v40  ;;  %v10889_v19 = vadd.f32 %v17949_v41, %v10850_v56  ;;  %v10851_v39 = vmul.f32 %v17944_v49, %v10747_v31  ;;  %v11230_v40 = vmul.f32 %v17932_v37, %v17927_v34 }
 0x66e   : > { %v11294_v52 = vadd.f32 %v11262_v28, %v10891_v60  ;;  %v10892_v25 = vadd.f32 %v17949_v41, %v10853_v13  ;;  %v11232_v28 = vmul.f32 %v17925_v38, %v17932_v37 }
 0x66f   : > { %v11292_v42 = vadd.f32 %v11260_v14, %v10889_v19  ;;  %v10890_v4 = vadd.f32 %v17949_v41, %v10851_v39  ;;  %v11269_v19 = vadd.f32 %v17938_v63, %v11230_v40 }
 0x670   : > { %v11326_v8 = vmax.f32 %v11294_v52, 0.0  ;;  %v11295_v27 = vadd.f32 %v11263_v1, %v10892_v25  ;;  %v11271_v34 = vadd.f32 %v17938_v63, %v11232_v28 }
 0x671   : > { %v11324_v33 = vmax.f32 %v11292_v42, 0.0  ;;  %v11293_v18 = vadd.f32 %v11261_v58, %v10890_v4  ;;  %v13155_v20 = vpop.f32.mrb[40].mxu1 }
 0x672   : > { %11358 = vst.msk [vmem:[%s17968_s14 + $0xb0] sm:$0xff] %vm6754_vm9, %v11326_v8  ;;  %v11327_v43 = vmax.f32 %v11295_v27, 0.0  ;;  %v10856_v15 = vmul.f32 %v13155_v20, %v17944_v49  ;;  %v10760_v50 = vpop.f32.mrb[41].mxu1 }
 0x673   : > { %11356 = vst.msk [vmem:[%s17968_s14 + $0xa0] sm:$0xff] %vm6754_vm9, %v11324_v33  ;;  %v11325_v30 = vmax.f32 %v11293_v18, 0.0  ;;  %v10854_v5 = vmul.f32 %v17944_v49, %v10760_v50  ;;  %v13156_v47 = vpop.f32.mrb[42].mxu1 }
 0x674   : > { %11359 = vst.msk [vmem:[%s17968_s14 + $0xb8] sm:$0xff] %vm6754_vm9, %v11327_v43  ;;  %v10895_v21 = vadd.f32 %v17949_v41, %v10856_v15  ;;  %v10857_v26 = vmul.f32 %v13156_v47, %v17944_v49  ;;  %v10763_v0 = vpop.f32.mrb[43].mxu1 }
 0x675   : > { %11357 = vst.msk [vmem:[%s17968_s14 + $0xa8] sm:$0xff] %vm6754_vm9, %v11325_v30  ;;  %v10893_v59 = vadd.f32 %v17949_v41, %v10854_v5  ;;  %v10855_v22 = vmul.f32 %v17944_v49, %v10763_v0 }
 0x676   : > { %v11298_v16 = vadd.f32 %v11266_v23, %v10895_v21  ;;  %v10896_v10 = vadd.f32 %v17949_v41, %v10857_v26 }
 0x677   : > { %v11296_v2 = vadd.f32 %v11264_v9, %v10893_v59  ;;  %v10894_v3 = vadd.f32 %v17949_v41, %v10855_v22 }
 0x678   : > { %v11330_v17 = vmax.f32 %v11298_v16, 0.0  ;;  %v11299_v11 = vadd.f32 %v11267_v36, %v10896_v10 }
 0x679   : > { %v11328_v29 = vmax.f32 %v11296_v2, 0.0  ;;  %v11297_v35 = vadd.f32 %v11265_v7, %v10894_v3  ;;  %v13159_v61 = vpop.f32.mrb[44].mxu1 }
 0x67a   : > { %11362 = vst.msk [vmem:[%s17968_s14 + $0xd0] sm:$0xff] %vm6754_vm9, %v11330_v17  ;;  %v11331_v45 = vmax.f32 %v11299_v11, 0.0  ;;  %v10860_v24 = vmul.f32 %v13159_v61, %v17944_v49  ;;  %v10776_v51 = vpop.f32.mrb[45].mxu1 }
 0x67b   : > { %11360 = vst.msk [vmem:[%s17968_s14 + $0xc0] sm:$0xff] %vm6754_vm9, %v11328_v29  ;;  %v11329_v48 = vmax.f32 %v11297_v35, 0.0  ;;  %v10858_v14 = vmul.f32 %v17944_v49, %v10776_v51  ;;  %v13160_v62 = vpop.f32.mrb[46].mxu1 }
 0x67c   : > { %11363 = vst.msk [vmem:[%s17968_s14 + $0xd8] sm:$0xff] %vm6754_vm9, %v11331_v45  ;;  %v10899_v56 = vadd.f32 %v17949_v41, %v10860_v24  ;;  %v10861_v38 = vmul.f32 %v13160_v62, %v17944_v49  ;;  %v10779_v53 = vpop.f32.mrb[47].mxu1 }
 0x67d   : > { %11361 = vst.msk [vmem:[%s17968_s14 + $0xc8] sm:$0xff] %vm6754_vm9, %v11329_v48  ;;  %v10897_v60 = vadd.f32 %v17949_v41, %v10858_v14  ;;  %v10859_v13 = vmul.f32 %v17944_v49, %v10779_v53 }
 0x67e   : > { %v11302_v37 = vadd.f32 %v11270_v12, %v10899_v56  ;;  %v10900_v31 = vadd.f32 %v17949_v41, %v10861_v38 }
 0x67f   : > { %v11300_v39 = vadd.f32 %v11268_v32, %v10897_v60  ;;  %v10898_v1 = vadd.f32 %v17949_v41, %v10859_v13 }
 0x680   : > { %v11334_v52 = vmax.f32 %v11302_v37, 0.0  ;;  %v11303_v25 = vadd.f32 %v11271_v34, %v10900_v31 }
 0x681   : > { %v11332_v44 = vmax.f32 %v11300_v39, 0.0  ;;  %v11301_v58 = vadd.f32 %v11269_v19, %v10898_v1 }
 0x682   : > { %11366 = vst.msk [vmem:[%s17968_s14 + $0xf0] sm:$0xff] %vm6754_vm9, %v11334_v52  ;;  %v11335_v42 = vmax.f32 %v11303_v25, 0.0 }
 0x683   : > { %11364 = vst.msk [vmem:[%s17968_s14 + $0xe0] sm:$0xff] %vm6754_vm9, %v11332_v44  ;;  %v11333_v49 = vmax.f32 %v11301_v58, 0.0 }
 0x684   : > { %11367 = vst.msk [vmem:[%s17968_s14 + $0xf8] sm:$0xff] %vm6754_vm9, %v11335_v42 }
 0x685   : > { %11365 = vst.msk [vmem:[%s17968_s14 + $0xe8] sm:$0xff] %vm6754_vm9, %v11333_v49 }
 0x686 PF: > { %s20_s13 = sadd.s32 1, %s13922_s13  }
 0x687   : > { %p17_p4 = scmp.ge.s32.totalorder %s20_s13, 4  }
 0x689   :  { %19 = sbr.rel (!%p17_p4) target bundleno = 1 (0x1), region = 112 }

</bundles_post_ra>
